<compile_context>
chip_gen: v7x
topology: tpu7x:2x2x1
jax: 0.10.0
libtpu: 0.0.40
codegen_flags: <defaults>
</compile_context>

<pallas_src>
import functools

import jax
import jax.numpy as jnp
from jax import lax
from jax.experimental import pallas as pl
from jax.experimental.pallas import tpu as pltpu

RNN_LAYERS = 2
FFN_LAYERS = 5
LN_EPS = 1e-5        # PyTorch nn.LayerNorm default
LEAKY_SLOPE = 0.01   # F.leaky_relu default negative_slope


def _round_up(v, m):
    return ((v + m - 1) // m) * m


def _pick_batch_tile(bp):
    # Prefer >=2 batch tiles: megacore "parallel" sharding on v7x, and the BlockSpec
    # pipeline then overlaps the x/out DMAs of tile b+1 with compute of tile b.
    for bt in (64, 32, 16, 8):
        if bp % bt == 0 and bp // bt >= 2:
            return bt
    return bp


def _pick_unroll(trips, hp):
    if trips <= 1:
        return 1
    if hp >= 512:
        return 2          # large H: keep live gate slabs small, avoid vreg spills
    if trips <= 16:
        return True       # fully unroll short recurrences
    return 4


def _vmem_limit_bytes():
    try:
        info = pltpu.get_tpu_info()
        cap = int(getattr(info, "vmem_capacity_bytes", 64 * 1024 * 1024))
    except Exception:
        cap = 64 * 1024 * 1024          # conservative fallback (v7x-sized)
    # leave ~1/8 headroom for compiler-internal scratch
    return max(32 * 1024 * 1024, (cap // 8) * 7)


def rnn_kernel(x_ref, h0_ref, w_ref, b_ref, wff_ref, bff_ref, gam_ref, bet_ref,
               wo_ref, bo_ref, out_ref, hn_ref, seq_ref, gates_ref, *, h_real):
    # x_ref:     (1, T*Bt, Hp)   time-major batch tile (lane-padded hidden)
    # h0_ref:    (1, L, Bt, Hp)
    # w_ref:     (L, 2Hp, 4Hp)   rows [0:Hp)=input weights, [Hp:2Hp)=hidden weights;
    #                            column blocks: 0:r 1:z 2:n_input 3:n_hidden
    # b_ref:     (L, 1, 4Hp)     [b_ir+b_hr | b_iz+b_hz | b_in | b_hn]
    # wff_ref:   (F, Hp, Hp), bff/gam/bet: (F, 1, Hp)
    # wo_ref:    (Hp, Op), bo_ref: (1, Op)
    # out_ref:   (1, T*Bt, Op), hn_ref: (1, L, Bt, Hp)
    # seq_ref:   VMEM scratch (T*Bt, Hp)  -> final GRU layer outputs (FFN input)
    # gates_ref: VMEM scratch (T*Bt, 4Hp) -> hoisted input projections
    TB, Hp = seq_ref.shape
    _, L, Bt, _ = h0_ref.shape
    T = TB // Bt
    NF = wff_ref.shape[0]

    x_flat = x_ref[0]                                       # (T*Bt, Hp)

    def gru_cell(ig, hg, h):
        # ig carries the fused biases; block 3 of ig is exactly b_hn (see packing),
        # so n = tanh(ig2 + r*(hg3 + ig3)) matches the PyTorch GRU equations.
        r = jax.nn.sigmoid(ig[:, :Hp] + hg[:, :Hp])
        z = jax.nn.sigmoid(ig[:, Hp:2 * Hp] + hg[:, Hp:2 * Hp])
        n = jnp.tanh(ig[:, 2 * Hp:3 * Hp] + r * (hg[:, 3 * Hp:] + ig[:, 3 * Hp:]))
        return (1.0 - z) * n + z * h

    def hidden_proj(l, h):
        # TODO(synk): hold this RHS in the MXU with pltpu.matmul_push_rhs/acc_lhs/pop.
        return jnp.dot(h, w_ref[l, pl.ds(Hp, Hp), :],
                       preferred_element_type=jnp.float32)

    if L == 2:
        # ---- wavefront-pipelined 2-layer GRU ------------------------------------
        gates_ref[...] = (
            jnp.dot(x_flat, w_ref[0, pl.ds(0, Hp), :],
                    preferred_element_type=jnp.float32) + b_ref[0])
        b1 = b_ref[1]                                        # (1, 4Hp), hoisted

        def l0_step(t, h):
            r0 = t * Bt if isinstance(t, int) else pl.multiple_of(t * Bt, Bt)
            ig = gates_ref[pl.ds(r0, Bt), :]
            return gru_cell(ig, hidden_proj(0, h), h)

        def l1_step(a, h):
            # fused input+hidden projection: ONE (Bt, 2Hp) @ (2Hp, 4Hp) matmul
            g = jnp.dot(jnp.concatenate([a, h], axis=-1), w_ref[1],
                        preferred_element_type=jnp.float32) + b1
            r = jax.nn.sigmoid(g[:, :Hp])
            z = jax.nn.sigmoid(g[:, Hp:2 * Hp])
            n = jnp.tanh(g[:, 2 * Hp:3 * Hp] + r * g[:, 3 * Hp:])
            return (1.0 - z) * n + z * h

        h0 = l0_step(0, h0_ref[0, 0])                        # prologue: layer-0 t=0
        h1 = h0_ref[0, 1]

        def body(i, carry):
            h0, h1 = carry
            h1n = l1_step(h0, h1)                            # layer-1 step i-1
            h0n = l0_step(i, h0)                             # layer-0 step i (indep.)
            r0 = pl.multiple_of((i - 1) * Bt, Bt)
            seq_ref[pl.ds(r0, Bt), :] = h1n
            return (h0n, h1n)

        h0, h1 = lax.fori_loop(1, T, body, (h0, h1),
                               unroll=_pick_unroll(T - 1, Hp))
        h1 = l1_step(h0, h1)                                 # epilogue: layer-1 t=T-1
        seq_ref[pl.ds((T - 1) * Bt, Bt), :] = h1
        hn_ref[0, 0] = h0
        hn_ref[0, 1] = h1
    else:
        # ---- generic stacked-GRU fallback (sequential over layers) -------------
        src = x_flat
        for l in range(L):
            gates_ref[...] = (
                jnp.dot(src, w_ref[l, pl.ds(0, Hp), :],
                        preferred_element_type=jnp.float32) + b_ref[l])

            def step(t, h, l=l):
                r0 = pl.multiple_of(t * Bt, Bt)
                ig = gates_ref[pl.ds(r0, Bt), :]
                h_new = gru_cell(ig, hidden_proj(l, h), h)
                seq_ref[pl.ds(r0, Bt), :] = h_new
                return h_new

            hn_ref[0, l] = lax.fori_loop(0, T, step, h0_ref[0, l],
                                         unroll=_pick_unroll(T, Hp))
            src = seq_ref[...]

    # ---- FFN head: f_out(x_in + [LN(leaky_relu(Linear(.)))] x5), full slab -----
    x_in = seq_ref[...]                                      # (T*Bt, Hp)
    inv_h = 1.0 / float(h_real)
    out = x_in
    for f in range(NF):
        y = jnp.dot(out, wff_ref[f], preferred_element_type=jnp.float32) + bff_ref[f]
        y = jnp.where(y >= 0.0, y, LEAKY_SLOPE * y)          # F.leaky_relu
        # single-pass LN stats; padded lanes are exact zeros, so dividing the raw
        # sums by the true feature width h_real is exact.
        mu = jnp.sum(y, axis=-1, keepdims=True) * inv_h
        var = jnp.sum(y * y, axis=-1, keepdims=True) * inv_h - mu * mu
        out = (y - mu) * lax.rsqrt(var + LN_EPS) * gam_ref[f] + bet_ref[f]
        # nn.Dropout in eval mode -> identity
    out_ref[0] = (jnp.dot(x_in + out, wo_ref[...],
                          preferred_element_type=jnp.float32) + bo_ref[...])


def init_params(key, d_h, d_o, rnn_layers=RNN_LAYERS, ffn_layers=FFN_LAYERS):
    ks = jax.random.split(key, 8)

    def xavier(k, shape, fan_in, fan_out):
        lim = (6.0 / (fan_in + fan_out)) ** 0.5
        return jax.random.uniform(k, shape, jnp.float32, -lim, lim)

    H = d_h
    blim = 1.0 / (H ** 0.5)
    return {
        "wih": xavier(ks[0], (rnn_layers, 3, H, H), H, H),
        "whh": xavier(ks[1], (rnn_layers, 3, H, H), H, H),
        "bih": jax.random.uniform(ks[2], (rnn_layers, 3, 1, H), jnp.float32, -blim, blim),
        "bhh": jax.random.uniform(ks[3], (rnn_layers, 3, 1, H), jnp.float32, -blim, blim),
        "wff": xavier(ks[4], (ffn_layers, H, H), H, H),
        "bff": jax.random.uniform(ks[5], (ffn_layers, 1, H), jnp.float32, -blim, blim),
        "gamma": jnp.ones((ffn_layers, 1, H), jnp.float32),
        "beta": jnp.zeros((ffn_layers, 1, H), jnp.float32),
        "wo": xavier(ks[6], (H, d_o), H, d_o),
        "bo": jax.random.uniform(ks[7], (1, d_o), jnp.float32, -blim, blim),
    }


def _pack_gru_params(p, hp):
    """Lane-aligned fused GRU weights.

    w_all[l]: (2hp, 4hp); rows [0:hp) = input weights, [hp:2hp) = hidden weights.
    Column blocks (each hp wide): 0:r  1:z  2:n(input part)  3:n(hidden part).
    b_all[l]: (1, 4hp) = [b_ir+b_hr | b_iz+b_hz | b_in | b_hn].
    With this packing:   g = [x|h] @ w + b  ->  r=sig(g0), z=sig(g1), n=tanh(g2 + r*g3)
    and when x/h are projected separately (ig, hg): n = tanh(ig2 + r*(hg3 + ig3)),
    since ig3 == b_hn (the input rows of block 3 are zero).
    """
    L = p["wih"].shape[0]
    H = p["wih"].shape[-1]
    w_all = jnp.zeros((L, 2 * hp, 4 * hp), jnp.float32)
    b_all = jnp.zeros((L, 1, 4 * hp), jnp.float32)
    for g, col in ((0, 0), (1, 1), (2, 2)):      # input weights -> blocks 0,1,2
        w_all = w_all.at[:, :H, col * hp:col * hp + H].set(p["wih"][:, g])
    for g, col in ((0, 0), (1, 1), (2, 3)):      # hidden weights -> blocks 0,1,3
        w_all = w_all.at[:, hp:hp + H, col * hp:col * hp + H].set(p["whh"][:, g])
    b_all = b_all.at[:, :, 0 * hp:0 * hp + H].set(p["bih"][:, 0] + p["bhh"][:, 0])
    b_all = b_all.at[:, :, 1 * hp:1 * hp + H].set(p["bih"][:, 1] + p["bhh"][:, 1])
    b_all = b_all.at[:, :, 2 * hp:2 * hp + H].set(p["bih"][:, 2])
    b_all = b_all.at[:, :, 3 * hp:3 * hp + H].set(p["bhh"][:, 2])
    return w_all, b_all


@jax.jit
def rnn_forward(x, h0, p):
    # x: (B, T, H) batch_first; h0: (L, B, H)
    B, T, H = x.shape
    L = h0.shape[0]
    O = p["wo"].shape[-1]
    NF = p["wff"].shape[0]

    Hp = _round_up(H, 128)             # lane-aligned gate blocks
    Op = _round_up(O, 128)             # lane-dense output stores
    Bp = _round_up(B, 8)               # sublane-dense batch
    Bt = _pick_batch_tile(Bp)
    nb = Bp // Bt

    w_all, b_all = _pack_gru_params(p, Hp)
    wff_p = jnp.zeros((NF, Hp, Hp), jnp.float32).at[:, :H, :H].set(p["wff"])
    bff_p = jnp.zeros((NF, 1, Hp), jnp.float32).at[:, :, :H].set(p["bff"])
    gam_p = jnp.zeros((NF, 1, Hp), jnp.float32).at[:, :, :H].set(p["gamma"])
    bet_p = jnp.zeros((NF, 1, Hp), jnp.float32).at[:, :, :H].set(p["beta"])
    wo_p = jnp.zeros((Hp, Op), jnp.float32).at[:H, :O].set(p["wo"])
    bo_p = jnp.zeros((1, Op), jnp.float32).at[:, :O].set(p["bo"])

    # time-major, pad batch->Bp and hidden->Hp, then regroup into nb batch tiles
    x_t = jnp.transpose(x, (1, 0, 2))                                  # (T, B, H)
    x_pad = jnp.pad(x_t, ((0, 0), (0, Bp - B), (0, Hp - H)))           # (T, Bp, Hp)
    x_tiles = jnp.transpose(x_pad.reshape(T, nb, Bt, Hp),
                            (1, 0, 2, 3)).reshape(nb, T * Bt, Hp)
    h0_pad = jnp.pad(h0, ((0, 0), (0, Bp - B), (0, Hp - H)))           # (L, Bp, Hp)
    h0_tiles = jnp.transpose(h0_pad.reshape(L, nb, Bt, Hp), (1, 0, 2, 3))

    def full_spec(a):
        n = a.ndim
        return pl.BlockSpec(a.shape, lambda b, _n=n: (0,) * _n)

    kernel = functools.partial(rnn_kernel, h_real=H)
    out_tiles, hn_tiles = pl.pallas_call(
        kernel,
        grid=(nb,),
        in_specs=[
            pl.BlockSpec((1, T * Bt, Hp), lambda b: (b, 0, 0)),
            pl.BlockSpec((1, L, Bt, Hp), lambda b: (b, 0, 0, 0)),
            full_spec(w_all), full_spec(b_all),
            full_spec(wff_p), full_spec(bff_p),
            full_spec(gam_p), full_spec(bet_p),
            full_spec(wo_p), full_spec(bo_p),
        ],
        out_specs=(
            pl.BlockSpec((1, T * Bt, Op), lambda b: (b, 0, 0)),
            pl.BlockSpec((1, L, Bt, Hp), lambda b: (b, 0, 0, 0)),
        ),
        out_shape=(jax.ShapeDtypeStruct((nb, T * Bt, Op), jnp.float32),
                   jax.ShapeDtypeStruct((nb, L, Bt, Hp), jnp.float32)),
        scratch_shapes=[pltpu.VMEM((T * Bt, Hp), jnp.float32),
                        pltpu.VMEM((T * Bt, 4 * Hp), jnp.float32)],
        compiler_params=pltpu.CompilerParams(
            dimension_semantics=("parallel",),
            vmem_limit_bytes=_vmem_limit_bytes()),
    )(x_tiles, h0_tiles, w_all, b_all, wff_p, bff_p, gam_p, bet_p, wo_p, bo_p)

    out = jnp.transpose(out_tiles.reshape(nb, T, Bt, Op),
                        (1, 0, 2, 3)).reshape(T, Bp, Op)
    out = jnp.transpose(out[:, :B, :O], (1, 0, 2))                     # (B, T, O)
    hn = jnp.transpose(hn_tiles, (1, 0, 2, 3)).reshape(L, Bp, Hp)[:, :B, :H]
    return out, hn


def rnn_reference(x, h0, p):
    """Pure-JAX reference with identical (eval-mode) semantics, f32-exact matmuls."""
    hp = lax.Precision.HIGHEST
    dot = lambda a, b: jnp.dot(a, b, precision=hp)
    B, T, H = x.shape
    L = h0.shape[0]
    seq = jnp.transpose(x, (1, 0, 2))
    hn = []
    for l in range(L):
        h = h0[l]
        outs = []
        for t in range(T):
            x_t = seq[t]
            r = jax.nn.sigmoid(dot(x_t, p["wih"][l, 0]) + p["bih"][l, 0]
                               + dot(h, p["whh"][l, 0]) + p["bhh"][l, 0])
            z = jax.nn.sigmoid(dot(x_t, p["wih"][l, 1]) + p["bih"][l, 1]
                               + dot(h, p["whh"][l, 1]) + p["bhh"][l, 1])
            n = jnp.tanh(dot(x_t, p["wih"][l, 2]) + p["bih"][l, 2]
                         + r * (dot(h, p["whh"][l, 2]) + p["bhh"][l, 2]))
            h = (1.0 - z) * n + z * h
            outs.append(h)
        seq = jnp.stack(outs, 0)
        hn.append(h)
    hn = jnp.stack(hn, 0)
    x_in = jnp.transpose(seq, (1, 0, 2))                               # (B, T, H)
    out = x_in
    for f in range(p["wff"].shape[0]):
        y = dot(out, p["wff"][f]) + p["bff"][f]
        y = jnp.where(y >= 0.0, y, LEAKY_SLOPE * y)
        mu = jnp.mean(y, -1, keepdims=True)
        var = jnp.mean((y - mu) ** 2, -1, keepdims=True)
        out = (y - mu) / jnp.sqrt(var + LN_EPS) * p["gamma"][f] + p["beta"][f]
    o = dot(x_in + out, p["wo"]) + p["bo"]
    return o, hn


if __name__ == "__main__":
    B, T = 2, 8
    d_h, d_o = 32, 8
    L = RNN_LAYERS

    key = jax.random.PRNGKey(0)
    kx, kh, kp = jax.random.split(key, 3)
    x = jax.random.normal(kx, (B, T, d_h), jnp.float32)
    h0 = jax.random.normal(kh, (L, B, d_h), jnp.float32)
    params = init_params(kp, d_h, d_o)

    out, hn = rnn_forward(x, h0, params)
    jax.block_until_ready((out, hn))

    assert out.shape == (B, T, d_o) and hn.shape == (L, B, d_h)

    ref_out, ref_hn = rnn_reference(x, h0, params)
    err_o = float(jnp.max(jnp.abs(out - ref_out)))
    err_h = float(jnp.max(jnp.abs(hn - ref_hn)))
    assert err_o < 1e-3 and err_h < 1e-3, (err_o, err_h)

    print("KERNEL_OK")
</pallas_src>

<mosaic_0001>
module attributes {stable_mosaic.version = 11 : i64} {
  func.func @rnn_kernel(%arg0: i32, %arg1: memref<1x64x128xf32, #tpu.memory_space<vmem>>, %arg2: memref<1x2x8x128xf32, #tpu.memory_space<vmem>>, %arg3: memref<2x256x512xf32, #tpu.memory_space<vmem>>, %arg4: memref<2x1x512xf32, #tpu.memory_space<vmem>>, %arg5: memref<5x128x128xf32, #tpu.memory_space<vmem>>, %arg6: memref<5x1x128xf32, #tpu.memory_space<vmem>>, %arg7: memref<5x1x128xf32, #tpu.memory_space<vmem>>, %arg8: memref<5x1x128xf32, #tpu.memory_space<vmem>>, %arg9: memref<128x128xf32, #tpu.memory_space<vmem>>, %arg10: memref<1x128xf32, #tpu.memory_space<vmem>>, %arg11: memref<1x64x128xf32, #tpu.memory_space<vmem>>, %arg12: memref<1x2x8x128xf32, #tpu.memory_space<vmem>>, %arg13: memref<64x128xf32, #tpu.memory_space<vmem>>, %arg14: memref<64x512xf32, #tpu.memory_space<vmem>>) attributes {dimension_semantics = [#tpu.dimension_semantics<parallel>], iteration_bounds = array<i64: 1>, scalar_prefetch = 0 : i64, scratch_operands = 2 : i64, tpu.core_type = #tpu.core_type<tc>, window_params = [{transform_indices = @transform_0, window_bounds = array<i64: 1, 64, 128>}, {transform_indices = @transform_1, window_bounds = array<i64: 1, 2, 8, 128>}, {pipeline_mode = #tpu.pipeline_mode<synchronous>, transform_indices = @transform_2, window_bounds = array<i64: 2, 256, 512>}, {pipeline_mode = #tpu.pipeline_mode<synchronous>, transform_indices = @transform_3, window_bounds = array<i64: 2, 1, 512>}, {pipeline_mode = #tpu.pipeline_mode<synchronous>, transform_indices = @transform_4, window_bounds = array<i64: 5, 128, 128>}, {pipeline_mode = #tpu.pipeline_mode<synchronous>, transform_indices = @transform_5, window_bounds = array<i64: 5, 1, 128>}, {pipeline_mode = #tpu.pipeline_mode<synchronous>, transform_indices = @transform_6, window_bounds = array<i64: 5, 1, 128>}, {pipeline_mode = #tpu.pipeline_mode<synchronous>, transform_indices = @transform_7, window_bounds = array<i64: 5, 1, 128>}, {pipeline_mode = #tpu.pipeline_mode<synchronous>, transform_indices = @transform_8, window_bounds = array<i64: 128, 128>}, {pipeline_mode = #tpu.pipeline_mode<synchronous>, transform_indices = @transform_9, window_bounds = array<i64: 1, 128>}, {transform_indices = @transform_10, window_bounds = array<i64: 1, 64, 128>}, {transform_indices = @transform_11, window_bounds = array<i64: 1, 2, 8, 128>}]} {
    %c0 = arith.constant 0 : index
    %c0_0 = arith.constant 0 : index
    %c0_1 = arith.constant 0 : index
    %0 = vector.load %arg1[%c0, %c0_0, %c0_1] : memref<1x64x128xf32, #tpu.memory_space<vmem>>, vector<1x64x128xf32>
    %1 = vector.shape_cast %0 : vector<1x64x128xf32> to vector<64x128xf32>
    %c0_2 = arith.constant 0 : index
    %c0_3 = arith.constant 0 : index
    %c0_4 = arith.constant 0 : index
    %2 = vector.load %arg3[%c0_2, %c0_3, %c0_4] : memref<2x256x512xf32, #tpu.memory_space<vmem>>, vector<1x128x512xf32>
    %3 = vector.shape_cast %2 : vector<1x128x512xf32> to vector<128x512xf32>
    %cst = arith.constant dense<0.000000e+00> : vector<64x512xf32>
    %4 = tpu.matmul %1, %3, %cst {dimension_numbers = #tpu.dot_dimension_numbers<[1], [0], [0], [1], [0, 0, 1, 1], [], []>} : vector<64x128xf32>, vector<128x512xf32>, vector<64x512xf32> -> vector<64x512xf32>
    %c0_5 = arith.constant 0 : index
    %c0_6 = arith.constant 0 : index
    %c0_7 = arith.constant 0 : index
    %5 = vector.load %arg4[%c0_5, %c0_6, %c0_7] : memref<2x1x512xf32, #tpu.memory_space<vmem>>, vector<1x1x512xf32>
    %6 = vector.shape_cast %5 : vector<1x1x512xf32> to vector<1x512xf32>
    %7 = vector.broadcast %6 : vector<1x512xf32> to vector<64x512xf32>
    %8 = arith.addf %4, %7 : vector<64x512xf32>
    %c0_8 = arith.constant 0 : index
    %c0_9 = arith.constant 0 : index
    %9 = vector.load %arg14[%c0_8, %c0_9] : memref<64x512xf32, #tpu.memory_space<vmem>>, vector<64x512xf32>
    tpu.vector_store %arg14[%c0_8, %c0_9], %8 {strides = array<i32>} : memref<64x512xf32, #tpu.memory_space<vmem>>, vector<64x512xf32>,
    %c1 = arith.constant 1 : index
    %c0_10 = arith.constant 0 : index
    %c0_11 = arith.constant 0 : index
    %10 = vector.load %arg4[%c1, %c0_10, %c0_11] : memref<2x1x512xf32, #tpu.memory_space<vmem>>, vector<1x1x512xf32>
    %11 = vector.shape_cast %10 : vector<1x1x512xf32> to vector<1x512xf32>
    %c0_12 = arith.constant 0 : index
    %c0_13 = arith.constant 0 : index
    %c0_14 = arith.constant 0 : index
    %c0_15 = arith.constant 0 : index
    %12 = vector.load %arg2[%c0_12, %c0_13, %c0_14, %c0_15] : memref<1x2x8x128xf32, #tpu.memory_space<vmem>>, vector<1x1x8x128xf32>
    %13 = vector.shape_cast %12 : vector<1x1x8x128xf32> to vector<8x128xf32>
    %c0_16 = arith.constant 0 : index
    %c0_17 = arith.constant 0 : index
    %14 = vector.load %arg14[%c0_16, %c0_17] : memref<64x512xf32, #tpu.memory_space<vmem>>, vector<8x512xf32>
    %c0_18 = arith.constant 0 : index
    %c128 = arith.constant 128 : index
    %c0_19 = arith.constant 0 : index
    %15 = vector.load %arg3[%c0_18, %c128, %c0_19] : memref<2x256x512xf32, #tpu.memory_space<vmem>>, vector<1x128x512xf32>
    %16 = vector.shape_cast %15 : vector<1x128x512xf32> to vector<128x512xf32>
    %cst_20 = arith.constant dense<0.000000e+00> : vector<8x512xf32>
    %17 = tpu.matmul %13, %16, %cst_20 {dimension_numbers = #tpu.dot_dimension_numbers<[1], [0], [0], [1], [0, 0, 1, 1], [], []>} : vector<8x128xf32>, vector<128x512xf32>, vector<8x512xf32> -> vector<8x512xf32>
    %18 = vector.extract_strided_slice %14 {offsets = [0, 0], sizes = [8, 128], strides = [1, 1]} : vector<8x512xf32> to vector<8x128xf32>
    %19 = vector.extract_strided_slice %17 {offsets = [0, 0], sizes = [8, 128], strides = [1, 1]} : vector<8x512xf32> to vector<8x128xf32>
    %20 = arith.addf %18, %19 : vector<8x128xf32>
    %21 = arith.negf %20 : vector<8x128xf32>
    %22 = math.exp %21 : vector<8x128xf32>
    %cst_21 = arith.constant 1.000000e+00 : f32
    %23 = vector.broadcast %cst_21 : f32 to vector<8x128xf32>
    %24 = arith.addf %23, %22 : vector<8x128xf32>
    %25 = arith.divf %23, %24 : vector<8x128xf32>
    %26 = vector.extract_strided_slice %14 {offsets = [0, 128], sizes = [8, 128], strides = [1, 1]} : vector<8x512xf32> to vector<8x128xf32>
    %27 = vector.extract_strided_slice %17 {offsets = [0, 128], sizes = [8, 128], strides = [1, 1]} : vector<8x512xf32> to vector<8x128xf32>
    %28 = arith.addf %26, %27 : vector<8x128xf32>
    %29 = arith.negf %28 : vector<8x128xf32>
    %30 = math.exp %29 : vector<8x128xf32>
    %cst_22 = arith.constant 1.000000e+00 : f32
    %31 = vector.broadcast %cst_22 : f32 to vector<8x128xf32>
    %32 = arith.addf %31, %30 : vector<8x128xf32>
    %33 = arith.divf %31, %32 : vector<8x128xf32>
    %34 = vector.extract_strided_slice %14 {offsets = [0, 256], sizes = [8, 128], strides = [1, 1]} : vector<8x512xf32> to vector<8x128xf32>
    %35 = vector.extract_strided_slice %17 {offsets = [0, 384], sizes = [8, 128], strides = [1, 1]} : vector<8x512xf32> to vector<8x128xf32>
    %36 = vector.extract_strided_slice %14 {offsets = [0, 384], sizes = [8, 128], strides = [1, 1]} : vector<8x512xf32> to vector<8x128xf32>
    %37 = arith.addf %35, %36 : vector<8x128xf32>
    %38 = arith.mulf %25, %37 : vector<8x128xf32>
    %39 = arith.addf %34, %38 : vector<8x128xf32>
    %40 = math.tanh %39 : vector<8x128xf32>
    %cst_23 = arith.constant 1.000000e+00 : f32
    %41 = vector.broadcast %cst_23 : f32 to vector<8x128xf32>
    %42 = arith.subf %41, %33 : vector<8x128xf32>
    %43 = arith.mulf %42, %40 : vector<8x128xf32>
    %44 = arith.mulf %33, %13 : vector<8x128xf32>
    %45 = arith.addf %43, %44 : vector<8x128xf32>
    %c0_24 = arith.constant 0 : index
    %c1_25 = arith.constant 1 : index
    %c0_26 = arith.constant 0 : index
    %c0_27 = arith.constant 0 : index
    %46 = vector.load %arg2[%c0_24, %c1_25, %c0_26, %c0_27] : memref<1x2x8x128xf32, #tpu.memory_space<vmem>>, vector<1x1x8x128xf32>
    %47 = vector.shape_cast %46 : vector<1x1x8x128xf32> to vector<8x128xf32>
    %c1_i32 = arith.constant 1 : i32
    %48 = tpu.concatenate %45, %47 in 1 : vector<8x128xf32>, vector<8x128xf32> -> vector<8x256xf32>
    %c1_28 = arith.constant 1 : index
    %c0_29 = arith.constant 0 : index
    %c0_30 = arith.constant 0 : index
    %49 = vector.load %arg3[%c1_28, %c0_29, %c0_30] : memref<2x256x512xf32, #tpu.memory_space<vmem>>, vector<1x256x512xf32>
    %50 = vector.shape_cast %49 : vector<1x256x512xf32> to vector<256x512xf32>
    %cst_31 = arith.constant dense<0.000000e+00> : vector<8x512xf32>
    %51 = tpu.matmul %48, %50, %cst_31 {dimension_numbers = #tpu.dot_dimension_numbers<[1], [0], [0], [1], [0, 0, 1, 1], [], []>} : vector<8x256xf32>, vector<256x512xf32>, vector<8x512xf32> -> vector<8x512xf32>
    %52 = vector.broadcast %11 : vector<1x512xf32> to vector<8x512xf32>
    %53 = arith.addf %51, %52 : vector<8x512xf32>
    %54 = vector.extract_strided_slice %53 {offsets = [0, 0], sizes = [8, 128], strides = [1, 1]} : vector<8x512xf32> to vector<8x128xf32>
    %55 = arith.negf %54 : vector<8x128xf32>
    %56 = math.exp %55 : vector<8x128xf32>
    %cst_32 = arith.constant 1.000000e+00 : f32
    %57 = vector.broadcast %cst_32 : f32 to vector<8x128xf32>
    %58 = arith.addf %57, %56 : vector<8x128xf32>
    %59 = arith.divf %57, %58 : vector<8x128xf32>
    %60 = vector.extract_strided_slice %53 {offsets = [0, 128], sizes = [8, 128], strides = [1, 1]} : vector<8x512xf32> to vector<8x128xf32>
    %61 = arith.negf %60 : vector<8x128xf32>
    %62 = math.exp %61 : vector<8x128xf32>
    %cst_33 = arith.constant 1.000000e+00 : f32
    %63 = vector.broadcast %cst_33 : f32 to vector<8x128xf32>
    %64 = arith.addf %63, %62 : vector<8x128xf32>
    %65 = arith.divf %63, %64 : vector<8x128xf32>
    %66 = vector.extract_strided_slice %53 {offsets = [0, 256], sizes = [8, 128], strides = [1, 1]} : vector<8x512xf32> to vector<8x128xf32>
    %67 = vector.extract_strided_slice %53 {offsets = [0, 384], sizes = [8, 128], strides = [1, 1]} : vector<8x512xf32> to vector<8x128xf32>
    %68 = arith.mulf %59, %67 : vector<8x128xf32>
    %69 = arith.addf %66, %68 : vector<8x128xf32>
    %70 = math.tanh %69 : vector<8x128xf32>
    %cst_34 = arith.constant 1.000000e+00 : f32
    %71 = vector.broadcast %cst_34 : f32 to vector<8x128xf32>
    %72 = arith.subf %71, %65 : vector<8x128xf32>
    %73 = arith.mulf %72, %70 : vector<8x128xf32>
    %74 = arith.mulf %65, %47 : vector<8x128xf32>
    %75 = arith.addf %73, %74 : vector<8x128xf32>
    %c8_i32 = arith.constant 8 : i32
    %76 = arith.muli %c1_i32, %c8_i32 : i32
    %77 = tpu.assume_multiple %76, 8 : i32
    %78 = arith.index_cast %77 : i32 to index
    %c0_35 = arith.constant 0 : index
    %79 = vector.load %arg14[%78, %c0_35] : memref<64x512xf32, #tpu.memory_space<vmem>>, vector<8x512xf32>
    %c0_36 = arith.constant 0 : index
    %c128_37 = arith.constant 128 : index
    %c0_38 = arith.constant 0 : index
    %80 = vector.load %arg3[%c0_36, %c128_37, %c0_38] : memref<2x256x512xf32, #tpu.memory_space<vmem>>, vector<1x128x512xf32>
    %81 = vector.shape_cast %80 : vector<1x128x512xf32> to vector<128x512xf32>
    %cst_39 = arith.constant dense<0.000000e+00> : vector<8x512xf32>
    %82 = tpu.matmul %45, %81, %cst_39 {dimension_numbers = #tpu.dot_dimension_numbers<[1], [0], [0], [1], [0, 0, 1, 1], [], []>} : vector<8x128xf32>, vector<128x512xf32>, vector<8x512xf32> -> vector<8x512xf32>
    %83 = vector.extract_strided_slice %79 {offsets = [0, 0], sizes = [8, 128], strides = [1, 1]} : vector<8x512xf32> to vector<8x128xf32>
    %84 = vector.extract_strided_slice %82 {offsets = [0, 0], sizes = [8, 128], strides = [1, 1]} : vector<8x512xf32> to vector<8x128xf32>
    %85 = arith.addf %83, %84 : vector<8x128xf32>
    %86 = arith.negf %85 : vector<8x128xf32>
    %87 = math.exp %86 : vector<8x128xf32>
    %cst_40 = arith.constant 1.000000e+00 : f32
    %88 = vector.broadcast %cst_40 : f32 to vector<8x128xf32>
    %89 = arith.addf %88, %87 : vector<8x128xf32>
    %90 = arith.divf %88, %89 : vector<8x128xf32>
    %91 = vector.extract_strided_slice %79 {offsets = [0, 128], sizes = [8, 128], strides = [1, 1]} : vector<8x512xf32> to vector<8x128xf32>
    %92 = vector.extract_strided_slice %82 {offsets = [0, 128], sizes = [8, 128], strides = [1, 1]} : vector<8x512xf32> to vector<8x128xf32>
    %93 = arith.addf %91, %92 : vector<8x128xf32>
    %94 = arith.negf %93 : vector<8x128xf32>
    %95 = math.exp %94 : vector<8x128xf32>
    %cst_41 = arith.constant 1.000000e+00 : f32
    %96 = vector.broadcast %cst_41 : f32 to vector<8x128xf32>
    %97 = arith.addf %96, %95 : vector<8x128xf32>
    %98 = arith.divf %96, %97 : vector<8x128xf32>
    %99 = vector.extract_strided_slice %79 {offsets = [0, 256], sizes = [8, 128], strides = [1, 1]} : vector<8x512xf32> to vector<8x128xf32>
    %100 = vector.extract_strided_slice %82 {offsets = [0, 384], sizes = [8, 128], strides = [1, 1]} : vector<8x512xf32> to vector<8x128xf32>
    %101 = vector.extract_strided_slice %79 {offsets = [0, 384], sizes = [8, 128], strides = [1, 1]} : vector<8x512xf32> to vector<8x128xf32>
    %102 = arith.addf %100, %101 : vector<8x128xf32>
    %103 = arith.mulf %90, %102 : vector<8x128xf32>
    %104 = arith.addf %99, %103 : vector<8x128xf32>
    %105 = math.tanh %104 : vector<8x128xf32>
    %cst_42 = arith.constant 1.000000e+00 : f32
    %106 = vector.broadcast %cst_42 : f32 to vector<8x128xf32>
    %107 = arith.subf %106, %98 : vector<8x128xf32>
    %108 = arith.mulf %107, %105 : vector<8x128xf32>
    %109 = arith.mulf %98, %45 : vector<8x128xf32>
    %110 = arith.addf %108, %109 : vector<8x128xf32>
    %c1_i32_43 = arith.constant 1 : i32
    %111 = arith.subi %c1_i32, %c1_i32_43 : i32
    %c8_i32_44 = arith.constant 8 : i32
    %112 = arith.muli %111, %c8_i32_44 : i32
    %113 = tpu.assume_multiple %112, 8 : i32
    %114 = arith.index_cast %113 : i32 to index
    %c0_45 = arith.constant 0 : index
    %115 = vector.load %arg13[%114, %c0_45] : memref<64x128xf32, #tpu.memory_space<vmem>>, vector<8x128xf32>
    tpu.vector_store %arg13[%114, %c0_45], %75 {strides = array<i32>} : memref<64x128xf32, #tpu.memory_space<vmem>>, vector<8x128xf32>,
    %c2_i32 = arith.constant 2 : i32
    %116 = tpu.concatenate %110, %75 in 1 : vector<8x128xf32>, vector<8x128xf32> -> vector<8x256xf32>
    %c1_46 = arith.constant 1 : index
    %c0_47 = arith.constant 0 : index
    %c0_48 = arith.constant 0 : index
    %117 = vector.load %arg3[%c1_46, %c0_47, %c0_48] : memref<2x256x512xf32, #tpu.memory_space<vmem>>, vector<1x256x512xf32>
    %118 = vector.shape_cast %117 : vector<1x256x512xf32> to vector<256x512xf32>
    %cst_49 = arith.constant dense<0.000000e+00> : vector<8x512xf32>
    %119 = tpu.matmul %116, %118, %cst_49 {dimension_numbers = #tpu.dot_dimension_numbers<[1], [0], [0], [1], [0, 0, 1, 1], [], []>} : vector<8x256xf32>, vector<256x512xf32>, vector<8x512xf32> -> vector<8x512xf32>
    %120 = vector.broadcast %11 : vector<1x512xf32> to vector<8x512xf32>
    %121 = arith.addf %119, %120 : vector<8x512xf32>
    %122 = vector.extract_strided_slice %121 {offsets = [0, 0], sizes = [8, 128], strides = [1, 1]} : vector<8x512xf32> to vector<8x128xf32>
    %123 = arith.negf %122 : vector<8x128xf32>
    %124 = math.exp %123 : vector<8x128xf32>
    %cst_50 = arith.constant 1.000000e+00 : f32
    %125 = vector.broadcast %cst_50 : f32 to vector<8x128xf32>
    %126 = arith.addf %125, %124 : vector<8x128xf32>
    %127 = arith.divf %125, %126 : vector<8x128xf32>
    %128 = vector.extract_strided_slice %121 {offsets = [0, 128], sizes = [8, 128], strides = [1, 1]} : vector<8x512xf32> to vector<8x128xf32>
    %129 = arith.negf %128 : vector<8x128xf32>
    %130 = math.exp %129 : vector<8x128xf32>
    %cst_51 = arith.constant 1.000000e+00 : f32
    %131 = vector.broadcast %cst_51 : f32 to vector<8x128xf32>
    %132 = arith.addf %131, %130 : vector<8x128xf32>
    %133 = arith.divf %131, %132 : vector<8x128xf32>
    %134 = vector.extract_strided_slice %121 {offsets = [0, 256], sizes = [8, 128], strides = [1, 1]} : vector<8x512xf32> to vector<8x128xf32>
    %135 = vector.extract_strided_slice %121 {offsets = [0, 384], sizes = [8, 128], strides = [1, 1]} : vector<8x512xf32> to vector<8x128xf32>
    %136 = arith.mulf %127, %135 : vector<8x128xf32>
    %137 = arith.addf %134, %136 : vector<8x128xf32>
    %138 = math.tanh %137 : vector<8x128xf32>
    %cst_52 = arith.constant 1.000000e+00 : f32
    %139 = vector.broadcast %cst_52 : f32 to vector<8x128xf32>
    %140 = arith.subf %139, %133 : vector<8x128xf32>
    %141 = arith.mulf %140, %138 : vector<8x128xf32>
    %142 = arith.mulf %133, %75 : vector<8x128xf32>
    %143 = arith.addf %141, %142 : vector<8x128xf32>
    %c8_i32_53 = arith.constant 8 : i32
    %144 = arith.muli %c2_i32, %c8_i32_53 : i32
    %145 = tpu.assume_multiple %144, 8 : i32
    %146 = arith.index_cast %145 : i32 to index
    %c0_54 = arith.constant 0 : index
    %147 = vector.load %arg14[%146, %c0_54] : memref<64x512xf32, #tpu.memory_space<vmem>>, vector<8x512xf32>
    %c0_55 = arith.constant 0 : index
    %c128_56 = arith.constant 128 : index
    %c0_57 = arith.constant 0 : index
    %148 = vector.load %arg3[%c0_55, %c128_56, %c0_57] : memref<2x256x512xf32, #tpu.memory_space<vmem>>, vector<1x128x512xf32>
    %149 = vector.shape_cast %148 : vector<1x128x512xf32> to vector<128x512xf32>
    %cst_58 = arith.constant dense<0.000000e+00> : vector<8x512xf32>
    %150 = tpu.matmul %110, %149, %cst_58 {dimension_numbers = #tpu.dot_dimension_numbers<[1], [0], [0], [1], [0, 0, 1, 1], [], []>} : vector<8x128xf32>, vector<128x512xf32>, vector<8x512xf32> -> vector<8x512xf32>
    %151 = vector.extract_strided_slice %147 {offsets = [0, 0], sizes = [8, 128], strides = [1, 1]} : vector<8x512xf32> to vector<8x128xf32>
    %152 = vector.extract_strided_slice %150 {offsets = [0, 0], sizes = [8, 128], strides = [1, 1]} : vector<8x512xf32> to vector<8x128xf32>
    %153 = arith.addf %151, %152 : vector<8x128xf32>
    %154 = arith.negf %153 : vector<8x128xf32>
    %155 = math.exp %154 : vector<8x128xf32>
    %cst_59 = arith.constant 1.000000e+00 : f32
    %156 = vector.broadcast %cst_59 : f32 to vector<8x128xf32>
    %157 = arith.addf %156, %155 : vector<8x128xf32>
    %158 = arith.divf %156, %157 : vector<8x128xf32>
    %159 = vector.extract_strided_slice %147 {offsets = [0, 128], sizes = [8, 128], strides = [1, 1]} : vector<8x512xf32> to vector<8x128xf32>
    %160 = vector.extract_strided_slice %150 {offsets = [0, 128], sizes = [8, 128], strides = [1, 1]} : vector<8x512xf32> to vector<8x128xf32>
    %161 = arith.addf %159, %160 : vector<8x128xf32>
    %162 = arith.negf %161 : vector<8x128xf32>
    %163 = math.exp %162 : vector<8x128xf32>
    %cst_60 = arith.constant 1.000000e+00 : f32
    %164 = vector.broadcast %cst_60 : f32 to vector<8x128xf32>
    %165 = arith.addf %164, %163 : vector<8x128xf32>
    %166 = arith.divf %164, %165 : vector<8x128xf32>
    %167 = vector.extract_strided_slice %147 {offsets = [0, 256], sizes = [8, 128], strides = [1, 1]} : vector<8x512xf32> to vector<8x128xf32>
    %168 = vector.extract_strided_slice %150 {offsets = [0, 384], sizes = [8, 128], strides = [1, 1]} : vector<8x512xf32> to vector<8x128xf32>
    %169 = vector.extract_strided_slice %147 {offsets = [0, 384], sizes = [8, 128], strides = [1, 1]} : vector<8x512xf32> to vector<8x128xf32>
    %170 = arith.addf %168, %169 : vector<8x128xf32>
    %171 = arith.mulf %158, %170 : vector<8x128xf32>
    %172 = arith.addf %167, %171 : vector<8x128xf32>
    %173 = math.tanh %172 : vector<8x128xf32>
    %cst_61 = arith.constant 1.000000e+00 : f32
    %174 = vector.broadcast %cst_61 : f32 to vector<8x128xf32>
    %175 = arith.subf %174, %166 : vector<8x128xf32>
    %176 = arith.mulf %175, %173 : vector<8x128xf32>
    %177 = arith.mulf %166, %110 : vector<8x128xf32>
    %178 = arith.addf %176, %177 : vector<8x128xf32>
    %c1_i32_62 = arith.constant 1 : i32
    %179 = arith.subi %c2_i32, %c1_i32_62 : i32
    %c8_i32_63 = arith.constant 8 : i32
    %180 = arith.muli %179, %c8_i32_63 : i32
    %181 = tpu.assume_multiple %180, 8 : i32
    %182 = arith.index_cast %181 : i32 to index
    %c0_64 = arith.constant 0 : index
    %183 = vector.load %arg13[%182, %c0_64] : memref<64x128xf32, #tpu.memory_space<vmem>>, vector<8x128xf32>
    tpu.vector_store %arg13[%182, %c0_64], %143 {strides = array<i32>} : memref<64x128xf32, #tpu.memory_space<vmem>>, vector<8x128xf32>,
    %c3_i32 = arith.constant 3 : i32
    %184 = tpu.concatenate %178, %143 in 1 : vector<8x128xf32>, vector<8x128xf32> -> vector<8x256xf32>
    %c1_65 = arith.constant 1 : index
    %c0_66 = arith.constant 0 : index
    %c0_67 = arith.constant 0 : index
    %185 = vector.load %arg3[%c1_65, %c0_66, %c0_67] : memref<2x256x512xf32, #tpu.memory_space<vmem>>, vector<1x256x512xf32>
    %186 = vector.shape_cast %185 : vector<1x256x512xf32> to vector<256x512xf32>
    %cst_68 = arith.constant dense<0.000000e+00> : vector<8x512xf32>
    %187 = tpu.matmul %184, %186, %cst_68 {dimension_numbers = #tpu.dot_dimension_numbers<[1], [0], [0], [1], [0, 0, 1, 1], [], []>} : vector<8x256xf32>, vector<256x512xf32>, vector<8x512xf32> -> vector<8x512xf32>
    %188 = vector.broadcast %11 : vector<1x512xf32> to vector<8x512xf32>
    %189 = arith.addf %187, %188 : vector<8x512xf32>
    %190 = vector.extract_strided_slice %189 {offsets = [0, 0], sizes = [8, 128], strides = [1, 1]} : vector<8x512xf32> to vector<8x128xf32>
    %191 = arith.negf %190 : vector<8x128xf32>
    %192 = math.exp %191 : vector<8x128xf32>
    %cst_69 = arith.constant 1.000000e+00 : f32
    %193 = vector.broadcast %cst_69 : f32 to vector<8x128xf32>
    %194 = arith.addf %193, %192 : vector<8x128xf32>
    %195 = arith.divf %193, %194 : vector<8x128xf32>
    %196 = vector.extract_strided_slice %189 {offsets = [0, 128], sizes = [8, 128], strides = [1, 1]} : vector<8x512xf32> to vector<8x128xf32>
    %197 = arith.negf %196 : vector<8x128xf32>
    %198 = math.exp %197 : vector<8x128xf32>
    %cst_70 = arith.constant 1.000000e+00 : f32
    %199 = vector.broadcast %cst_70 : f32 to vector<8x128xf32>
    %200 = arith.addf %199, %198 : vector<8x128xf32>
    %201 = arith.divf %199, %200 : vector<8x128xf32>
    %202 = vector.extract_strided_slice %189 {offsets = [0, 256], sizes = [8, 128], strides = [1, 1]} : vector<8x512xf32> to vector<8x128xf32>
    %203 = vector.extract_strided_slice %189 {offsets = [0, 384], sizes = [8, 128], strides = [1, 1]} : vector<8x512xf32> to vector<8x128xf32>
    %204 = arith.mulf %195, %203 : vector<8x128xf32>
    %205 = arith.addf %202, %204 : vector<8x128xf32>
    %206 = math.tanh %205 : vector<8x128xf32>
    %cst_71 = arith.constant 1.000000e+00 : f32
    %207 = vector.broadcast %cst_71 : f32 to vector<8x128xf32>
    %208 = arith.subf %207, %201 : vector<8x128xf32>
    %209 = arith.mulf %208, %206 : vector<8x128xf32>
    %210 = arith.mulf %201, %143 : vector<8x128xf32>
    %211 = arith.addf %209, %210 : vector<8x128xf32>
    %c8_i32_72 = arith.constant 8 : i32
    %212 = arith.muli %c3_i32, %c8_i32_72 : i32
    %213 = tpu.assume_multiple %212, 8 : i32
    %214 = arith.index_cast %213 : i32 to index
    %c0_73 = arith.constant 0 : index
    %215 = vector.load %arg14[%214, %c0_73] : memref<64x512xf32, #tpu.memory_space<vmem>>, vector<8x512xf32>
    %c0_74 = arith.constant 0 : index
    %c128_75 = arith.constant 128 : index
    %c0_76 = arith.constant 0 : index
    %216 = vector.load %arg3[%c0_74, %c128_75, %c0_76] : memref<2x256x512xf32, #tpu.memory_space<vmem>>, vector<1x128x512xf32>
    %217 = vector.shape_cast %216 : vector<1x128x512xf32> to vector<128x512xf32>
    %cst_77 = arith.constant dense<0.000000e+00> : vector<8x512xf32>
    %218 = tpu.matmul %178, %217, %cst_77 {dimension_numbers = #tpu.dot_dimension_numbers<[1], [0], [0], [1], [0, 0, 1, 1], [], []>} : vector<8x128xf32>, vector<128x512xf32>, vector<8x512xf32> -> vector<8x512xf32>
    %219 = vector.extract_strided_slice %215 {offsets = [0, 0], sizes = [8, 128], strides = [1, 1]} : vector<8x512xf32> to vector<8x128xf32>
    %220 = vector.extract_strided_slice %218 {offsets = [0, 0], sizes = [8, 128], strides = [1, 1]} : vector<8x512xf32> to vector<8x128xf32>
    %221 = arith.addf %219, %220 : vector<8x128xf32>
    %222 = arith.negf %221 : vector<8x128xf32>
    %223 = math.exp %222 : vector<8x128xf32>
    %cst_78 = arith.constant 1.000000e+00 : f32
    %224 = vector.broadcast %cst_78 : f32 to vector<8x128xf32>
    %225 = arith.addf %224, %223 : vector<8x128xf32>
    %226 = arith.divf %224, %225 : vector<8x128xf32>
    %227 = vector.extract_strided_slice %215 {offsets = [0, 128], sizes = [8, 128], strides = [1, 1]} : vector<8x512xf32> to vector<8x128xf32>
    %228 = vector.extract_strided_slice %218 {offsets = [0, 128], sizes = [8, 128], strides = [1, 1]} : vector<8x512xf32> to vector<8x128xf32>
    %229 = arith.addf %227, %228 : vector<8x128xf32>
    %230 = arith.negf %229 : vector<8x128xf32>
    %231 = math.exp %230 : vector<8x128xf32>
    %cst_79 = arith.constant 1.000000e+00 : f32
    %232 = vector.broadcast %cst_79 : f32 to vector<8x128xf32>
    %233 = arith.addf %232, %231 : vector<8x128xf32>
    %234 = arith.divf %232, %233 : vector<8x128xf32>
    %235 = vector.extract_strided_slice %215 {offsets = [0, 256], sizes = [8, 128], strides = [1, 1]} : vector<8x512xf32> to vector<8x128xf32>
    %236 = vector.extract_strided_slice %218 {offsets = [0, 384], sizes = [8, 128], strides = [1, 1]} : vector<8x512xf32> to vector<8x128xf32>
    %237 = vector.extract_strided_slice %215 {offsets = [0, 384], sizes = [8, 128], strides = [1, 1]} : vector<8x512xf32> to vector<8x128xf32>
    %238 = arith.addf %236, %237 : vector<8x128xf32>
    %239 = arith.mulf %226, %238 : vector<8x128xf32>
    %240 = arith.addf %235, %239 : vector<8x128xf32>
    %241 = math.tanh %240 : vector<8x128xf32>
    %cst_80 = arith.constant 1.000000e+00 : f32
    %242 = vector.broadcast %cst_80 : f32 to vector<8x128xf32>
    %243 = arith.subf %242, %234 : vector<8x128xf32>
    %244 = arith.mulf %243, %241 : vector<8x128xf32>
    %245 = arith.mulf %234, %178 : vector<8x128xf32>
    %246 = arith.addf %244, %245 : vector<8x128xf32>
    %c1_i32_81 = arith.constant 1 : i32
    %247 = arith.subi %c3_i32, %c1_i32_81 : i32
    %c8_i32_82 = arith.constant 8 : i32
    %248 = arith.muli %247, %c8_i32_82 : i32
    %249 = tpu.assume_multiple %248, 8 : i32
    %250 = arith.index_cast %249 : i32 to index
    %c0_83 = arith.constant 0 : index
    %251 = vector.load %arg13[%250, %c0_83] : memref<64x128xf32, #tpu.memory_space<vmem>>, vector<8x128xf32>
    tpu.vector_store %arg13[%250, %c0_83], %211 {strides = array<i32>} : memref<64x128xf32, #tpu.memory_space<vmem>>, vector<8x128xf32>,
    %c4_i32 = arith.constant 4 : i32
    %252 = tpu.concatenate %246, %211 in 1 : vector<8x128xf32>, vector<8x128xf32> -> vector<8x256xf32>
    %c1_84 = arith.constant 1 : index
    %c0_85 = arith.constant 0 : index
    %c0_86 = arith.constant 0 : index
    %253 = vector.load %arg3[%c1_84, %c0_85, %c0_86] : memref<2x256x512xf32, #tpu.memory_space<vmem>>, vector<1x256x512xf32>
    %254 = vector.shape_cast %253 : vector<1x256x512xf32> to vector<256x512xf32>
    %cst_87 = arith.constant dense<0.000000e+00> : vector<8x512xf32>
    %255 = tpu.matmul %252, %254, %cst_87 {dimension_numbers = #tpu.dot_dimension_numbers<[1], [0], [0], [1], [0, 0, 1, 1], [], []>} : vector<8x256xf32>, vector<256x512xf32>, vector<8x512xf32> -> vector<8x512xf32>
    %256 = vector.broadcast %11 : vector<1x512xf32> to vector<8x512xf32>
    %257 = arith.addf %255, %256 : vector<8x512xf32>
    %258 = vector.extract_strided_slice %257 {offsets = [0, 0], sizes = [8, 128], strides = [1, 1]} : vector<8x512xf32> to vector<8x128xf32>
    %259 = arith.negf %258 : vector<8x128xf32>
    %260 = math.exp %259 : vector<8x128xf32>
    %cst_88 = arith.constant 1.000000e+00 : f32
    %261 = vector.broadcast %cst_88 : f32 to vector<8x128xf32>
    %262 = arith.addf %261, %260 : vector<8x128xf32>
    %263 = arith.divf %261, %262 : vector<8x128xf32>
    %264 = vector.extract_strided_slice %257 {offsets = [0, 128], sizes = [8, 128], strides = [1, 1]} : vector<8x512xf32> to vector<8x128xf32>
    %265 = arith.negf %264 : vector<8x128xf32>
    %266 = math.exp %265 : vector<8x128xf32>
    %cst_89 = arith.constant 1.000000e+00 : f32
    %267 = vector.broadcast %cst_89 : f32 to vector<8x128xf32>
    %268 = arith.addf %267, %266 : vector<8x128xf32>
    %269 = arith.divf %267, %268 : vector<8x128xf32>
    %270 = vector.extract_strided_slice %257 {offsets = [0, 256], sizes = [8, 128], strides = [1, 1]} : vector<8x512xf32> to vector<8x128xf32>
    %271 = vector.extract_strided_slice %257 {offsets = [0, 384], sizes = [8, 128], strides = [1, 1]} : vector<8x512xf32> to vector<8x128xf32>
    %272 = arith.mulf %263, %271 : vector<8x128xf32>
    %273 = arith.addf %270, %272 : vector<8x128xf32>
    %274 = math.tanh %273 : vector<8x128xf32>
    %cst_90 = arith.constant 1.000000e+00 : f32
    %275 = vector.broadcast %cst_90 : f32 to vector<8x128xf32>
    %276 = arith.subf %275, %269 : vector<8x128xf32>
    %277 = arith.mulf %276, %274 : vector<8x128xf32>
    %278 = arith.mulf %269, %211 : vector<8x128xf32>
    %279 = arith.addf %277, %278 : vector<8x128xf32>
    %c8_i32_91 = arith.constant 8 : i32
    %280 = arith.muli %c4_i32, %c8_i32_91 : i32
    %281 = tpu.assume_multiple %280, 8 : i32
    %282 = arith.index_cast %281 : i32 to index
    %c0_92 = arith.constant 0 : index
    %283 = vector.load %arg14[%282, %c0_92] : memref<64x512xf32, #tpu.memory_space<vmem>>, vector<8x512xf32>
    %c0_93 = arith.constant 0 : index
    %c128_94 = arith.constant 128 : index
    %c0_95 = arith.constant 0 : index
    %284 = vector.load %arg3[%c0_93, %c128_94, %c0_95] : memref<2x256x512xf32, #tpu.memory_space<vmem>>, vector<1x128x512xf32>
    %285 = vector.shape_cast %284 : vector<1x128x512xf32> to vector<128x512xf32>
    %cst_96 = arith.constant dense<0.000000e+00> : vector<8x512xf32>
    %286 = tpu.matmul %246, %285, %cst_96 {dimension_numbers = #tpu.dot_dimension_numbers<[1], [0], [0], [1], [0, 0, 1, 1], [], []>} : vector<8x128xf32>, vector<128x512xf32>, vector<8x512xf32> -> vector<8x512xf32>
    %287 = vector.extract_strided_slice %283 {offsets = [0, 0], sizes = [8, 128], strides = [1, 1]} : vector<8x512xf32> to vector<8x128xf32>
    %288 = vector.extract_strided_slice %286 {offsets = [0, 0], sizes = [8, 128], strides = [1, 1]} : vector<8x512xf32> to vector<8x128xf32>
    %289 = arith.addf %287, %288 : vector<8x128xf32>
    %290 = arith.negf %289 : vector<8x128xf32>
    %291 = math.exp %290 : vector<8x128xf32>
    %cst_97 = arith.constant 1.000000e+00 : f32
    %292 = vector.broadcast %cst_97 : f32 to vector<8x128xf32>
    %293 = arith.addf %292, %291 : vector<8x128xf32>
    %294 = arith.divf %292, %293 : vector<8x128xf32>
    %295 = vector.extract_strided_slice %283 {offsets = [0, 128], sizes = [8, 128], strides = [1, 1]} : vector<8x512xf32> to vector<8x128xf32>
    %296 = vector.extract_strided_slice %286 {offsets = [0, 128], sizes = [8, 128], strides = [1, 1]} : vector<8x512xf32> to vector<8x128xf32>
    %297 = arith.addf %295, %296 : vector<8x128xf32>
    %298 = arith.negf %297 : vector<8x128xf32>
    %299 = math.exp %298 : vector<8x128xf32>
    %cst_98 = arith.constant 1.000000e+00 : f32
    %300 = vector.broadcast %cst_98 : f32 to vector<8x128xf32>
    %301 = arith.addf %300, %299 : vector<8x128xf32>
    %302 = arith.divf %300, %301 : vector<8x128xf32>
    %303 = vector.extract_strided_slice %283 {offsets = [0, 256], sizes = [8, 128], strides = [1, 1]} : vector<8x512xf32> to vector<8x128xf32>
    %304 = vector.extract_strided_slice %286 {offsets = [0, 384], sizes = [8, 128], strides = [1, 1]} : vector<8x512xf32> to vector<8x128xf32>
    %305 = vector.extract_strided_slice %283 {offsets = [0, 384], sizes = [8, 128], strides = [1, 1]} : vector<8x512xf32> to vector<8x128xf32>
    %306 = arith.addf %304, %305 : vector<8x128xf32>
    %307 = arith.mulf %294, %306 : vector<8x128xf32>
    %308 = arith.addf %303, %307 : vector<8x128xf32>
    %309 = math.tanh %308 : vector<8x128xf32>
    %cst_99 = arith.constant 1.000000e+00 : f32
    %310 = vector.broadcast %cst_99 : f32 to vector<8x128xf32>
    %311 = arith.subf %310, %302 : vector<8x128xf32>
    %312 = arith.mulf %311, %309 : vector<8x128xf32>
    %313 = arith.mulf %302, %246 : vector<8x128xf32>
    %314 = arith.addf %312, %313 : vector<8x128xf32>
    %c1_i32_100 = arith.constant 1 : i32
    %315 = arith.subi %c4_i32, %c1_i32_100 : i32
    %c8_i32_101 = arith.constant 8 : i32
    %316 = arith.muli %315, %c8_i32_101 : i32
    %317 = tpu.assume_multiple %316, 8 : i32
    %318 = arith.index_cast %317 : i32 to index
    %c0_102 = arith.constant 0 : index
    %319 = vector.load %arg13[%318, %c0_102] : memref<64x128xf32, #tpu.memory_space<vmem>>, vector<8x128xf32>
    tpu.vector_store %arg13[%318, %c0_102], %279 {strides = array<i32>} : memref<64x128xf32, #tpu.memory_space<vmem>>, vector<8x128xf32>,
    %c5_i32 = arith.constant 5 : i32
    %320 = tpu.concatenate %314, %279 in 1 : vector<8x128xf32>, vector<8x128xf32> -> vector<8x256xf32>
    %c1_103 = arith.constant 1 : index
    %c0_104 = arith.constant 0 : index
    %c0_105 = arith.constant 0 : index
    %321 = vector.load %arg3[%c1_103, %c0_104, %c0_105] : memref<2x256x512xf32, #tpu.memory_space<vmem>>, vector<1x256x512xf32>
    %322 = vector.shape_cast %321 : vector<1x256x512xf32> to vector<256x512xf32>
    %cst_106 = arith.constant dense<0.000000e+00> : vector<8x512xf32>
    %323 = tpu.matmul %320, %322, %cst_106 {dimension_numbers = #tpu.dot_dimension_numbers<[1], [0], [0], [1], [0, 0, 1, 1], [], []>} : vector<8x256xf32>, vector<256x512xf32>, vector<8x512xf32> -> vector<8x512xf32>
    %324 = vector.broadcast %11 : vector<1x512xf32> to vector<8x512xf32>
    %325 = arith.addf %323, %324 : vector<8x512xf32>
    %326 = vector.extract_strided_slice %325 {offsets = [0, 0], sizes = [8, 128], strides = [1, 1]} : vector<8x512xf32> to vector<8x128xf32>
    %327 = arith.negf %326 : vector<8x128xf32>
    %328 = math.exp %327 : vector<8x128xf32>
    %cst_107 = arith.constant 1.000000e+00 : f32
    %329 = vector.broadcast %cst_107 : f32 to vector<8x128xf32>
    %330 = arith.addf %329, %328 : vector<8x128xf32>
    %331 = arith.divf %329, %330 : vector<8x128xf32>
    %332 = vector.extract_strided_slice %325 {offsets = [0, 128], sizes = [8, 128], strides = [1, 1]} : vector<8x512xf32> to vector<8x128xf32>
    %333 = arith.negf %332 : vector<8x128xf32>
    %334 = math.exp %333 : vector<8x128xf32>
    %cst_108 = arith.constant 1.000000e+00 : f32
    %335 = vector.broadcast %cst_108 : f32 to vector<8x128xf32>
    %336 = arith.addf %335, %334 : vector<8x128xf32>
    %337 = arith.divf %335, %336 : vector<8x128xf32>
    %338 = vector.extract_strided_slice %325 {offsets = [0, 256], sizes = [8, 128], strides = [1, 1]} : vector<8x512xf32> to vector<8x128xf32>
    %339 = vector.extract_strided_slice %325 {offsets = [0, 384], sizes = [8, 128], strides = [1, 1]} : vector<8x512xf32> to vector<8x128xf32>
    %340 = arith.mulf %331, %339 : vector<8x128xf32>
    %341 = arith.addf %338, %340 : vector<8x128xf32>
    %342 = math.tanh %341 : vector<8x128xf32>
    %cst_109 = arith.constant 1.000000e+00 : f32
    %343 = vector.broadcast %cst_109 : f32 to vector<8x128xf32>
    %344 = arith.subf %343, %337 : vector<8x128xf32>
    %345 = arith.mulf %344, %342 : vector<8x128xf32>
    %346 = arith.mulf %337, %279 : vector<8x128xf32>
    %347 = arith.addf %345, %346 : vector<8x128xf32>
    %c8_i32_110 = arith.constant 8 : i32
    %348 = arith.muli %c5_i32, %c8_i32_110 : i32
    %349 = tpu.assume_multiple %348, 8 : i32
    %350 = arith.index_cast %349 : i32 to index
    %c0_111 = arith.constant 0 : index
    %351 = vector.load %arg14[%350, %c0_111] : memref<64x512xf32, #tpu.memory_space<vmem>>, vector<8x512xf32>
    %c0_112 = arith.constant 0 : index
    %c128_113 = arith.constant 128 : index
    %c0_114 = arith.constant 0 : index
    %352 = vector.load %arg3[%c0_112, %c128_113, %c0_114] : memref<2x256x512xf32, #tpu.memory_space<vmem>>, vector<1x128x512xf32>
    %353 = vector.shape_cast %352 : vector<1x128x512xf32> to vector<128x512xf32>
    %cst_115 = arith.constant dense<0.000000e+00> : vector<8x512xf32>
    %354 = tpu.matmul %314, %353, %cst_115 {dimension_numbers = #tpu.dot_dimension_numbers<[1], [0], [0], [1], [0, 0, 1, 1], [], []>} : vector<8x128xf32>, vector<128x512xf32>, vector<8x512xf32> -> vector<8x512xf32>
    %355 = vector.extract_strided_slice %351 {offsets = [0, 0], sizes = [8, 128], strides = [1, 1]} : vector<8x512xf32> to vector<8x128xf32>
    %356 = vector.extract_strided_slice %354 {offsets = [0, 0], sizes = [8, 128], strides = [1, 1]} : vector<8x512xf32> to vector<8x128xf32>
    %357 = arith.addf %355, %356 : vector<8x128xf32>
    %358 = arith.negf %357 : vector<8x128xf32>
    %359 = math.exp %358 : vector<8x128xf32>
    %cst_116 = arith.constant 1.000000e+00 : f32
    %360 = vector.broadcast %cst_116 : f32 to vector<8x128xf32>
    %361 = arith.addf %360, %359 : vector<8x128xf32>
    %362 = arith.divf %360, %361 : vector<8x128xf32>
    %363 = vector.extract_strided_slice %351 {offsets = [0, 128], sizes = [8, 128], strides = [1, 1]} : vector<8x512xf32> to vector<8x128xf32>
    %364 = vector.extract_strided_slice %354 {offsets = [0, 128], sizes = [8, 128], strides = [1, 1]} : vector<8x512xf32> to vector<8x128xf32>
    %365 = arith.addf %363, %364 : vector<8x128xf32>
    %366 = arith.negf %365 : vector<8x128xf32>
    %367 = math.exp %366 : vector<8x128xf32>
    %cst_117 = arith.constant 1.000000e+00 : f32
    %368 = vector.broadcast %cst_117 : f32 to vector<8x128xf32>
    %369 = arith.addf %368, %367 : vector<8x128xf32>
    %370 = arith.divf %368, %369 : vector<8x128xf32>
    %371 = vector.extract_strided_slice %351 {offsets = [0, 256], sizes = [8, 128], strides = [1, 1]} : vector<8x512xf32> to vector<8x128xf32>
    %372 = vector.extract_strided_slice %354 {offsets = [0, 384], sizes = [8, 128], strides = [1, 1]} : vector<8x512xf32> to vector<8x128xf32>
    %373 = vector.extract_strided_slice %351 {offsets = [0, 384], sizes = [8, 128], strides = [1, 1]} : vector<8x512xf32> to vector<8x128xf32>
    %374 = arith.addf %372, %373 : vector<8x128xf32>
    %375 = arith.mulf %362, %374 : vector<8x128xf32>
    %376 = arith.addf %371, %375 : vector<8x128xf32>
    %377 = math.tanh %376 : vector<8x128xf32>
    %cst_118 = arith.constant 1.000000e+00 : f32
    %378 = vector.broadcast %cst_118 : f32 to vector<8x128xf32>
    %379 = arith.subf %378, %370 : vector<8x128xf32>
    %380 = arith.mulf %379, %377 : vector<8x128xf32>
    %381 = arith.mulf %370, %314 : vector<8x128xf32>
    %382 = arith.addf %380, %381 : vector<8x128xf32>
    %c1_i32_119 = arith.constant 1 : i32
    %383 = arith.subi %c5_i32, %c1_i32_119 : i32
    %c8_i32_120 = arith.constant 8 : i32
    %384 = arith.muli %383, %c8_i32_120 : i32
    %385 = tpu.assume_multiple %384, 8 : i32
    %386 = arith.index_cast %385 : i32 to index
    %c0_121 = arith.constant 0 : index
    %387 = vector.load %arg13[%386, %c0_121] : memref<64x128xf32, #tpu.memory_space<vmem>>, vector<8x128xf32>
    tpu.vector_store %arg13[%386, %c0_121], %347 {strides = array<i32>} : memref<64x128xf32, #tpu.memory_space<vmem>>, vector<8x128xf32>,
    %c6_i32 = arith.constant 6 : i32
    %388 = tpu.concatenate %382, %347 in 1 : vector<8x128xf32>, vector<8x128xf32> -> vector<8x256xf32>
    %c1_122 = arith.constant 1 : index
    %c0_123 = arith.constant 0 : index
    %c0_124 = arith.constant 0 : index
    %389 = vector.load %arg3[%c1_122, %c0_123, %c0_124] : memref<2x256x512xf32, #tpu.memory_space<vmem>>, vector<1x256x512xf32>
    %390 = vector.shape_cast %389 : vector<1x256x512xf32> to vector<256x512xf32>
    %cst_125 = arith.constant dense<0.000000e+00> : vector<8x512xf32>
    %391 = tpu.matmul %388, %390, %cst_125 {dimension_numbers = #tpu.dot_dimension_numbers<[1], [0], [0], [1], [0, 0, 1, 1], [], []>} : vector<8x256xf32>, vector<256x512xf32>, vector<8x512xf32> -> vector<8x512xf32>
    %392 = vector.broadcast %11 : vector<1x512xf32> to vector<8x512xf32>
    %393 = arith.addf %391, %392 : vector<8x512xf32>
    %394 = vector.extract_strided_slice %393 {offsets = [0, 0], sizes = [8, 128], strides = [1, 1]} : vector<8x512xf32> to vector<8x128xf32>
    %395 = arith.negf %394 : vector<8x128xf32>
    %396 = math.exp %395 : vector<8x128xf32>
    %cst_126 = arith.constant 1.000000e+00 : f32
    %397 = vector.broadcast %cst_126 : f32 to vector<8x128xf32>
    %398 = arith.addf %397, %396 : vector<8x128xf32>
    %399 = arith.divf %397, %398 : vector<8x128xf32>
    %400 = vector.extract_strided_slice %393 {offsets = [0, 128], sizes = [8, 128], strides = [1, 1]} : vector<8x512xf32> to vector<8x128xf32>
    %401 = arith.negf %400 : vector<8x128xf32>
    %402 = math.exp %401 : vector<8x128xf32>
    %cst_127 = arith.constant 1.000000e+00 : f32
    %403 = vector.broadcast %cst_127 : f32 to vector<8x128xf32>
    %404 = arith.addf %403, %402 : vector<8x128xf32>
    %405 = arith.divf %403, %404 : vector<8x128xf32>
    %406 = vector.extract_strided_slice %393 {offsets = [0, 256], sizes = [8, 128], strides = [1, 1]} : vector<8x512xf32> to vector<8x128xf32>
    %407 = vector.extract_strided_slice %393 {offsets = [0, 384], sizes = [8, 128], strides = [1, 1]} : vector<8x512xf32> to vector<8x128xf32>
    %408 = arith.mulf %399, %407 : vector<8x128xf32>
    %409 = arith.addf %406, %408 : vector<8x128xf32>
    %410 = math.tanh %409 : vector<8x128xf32>
    %cst_128 = arith.constant 1.000000e+00 : f32
    %411 = vector.broadcast %cst_128 : f32 to vector<8x128xf32>
    %412 = arith.subf %411, %405 : vector<8x128xf32>
    %413 = arith.mulf %412, %410 : vector<8x128xf32>
    %414 = arith.mulf %405, %347 : vector<8x128xf32>
    %415 = arith.addf %413, %414 : vector<8x128xf32>
    %c8_i32_129 = arith.constant 8 : i32
    %416 = arith.muli %c6_i32, %c8_i32_129 : i32
    %417 = tpu.assume_multiple %416, 8 : i32
    %418 = arith.index_cast %417 : i32 to index
    %c0_130 = arith.constant 0 : index
    %419 = vector.load %arg14[%418, %c0_130] : memref<64x512xf32, #tpu.memory_space<vmem>>, vector<8x512xf32>
    %c0_131 = arith.constant 0 : index
    %c128_132 = arith.constant 128 : index
    %c0_133 = arith.constant 0 : index
    %420 = vector.load %arg3[%c0_131, %c128_132, %c0_133] : memref<2x256x512xf32, #tpu.memory_space<vmem>>, vector<1x128x512xf32>
    %421 = vector.shape_cast %420 : vector<1x128x512xf32> to vector<128x512xf32>
    %cst_134 = arith.constant dense<0.000000e+00> : vector<8x512xf32>
    %422 = tpu.matmul %382, %421, %cst_134 {dimension_numbers = #tpu.dot_dimension_numbers<[1], [0], [0], [1], [0, 0, 1, 1], [], []>} : vector<8x128xf32>, vector<128x512xf32>, vector<8x512xf32> -> vector<8x512xf32>
    %423 = vector.extract_strided_slice %419 {offsets = [0, 0], sizes = [8, 128], strides = [1, 1]} : vector<8x512xf32> to vector<8x128xf32>
    %424 = vector.extract_strided_slice %422 {offsets = [0, 0], sizes = [8, 128], strides = [1, 1]} : vector<8x512xf32> to vector<8x128xf32>
    %425 = arith.addf %423, %424 : vector<8x128xf32>
    %426 = arith.negf %425 : vector<8x128xf32>
    %427 = math.exp %426 : vector<8x128xf32>
    %cst_135 = arith.constant 1.000000e+00 : f32
    %428 = vector.broadcast %cst_135 : f32 to vector<8x128xf32>
    %429 = arith.addf %428, %427 : vector<8x128xf32>
    %430 = arith.divf %428, %429 : vector<8x128xf32>
    %431 = vector.extract_strided_slice %419 {offsets = [0, 128], sizes = [8, 128], strides = [1, 1]} : vector<8x512xf32> to vector<8x128xf32>
    %432 = vector.extract_strided_slice %422 {offsets = [0, 128], sizes = [8, 128], strides = [1, 1]} : vector<8x512xf32> to vector<8x128xf32>
    %433 = arith.addf %431, %432 : vector<8x128xf32>
    %434 = arith.negf %433 : vector<8x128xf32>
    %435 = math.exp %434 : vector<8x128xf32>
    %cst_136 = arith.constant 1.000000e+00 : f32
    %436 = vector.broadcast %cst_136 : f32 to vector<8x128xf32>
    %437 = arith.addf %436, %435 : vector<8x128xf32>
    %438 = arith.divf %436, %437 : vector<8x128xf32>
    %439 = vector.extract_strided_slice %419 {offsets = [0, 256], sizes = [8, 128], strides = [1, 1]} : vector<8x512xf32> to vector<8x128xf32>
    %440 = vector.extract_strided_slice %422 {offsets = [0, 384], sizes = [8, 128], strides = [1, 1]} : vector<8x512xf32> to vector<8x128xf32>
    %441 = vector.extract_strided_slice %419 {offsets = [0, 384], sizes = [8, 128], strides = [1, 1]} : vector<8x512xf32> to vector<8x128xf32>
    %442 = arith.addf %440, %441 : vector<8x128xf32>
    %443 = arith.mulf %430, %442 : vector<8x128xf32>
    %444 = arith.addf %439, %443 : vector<8x128xf32>
    %445 = math.tanh %444 : vector<8x128xf32>
    %cst_137 = arith.constant 1.000000e+00 : f32
    %446 = vector.broadcast %cst_137 : f32 to vector<8x128xf32>
    %447 = arith.subf %446, %438 : vector<8x128xf32>
    %448 = arith.mulf %447, %445 : vector<8x128xf32>
    %449 = arith.mulf %438, %382 : vector<8x128xf32>
    %450 = arith.addf %448, %449 : vector<8x128xf32>
    %c1_i32_138 = arith.constant 1 : i32
    %451 = arith.subi %c6_i32, %c1_i32_138 : i32
    %c8_i32_139 = arith.constant 8 : i32
    %452 = arith.muli %451, %c8_i32_139 : i32
    %453 = tpu.assume_multiple %452, 8 : i32
    %454 = arith.index_cast %453 : i32 to index
    %c0_140 = arith.constant 0 : index
    %455 = vector.load %arg13[%454, %c0_140] : memref<64x128xf32, #tpu.memory_space<vmem>>, vector<8x128xf32>
    tpu.vector_store %arg13[%454, %c0_140], %415 {strides = array<i32>} : memref<64x128xf32, #tpu.memory_space<vmem>>, vector<8x128xf32>,
    %c7_i32 = arith.constant 7 : i32
    %456 = tpu.concatenate %450, %415 in 1 : vector<8x128xf32>, vector<8x128xf32> -> vector<8x256xf32>
    %c1_141 = arith.constant 1 : index
    %c0_142 = arith.constant 0 : index
    %c0_143 = arith.constant 0 : index
    %457 = vector.load %arg3[%c1_141, %c0_142, %c0_143] : memref<2x256x512xf32, #tpu.memory_space<vmem>>, vector<1x256x512xf32>
    %458 = vector.shape_cast %457 : vector<1x256x512xf32> to vector<256x512xf32>
    %cst_144 = arith.constant dense<0.000000e+00> : vector<8x512xf32>
    %459 = tpu.matmul %456, %458, %cst_144 {dimension_numbers = #tpu.dot_dimension_numbers<[1], [0], [0], [1], [0, 0, 1, 1], [], []>} : vector<8x256xf32>, vector<256x512xf32>, vector<8x512xf32> -> vector<8x512xf32>
    %460 = vector.broadcast %11 : vector<1x512xf32> to vector<8x512xf32>
    %461 = arith.addf %459, %460 : vector<8x512xf32>
    %462 = vector.extract_strided_slice %461 {offsets = [0, 0], sizes = [8, 128], strides = [1, 1]} : vector<8x512xf32> to vector<8x128xf32>
    %463 = arith.negf %462 : vector<8x128xf32>
    %464 = math.exp %463 : vector<8x128xf32>
    %cst_145 = arith.constant 1.000000e+00 : f32
    %465 = vector.broadcast %cst_145 : f32 to vector<8x128xf32>
    %466 = arith.addf %465, %464 : vector<8x128xf32>
    %467 = arith.divf %465, %466 : vector<8x128xf32>
    %468 = vector.extract_strided_slice %461 {offsets = [0, 128], sizes = [8, 128], strides = [1, 1]} : vector<8x512xf32> to vector<8x128xf32>
    %469 = arith.negf %468 : vector<8x128xf32>
    %470 = math.exp %469 : vector<8x128xf32>
    %cst_146 = arith.constant 1.000000e+00 : f32
    %471 = vector.broadcast %cst_146 : f32 to vector<8x128xf32>
    %472 = arith.addf %471, %470 : vector<8x128xf32>
    %473 = arith.divf %471, %472 : vector<8x128xf32>
    %474 = vector.extract_strided_slice %461 {offsets = [0, 256], sizes = [8, 128], strides = [1, 1]} : vector<8x512xf32> to vector<8x128xf32>
    %475 = vector.extract_strided_slice %461 {offsets = [0, 384], sizes = [8, 128], strides = [1, 1]} : vector<8x512xf32> to vector<8x128xf32>
    %476 = arith.mulf %467, %475 : vector<8x128xf32>
    %477 = arith.addf %474, %476 : vector<8x128xf32>
    %478 = math.tanh %477 : vector<8x128xf32>
    %cst_147 = arith.constant 1.000000e+00 : f32
    %479 = vector.broadcast %cst_147 : f32 to vector<8x128xf32>
    %480 = arith.subf %479, %473 : vector<8x128xf32>
    %481 = arith.mulf %480, %478 : vector<8x128xf32>
    %482 = arith.mulf %473, %415 : vector<8x128xf32>
    %483 = arith.addf %481, %482 : vector<8x128xf32>
    %c8_i32_148 = arith.constant 8 : i32
    %484 = arith.muli %c7_i32, %c8_i32_148 : i32
    %485 = tpu.assume_multiple %484, 8 : i32
    %486 = arith.index_cast %485 : i32 to index
    %c0_149 = arith.constant 0 : index
    %487 = vector.load %arg14[%486, %c0_149] : memref<64x512xf32, #tpu.memory_space<vmem>>, vector<8x512xf32>
    %c0_150 = arith.constant 0 : index
    %c128_151 = arith.constant 128 : index
    %c0_152 = arith.constant 0 : index
    %488 = vector.load %arg3[%c0_150, %c128_151, %c0_152] : memref<2x256x512xf32, #tpu.memory_space<vmem>>, vector<1x128x512xf32>
    %489 = vector.shape_cast %488 : vector<1x128x512xf32> to vector<128x512xf32>
    %cst_153 = arith.constant dense<0.000000e+00> : vector<8x512xf32>
    %490 = tpu.matmul %450, %489, %cst_153 {dimension_numbers = #tpu.dot_dimension_numbers<[1], [0], [0], [1], [0, 0, 1, 1], [], []>} : vector<8x128xf32>, vector<128x512xf32>, vector<8x512xf32> -> vector<8x512xf32>
    %491 = vector.extract_strided_slice %487 {offsets = [0, 0], sizes = [8, 128], strides = [1, 1]} : vector<8x512xf32> to vector<8x128xf32>
    %492 = vector.extract_strided_slice %490 {offsets = [0, 0], sizes = [8, 128], strides = [1, 1]} : vector<8x512xf32> to vector<8x128xf32>
    %493 = arith.addf %491, %492 : vector<8x128xf32>
    %494 = arith.negf %493 : vector<8x128xf32>
    %495 = math.exp %494 : vector<8x128xf32>
    %cst_154 = arith.constant 1.000000e+00 : f32
    %496 = vector.broadcast %cst_154 : f32 to vector<8x128xf32>
    %497 = arith.addf %496, %495 : vector<8x128xf32>
    %498 = arith.divf %496, %497 : vector<8x128xf32>
    %499 = vector.extract_strided_slice %487 {offsets = [0, 128], sizes = [8, 128], strides = [1, 1]} : vector<8x512xf32> to vector<8x128xf32>
    %500 = vector.extract_strided_slice %490 {offsets = [0, 128], sizes = [8, 128], strides = [1, 1]} : vector<8x512xf32> to vector<8x128xf32>
    %501 = arith.addf %499, %500 : vector<8x128xf32>
    %502 = arith.negf %501 : vector<8x128xf32>
    %503 = math.exp %502 : vector<8x128xf32>
    %cst_155 = arith.constant 1.000000e+00 : f32
    %504 = vector.broadcast %cst_155 : f32 to vector<8x128xf32>
    %505 = arith.addf %504, %503 : vector<8x128xf32>
    %506 = arith.divf %504, %505 : vector<8x128xf32>
    %507 = vector.extract_strided_slice %487 {offsets = [0, 256], sizes = [8, 128], strides = [1, 1]} : vector<8x512xf32> to vector<8x128xf32>
    %508 = vector.extract_strided_slice %490 {offsets = [0, 384], sizes = [8, 128], strides = [1, 1]} : vector<8x512xf32> to vector<8x128xf32>
    %509 = vector.extract_strided_slice %487 {offsets = [0, 384], sizes = [8, 128], strides = [1, 1]} : vector<8x512xf32> to vector<8x128xf32>
    %510 = arith.addf %508, %509 : vector<8x128xf32>
    %511 = arith.mulf %498, %510 : vector<8x128xf32>
    %512 = arith.addf %507, %511 : vector<8x128xf32>
    %513 = math.tanh %512 : vector<8x128xf32>
    %cst_156 = arith.constant 1.000000e+00 : f32
    %514 = vector.broadcast %cst_156 : f32 to vector<8x128xf32>
    %515 = arith.subf %514, %506 : vector<8x128xf32>
    %516 = arith.mulf %515, %513 : vector<8x128xf32>
    %517 = arith.mulf %506, %450 : vector<8x128xf32>
    %518 = arith.addf %516, %517 : vector<8x128xf32>
    %c1_i32_157 = arith.constant 1 : i32
    %519 = arith.subi %c7_i32, %c1_i32_157 : i32
    %c8_i32_158 = arith.constant 8 : i32
    %520 = arith.muli %519, %c8_i32_158 : i32
    %521 = tpu.assume_multiple %520, 8 : i32
    %522 = arith.index_cast %521 : i32 to index
    %c0_159 = arith.constant 0 : index
    %523 = vector.load %arg13[%522, %c0_159] : memref<64x128xf32, #tpu.memory_space<vmem>>, vector<8x128xf32>
    tpu.vector_store %arg13[%522, %c0_159], %483 {strides = array<i32>} : memref<64x128xf32, #tpu.memory_space<vmem>>, vector<8x128xf32>,
    %c7_i32_160 = arith.constant 7 : i32
    %524 = tpu.concatenate %518, %483 in 1 : vector<8x128xf32>, vector<8x128xf32> -> vector<8x256xf32>
    %c1_161 = arith.constant 1 : index
    %c0_162 = arith.constant 0 : index
    %c0_163 = arith.constant 0 : index
    %525 = vector.load %arg3[%c1_161, %c0_162, %c0_163] : memref<2x256x512xf32, #tpu.memory_space<vmem>>, vector<1x256x512xf32>
    %526 = vector.shape_cast %525 : vector<1x256x512xf32> to vector<256x512xf32>
    %cst_164 = arith.constant dense<0.000000e+00> : vector<8x512xf32>
    %527 = tpu.matmul %524, %526, %cst_164 {dimension_numbers = #tpu.dot_dimension_numbers<[1], [0], [0], [1], [0, 0, 1, 1], [], []>} : vector<8x256xf32>, vector<256x512xf32>, vector<8x512xf32> -> vector<8x512xf32>
    %528 = vector.broadcast %11 : vector<1x512xf32> to vector<8x512xf32>
    %529 = arith.addf %527, %528 : vector<8x512xf32>
    %530 = vector.extract_strided_slice %529 {offsets = [0, 0], sizes = [8, 128], strides = [1, 1]} : vector<8x512xf32> to vector<8x128xf32>
    %531 = arith.negf %530 : vector<8x128xf32>
    %532 = math.exp %531 : vector<8x128xf32>
    %cst_165 = arith.constant 1.000000e+00 : f32
    %533 = vector.broadcast %cst_165 : f32 to vector<8x128xf32>
    %534 = arith.addf %533, %532 : vector<8x128xf32>
    %535 = arith.divf %533, %534 : vector<8x128xf32>
    %536 = vector.extract_strided_slice %529 {offsets = [0, 128], sizes = [8, 128], strides = [1, 1]} : vector<8x512xf32> to vector<8x128xf32>
    %537 = arith.negf %536 : vector<8x128xf32>
    %538 = math.exp %537 : vector<8x128xf32>
    %cst_166 = arith.constant 1.000000e+00 : f32
    %539 = vector.broadcast %cst_166 : f32 to vector<8x128xf32>
    %540 = arith.addf %539, %538 : vector<8x128xf32>
    %541 = arith.divf %539, %540 : vector<8x128xf32>
    %542 = vector.extract_strided_slice %529 {offsets = [0, 256], sizes = [8, 128], strides = [1, 1]} : vector<8x512xf32> to vector<8x128xf32>
    %543 = vector.extract_strided_slice %529 {offsets = [0, 384], sizes = [8, 128], strides = [1, 1]} : vector<8x512xf32> to vector<8x128xf32>
    %544 = arith.mulf %535, %543 : vector<8x128xf32>
    %545 = arith.addf %542, %544 : vector<8x128xf32>
    %546 = math.tanh %545 : vector<8x128xf32>
    %cst_167 = arith.constant 1.000000e+00 : f32
    %547 = vector.broadcast %cst_167 : f32 to vector<8x128xf32>
    %548 = arith.subf %547, %541 : vector<8x128xf32>
    %549 = arith.mulf %548, %546 : vector<8x128xf32>
    %550 = arith.mulf %541, %483 : vector<8x128xf32>
    %551 = arith.addf %549, %550 : vector<8x128xf32>
    %c56 = arith.constant 56 : index
    %c0_168 = arith.constant 0 : index
    %552 = vector.load %arg13[%c56, %c0_168] : memref<64x128xf32, #tpu.memory_space<vmem>>, vector<8x128xf32>
    tpu.vector_store %arg13[%c56, %c0_168], %551 {strides = array<i32>} : memref<64x128xf32, #tpu.memory_space<vmem>>, vector<8x128xf32>,
    %c0_169 = arith.constant 0 : index
    %c0_170 = arith.constant 0 : index
    %c0_171 = arith.constant 0 : index
    %c0_172 = arith.constant 0 : index
    %553 = vector.load %arg12[%c0_169, %c0_170, %c0_171, %c0_172] : memref<1x2x8x128xf32, #tpu.memory_space<vmem>>, vector<1x1x8x128xf32>
    %554 = vector.shape_cast %553 : vector<1x1x8x128xf32> to vector<8x128xf32>
    %555 = vector.shape_cast %518 : vector<8x128xf32> to vector<1x1x8x128xf32>
    tpu.vector_store %arg12[%c0_169, %c0_170, %c0_171, %c0_172], %555 {strides = array<i32>} : memref<1x2x8x128xf32, #tpu.memory_space<vmem>>, vector<1x1x8x128xf32>,
    %c0_173 = arith.constant 0 : index
    %c1_174 = arith.constant 1 : index
    %c0_175 = arith.constant 0 : index
    %c0_176 = arith.constant 0 : index
    %556 = vector.load %arg12[%c0_173, %c1_174, %c0_175, %c0_176] : memref<1x2x8x128xf32, #tpu.memory_space<vmem>>, vector<1x1x8x128xf32>
    %557 = vector.shape_cast %556 : vector<1x1x8x128xf32> to vector<8x128xf32>
    %558 = vector.shape_cast %551 : vector<8x128xf32> to vector<1x1x8x128xf32>
    tpu.vector_store %arg12[%c0_173, %c1_174, %c0_175, %c0_176], %558 {strides = array<i32>} : memref<1x2x8x128xf32, #tpu.memory_space<vmem>>, vector<1x1x8x128xf32>,
    %c0_177 = arith.constant 0 : index
    %c0_178 = arith.constant 0 : index
    %559 = vector.load %arg13[%c0_177, %c0_178] : memref<64x128xf32, #tpu.memory_space<vmem>>, vector<64x128xf32>
    %c0_179 = arith.constant 0 : index
    %c0_180 = arith.constant 0 : index
    %c0_181 = arith.constant 0 : index
    %560 = vector.load %arg5[%c0_179, %c0_180, %c0_181] : memref<5x128x128xf32, #tpu.memory_space<vmem>>, vector<1x128x128xf32>
    %561 = vector.shape_cast %560 : vector<1x128x128xf32> to vector<128x128xf32>
    %cst_182 = arith.constant dense<0.000000e+00> : vector<64x128xf32>
    %562 = tpu.matmul %559, %561, %cst_182 {dimension_numbers = #tpu.dot_dimension_numbers<[1], [0], [0], [1], [0, 0, 1, 1], [], []>} : vector<64x128xf32>, vector<128x128xf32>, vector<64x128xf32> -> vector<64x128xf32>
    %c0_183 = arith.constant 0 : index
    %c0_184 = arith.constant 0 : index
    %c0_185 = arith.constant 0 : index
    %563 = vector.load %arg6[%c0_183, %c0_184, %c0_185] : memref<5x1x128xf32, #tpu.memory_space<vmem>>, vector<1x1x128xf32>
    %564 = vector.shape_cast %563 : vector<1x1x128xf32> to vector<1x128xf32>
    %565 = vector.broadcast %564 : vector<1x128xf32> to vector<64x128xf32>
    %566 = arith.addf %562, %565 : vector<64x128xf32>
    %cst_186 = arith.constant 0.000000e+00 : f32
    %567 = vector.broadcast %cst_186 : f32 to vector<64x128xf32>
    %568 = arith.cmpf oge, %566, %567 : vector<64x128xf32>
    %cst_187 = arith.constant 0.00999999977 : f32
    %569 = vector.broadcast %cst_187 : f32 to vector<64x128xf32>
    %570 = arith.mulf %569, %566 : vector<64x128xf32>
    %571 = arith.select %568, %566, %570 : vector<64x128xi1>, vector<64x128xf32>
    %cst_188 = arith.constant dense<0.000000e+00> : vector<64xf32>
    %572 = vector.multi_reduction <add>, %571, %cst_188 [1] : vector<64x128xf32> to vector<64xf32>
    %573 = vector.shape_cast %572 : vector<64xf32> to vector<64x1xf32>
    %cst_189 = arith.constant 3.125000e-02 : f32
    %574 = vector.broadcast %cst_189 : f32 to vector<64x1xf32>
    %575 = arith.mulf %573, %574 : vector<64x1xf32>
    %576 = arith.mulf %571, %571 : vector<64x128xf32>
    %cst_190 = arith.constant dense<0.000000e+00> : vector<64xf32>
    %577 = vector.multi_reduction <add>, %576, %cst_190 [1] : vector<64x128xf32> to vector<64xf32>
    %578 = vector.shape_cast %577 : vector<64xf32> to vector<64x1xf32>
    %cst_191 = arith.constant 3.125000e-02 : f32
    %579 = vector.broadcast %cst_191 : f32 to vector<64x1xf32>
    %580 = arith.mulf %578, %579 : vector<64x1xf32>
    %581 = arith.mulf %575, %575 : vector<64x1xf32>
    %582 = arith.subf %580, %581 : vector<64x1xf32>
    %583 = vector.broadcast %575 : vector<64x1xf32> to vector<64x128xf32>
    %584 = arith.subf %571, %583 : vector<64x128xf32>
    %cst_192 = arith.constant 9.99999974E-6 : f32
    %585 = vector.broadcast %cst_192 : f32 to vector<64x1xf32>
    %586 = arith.addf %582, %585 : vector<64x1xf32>
    %587 = math.rsqrt %586 : vector<64x1xf32>
    %588 = vector.broadcast %587 : vector<64x1xf32> to vector<64x128xf32>
    %589 = arith.mulf %584, %588 : vector<64x128xf32>
    %c0_193 = arith.constant 0 : index
    %c0_194 = arith.constant 0 : index
    %c0_195 = arith.constant 0 : index
    %590 = vector.load %arg7[%c0_193, %c0_194, %c0_195] : memref<5x1x128xf32, #tpu.memory_space<vmem>>, vector<1x1x128xf32>
    %591 = vector.shape_cast %590 : vector<1x1x128xf32> to vector<1x128xf32>
    %592 = vector.broadcast %591 : vector<1x128xf32> to vector<64x128xf32>
    %593 = arith.mulf %589, %592 : vector<64x128xf32>
    %c0_196 = arith.constant 0 : index
    %c0_197 = arith.constant 0 : index
    %c0_198 = arith.constant 0 : index
    %594 = vector.load %arg8[%c0_196, %c0_197, %c0_198] : memref<5x1x128xf32, #tpu.memory_space<vmem>>, vector<1x1x128xf32>
    %595 = vector.shape_cast %594 : vector<1x1x128xf32> to vector<1x128xf32>
    %596 = vector.broadcast %595 : vector<1x128xf32> to vector<64x128xf32>
    %597 = arith.addf %593, %596 : vector<64x128xf32>
    %c1_199 = arith.constant 1 : index
    %c0_200 = arith.constant 0 : index
    %c0_201 = arith.constant 0 : index
    %598 = vector.load %arg5[%c1_199, %c0_200, %c0_201] : memref<5x128x128xf32, #tpu.memory_space<vmem>>, vector<1x128x128xf32>
    %599 = vector.shape_cast %598 : vector<1x128x128xf32> to vector<128x128xf32>
    %cst_202 = arith.constant dense<0.000000e+00> : vector<64x128xf32>
    %600 = tpu.matmul %597, %599, %cst_202 {dimension_numbers = #tpu.dot_dimension_numbers<[1], [0], [0], [1], [0, 0, 1, 1], [], []>} : vector<64x128xf32>, vector<128x128xf32>, vector<64x128xf32> -> vector<64x128xf32>
    %c1_203 = arith.constant 1 : index
    %c0_204 = arith.constant 0 : index
    %c0_205 = arith.constant 0 : index
    %601 = vector.load %arg6[%c1_203, %c0_204, %c0_205] : memref<5x1x128xf32, #tpu.memory_space<vmem>>, vector<1x1x128xf32>
    %602 = vector.shape_cast %601 : vector<1x1x128xf32> to vector<1x128xf32>
    %603 = vector.broadcast %602 : vector<1x128xf32> to vector<64x128xf32>
    %604 = arith.addf %600, %603 : vector<64x128xf32>
    %cst_206 = arith.constant 0.000000e+00 : f32
    %605 = vector.broadcast %cst_206 : f32 to vector<64x128xf32>
    %606 = arith.cmpf oge, %604, %605 : vector<64x128xf32>
    %cst_207 = arith.constant 0.00999999977 : f32
    %607 = vector.broadcast %cst_207 : f32 to vector<64x128xf32>
    %608 = arith.mulf %607, %604 : vector<64x128xf32>
    %609 = arith.select %606, %604, %608 : vector<64x128xi1>, vector<64x128xf32>
    %cst_208 = arith.constant dense<0.000000e+00> : vector<64xf32>
    %610 = vector.multi_reduction <add>, %609, %cst_208 [1] : vector<64x128xf32> to vector<64xf32>
    %611 = vector.shape_cast %610 : vector<64xf32> to vector<64x1xf32>
    %cst_209 = arith.constant 3.125000e-02 : f32
    %612 = vector.broadcast %cst_209 : f32 to vector<64x1xf32>
    %613 = arith.mulf %611, %612 : vector<64x1xf32>
    %614 = arith.mulf %609, %609 : vector<64x128xf32>
    %cst_210 = arith.constant dense<0.000000e+00> : vector<64xf32>
    %615 = vector.multi_reduction <add>, %614, %cst_210 [1] : vector<64x128xf32> to vector<64xf32>
    %616 = vector.shape_cast %615 : vector<64xf32> to vector<64x1xf32>
    %cst_211 = arith.constant 3.125000e-02 : f32
    %617 = vector.broadcast %cst_211 : f32 to vector<64x1xf32>
    %618 = arith.mulf %616, %617 : vector<64x1xf32>
    %619 = arith.mulf %613, %613 : vector<64x1xf32>
    %620 = arith.subf %618, %619 : vector<64x1xf32>
    %621 = vector.broadcast %613 : vector<64x1xf32> to vector<64x128xf32>
    %622 = arith.subf %609, %621 : vector<64x128xf32>
    %cst_212 = arith.constant 9.99999974E-6 : f32
    %623 = vector.broadcast %cst_212 : f32 to vector<64x1xf32>
    %624 = arith.addf %620, %623 : vector<64x1xf32>
    %625 = math.rsqrt %624 : vector<64x1xf32>
    %626 = vector.broadcast %625 : vector<64x1xf32> to vector<64x128xf32>
    %627 = arith.mulf %622, %626 : vector<64x128xf32>
    %c1_213 = arith.constant 1 : index
    %c0_214 = arith.constant 0 : index
    %c0_215 = arith.constant 0 : index
    %628 = vector.load %arg7[%c1_213, %c0_214, %c0_215] : memref<5x1x128xf32, #tpu.memory_space<vmem>>, vector<1x1x128xf32>
    %629 = vector.shape_cast %628 : vector<1x1x128xf32> to vector<1x128xf32>
    %630 = vector.broadcast %629 : vector<1x128xf32> to vector<64x128xf32>
    %631 = arith.mulf %627, %630 : vector<64x128xf32>
    %c1_216 = arith.constant 1 : index
    %c0_217 = arith.constant 0 : index
    %c0_218 = arith.constant 0 : index
    %632 = vector.load %arg8[%c1_216, %c0_217, %c0_218] : memref<5x1x128xf32, #tpu.memory_space<vmem>>, vector<1x1x128xf32>
    %633 = vector.shape_cast %632 : vector<1x1x128xf32> to vector<1x128xf32>
    %634 = vector.broadcast %633 : vector<1x128xf32> to vector<64x128xf32>
    %635 = arith.addf %631, %634 : vector<64x128xf32>
    %c2 = arith.constant 2 : index
    %c0_219 = arith.constant 0 : index
    %c0_220 = arith.constant 0 : index
    %636 = vector.load %arg5[%c2, %c0_219, %c0_220] : memref<5x128x128xf32, #tpu.memory_space<vmem>>, vector<1x128x128xf32>
    %637 = vector.shape_cast %636 : vector<1x128x128xf32> to vector<128x128xf32>
    %cst_221 = arith.constant dense<0.000000e+00> : vector<64x128xf32>
    %638 = tpu.matmul %635, %637, %cst_221 {dimension_numbers = #tpu.dot_dimension_numbers<[1], [0], [0], [1], [0, 0, 1, 1], [], []>} : vector<64x128xf32>, vector<128x128xf32>, vector<64x128xf32> -> vector<64x128xf32>
    %c2_222 = arith.constant 2 : index
    %c0_223 = arith.constant 0 : index
    %c0_224 = arith.constant 0 : index
    %639 = vector.load %arg6[%c2_222, %c0_223, %c0_224] : memref<5x1x128xf32, #tpu.memory_space<vmem>>, vector<1x1x128xf32>
    %640 = vector.shape_cast %639 : vector<1x1x128xf32> to vector<1x128xf32>
    %641 = vector.broadcast %640 : vector<1x128xf32> to vector<64x128xf32>
    %642 = arith.addf %638, %641 : vector<64x128xf32>
    %cst_225 = arith.constant 0.000000e+00 : f32
    %643 = vector.broadcast %cst_225 : f32 to vector<64x128xf32>
    %644 = arith.cmpf oge, %642, %643 : vector<64x128xf32>
    %cst_226 = arith.constant 0.00999999977 : f32
    %645 = vector.broadcast %cst_226 : f32 to vector<64x128xf32>
    %646 = arith.mulf %645, %642 : vector<64x128xf32>
    %647 = arith.select %644, %642, %646 : vector<64x128xi1>, vector<64x128xf32>
    %cst_227 = arith.constant dense<0.000000e+00> : vector<64xf32>
    %648 = vector.multi_reduction <add>, %647, %cst_227 [1] : vector<64x128xf32> to vector<64xf32>
    %649 = vector.shape_cast %648 : vector<64xf32> to vector<64x1xf32>
    %cst_228 = arith.constant 3.125000e-02 : f32
    %650 = vector.broadcast %cst_228 : f32 to vector<64x1xf32>
    %651 = arith.mulf %649, %650 : vector<64x1xf32>
    %652 = arith.mulf %647, %647 : vector<64x128xf32>
    %cst_229 = arith.constant dense<0.000000e+00> : vector<64xf32>
    %653 = vector.multi_reduction <add>, %652, %cst_229 [1] : vector<64x128xf32> to vector<64xf32>
    %654 = vector.shape_cast %653 : vector<64xf32> to vector<64x1xf32>
    %cst_230 = arith.constant 3.125000e-02 : f32
    %655 = vector.broadcast %cst_230 : f32 to vector<64x1xf32>
    %656 = arith.mulf %654, %655 : vector<64x1xf32>
    %657 = arith.mulf %651, %651 : vector<64x1xf32>
    %658 = arith.subf %656, %657 : vector<64x1xf32>
    %659 = vector.broadcast %651 : vector<64x1xf32> to vector<64x128xf32>
    %660 = arith.subf %647, %659 : vector<64x128xf32>
    %cst_231 = arith.constant 9.99999974E-6 : f32
    %661 = vector.broadcast %cst_231 : f32 to vector<64x1xf32>
    %662 = arith.addf %658, %661 : vector<64x1xf32>
    %663 = math.rsqrt %662 : vector<64x1xf32>
    %664 = vector.broadcast %663 : vector<64x1xf32> to vector<64x128xf32>
    %665 = arith.mulf %660, %664 : vector<64x128xf32>
    %c2_232 = arith.constant 2 : index
    %c0_233 = arith.constant 0 : index
    %c0_234 = arith.constant 0 : index
    %666 = vector.load %arg7[%c2_232, %c0_233, %c0_234] : memref<5x1x128xf32, #tpu.memory_space<vmem>>, vector<1x1x128xf32>
    %667 = vector.shape_cast %666 : vector<1x1x128xf32> to vector<1x128xf32>
    %668 = vector.broadcast %667 : vector<1x128xf32> to vector<64x128xf32>
    %669 = arith.mulf %665, %668 : vector<64x128xf32>
    %c2_235 = arith.constant 2 : index
    %c0_236 = arith.constant 0 : index
    %c0_237 = arith.constant 0 : index
    %670 = vector.load %arg8[%c2_235, %c0_236, %c0_237] : memref<5x1x128xf32, #tpu.memory_space<vmem>>, vector<1x1x128xf32>
    %671 = vector.shape_cast %670 : vector<1x1x128xf32> to vector<1x128xf32>
    %672 = vector.broadcast %671 : vector<1x128xf32> to vector<64x128xf32>
    %673 = arith.addf %669, %672 : vector<64x128xf32>
    %c3 = arith.constant 3 : index
    %c0_238 = arith.constant 0 : index
    %c0_239 = arith.constant 0 : index
    %674 = vector.load %arg5[%c3, %c0_238, %c0_239] : memref<5x128x128xf32, #tpu.memory_space<vmem>>, vector<1x128x128xf32>
    %675 = vector.shape_cast %674 : vector<1x128x128xf32> to vector<128x128xf32>
    %cst_240 = arith.constant dense<0.000000e+00> : vector<64x128xf32>
    %676 = tpu.matmul %673, %675, %cst_240 {dimension_numbers = #tpu.dot_dimension_numbers<[1], [0], [0], [1], [0, 0, 1, 1], [], []>} : vector<64x128xf32>, vector<128x128xf32>, vector<64x128xf32> -> vector<64x128xf32>
    %c3_241 = arith.constant 3 : index
    %c0_242 = arith.constant 0 : index
    %c0_243 = arith.constant 0 : index
    %677 = vector.load %arg6[%c3_241, %c0_242, %c0_243] : memref<5x1x128xf32, #tpu.memory_space<vmem>>, vector<1x1x128xf32>
    %678 = vector.shape_cast %677 : vector<1x1x128xf32> to vector<1x128xf32>
    %679 = vector.broadcast %678 : vector<1x128xf32> to vector<64x128xf32>
    %680 = arith.addf %676, %679 : vector<64x128xf32>
    %cst_244 = arith.constant 0.000000e+00 : f32
    %681 = vector.broadcast %cst_244 : f32 to vector<64x128xf32>
    %682 = arith.cmpf oge, %680, %681 : vector<64x128xf32>
    %cst_245 = arith.constant 0.00999999977 : f32
    %683 = vector.broadcast %cst_245 : f32 to vector<64x128xf32>
    %684 = arith.mulf %683, %680 : vector<64x128xf32>
    %685 = arith.select %682, %680, %684 : vector<64x128xi1>, vector<64x128xf32>
    %cst_246 = arith.constant dense<0.000000e+00> : vector<64xf32>
    %686 = vector.multi_reduction <add>, %685, %cst_246 [1] : vector<64x128xf32> to vector<64xf32>
    %687 = vector.shape_cast %686 : vector<64xf32> to vector<64x1xf32>
    %cst_247 = arith.constant 3.125000e-02 : f32
    %688 = vector.broadcast %cst_247 : f32 to vector<64x1xf32>
    %689 = arith.mulf %687, %688 : vector<64x1xf32>
    %690 = arith.mulf %685, %685 : vector<64x128xf32>
    %cst_248 = arith.constant dense<0.000000e+00> : vector<64xf32>
    %691 = vector.multi_reduction <add>, %690, %cst_248 [1] : vector<64x128xf32> to vector<64xf32>
    %692 = vector.shape_cast %691 : vector<64xf32> to vector<64x1xf32>
    %cst_249 = arith.constant 3.125000e-02 : f32
    %693 = vector.broadcast %cst_249 : f32 to vector<64x1xf32>
    %694 = arith.mulf %692, %693 : vector<64x1xf32>
    %695 = arith.mulf %689, %689 : vector<64x1xf32>
    %696 = arith.subf %694, %695 : vector<64x1xf32>
    %697 = vector.broadcast %689 : vector<64x1xf32> to vector<64x128xf32>
    %698 = arith.subf %685, %697 : vector<64x128xf32>
    %cst_250 = arith.constant 9.99999974E-6 : f32
    %699 = vector.broadcast %cst_250 : f32 to vector<64x1xf32>
    %700 = arith.addf %696, %699 : vector<64x1xf32>
    %701 = math.rsqrt %700 : vector<64x1xf32>
    %702 = vector.broadcast %701 : vector<64x1xf32> to vector<64x128xf32>
    %703 = arith.mulf %698, %702 : vector<64x128xf32>
    %c3_251 = arith.constant 3 : index
    %c0_252 = arith.constant 0 : index
    %c0_253 = arith.constant 0 : index
    %704 = vector.load %arg7[%c3_251, %c0_252, %c0_253] : memref<5x1x128xf32, #tpu.memory_space<vmem>>, vector<1x1x128xf32>
    %705 = vector.shape_cast %704 : vector<1x1x128xf32> to vector<1x128xf32>
    %706 = vector.broadcast %705 : vector<1x128xf32> to vector<64x128xf32>
    %707 = arith.mulf %703, %706 : vector<64x128xf32>
    %c3_254 = arith.constant 3 : index
    %c0_255 = arith.constant 0 : index
    %c0_256 = arith.constant 0 : index
    %708 = vector.load %arg8[%c3_254, %c0_255, %c0_256] : memref<5x1x128xf32, #tpu.memory_space<vmem>>, vector<1x1x128xf32>
    %709 = vector.shape_cast %708 : vector<1x1x128xf32> to vector<1x128xf32>
    %710 = vector.broadcast %709 : vector<1x128xf32> to vector<64x128xf32>
    %711 = arith.addf %707, %710 : vector<64x128xf32>
    %c4 = arith.constant 4 : index
    %c0_257 = arith.constant 0 : index
    %c0_258 = arith.constant 0 : index
    %712 = vector.load %arg5[%c4, %c0_257, %c0_258] : memref<5x128x128xf32, #tpu.memory_space<vmem>>, vector<1x128x128xf32>
    %713 = vector.shape_cast %712 : vector<1x128x128xf32> to vector<128x128xf32>
    %cst_259 = arith.constant dense<0.000000e+00> : vector<64x128xf32>
    %714 = tpu.matmul %711, %713, %cst_259 {dimension_numbers = #tpu.dot_dimension_numbers<[1], [0], [0], [1], [0, 0, 1, 1], [], []>} : vector<64x128xf32>, vector<128x128xf32>, vector<64x128xf32> -> vector<64x128xf32>
    %c4_260 = arith.constant 4 : index
    %c0_261 = arith.constant 0 : index
    %c0_262 = arith.constant 0 : index
    %715 = vector.load %arg6[%c4_260, %c0_261, %c0_262] : memref<5x1x128xf32, #tpu.memory_space<vmem>>, vector<1x1x128xf32>
    %716 = vector.shape_cast %715 : vector<1x1x128xf32> to vector<1x128xf32>
    %717 = vector.broadcast %716 : vector<1x128xf32> to vector<64x128xf32>
    %718 = arith.addf %714, %717 : vector<64x128xf32>
    %cst_263 = arith.constant 0.000000e+00 : f32
    %719 = vector.broadcast %cst_263 : f32 to vector<64x128xf32>
    %720 = arith.cmpf oge, %718, %719 : vector<64x128xf32>
    %cst_264 = arith.constant 0.00999999977 : f32
    %721 = vector.broadcast %cst_264 : f32 to vector<64x128xf32>
    %722 = arith.mulf %721, %718 : vector<64x128xf32>
    %723 = arith.select %720, %718, %722 : vector<64x128xi1>, vector<64x128xf32>
    %cst_265 = arith.constant dense<0.000000e+00> : vector<64xf32>
    %724 = vector.multi_reduction <add>, %723, %cst_265 [1] : vector<64x128xf32> to vector<64xf32>
    %725 = vector.shape_cast %724 : vector<64xf32> to vector<64x1xf32>
    %cst_266 = arith.constant 3.125000e-02 : f32
    %726 = vector.broadcast %cst_266 : f32 to vector<64x1xf32>
    %727 = arith.mulf %725, %726 : vector<64x1xf32>
    %728 = arith.mulf %723, %723 : vector<64x128xf32>
    %cst_267 = arith.constant dense<0.000000e+00> : vector<64xf32>
    %729 = vector.multi_reduction <add>, %728, %cst_267 [1] : vector<64x128xf32> to vector<64xf32>
    %730 = vector.shape_cast %729 : vector<64xf32> to vector<64x1xf32>
    %cst_268 = arith.constant 3.125000e-02 : f32
    %731 = vector.broadcast %cst_268 : f32 to vector<64x1xf32>
    %732 = arith.mulf %730, %731 : vector<64x1xf32>
    %733 = arith.mulf %727, %727 : vector<64x1xf32>
    %734 = arith.subf %732, %733 : vector<64x1xf32>
    %735 = vector.broadcast %727 : vector<64x1xf32> to vector<64x128xf32>
    %736 = arith.subf %723, %735 : vector<64x128xf32>
    %cst_269 = arith.constant 9.99999974E-6 : f32
    %737 = vector.broadcast %cst_269 : f32 to vector<64x1xf32>
    %738 = arith.addf %734, %737 : vector<64x1xf32>
    %739 = math.rsqrt %738 : vector<64x1xf32>
    %740 = vector.broadcast %739 : vector<64x1xf32> to vector<64x128xf32>
    %741 = arith.mulf %736, %740 : vector<64x128xf32>
    %c4_270 = arith.constant 4 : index
    %c0_271 = arith.constant 0 : index
    %c0_272 = arith.constant 0 : index
    %742 = vector.load %arg7[%c4_270, %c0_271, %c0_272] : memref<5x1x128xf32, #tpu.memory_space<vmem>>, vector<1x1x128xf32>
    %743 = vector.shape_cast %742 : vector<1x1x128xf32> to vector<1x128xf32>
    %744 = vector.broadcast %743 : vector<1x128xf32> to vector<64x128xf32>
    %745 = arith.mulf %741, %744 : vector<64x128xf32>
    %c4_273 = arith.constant 4 : index
    %c0_274 = arith.constant 0 : index
    %c0_275 = arith.constant 0 : index
    %746 = vector.load %arg8[%c4_273, %c0_274, %c0_275] : memref<5x1x128xf32, #tpu.memory_space<vmem>>, vector<1x1x128xf32>
    %747 = vector.shape_cast %746 : vector<1x1x128xf32> to vector<1x128xf32>
    %748 = vector.broadcast %747 : vector<1x128xf32> to vector<64x128xf32>
    %749 = arith.addf %745, %748 : vector<64x128xf32>
    %750 = arith.addf %559, %749 : vector<64x128xf32>
    %c0_276 = arith.constant 0 : index
    %c0_277 = arith.constant 0 : index
    %751 = vector.load %arg9[%c0_276, %c0_277] : memref<128x128xf32, #tpu.memory_space<vmem>>, vector<128x128xf32>
    %cst_278 = arith.constant dense<0.000000e+00> : vector<64x128xf32>
    %752 = tpu.matmul %750, %751, %cst_278 {dimension_numbers = #tpu.dot_dimension_numbers<[1], [0], [0], [1], [0, 0, 1, 1], [], []>} : vector<64x128xf32>, vector<128x128xf32>, vector<64x128xf32> -> vector<64x128xf32>
    %c0_279 = arith.constant 0 : index
    %c0_280 = arith.constant 0 : index
    %753 = vector.load %arg10[%c0_279, %c0_280] : memref<1x128xf32, #tpu.memory_space<vmem>>, vector<1x128xf32>
    %754 = vector.broadcast %753 : vector<1x128xf32> to vector<64x128xf32>
    %755 = arith.addf %752, %754 : vector<64x128xf32>
    %c0_281 = arith.constant 0 : index
    %c0_282 = arith.constant 0 : index
    %c0_283 = arith.constant 0 : index
    %756 = vector.load %arg11[%c0_281, %c0_282, %c0_283] : memref<1x64x128xf32, #tpu.memory_space<vmem>>, vector<1x64x128xf32>
    %757 = vector.shape_cast %756 : vector<1x64x128xf32> to vector<64x128xf32>
    %758 = vector.shape_cast %755 : vector<64x128xf32> to vector<1x64x128xf32>
    tpu.vector_store %arg11[%c0_281, %c0_282, %c0_283], %758 {strides = array<i32>} : memref<1x64x128xf32, #tpu.memory_space<vmem>>, vector<1x64x128xf32>,
    return
  }
  func.func @transform_0(%arg0: i32) -> (i32, i32, i32) {
    %c0_i32 = arith.constant 0 : i32
    %c0_i32_0 = arith.constant 0 : i32
    %c0_i32_1 = arith.constant 0 : i32
    return %arg0, %c0_i32, %c0_i32_0 : i32, i32, i32
  }
  func.func @transform_1(%arg0: i32) -> (i32, i32, i32, i32) {
    %c0_i32 = arith.constant 0 : i32
    %c0_i32_0 = arith.constant 0 : i32
    %c0_i32_1 = arith.constant 0 : i32
    %c0_i32_2 = arith.constant 0 : i32
    return %arg0, %c0_i32, %c0_i32_0, %c0_i32_1 : i32, i32, i32, i32
  }
  func.func @transform_2(%arg0: i32) -> (i32, i32, i32) {
    %c0_i32 = arith.constant 0 : i32
    %c0_i32_0 = arith.constant 0 : i32
    %c0_i32_1 = arith.constant 0 : i32
    %c0_i32_2 = arith.constant 0 : i32
    return %c0_i32, %c0_i32_0, %c0_i32_1 : i32, i32, i32
  }
  func.func @transform_3(%arg0: i32) -> (i32, i32, i32) {
    %c0_i32 = arith.constant 0 : i32
    %c0_i32_0 = arith.constant 0 : i32
    %c0_i32_1 = arith.constant 0 : i32
    %c0_i32_2 = arith.constant 0 : i32
    return %c0_i32, %c0_i32_0, %c0_i32_1 : i32, i32, i32
  }
  func.func @transform_4(%arg0: i32) -> (i32, i32, i32) {
    %c0_i32 = arith.constant 0 : i32
    %c0_i32_0 = arith.constant 0 : i32
    %c0_i32_1 = arith.constant 0 : i32
    %c0_i32_2 = arith.constant 0 : i32
    return %c0_i32, %c0_i32_0, %c0_i32_1 : i32, i32, i32
  }
  func.func @transform_5(%arg0: i32) -> (i32, i32, i32) {
    %c0_i32 = arith.constant 0 : i32
    %c0_i32_0 = arith.constant 0 : i32
    %c0_i32_1 = arith.constant 0 : i32
    %c0_i32_2 = arith.constant 0 : i32
    return %c0_i32, %c0_i32_0, %c0_i32_1 : i32, i32, i32
  }
  func.func @transform_6(%arg0: i32) -> (i32, i32, i32) {
    %c0_i32 = arith.constant 0 : i32
    %c0_i32_0 = arith.constant 0 : i32
    %c0_i32_1 = arith.constant 0 : i32
    %c0_i32_2 = arith.constant 0 : i32
    return %c0_i32, %c0_i32_0, %c0_i32_1 : i32, i32, i32
  }
  func.func @transform_7(%arg0: i32) -> (i32, i32, i32) {
    %c0_i32 = arith.constant 0 : i32
    %c0_i32_0 = arith.constant 0 : i32
    %c0_i32_1 = arith.constant 0 : i32
    %c0_i32_2 = arith.constant 0 : i32
    return %c0_i32, %c0_i32_0, %c0_i32_1 : i32, i32, i32
  }
  func.func @transform_8(%arg0: i32) -> (i32, i32) {
    %c0_i32 = arith.constant 0 : i32
    %c0_i32_0 = arith.constant 0 : i32
    %c0_i32_1 = arith.constant 0 : i32
    return %c0_i32, %c0_i32_0 : i32, i32
  }
  func.func @transform_9(%arg0: i32) -> (i32, i32) {
    %c0_i32 = arith.constant 0 : i32
    %c0_i32_0 = arith.constant 0 : i32
    %c0_i32_1 = arith.constant 0 : i32
    return %c0_i32, %c0_i32_0 : i32, i32
  }
  func.func @transform_10(%arg0: i32) -> (i32, i32, i32) {
    %c0_i32 = arith.constant 0 : i32
    %c0_i32_0 = arith.constant 0 : i32
    %c0_i32_1 = arith.constant 0 : i32
    return %arg0, %c0_i32, %c0_i32_0 : i32, i32, i32
  }
  func.func @transform_11(%arg0: i32) -> (i32, i32, i32, i32) {
    %c0_i32 = arith.constant 0 : i32
    %c0_i32_0 = arith.constant 0 : i32
    %c0_i32_1 = arith.constant 0 : i32
    %c0_i32_2 = arith.constant 0 : i32
    return %arg0, %c0_i32, %c0_i32_0, %c0_i32_1 : i32, i32, i32, i32
  }
}

</mosaic_0001>

<bundles_post_ra>
// kernel: rnn_forward.1
= control target key start
LH: loop header
LB: loop body
LE: loop exit
PB: predicated region body
PF: predicated region fallthrough
CT: control target
= control target key end

     0   :  { %v14896_v3 = vmov 0.0   ;;  %s14884_s2 = inlined_call_operand.vmem [shape: f32[2,256,512], index: 2, kind: input, shape index: {}]   ;;  %s14885_s0 = inlined_call_operand.vmem [shape: f32[1,64,128], index: 0, kind: input, shape index: {}]   ;;  %s14886_s1 = inlined_call_operand.vmem [shape: f32[1,2,8,128], index: 1, kind: input, shape index: {}]   ;;  %s14887_s3 = inlined_call_operand.vmem [shape: f32[2,1,512], index: 3, kind: input, shape index: {}]   ;;  %s14888_s4 = inlined_call_operand.vmem [shape: f32[5,128,128], index: 4, kind: input, shape index: {}]   ;;  %s14889_s11 = inlined_call_operand.vmem [shape: f32[1,2,8,128], index: 11, kind: output, shape index: {1}]   ;;  %s14890_s5 = inlined_call_operand.vmem [shape: f32[5,1,128], index: 5, kind: input, shape index: {}]   ;;  %s14891_s6 = inlined_call_operand.vmem [shape: f32[5,1,128], index: 6, kind: input, shape index: {}]   ;;  %s14892_s7 = inlined_call_operand.vmem [shape: f32[5,1,128], index: 7, kind: input, shape index: {}]   ;;  %s14893_s8 = inlined_call_operand.vmem [shape: f32[128,128], index: 8, kind: input, shape index: {}]   ;;  %s14894_s9 = inlined_call_operand.vmem [shape: f32[1,128], index: 9, kind: input, shape index: {}]   ;;  %s14895_s10 = inlined_call_operand.vmem [shape: f32[1,64,128], index: 10, kind: output, shape index: {0}]  }
   0x1   :  { %v46_v0 = vld [vmem:[%s14884_s2 + $0x8] sm:$0xff]  ;;  %v48_v2 = vld [vmem:[%s14884_s2 + $0x18] sm:$0xff]  ;;  %195 = vmatprep.mubr.f32.mxu0 %v14896_v3  ;;  %308 = vmatprep.mubr.f32.mxu1 %v14896_v3  ;;  %v45_v6 = vld [vmem:[%s14884_s2] sm:$0xff] }
   0x2   :  { %v50_v1 = vld [vmem:[%s14884_s2 + $0x28] sm:$0xff]  ;;  %v52_v5 = vld [vmem:[%s14884_s2 + $0x38] sm:$0xff]  ;;  %v49_v7 = vld [vmem:[%s14884_s2 + $0x20] sm:$0xff] }
   0x3   :  { %v7722_v4 = vpack.c.bf16 %v50_v1, %v46_v0  ;;  %v7754_v8 = vpack.c.bf16 %v52_v5, %v48_v2  ;;  %v7724_v9 = vpack.c.bf16 %v49_v7, %v45_v6  ;;  %v47_v10 = vld [vmem:[%s14884_s2 + $0x10] sm:$0xff]  ;;  %v54_v12 = vld [vmem:[%s14884_s2 + $0x48] sm:$0xff]  ;;  %v56_v15 = vld [vmem:[%s14884_s2 + $0x58] sm:$0xff] }
   0x4   :  { %v51_v11 = vld [vmem:[%s14884_s2 + $0x30] sm:$0xff]  ;;  %v58_v14 = vld [vmem:[%s14884_s2 + $0x68] sm:$0xff]  ;;  %v60_v16 = vld [vmem:[%s14884_s2 + $0x78] sm:$0xff] }
   0x5   :  { %7723 = vmatprep.subr.bf16.mxu0 %v7722_v4  ;;  %v7756_v13 = vpack.c.bf16 %v51_v11, %v47_v10  ;;  %7755 = vmatprep.subr.bf16.mxu1 %v7754_v8  ;;  %v7726_v17 = vpack.c.bf16 %v58_v14, %v54_v12  ;;  %v7758_v18 = vpack.c.bf16 %v60_v16, %v56_v15  ;;  %v53_v19 = vld [vmem:[%s14884_s2 + $0x40] sm:$0xff]  ;;  %v55_v21 = vld [vmem:[%s14884_s2 + $0x50] sm:$0xff]  ;;  %v62_v24 = vld [vmem:[%s14884_s2 + $0x88] sm:$0xff] }
   0x6   :  { %7725 = vmatpush1.bf16.msra.mxu0 %v7724_v9  ;;  %v57_v20 = vld [vmem:[%s14884_s2 + $0x60] sm:$0xff]  ;;  %v59_v23 = vld [vmem:[%s14884_s2 + $0x70] sm:$0xff]  ;;  %v66_v25 = vld [vmem:[%s14884_s2 + $0xa8] sm:$0xff] }
   0x7   :  { %7757 = vmatpush1.bf16.msra.mxu1 %v7756_v13  ;;  %v7728_v22 = vpack.c.bf16 %v57_v20, %v53_v19  ;;  %7727 = vmatprep.subr.bf16.mxu0 %v7726_v17  ;;  %v7760_v26 = vpack.c.bf16 %v59_v23, %v55_v21  ;;  %v7730_v27 = vpack.c.bf16 %v66_v25, %v62_v24  ;;  %v64_v28 = vld [vmem:[%s14884_s2 + $0x98] sm:$0xff]  ;;  %v61_v30 = vld [vmem:[%s14884_s2 + $0x80] sm:$0xff]  ;;  %v63_v33 = vld [vmem:[%s14884_s2 + $0x90] sm:$0xff] }
   0x8   :  { %7759 = vmatprep.subr.bf16.mxu1 %v7758_v18  ;;  %v68_v29 = vld [vmem:[%s14884_s2 + $0xb8] sm:$0xff]  ;;  %v65_v32 = vld [vmem:[%s14884_s2 + $0xa0] sm:$0xff]  ;;  %v67_v34 = vld [vmem:[%s14884_s2 + $0xb0] sm:$0xff] }
   0x9   :  { %v7762_v31 = vpack.c.bf16 %v68_v29, %v64_v28  ;;  %v7732_v35 = vpack.c.bf16 %v65_v32, %v61_v30  ;;  %v70_v36 = vld [vmem:[%s14884_s2 + $0xc8] sm:$0xff]  ;;  %v72_v38 = vld [vmem:[%s14884_s2 + $0xd8] sm:$0xff]  ;;  %v7764_v39 = vpack.c.bf16 %v67_v34, %v63_v33  ;;  %v69_v42 = vld [vmem:[%s14884_s2 + $0xc0] sm:$0xff] }
   0xa   :  { %7729 = vmatpush1.bf16.msra.mxu0 %v7728_v22  ;;  %v74_v37 = vld [vmem:[%s14884_s2 + $0xe8] sm:$0xff]  ;;  %v76_v41 = vld [vmem:[%s14884_s2 + $0xf8] sm:$0xff]  ;;  %v73_v43 = vld [vmem:[%s14884_s2 + $0xe0] sm:$0xff] }
   0xb   :  { %7761 = vmatpush1.bf16.msra.mxu1 %v7760_v26  ;;  %7731 = vmatprep.subr.bf16.mxu0 %v7730_v27  ;;  %v7734_v40 = vpack.c.bf16 %v74_v37, %v70_v36  ;;  %v7766_v44 = vpack.c.bf16 %v76_v41, %v72_v38  ;;  %v71_v45 = vld [vmem:[%s14884_s2 + $0xd0] sm:$0xff]  ;;  %v78_v47 = vld [vmem:[%s14884_s2 + $0x108] sm:$0xff]  ;;  %v80_v49 = vld [vmem:[%s14884_s2 + $0x118] sm:$0xff]  ;;  %v7736_v51 = vpack.c.bf16 %v73_v43, %v69_v42 }
   0xc   :  { %7763 = vmatprep.subr.bf16.mxu1 %v7762_v31  ;;  %v75_v46 = vld [vmem:[%s14884_s2 + $0xf0] sm:$0xff]  ;;  %v82_v48 = vld [vmem:[%s14884_s2 + $0x128] sm:$0xff]  ;;  %v84_v50 = vld [vmem:[%s14884_s2 + $0x138] sm:$0xff] }
   0xd   :  { %v7768_v52 = vpack.c.bf16 %v75_v46, %v71_v45  ;;  %v7738_v53 = vpack.c.bf16 %v82_v48, %v78_v47  ;;  %v77_v54 = vld [vmem:[%s14884_s2 + $0x100] sm:$0xff]  ;;  %v79_v56 = vld [vmem:[%s14884_s2 + $0x110] sm:$0xff]  ;;  %v7770_v57 = vpack.c.bf16 %v84_v50, %v80_v49  ;;  %v86_v59 = vld [vmem:[%s14884_s2 + $0x148] sm:$0xff] }
   0xe   :  { %7733 = vmatpush1.bf16.msra.mxu0 %v7732_v35  ;;  %v81_v55 = vld [vmem:[%s14884_s2 + $0x120] sm:$0xff]  ;;  %v83_v58 = vld [vmem:[%s14884_s2 + $0x130] sm:$0xff]  ;;  %v90_v60 = vld [vmem:[%s14884_s2 + $0x168] sm:$0xff] }
   0xf   :  { %7765 = vmatpush1.bf16.msra.mxu1 %v7764_v39  ;;  %7735 = vmatprep.subr.bf16.mxu0 %v7734_v40  ;;  %v88_v61 = vld [vmem:[%s14884_s2 + $0x158] sm:$0xff]  ;;  %v7740_v63 = vpack.c.bf16 %v81_v55, %v77_v54  ;;  %v7772_v0 = vpack.c.bf16 %v83_v58, %v79_v56  ;;  %v7742_v1 = vpack.c.bf16 %v90_v60, %v86_v59  ;;  %v85_v2 = vld [vmem:[%s14884_s2 + $0x140] sm:$0xff]  ;;  %v87_v5 = vld [vmem:[%s14884_s2 + $0x150] sm:$0xff] }
  0x10   :  { %7767 = vmatprep.subr.bf16.mxu1 %v7766_v44  ;;  %v92_v62 = vld [vmem:[%s14884_s2 + $0x178] sm:$0xff]  ;;  %v89_v4 = vld [vmem:[%s14884_s2 + $0x160] sm:$0xff]  ;;  %v91_v7 = vld [vmem:[%s14884_s2 + $0x170] sm:$0xff] }
  0x11   :  { %v7774_v6 = vpack.c.bf16 %v92_v62, %v88_v61  ;;  %v94_v8 = vld [vmem:[%s14884_s2 + $0x188] sm:$0xff]  ;;  %v96_v10 = vld [vmem:[%s14884_s2 + $0x198] sm:$0xff]  ;;  %v7744_v12 = vpack.c.bf16 %v89_v4, %v85_v2  ;;  %v7776_v13 = vpack.c.bf16 %v91_v7, %v87_v5  ;;  %v93_v15 = vld [vmem:[%s14884_s2 + $0x180] sm:$0xff] }
  0x12   :  { %7737 = vmatpush1.bf16.msra.mxu0 %v7736_v51  ;;  %v98_v9 = vld [vmem:[%s14884_s2 + $0x1a8] sm:$0xff]  ;;  %v100_v11 = vld [vmem:[%s14884_s2 + $0x1b8] sm:$0xff]  ;;  %v97_v16 = vld [vmem:[%s14884_s2 + $0x1a0] sm:$0xff] }
  0x13   :  { %7769 = vmatpush1.bf16.msra.mxu1 %v7768_v52  ;;  %7739 = vmatprep.subr.bf16.mxu0 %v7738_v53  ;;  %v7746_v14 = vpack.c.bf16 %v98_v9, %v94_v8  ;;  %v95_v17 = vld [vmem:[%s14884_s2 + $0x190] sm:$0xff]  ;;  %v7778_v18 = vpack.c.bf16 %v100_v11, %v96_v10  ;;  %v102_v20 = vld [vmem:[%s14884_s2 + $0x1c8] sm:$0xff]  ;;  %v104_v22 = vld [vmem:[%s14884_s2 + $0x1d8] sm:$0xff]  ;;  %v7748_v24 = vpack.c.bf16 %v97_v16, %v93_v15 }
  0x14   :  { %7771 = vmatprep.subr.bf16.mxu1 %v7770_v57  ;;  %v99_v19 = vld [vmem:[%s14884_s2 + $0x1b0] sm:$0xff]  ;;  %v106_v21 = vld [vmem:[%s14884_s2 + $0x1e8] sm:$0xff]  ;;  %v108_v23 = vld [vmem:[%s14884_s2 + $0x1f8] sm:$0xff] }
  0x15   :  { %v7780_v25 = vpack.c.bf16 %v99_v19, %v95_v17  ;;  %v7750_v26 = vpack.c.bf16 %v106_v21, %v102_v20  ;;  %v101_v27 = vld [vmem:[%s14884_s2 + $0x1c0] sm:$0xff]  ;;  %v103_v29 = vld [vmem:[%s14884_s2 + $0x1d0] sm:$0xff]  ;;  %v7782_v30 = vpack.c.bf16 %v108_v23, %v104_v22  ;;  %v397_v32 = vld [vmem:[%s14884_s2 + $0x208] sm:$0xff] }
  0x16   :  { %7741 = vmatpush1.bf16.msra.mxu0 %v7740_v63  ;;  %v105_v28 = vld [vmem:[%s14884_s2 + $0x1e0] sm:$0xff]  ;;  %v107_v31 = vld [vmem:[%s14884_s2 + $0x1f0] sm:$0xff]  ;;  %v401_v33 = vld [vmem:[%s14884_s2 + $0x228] sm:$0xff] }
  0x17   :  { %7773 = vmatpush1.bf16.msra.mxu1 %v7772_v0  ;;  %7743 = vmatprep.subr.bf16.mxu0 %v7742_v1  ;;  %v399_v34 = vld [vmem:[%s14884_s2 + $0x218] sm:$0xff]  ;;  %v7752_v36 = vpack.c.bf16 %v105_v28, %v101_v27  ;;  %v7784_v37 = vpack.c.bf16 %v107_v31, %v103_v29  ;;  %v10055_v38 = vpack.c.bf16 %v401_v33, %v397_v32  ;;  %v396_v39 = vld [vmem:[%s14884_s2 + $0x200] sm:$0xff]  ;;  %v398_v42 = vld [vmem:[%s14884_s2 + $0x210] sm:$0xff] }
  0x18   :  { %7775 = vmatprep.subr.bf16.mxu1 %v7774_v6  ;;  %v403_v35 = vld [vmem:[%s14884_s2 + $0x238] sm:$0xff]  ;;  %v400_v40 = vld [vmem:[%s14884_s2 + $0x220] sm:$0xff]  ;;  %v402_v43 = vld [vmem:[%s14884_s2 + $0x230] sm:$0xff] }
  0x19   :  { %v10063_v41 = vpack.c.bf16 %v403_v35, %v399_v34  ;;  %v405_v44 = vld [vmem:[%s14884_s2 + $0x248] sm:$0xff]  ;;  %v37_v46 = vld [vmem:[%s14885_s0] sm:$0xff]  ;;  %v10080_v47 = vpack.c.bf16 %v400_v40, %v396_v39  ;;  %v407_v48 = vld [vmem:[%s14884_s2 + $0x258] sm:$0xff]  ;;  %v10089_v50 = vpack.c.bf16 %v402_v43, %v398_v42 }
  0x1a   :  { %7745 = vmatpush1.bf16.msra.mxu0 %v7744_v12  ;;  %v409_v45 = vld [vmem:[%s14884_s2 + $0x268] sm:$0xff]  ;;  %v411_v49 = vld [vmem:[%s14884_s2 + $0x278] sm:$0xff]  ;;  %v404_v51 = vld [vmem:[%s14884_s2 + $0x240] sm:$0xff] }
  0x1b   :  { %7777 = vmatpush1.bf16.msra.mxu1 %v7776_v13  ;;  %7747 = vmatprep.subr.bf16.mxu0 %v7746_v14  ;;  %v408_v52 = vld [vmem:[%s14884_s2 + $0x260] sm:$0xff]  ;;  %v10098_v53 = vpack.c.bf16 %v409_v45, %v405_v44  ;;  %v406_v54 = vld [vmem:[%s14884_s2 + $0x250] sm:$0xff]  ;;  %v10106_v56 = vpack.c.bf16 %v411_v49, %v407_v48  ;;  %v413_v57 = vld [vmem:[%s14884_s2 + $0x288] sm:$0xff] }
  0x1c   :  { %7779 = vmatprep.subr.bf16.mxu1 %v7778_v18  ;;  %v410_v55 = vld [vmem:[%s14884_s2 + $0x270] sm:$0xff]  ;;  %v417_v58 = vld [vmem:[%s14884_s2 + $0x2a8] sm:$0xff]  ;;  %v10118_v60 = vpack.c.bf16 %v408_v52, %v404_v51  ;;  %v415_v61 = vld [vmem:[%s14884_s2 + $0x298] sm:$0xff] }
  0x1d   :  { %v38_v59 = vld [vmem:[%s14885_s0 + $0x8] sm:$0xff]  ;;  %v419_v62 = vld [vmem:[%s14884_s2 + $0x2b8] sm:$0xff]  ;;  %v10128_v63 = vpack.c.bf16 %v410_v55, %v406_v54  ;;  %v412_v0 = vld [vmem:[%s14884_s2 + $0x280] sm:$0xff]  ;;  %v10138_v2 = vpack.c.bf16 %v417_v58, %v413_v57 }
  0x1e   :  { %7749 = vmatpush1.bf16.msra.mxu0 %v7748_v24  ;;  %v416_v1 = vld [vmem:[%s14884_s2 + $0x2a0] sm:$0xff]  ;;  %v414_v4 = vld [vmem:[%s14884_s2 + $0x290] sm:$0xff]  ;;  %v10147_v6 = vpack.c.bf16 %v419_v62, %v415_v61  ;;  %v421_v7 = vld [vmem:[%s14884_s2 + $0x2c8] sm:$0xff] }
  0x1f   :  { %7781 = vmatpush1.bf16.msra.mxu1 %v7780_v25  ;;  %7751 = vmatprep.subr.bf16.mxu0 %v7750_v26  ;;  %v418_v5 = vld [vmem:[%s14884_s2 + $0x2b0] sm:$0xff]  ;;  %v425_v8 = vld [vmem:[%s14884_s2 + $0x2e8] sm:$0xff]  ;;  %v10159_v10 = vpack.c.bf16 %v416_v1, %v412_v0  ;;  %v423_v11 = vld [vmem:[%s14884_s2 + $0x2d8] sm:$0xff] }
  0x20   :  { %7783 = vmatprep.subr.bf16.mxu1 %v7782_v30  ;;  %v39_v9 = vld [vmem:[%s14885_s0 + $0x10] sm:$0xff]  ;;  %v427_v12 = vld [vmem:[%s14884_s2 + $0x2f8] sm:$0xff]  ;;  %v10169_v13 = vpack.c.bf16 %v418_v5, %v414_v4  ;;  %v420_v14 = vld [vmem:[%s14884_s2 + $0x2c0] sm:$0xff]  ;;  %v10179_v16 = vpack.c.bf16 %v425_v8, %v421_v7 }
  0x21   :  { %v424_v15 = vld [vmem:[%s14884_s2 + $0x2e0] sm:$0xff]  ;;  %v422_v17 = vld [vmem:[%s14884_s2 + $0x2d0] sm:$0xff]  ;;  %v10188_v19 = vpack.c.bf16 %v427_v12, %v423_v11  ;;  %v429_v20 = vld [vmem:[%s14884_s2 + $0x308] sm:$0xff] }
  0x22   :  { %7753 = vmatpush1.bf16.msra.mxu0 %v7752_v36  ;;  %v426_v18 = vld [vmem:[%s14884_s2 + $0x2f0] sm:$0xff]  ;;  %v433_v21 = vld [vmem:[%s14884_s2 + $0x328] sm:$0xff]  ;;  %v40_v22 = vld [vmem:[%s14885_s0 + $0x18] sm:$0xff]  ;;  %v10200_v23 = vpack.c.bf16 %v424_v15, %v420_v14 }
  0x23   :  { %7785 = vmatpush1.bf16.msra.mxu1 %v7784_v37  ;;  %7787 = vmatprep.subr.bf16.mxu0 %v10055_v38  ;;  %v431_v24 = vld [vmem:[%s14884_s2 + $0x318] sm:$0xff]  ;;  %v10210_v26 = vpack.c.bf16 %v426_v18, %v422_v17  ;;  %v428_v27 = vld [vmem:[%s14884_s2 + $0x300] sm:$0xff]  ;;  %v10220_v29 = vpack.c.bf16 %v433_v21, %v429_v20  ;;  %v430_v30 = vld [vmem:[%s14884_s2 + $0x310] sm:$0xff] }
  0x24   :  { %7819 = vmatprep.subr.bf16.mxu1 %v10063_v41  ;;  %v435_v25 = vld [vmem:[%s14884_s2 + $0x338] sm:$0xff]  ;;  %v432_v28 = vld [vmem:[%s14884_s2 + $0x320] sm:$0xff]  ;;  %v434_v31 = vld [vmem:[%s14884_s2 + $0x330] sm:$0xff] }
  0x25   :  { %196 = vmatmul.mubr.f32.vlgmr.msra.gmra.mrb[0].mxu0 %v37_v46  ;;  %v10229_v32 = vpack.c.bf16 %v435_v25, %v431_v24  ;;  %v437_v33 = vld [vmem:[%s14884_s2 + $0x348] sm:$0xff]  ;;  %v41_v35 = vld [vmem:[%s14885_s0 + $0x20] sm:$0xff]  ;;  %v10241_v36 = vpack.c.bf16 %v432_v28, %v428_v27  ;;  %v439_v37 = vld [vmem:[%s14884_s2 + $0x358] sm:$0xff]  ;;  %v10251_v40 = vpack.c.bf16 %v434_v31, %v430_v30 }
  0x26   :  { %309 = vmatmul.mubr.f32.vlgmr.msra.gmra.mrb[0].mxu1 %v37_v46  ;;  %7789 = vmatpush1.bf16.msra.mxu0 %v10080_v47  ;;  %v441_v34 = vld [vmem:[%s14884_s2 + $0x368] sm:$0xff]  ;;  %v443_v39 = vld [vmem:[%s14884_s2 + $0x378] sm:$0xff]  ;;  %v436_v42 = vld [vmem:[%s14884_s2 + $0x340] sm:$0xff] }
  0x27   :  { %7821 = vmatpush1.bf16.msra.mxu1 %v10089_v50  ;;  %201 = vmatprep.mubr.f32.mxu0 %v14896_v3  ;;  %v440_v43 = vld [vmem:[%s14884_s2 + $0x360] sm:$0xff]  ;;  %v10261_v44 = vpack.c.bf16 %v441_v34, %v437_v33  ;;  %v438_v45 = vld [vmem:[%s14884_s2 + $0x350] sm:$0xff]  ;;  %v10270_v48 = vpack.c.bf16 %v443_v39, %v439_v37  ;;  %v445_v49 = vld [vmem:[%s14884_s2 + $0x388] sm:$0xff] }
  0x28   :  { %314 = vmatprep.mubr.f32.mxu1 %v14896_v3  ;;  %7791 = vmatprep.subr.bf16.mxu0 %v10098_v53  ;;  %v442_v46 = vld [vmem:[%s14884_s2 + $0x370] sm:$0xff]  ;;  %v449_v51 = vld [vmem:[%s14884_s2 + $0x3a8] sm:$0xff]  ;;  %v10282_v54 = vpack.c.bf16 %v440_v43, %v436_v42  ;;  %v447_v55 = vld [vmem:[%s14884_s2 + $0x398] sm:$0xff] }
  0x29   :  { %202 = vmatmul.mubr.f32.gmra.mrb[2].mxu0 %v38_v59  ;;  %7823 = vmatprep.subr.bf16.mxu1 %v10106_v56  ;;  %v42_v52 = vld [vmem:[%s14885_s0 + $0x28] sm:$0xff]  ;;  %v451_v57 = vld [vmem:[%s14884_s2 + $0x3b8] sm:$0xff]  ;;  %v10292_v58 = vpack.c.bf16 %v442_v46, %v438_v45  ;;  %v448_v61 = vld [vmem:[%s14884_s2 + $0x3a0] sm:$0xff]  ;;  %v10302_v62 = vpack.c.bf16 %v449_v51, %v445_v49 }
  0x2a   :  { %315 = vmatmul.mubr.f32.gmra.mrb[2].mxu1 %v38_v59  ;;  %7793 = vmatpush1.bf16.msra.mxu0 %v10118_v60  ;;  %v444_v59 = vld [vmem:[%s14884_s2 + $0x380] sm:$0xff]  ;;  %v446_v0 = vld [vmem:[%s14884_s2 + $0x390] sm:$0xff]  ;;  %v10311_v4 = vpack.c.bf16 %v451_v57, %v447_v55  ;;  %v453_v5 = vld [vmem:[%s14884_s2 + $0x3c8] sm:$0xff] }
  0x2b   :  { %7825 = vmatpush1.bf16.msra.mxu1 %v10128_v63  ;;  %207 = vmatprep.mubr.f32.mxu0 %v14896_v3  ;;  %v450_v1 = vld [vmem:[%s14884_s2 + $0x3b0] sm:$0xff]  ;;  %v457_v7 = vld [vmem:[%s14884_s2 + $0x3e8] sm:$0xff]  ;;  %v455_v11 = vld [vmem:[%s14884_s2 + $0x3d8] sm:$0xff] }
  0x2c   :  { %320 = vmatprep.mubr.f32.mxu1 %v14896_v3  ;;  %7795 = vmatprep.subr.bf16.mxu0 %v10138_v2  ;;  %v43_v8 = vld [vmem:[%s14885_s0 + $0x30] sm:$0xff]  ;;  %v459_v12 = vld [vmem:[%s14884_s2 + $0x3f8] sm:$0xff]  ;;  %v10333_v14 = vpack.c.bf16 %v450_v1, %v446_v0  ;;  %v452_v15 = vld [vmem:[%s14884_s2 + $0x3c0] sm:$0xff]  ;;  %v10343_v18 = vpack.c.bf16 %v457_v7, %v453_v5 }
  0x2d   :  { %208 = vmatmul.mubr.f32.gmra.mrb[4].mxu0 %v39_v9  ;;  %7827 = vmatprep.subr.bf16.mxu1 %v10147_v6  ;;  %v456_v17 = vld [vmem:[%s14884_s2 + $0x3e0] sm:$0xff]  ;;  %v454_v20 = vld [vmem:[%s14884_s2 + $0x3d0] sm:$0xff]  ;;  %v6168_v24 = vld [vmem:[%s14884_s2 + $0x408] sm:$0xff] }
  0x2e   :  { %321 = vmatmul.mubr.f32.gmra.mrb[4].mxu1 %v39_v9  ;;  %7797 = vmatpush1.bf16.msra.mxu0 %v10159_v10  ;;  %v10323_v9 = vpack.c.bf16 %v448_v61, %v444_v59  ;;  %v458_v21 = vld [vmem:[%s14884_s2 + $0x3f0] sm:$0xff]  ;;  %v6172_v25 = vld [vmem:[%s14884_s2 + $0x428] sm:$0xff]  ;;  %v44_v27 = vld [vmem:[%s14885_s0 + $0x38] sm:$0xff]  ;;  %v10364_v28 = vpack.c.bf16 %v456_v17, %v452_v15 }
  0x2f   :  { %7829 = vmatpush1.bf16.msra.mxu1 %v10169_v13  ;;  %213 = vmatprep.mubr.f32.mxu0 %v14896_v3  ;;  %v6170_v30 = vld [vmem:[%s14884_s2 + $0x418] sm:$0xff]  ;;  %v10374_v33 = vpack.c.bf16 %v458_v21, %v454_v20  ;;  %v10378_v34 = vpack.c.bf16 %v6172_v25, %v6168_v24  ;;  %v10387_v37 = vld [vmem:[%s14886_s1] sm:$0xff]  ;;  %v6169_v43 = vld [vmem:[%s14884_s2 + $0x410] sm:$0xff] }
  0x30   :  { %326 = vmatprep.mubr.f32.mxu1 %v14896_v3  ;;  %7799 = vmatprep.subr.bf16.mxu0 %v10179_v16  ;;  %v6174_v31 = vld [vmem:[%s14884_s2 + $0x438] sm:$0xff]  ;;  %v6167_v39 = vld [vmem:[%s14884_s2 + $0x400] sm:$0xff]  ;;  %v6173_v46 = vld [vmem:[%s14884_s2 + $0x430] sm:$0xff] }
  0x31   :  { %214 = vmatmul.mubr.f32.gmra.mrb[6].mxu0 %v40_v22  ;;  %7831 = vmatprep.subr.bf16.mxu1 %v10188_v19  ;;  %v6171_v42 = vld [vmem:[%s14884_s2 + $0x420] sm:$0xff]  ;;  %v10410_v49 = vpack.c.bf16 %v6173_v46, %v6169_v43  ;;  %v6176_v51 = vld [vmem:[%s14884_s2 + $0x448] sm:$0xff]  ;;  %v6178_v55 = vld [vmem:[%s14884_s2 + $0x458] sm:$0xff] }
  0x32   :  { %327 = vmatmul.mubr.f32.gmra.mrb[6].mxu1 %v40_v22  ;;  %7801 = vmatpush1.bf16.msra.mxu0 %v10200_v23  ;;  %v10352_v22 = vpack.c.bf16 %v459_v12, %v455_v11  ;;  %v10405_v45 = vpack.c.bf16 %v6171_v42, %v6167_v39  ;;  %v6182_v59 = vld [vmem:[%s14884_s2 + $0x478] sm:$0xff]  ;;  %v6175_v0 = vld [vmem:[%s14884_s2 + $0x440] sm:$0xff]  ;;  %v6177_v5 = vld [vmem:[%s14884_s2 + $0x450] sm:$0xff] }
  0x33   :  { %7833 = vmatpush1.bf16.msra.mxu1 %v10210_v26  ;;  %219 = vmatprep.mubr.f32.mxu0 %v14896_v3  ;;  %v10428_v61 = vpack.c.bf16 %v6182_v59, %v6178_v55  ;;  %v6179_v1 = vld [vmem:[%s14884_s2 + $0x460] sm:$0xff]  ;;  %v6184_v12 = vld [vmem:[%s14884_s2 + $0x488] sm:$0xff]  ;;  %v6186_v17 = vld [vmem:[%s14884_s2 + $0x498] sm:$0xff] }
  0x34   :  { %332 = vmatprep.mubr.f32.mxu1 %v14896_v3  ;;  %7803 = vmatprep.subr.bf16.mxu0 %v10220_v29  ;;  %v10441_v7 = vpack.c.bf16 %v6179_v1, %v6175_v0  ;;  %v6188_v15 = vld [vmem:[%s14884_s2 + $0x4a8] sm:$0xff]  ;;  %v6190_v21 = vld [vmem:[%s14884_s2 + $0x4b8] sm:$0xff]  ;;  %v6183_v25 = vld [vmem:[%s14884_s2 + $0x480] sm:$0xff] }
  0x35   :  { %220 = vmatmul.mubr.f32.gmra.mrb[8].mxu0 %v41_v35  ;;  %7835 = vmatprep.subr.bf16.mxu1 %v10229_v32  ;;  %v10459_v20 = vpack.c.bf16 %v6188_v15, %v6184_v12  ;;  %v10464_v24 = vpack.c.bf16 %v6190_v21, %v6186_v17  ;;  %v6189_v39 = vld [vmem:[%s14884_s2 + $0x4b0] sm:$0xff]  ;;  %v6192_v43 = vld [vmem:[%s14884_s2 + $0x4c8] sm:$0xff]  ;;  %v6198_v55 = vld [vmem:[%s14884_s2 + $0x4f8] sm:$0xff] }
  0x36   :  { %333 = vmatmul.mubr.f32.gmra.mrb[8].mxu1 %v41_v35  ;;  %7805 = vmatpush1.bf16.msra.mxu0 %v10241_v36  ;;  %v10381_v35 = vpack.c.bf16 %v6174_v31, %v6170_v30  ;;  %v6185_v30 = vld [vmem:[%s14884_s2 + $0x490] sm:$0xff]  ;;  %v6196_v46 = vld [vmem:[%s14884_s2 + $0x4e8] sm:$0xff]  ;;  %v6191_v0 = vld [vmem:[%s14884_s2 + $0x4c0] sm:$0xff] }
  0x37   :  { %7837 = vmatpush1.bf16.msra.mxu1 %v10251_v40  ;;  %225 = vmatprep.mubr.f32.mxu0 %v14896_v3  ;;  %v10482_v42 = vpack.c.bf16 %v6189_v39, %v6185_v30  ;;  %v6195_v1 = vld [vmem:[%s14884_s2 + $0x4e0] sm:$0xff]  ;;  %v6197_v12 = vld [vmem:[%s14884_s2 + $0x4f0] sm:$0xff]  ;;  %v6200_v17 = vld [vmem:[%s14884_s2 + $0x508] sm:$0xff] }
  0x38   :  { %338 = vmatprep.mubr.f32.mxu1 %v14896_v3  ;;  %7807 = vmatprep.subr.bf16.mxu0 %v10261_v44  ;;  %v6204_v21 = vld [vmem:[%s14884_s2 + $0x528] sm:$0xff]  ;;  %v6206_v30 = vld [vmem:[%s14884_s2 + $0x538] sm:$0xff]  ;;  %v6199_v39 = vld [vmem:[%s14884_s2 + $0x500] sm:$0xff] }
  0x39   :  { %226 = vmatmul.mubr.f32.gmra.mrb[10].mxu0 %v42_v52  ;;  %7839 = vmatprep.subr.bf16.mxu1 %v10270_v48  ;;  %15143 = vst [vmem:[#allocation4_spill] sm:$0xff] %v10482_v42 }
  0x3a   :  { %339 = vmatmul.mubr.f32.gmra.mrb[10].mxu1 %v42_v52  ;;  %7809 = vmatpush1.bf16.msra.mxu0 %v10282_v54  ;;  %v6180_v52 = vld [vmem:[%s14884_s2 + $0x468] sm:$0xff] }
  0x3b   :  { %7841 = vmatpush1.bf16.msra.mxu1 %v10292_v58  ;;  %231 = vmatprep.mubr.f32.mxu0 %v14896_v3  ;;  %v10423_v57 = vpack.c.bf16 %v6180_v52, %v6176_v51  ;;  %v6194_v51 = vld [vmem:[%s14884_s2 + $0x4d8] sm:$0xff]  ;;  %v10495_v52 = vpack.c.bf16 %v6196_v46, %v6192_v43  ;;  %v6203_v43 = vld [vmem:[%s14884_s2 + $0x520] sm:$0xff] }
  0x3c   :  { %344 = vmatprep.mubr.f32.mxu1 %v14896_v3  ;;  %7811 = vmatprep.subr.bf16.mxu0 %v10302_v62  ;;  %v10500_v59 = vpack.c.bf16 %v6198_v55, %v6194_v51  ;;  %v10544_v51 = vpack.c.bf16 %v6203_v43, %v6199_v39  ;;  %v6201_v55 = vld [vmem:[%s14884_s2 + $0x510] sm:$0xff]  ;;  %v6211_v39 = vld [vmem:[%s14884_s2 + $0x560] sm:$0xff] }
  0x3d   :  { %232 = vmatmul.mubr.f32.gmra.mrb[12].mxu0 %v43_v8  ;;  %7843 = vmatprep.subr.bf16.mxu1 %v10311_v4  ;;  %15144 = vst [vmem:[#allocation5_spill] sm:$0xff] %v10495_v52 }
  0x3e   :  { %345 = vmatmul.mubr.f32.gmra.mrb[12].mxu1 %v43_v8  ;;  %7813 = vmatpush1.bf16.msra.mxu0 %v10323_v9  ;;  %v6181_v8 = vld [vmem:[%s14884_s2 + $0x470] sm:$0xff]  ;;  %15145 = vst [vmem:[#allocation6_spill] sm:$0xff] %v10500_v59  ;;  %15150 = vst [vmem:[#allocation11_spill] sm:$0xff] %v10544_v51 }
  0x3f   :  { %7845 = vmatpush1.bf16.msra.mxu1 %v10333_v14  ;;  %237 = vmatprep.mubr.f32.mxu0 %v14896_v3  ;;  %v10446_v11 = vpack.c.bf16 %v6181_v8, %v6177_v5  ;;  %v6193_v5 = vld [vmem:[%s14884_s2 + $0x4d0] sm:$0xff]  ;;  %v10513_v8 = vpack.c.bf16 %v6195_v1, %v6191_v0 }
  0x40   :  { %350 = vmatprep.mubr.f32.mxu1 %v14896_v3  ;;  %7815 = vmatprep.subr.bf16.mxu0 %v10343_v18  ;;  %v10518_v15 = vpack.c.bf16 %v6197_v12, %v6193_v5  ;;  %v6205_v0 = vld [vmem:[%s14884_s2 + $0x530] sm:$0xff]  ;;  %v6208_v5 = vld [vmem:[%s14884_s2 + $0x548] sm:$0xff] }
  0x41   :  { %238 = vmatmul.mubr.f32.gmra.mrb[14].mxu0 %v44_v27  ;;  %7847 = vmatprep.subr.bf16.mxu1 %v10352_v22  ;;  %15146 = vst [vmem:[#allocation7_spill] sm:$0xff] %v10513_v8  ;;  %v10553_v1 = vpack.c.bf16 %v6205_v0, %v6201_v55  ;;  %v6212_v12 = vld [vmem:[%s14884_s2 + $0x568] sm:$0xff]  ;;  %v6209_v0 = vld [vmem:[%s14884_s2 + $0x550] sm:$0xff] }
  0x42   :  { %351 = vmatmul.mubr.f32.gmra.mrb[14].mxu1 %v44_v27  ;;  %7817 = vmatpush1.bf16.msra.mxu0 %v10364_v28  ;;  %v6187_v27 = vld [vmem:[%s14884_s2 + $0x4a0] sm:$0xff]  ;;  %15147 = vst [vmem:[#allocation8_spill] sm:$0xff] %v10518_v15 }
  0x43   :  { %7849 = vmatpush1.bf16.msra.mxu1 %v10374_v33  ;;  %524 = vmatprep.mubr.f32.mxu0 %v14896_v3  ;;  %v10477_v31 = vpack.c.bf16 %v6187_v27, %v6183_v25  ;;  %v6202_v25 = vld [vmem:[%s14884_s2 + $0x518] sm:$0xff]  ;;  %v10531_v27 = vpack.c.bf16 %v6204_v21, %v6200_v17  ;;  %15151 = vst [vmem:[#allocation12_spill] sm:$0xff] %v10553_v1 }
  0x44   :  { %595 = vmatprep.mubr.f32.mxu1 %v14896_v3  ;;  %7851 = vmatprep.subr.bf16.mxu0 %v10378_v34  ;;  %v10542_v46 = vpack.c.bf16 %v6206_v30, %v6202_v25  ;;  %v6210_v17 = vld [vmem:[%s14884_s2 + $0x558] sm:$0xff]  ;;  %v10567_v21 = vpack.c.bf16 %v6212_v12, %v6208_v5  ;;  %v6207_v30 = vld [vmem:[%s14884_s2 + $0x540] sm:$0xff]  ;;  %v6213_v5 = vld [vmem:[%s14884_s2 + $0x570] sm:$0xff] }
  0x45   :  { %525 = vmatmul.mubr.f32.vlgmr.msra.gmra.mrb[0].mxu0 %v10387_v37  ;;  %7915 = vmatprep.subr.bf16.mxu1 %v10381_v35  ;;  %15148 = vst [vmem:[#allocation9_spill] sm:$0xff] %v10531_v27  ;;  %v6214_v25 = vld [vmem:[%s14884_s2 + $0x578] sm:$0xff]  ;;  %v10580_v55 = vpack.c.bf16 %v6211_v39, %v6207_v30  ;;  %v10589_v12 = vpack.c.bf16 %v6213_v5, %v6209_v0  ;;  %v6215_v5 = vld [vmem:[%s14884_s2 + $0x580] sm:$0xff] }
  0x46   :  { %596 = vmatmul.mubr.f32.vlgmr.msra.gmra.mrb[16].mxu1 %v10387_v37  ;;  %7853 = vmatpush1.bf16.msra.mxu0 %v10405_v45  ;;  %15149 = vst [vmem:[#allocation10_spill] sm:$0xff] %v10542_v46  ;;  %15152 = vst [vmem:[#allocation13_spill] sm:$0xff] %v10567_v21  ;;  %v10578_v43 = vpack.c.bf16 %v6214_v25, %v6210_v17  ;;  %v6216_v17 = vld [vmem:[%s14884_s2 + $0x588] sm:$0xff]  ;;  %v6218_v30 = vld [vmem:[%s14884_s2 + $0x598] sm:$0xff] }
  0x47   :  { %7917 = vmatpush1.bf16.msra.mxu1 %v10410_v49  ;;  %7855 = vmatprep.subr.bf16.mxu0 %v10423_v57  ;;  %15154 = vst [vmem:[#allocation15_spill] sm:$0xff] %v10580_v55  ;;  %15155 = vst [vmem:[#allocation16_spill] sm:$0xff] %v10589_v12  ;;  %v6220_v25 = vld [vmem:[%s14884_s2 + $0x5a8] sm:$0xff]  ;;  %v6222_v0 = vld [vmem:[%s14884_s2 + $0x5b8] sm:$0xff] }
  0x48   :  { %7919 = vmatprep.subr.bf16.mxu1 %v10428_v61  ;;  %15153 = vst [vmem:[#allocation14_spill] sm:$0xff] %v10578_v43  ;;  %v10603_v39 = vpack.c.bf16 %v6220_v25, %v6216_v17  ;;  %v6219_v3 = vld [vmem:[%s14884_s2 + $0x5a0] sm:$0xff]  ;;  %v6217_v17 = vld [vmem:[%s14884_s2 + $0x590] sm:$0xff] }
  0x49   :  { %v6221_v25 = vld [vmem:[%s14884_s2 + $0x5b0] sm:$0xff] }
  0x4a   :  { %7857 = vmatpush1.bf16.msra.mxu0 %v10441_v7  ;;  %15156 = vst [vmem:[#allocation17_spill] sm:$0xff] %v10603_v39 }
  0x4b   :  { %7921 = vmatpush1.bf16.msra.mxu1 %v10446_v11  ;;  %7859 = vmatprep.subr.bf16.mxu0 %v10459_v20 }
  0x4c   :  { %7923 = vmatprep.subr.bf16.mxu1 %v10464_v24 }
  0x4e   :  { %7861 = vmatpush1.bf16.msra.mxu0 %v10477_v31 }
  0x4f   :  { %7925 = vmatpush1.bf16.msra.mxu1 %v10482_v42  ;;  %7863 = vmatprep.subr.bf16.mxu0 %v10495_v52 }
  0x50   :  { %7927 = vmatprep.subr.bf16.mxu1 %v10500_v59 }
  0x52   :  { %7865 = vmatpush1.bf16.msra.mxu0 %v10513_v8 }
  0x53   :  { %7929 = vmatpush1.bf16.msra.mxu1 %v10518_v15  ;;  %7867 = vmatprep.subr.bf16.mxu0 %v10531_v27 }
  0x54   :  { %7931 = vmatprep.subr.bf16.mxu1 %v10542_v46 }
  0x56   :  { %7869 = vmatpush1.bf16.msra.mxu0 %v10544_v51 }
  0x57   :  { %7933 = vmatpush1.bf16.msra.mxu1 %v10553_v1  ;;  %7871 = vmatprep.subr.bf16.mxu0 %v10567_v21  ;;  %v6281_v1 = vld [vmem:[%s14884_s2 + $0x790] sm:$0xff] }
  0x58   :  { %7935 = vmatprep.subr.bf16.mxu1 %v10578_v43  ;;  %v10616_v43 = vpack.c.bf16 %v6219_v3, %v6215_v5  ;;  %v6224_v3 = vld [vmem:[%s14884_s2 + $0x5c8] sm:$0xff] }
  0x5a   :  { %7873 = vmatpush1.bf16.msra.mxu0 %v10580_v55  ;;  %v10614_v55 = vpack.c.bf16 %v6222_v0, %v6218_v30  ;;  %15158 = vst [vmem:[#allocation19_spill] sm:$0xff] %v10616_v43  ;;  %v6228_v30 = vld [vmem:[%s14884_s2 + $0x5e8] sm:$0xff]  ;;  %v6226_v0 = vld [vmem:[%s14884_s2 + $0x5d8] sm:$0xff] }
  0x5b   :  { %7937 = vmatpush1.bf16.msra.mxu1 %v10589_v12  ;;  %7875 = vmatprep.subr.bf16.mxu0 %v10603_v39  ;;  %v10625_v12 = vpack.c.bf16 %v6221_v25, %v6217_v17  ;;  %v10639_v5 = vpack.c.bf16 %v6228_v30, %v6224_v3  ;;  %v6230_v17 = vld [vmem:[%s14884_s2 + $0x5f8] sm:$0xff]  ;;  %v6223_v25 = vld [vmem:[%s14884_s2 + $0x5c0] sm:$0xff]  ;;  %v6225_v3 = vld [vmem:[%s14884_s2 + $0x5d0] sm:$0xff] }
  0x5c   :  { %15157 = vst [vmem:[#allocation18_spill] sm:$0xff] %v10614_v55  ;;  %7939 = vmatprep.subr.bf16.mxu1 %v10614_v55  ;;  %v10650_v55 = vpack.c.bf16 %v6230_v17, %v6226_v0  ;;  %v6229_v30 = vld [vmem:[%s14884_s2 + $0x5f0] sm:$0xff]  ;;  %v6236_v0 = vld [vmem:[%s14884_s2 + $0x628] sm:$0xff]  ;;  %v6234_v17 = vld [vmem:[%s14884_s2 + $0x618] sm:$0xff] }
  0x5d   :  { %15159 = vst [vmem:[#allocation20_spill] sm:$0xff] %v10625_v12  ;;  %15160 = vst [vmem:[#allocation21_spill] sm:$0xff] %v10639_v5 }
  0x5e   :  { %7877 = vmatpush1.bf16.msra.mxu0 %v10616_v43  ;;  %v6227_v43 = vld [vmem:[%s14884_s2 + $0x5e0] sm:$0xff]  ;;  %15161 = vst [vmem:[#allocation22_spill] sm:$0xff] %v10650_v55 }
  0x5f   :  { %7941 = vmatpush1.bf16.msra.mxu1 %v10625_v12  ;;  %v10652_v39 = vpack.c.bf16 %v6227_v43, %v6223_v25  ;;  %7879 = vmatprep.subr.bf16.mxu0 %v10639_v5  ;;  %v10661_v12 = vpack.c.bf16 %v6229_v30, %v6225_v3  ;;  %v6232_v43 = vld [vmem:[%s14884_s2 + $0x608] sm:$0xff]  ;;  %v6238_v3 = vld [vmem:[%s14884_s2 + $0x638] sm:$0xff]  ;;  %v6231_v30 = vld [vmem:[%s14884_s2 + $0x600] sm:$0xff] }
  0x60   :  { %7943 = vmatprep.subr.bf16.mxu1 %v10650_v55  ;;  %v10675_v25 = vpack.c.bf16 %v6236_v0, %v6232_v43  ;;  %v10686_v55 = vpack.c.bf16 %v6238_v3, %v6234_v17  ;;  %v6233_v43 = vld [vmem:[%s14884_s2 + $0x610] sm:$0xff]  ;;  %v6244_v17 = vld [vmem:[%s14884_s2 + $0x668] sm:$0xff]  ;;  %v6242_v3 = vld [vmem:[%s14884_s2 + $0x658] sm:$0xff] }
  0x61   :  { %15162 = vst [vmem:[#allocation23_spill] sm:$0xff] %v10652_v39  ;;  %15163 = vst [vmem:[#allocation24_spill] sm:$0xff] %v10661_v12  ;;  %v6237_v0 = vld [vmem:[%s14884_s2 + $0x630] sm:$0xff] }
  0x62   :  { %7881 = vmatpush1.bf16.msra.mxu0 %v10652_v39  ;;  %15164 = vst [vmem:[#allocation25_spill] sm:$0xff] %v10675_v25  ;;  %v6235_v39 = vld [vmem:[%s14884_s2 + $0x620] sm:$0xff]  ;;  %15165 = vst [vmem:[#allocation26_spill] sm:$0xff] %v10686_v55 }
  0x63   :  { %7945 = vmatpush1.bf16.msra.mxu1 %v10661_v12  ;;  %v10688_v5 = vpack.c.bf16 %v6235_v39, %v6231_v30  ;;  %7883 = vmatprep.subr.bf16.mxu0 %v10675_v25  ;;  %v10697_v12 = vpack.c.bf16 %v6237_v0, %v6233_v43  ;;  %v6240_v39 = vld [vmem:[%s14884_s2 + $0x648] sm:$0xff]  ;;  %v6246_v43 = vld [vmem:[%s14884_s2 + $0x678] sm:$0xff]  ;;  %v6239_v0 = vld [vmem:[%s14884_s2 + $0x640] sm:$0xff] }
  0x64   :  { %7947 = vmatprep.subr.bf16.mxu1 %v10686_v55  ;;  %v10711_v30 = vpack.c.bf16 %v6244_v17, %v6240_v39  ;;  %v10722_v55 = vpack.c.bf16 %v6246_v43, %v6242_v3  ;;  %v6241_v39 = vld [vmem:[%s14884_s2 + $0x650] sm:$0xff]  ;;  %v6252_v3 = vld [vmem:[%s14884_s2 + $0x6a8] sm:$0xff]  ;;  %v6250_v43 = vld [vmem:[%s14884_s2 + $0x698] sm:$0xff] }
  0x65   :  { %15166 = vst [vmem:[#allocation27_spill] sm:$0xff] %v10688_v5  ;;  %15167 = vst [vmem:[#allocation28_spill] sm:$0xff] %v10697_v12  ;;  %v6245_v17 = vld [vmem:[%s14884_s2 + $0x670] sm:$0xff] }
  0x66   :  { %7885 = vmatpush1.bf16.msra.mxu0 %v10688_v5  ;;  %15168 = vst [vmem:[#allocation29_spill] sm:$0xff] %v10711_v30  ;;  %v6243_v5 = vld [vmem:[%s14884_s2 + $0x660] sm:$0xff]  ;;  %15169 = vst [vmem:[#allocation30_spill] sm:$0xff] %v10722_v55 }
  0x67   :  { %7949 = vmatpush1.bf16.msra.mxu1 %v10697_v12  ;;  %v10724_v25 = vpack.c.bf16 %v6243_v5, %v6239_v0  ;;  %7887 = vmatprep.subr.bf16.mxu0 %v10711_v30  ;;  %v10733_v12 = vpack.c.bf16 %v6245_v17, %v6241_v39  ;;  %v6248_v5 = vld [vmem:[%s14884_s2 + $0x688] sm:$0xff]  ;;  %v6254_v39 = vld [vmem:[%s14884_s2 + $0x6b8] sm:$0xff]  ;;  %v6247_v17 = vld [vmem:[%s14884_s2 + $0x680] sm:$0xff] }
  0x68   :  { %7951 = vmatprep.subr.bf16.mxu1 %v10722_v55  ;;  %v10747_v0 = vpack.c.bf16 %v6252_v3, %v6248_v5  ;;  %v10758_v55 = vpack.c.bf16 %v6254_v39, %v6250_v43  ;;  %v6249_v5 = vld [vmem:[%s14884_s2 + $0x690] sm:$0xff]  ;;  %v6260_v43 = vld [vmem:[%s14884_s2 + $0x6e8] sm:$0xff]  ;;  %v6258_v39 = vld [vmem:[%s14884_s2 + $0x6d8] sm:$0xff] }
  0x69   :  { %15170 = vst [vmem:[#allocation31_spill] sm:$0xff] %v10724_v25  ;;  %15171 = vst [vmem:[#allocation32_spill] sm:$0xff] %v10733_v12  ;;  %v6253_v3 = vld [vmem:[%s14884_s2 + $0x6b0] sm:$0xff] }
  0x6a   :  { %7889 = vmatpush1.bf16.msra.mxu0 %v10724_v25  ;;  %15172 = vst [vmem:[#allocation33_spill] sm:$0xff] %v10747_v0  ;;  %v6251_v25 = vld [vmem:[%s14884_s2 + $0x6a0] sm:$0xff]  ;;  %15173 = vst [vmem:[#allocation34_spill] sm:$0xff] %v10758_v55 }
  0x6b   :  { %7953 = vmatpush1.bf16.msra.mxu1 %v10733_v12  ;;  %v10760_v30 = vpack.c.bf16 %v6251_v25, %v6247_v17  ;;  %7891 = vmatprep.subr.bf16.mxu0 %v10747_v0  ;;  %v10769_v12 = vpack.c.bf16 %v6253_v3, %v6249_v5  ;;  %v6256_v25 = vld [vmem:[%s14884_s2 + $0x6c8] sm:$0xff]  ;;  %v6262_v5 = vld [vmem:[%s14884_s2 + $0x6f8] sm:$0xff]  ;;  %v6255_v3 = vld [vmem:[%s14884_s2 + $0x6c0] sm:$0xff] }
  0x6c   :  { %7955 = vmatprep.subr.bf16.mxu1 %v10758_v55  ;;  %v10783_v17 = vpack.c.bf16 %v6260_v43, %v6256_v25  ;;  %v10794_v55 = vpack.c.bf16 %v6262_v5, %v6258_v39  ;;  %v6257_v25 = vld [vmem:[%s14884_s2 + $0x6d0] sm:$0xff]  ;;  %v6268_v39 = vld [vmem:[%s14884_s2 + $0x728] sm:$0xff]  ;;  %v6266_v5 = vld [vmem:[%s14884_s2 + $0x718] sm:$0xff] }
  0x6d   :  { %15174 = vst [vmem:[#allocation35_spill] sm:$0xff] %v10760_v30  ;;  %15175 = vst [vmem:[#allocation36_spill] sm:$0xff] %v10769_v12  ;;  %v6261_v43 = vld [vmem:[%s14884_s2 + $0x6f0] sm:$0xff] }
  0x6e   :  { %7893 = vmatpush1.bf16.msra.mxu0 %v10760_v30  ;;  %15176 = vst [vmem:[#allocation37_spill] sm:$0xff] %v10783_v17  ;;  %v6259_v30 = vld [vmem:[%s14884_s2 + $0x6e0] sm:$0xff]  ;;  %15177 = vst [vmem:[#allocation38_spill] sm:$0xff] %v10794_v55 }
  0x6f   :  { %7957 = vmatpush1.bf16.msra.mxu1 %v10769_v12  ;;  %v10796_v0 = vpack.c.bf16 %v6259_v30, %v6255_v3  ;;  %7895 = vmatprep.subr.bf16.mxu0 %v10783_v17  ;;  %v10805_v12 = vpack.c.bf16 %v6261_v43, %v6257_v25  ;;  %v6264_v30 = vld [vmem:[%s14884_s2 + $0x708] sm:$0xff]  ;;  %v6270_v25 = vld [vmem:[%s14884_s2 + $0x738] sm:$0xff]  ;;  %v6263_v43 = vld [vmem:[%s14884_s2 + $0x700] sm:$0xff] }
  0x70   :  { %7959 = vmatprep.subr.bf16.mxu1 %v10794_v55  ;;  %v10819_v3 = vpack.c.bf16 %v6268_v39, %v6264_v30  ;;  %v10830_v55 = vpack.c.bf16 %v6270_v25, %v6266_v5  ;;  %v6265_v30 = vld [vmem:[%s14884_s2 + $0x710] sm:$0xff]  ;;  %v6276_v5 = vld [vmem:[%s14884_s2 + $0x768] sm:$0xff]  ;;  %v6274_v25 = vld [vmem:[%s14884_s2 + $0x758] sm:$0xff] }
  0x71   :  { %15178 = vst [vmem:[#allocation39_spill] sm:$0xff] %v10796_v0  ;;  %15179 = vst [vmem:[#allocation40_spill] sm:$0xff] %v10805_v12  ;;  %v6269_v39 = vld [vmem:[%s14884_s2 + $0x730] sm:$0xff] }
  0x72   :  { %7897 = vmatpush1.bf16.msra.mxu0 %v10796_v0  ;;  %15180 = vst [vmem:[#allocation41_spill] sm:$0xff] %v10819_v3  ;;  %v6267_v0 = vld [vmem:[%s14884_s2 + $0x720] sm:$0xff]  ;;  %15181 = vst [vmem:[#allocation42_spill] sm:$0xff] %v10830_v55 }
  0x73   :  { %7961 = vmatpush1.bf16.msra.mxu1 %v10805_v12  ;;  %v10832_v17 = vpack.c.bf16 %v6267_v0, %v6263_v43  ;;  %7899 = vmatprep.subr.bf16.mxu0 %v10819_v3  ;;  %v10841_v12 = vpack.c.bf16 %v6269_v39, %v6265_v30  ;;  %v6272_v0 = vld [vmem:[%s14884_s2 + $0x748] sm:$0xff]  ;;  %v6278_v30 = vld [vmem:[%s14884_s2 + $0x778] sm:$0xff]  ;;  %v6271_v39 = vld [vmem:[%s14884_s2 + $0x740] sm:$0xff] }
  0x74   :  { %7963 = vmatprep.subr.bf16.mxu1 %v10830_v55  ;;  %v10855_v43 = vpack.c.bf16 %v6276_v5, %v6272_v0  ;;  %v10866_v55 = vpack.c.bf16 %v6278_v30, %v6274_v25  ;;  %v6273_v0 = vld [vmem:[%s14884_s2 + $0x750] sm:$0xff]  ;;  %v6282_v25 = vld [vmem:[%s14884_s2 + $0x798] sm:$0xff] }
  0x75   :  { %15182 = vst [vmem:[#allocation43_spill] sm:$0xff] %v10832_v17  ;;  %15183 = vst [vmem:[#allocation44_spill] sm:$0xff] %v10841_v12  ;;  %v6277_v5 = vld [vmem:[%s14884_s2 + $0x770] sm:$0xff]  ;;  %v6286_v30 = vld [vmem:[%s14884_s2 + $0x7b8] sm:$0xff] }
  0x76   :  { %7901 = vmatpush1.bf16.msra.mxu0 %v10832_v17  ;;  %15184 = vst [vmem:[#allocation45_spill] sm:$0xff] %v10855_v43  ;;  %v6275_v17 = vld [vmem:[%s14884_s2 + $0x760] sm:$0xff]  ;;  %15185 = vst [vmem:[#allocation46_spill] sm:$0xff] %v10866_v55  ;;  %v10880_v21 = vpack.c.bf16 %v6277_v5, %v6273_v0  ;;  %v10895_v0 = vpack.c.bf16 %v6286_v30, %v6282_v25  ;;  %v6292_v25 = vld [vmem:[%s14884_s2 + $0x7e8] sm:$0xff] }
  0x77   :  { %7965 = vmatpush1.bf16.msra.mxu1 %v10841_v12  ;;  %v10868_v3 = vpack.c.bf16 %v6275_v17, %v6271_v39  ;;  %v6280_v12 = vld [vmem:[%s14884_s2 + $0x788] sm:$0xff]  ;;  %7903 = vmatprep.subr.bf16.mxu0 %v10855_v43  ;;  %v6279_v5 = vld [vmem:[%s14884_s2 + $0x780] sm:$0xff] }
  0x78   :  { %15187 = vst [vmem:[#allocation48_spill] sm:$0xff] %v10880_v21  ;;  %v6284_v17 = vld [vmem:[%s14884_s2 + $0x7a8] sm:$0xff]  ;;  %7967 = vmatprep.subr.bf16.mxu1 %v10866_v55  ;;  %15189 = vst [vmem:[#allocation50_spill] sm:$0xff] %v10895_v0  ;;  %v6283_v43 = vld [vmem:[%s14884_s2 + $0x7a0] sm:$0xff] }
  0x79   :  { %15186 = vst [vmem:[#allocation47_spill] sm:$0xff] %v10868_v3  ;;  %v10893_v39 = vpack.c.bf16 %v6284_v17, %v6280_v12  ;;  %v10907_v55 = vpack.c.bf16 %v6283_v43, %v6279_v5  ;;  %v6285_v12 = vld [vmem:[%s14884_s2 + $0x7b0] sm:$0xff]  ;;  %v6288_v17 = vld [vmem:[%s14884_s2 + $0x7c8] sm:$0xff]  ;;  %v6290_v5 = vld [vmem:[%s14884_s2 + $0x7d8] sm:$0xff] }
  0x7a   :  { %7905 = vmatpush1.bf16.msra.mxu0 %v10868_v3  ;;  %v10920_v30 = vpack.c.bf16 %v6285_v12, %v6281_v1  ;;  %v10922_v43 = vpack.c.bf16 %v6292_v25, %v6288_v17  ;;  %v6287_v3 = vld [vmem:[%s14884_s2 + $0x7c0] sm:$0xff]  ;;  %v6289_v12 = vld [vmem:[%s14884_s2 + $0x7d0] sm:$0xff] }
  0x7b   :  { %15188 = vst [vmem:[#allocation49_spill] sm:$0xff] %v10893_v39  ;;  %7969 = vmatpush1.bf16.msra.mxu1 %v10880_v21  ;;  %15190 = vst [vmem:[#allocation51_spill] sm:$0xff] %v10907_v55  ;;  %7907 = vmatprep.subr.bf16.mxu0 %v10893_v39  ;;  %v6294_v21 = vld [vmem:[%s14884_s2 + $0x7f8] sm:$0xff]  ;;  %v6291_v1 = vld [vmem:[%s14884_s2 + $0x7e0] sm:$0xff] }
  0x7c   :  { %7971 = vmatprep.subr.bf16.mxu1 %v10895_v0  ;;  %15191 = vst [vmem:[#allocation52_spill] sm:$0xff] %v10920_v30  ;;  %15192 = vst [vmem:[#allocation53_spill] sm:$0xff] %v10922_v43  ;;  %v10933_v51 = vpack.c.bf16 %v6294_v21, %v6290_v5  ;;  %v6293_v17 = vld [vmem:[%s14884_s2 + $0x7f0] sm:$0xff]  ;;  %v10945_v25 = vpack.c.bf16 %v6291_v1, %v6287_v3  ;;  %v10950_v21 = vld [vmem:[%s14886_s1 + $0x8] sm:$0xff]  ;;  %v111_v3 = vlaneseq }
  0x7d   :  { %15195 = vst [vmem:[#allocation56_spill] sm:$0xff] %v10950_v21  ;;  %v10954_v5 = vpack.c.bf16 %v6293_v17, %v6289_v12  ;;  %839 = vmatprep.mubr.f32.mxu0 %v10950_v21  ;;  %910 = vmatprep.mubr.f32.mxu1 %v10950_v21  ;;  %v109_v17 = vld [vmem:[%s14887_s3] sm:$0xf] }
  0x7e   :  { %15193 = vst [vmem:[#allocation54_spill] sm:$0xff] %v10933_v51  ;;  %7909 = vmatpush1.bf16.msra.mxu0 %v10907_v55  ;;  %15194 = vst [vmem:[#allocation55_spill] sm:$0xff] %v10945_v25  ;;  %v10963_v1 = vshrl.u32 %v111_v3, 7 }
  0x7f   :  { %7973 = vmatpush1.bf16.msra.mxu1 %v10920_v30  ;;  %7911 = vmatprep.subr.bf16.mxu0 %v10922_v43  ;;  %15196 = vst [vmem:[#allocation57_spill] sm:$0xff] %v10954_v5 }
  0x80   :  { %7975 = vmatprep.subr.bf16.mxu1 %v10933_v51  ;;  %15197 = vst [vmem:[#allocation58_spill] sm:$0xff] %v10963_v1  ;;  %v14949_v12 = vsub.s32 2, %v10963_v1  ;;  %v14951_v21 = vsub.s32 3, %v10963_v1 }
  0x82   :  { %7913 = vmatpush1.bf16.msra.mxu0 %v10945_v25 }
  0x83   :  { %7977 = vmatpush1.bf16.msra.mxu1 %v10954_v5  ;;  %7979 = vmatprep.subr.bf16.mxu0 %v10055_v38  ;;  %v122_v5 = vrot.slane %v109_v17, %v14949_v12  ;;  %v126_v38 = vrot.slane %v109_v17, %v14951_v21 }
  0x84   :  { %8011 = vmatprep.subr.bf16.mxu1 %v10063_v41 }
  0xf9   :  { %v310_v51 = vpop.f32.mrb[0].mxu1 }
  0xfa   :  { %v312_v43 = vpop.f32.mrb[1].mxu1 }
  0xfd   :  { %v316_v41 = vpop.f32.mrb[2].mxu1 }
  0xfe   :  { %v10974_v25 = vadd.f32 %v316_v41, %v122_v5  ;;  %v318_v3 = vpop.f32.mrb[3].mxu1 }
  0xff   :  { %v10976_v30 = vadd.f32 %v318_v3, %v126_v38 }
 0x100   :  { %15198 = vst [vmem:[#allocation59_spill] sm:$0xff] %v10974_v25 }
 0x101   :  { %15199 = vst [vmem:[#allocation60_spill] sm:$0xff] %v10976_v30  ;;  %v322_v55 = vpop.f32.mrb[4].mxu1 }
 0x102   :  { %v10978_v0 = vadd.f32 %v322_v55, %v122_v5  ;;  %v324_v39 = vpop.f32.mrb[5].mxu1 }
 0x103   :  { %v10980_v46 = vadd.f32 %v324_v39, %v126_v38 }
 0x104   :  { %15200 = vst [vmem:[#allocation61_spill] sm:$0xff] %v10978_v0 }
 0x105   :  { %15201 = vst [vmem:[#allocation62_spill] sm:$0xff] %v10980_v46  ;;  %v328_v27 = vpop.f32.mrb[6].mxu1  ;;  %v14954_v46 = vsub.s32 0, %v10963_v1 }
 0x106   :  { %v10982_v15 = vadd.f32 %v328_v27, %v122_v5  ;;  %v330_v8 = vpop.f32.mrb[7].mxu1 }
 0x107   :  { %v10984_v12 = vadd.f32 %v330_v8, %v126_v38 }
 0x108   :  { %15202 = vst [vmem:[#allocation63_spill] sm:$0xff] %v10982_v15 }
 0x109   :  { %15203 = vst [vmem:[#allocation64_spill] sm:$0xff] %v10984_v12  ;;  %v334_v59 = vpop.f32.mrb[8].mxu1 }
 0x10a   :  { %v10986_v21 = vadd.f32 %v334_v59, %v122_v5  ;;  %v336_v41 = vpop.f32.mrb[9].mxu1  ;;  %v14957_v59 = vsub.s32 1, %v10963_v1 }
 0x10b   :  { %v10988_v25 = vadd.f32 %v336_v41, %v126_v38  ;;  %v11002_v41 = vrot.slane %v109_v17, %v14954_v46 }
 0x10c   :  { %15204 = vst [vmem:[#allocation65_spill] sm:$0xff] %v10986_v21 }
 0x10d   :  { %15205 = vst [vmem:[#allocation66_spill] sm:$0xff] %v10988_v25  ;;  %v340_v3 = vpop.f32.mrb[10].mxu1 }
 0x10e   :  { %v10990_v30 = vadd.f32 %v340_v3, %v122_v5  ;;  %v342_v55 = vpop.f32.mrb[11].mxu1 }
 0x10f   :  { %v10992_v0 = vadd.f32 %v342_v55, %v126_v38 }
 0x110   :  { %15206 = vst [vmem:[#allocation67_spill] sm:$0xff] %v10990_v30 }
 0x111   :  { %15207 = vst [vmem:[#allocation68_spill] sm:$0xff] %v10992_v0  ;;  %v346_v39 = vpop.f32.mrb[12].mxu1 }
 0x112   :  { %v10995_v27 = vadd.f32 %v346_v39, %v122_v5  ;;  %v348_v15 = vpop.f32.mrb[13].mxu1  ;;  %v11010_v39 = vrot.slane %v109_v17, %v14957_v59  ;;  %v311_v59 = vadd.f32 %v310_v51, %v122_v5  ;;  %v15256_v51 = vld [vmem:[#allocation47_spill] sm:$0xff] }
 0x113   :  { %v10997_v8 = vadd.f32 %v348_v15, %v126_v38 }
 0x114   :  { %15208 = vst [vmem:[#allocation69_spill] sm:$0xff] %v10995_v27  ;;  %v313_v27 = vadd.f32 %v312_v43, %v126_v38 }
 0x115   :  { %15209 = vst [vmem:[#allocation70_spill] sm:$0xff] %v10997_v8  ;;  %v352_v21 = vpop.f32.mrb[14].mxu1 }
 0x116   :  { %v11004_v3 = vadd.f32 %v352_v21, %v122_v5  ;;  %v354_v30 = vpop.f32.mrb[15].mxu1  ;;  %v15257_v5 = vld [vmem:[#allocation48_spill] sm:$0xff] }
 0x117   :  { %v11006_v55 = vadd.f32 %v354_v30, %v126_v38 }
 0x118   :  { %15210 = vst [vmem:[#allocation71_spill] sm:$0xff] %v11004_v3  ;;  %v526_v0 = vpop.f32.mrb[0].mxu0 }
 0x119   :  { %15211 = vst [vmem:[#allocation72_spill] sm:$0xff] %v11006_v55  ;;  %v9514_v15 = vadd.f32 %v526_v0, %v11002_v41  ;;  %v597_v8 = vpop.f32.mrb[16].mxu1  ;;  %v528_v25 = vpop.f32.mrb[1].mxu0 }
 0x11a   :  { %v598_v12 = vpop.f32.mrb[17].mxu1  ;;  %v9515_v46 = vadd.f32 %v528_v25, %v11010_v39 }
 0x11b   :  { %v6164_v52 = vmul.f32 -1.442695, %v9514_v15  ;;  %v615_v42 = vadd.f32 %v598_v12, %v313_v27  ;;  %v15259_v27 = vld [vmem:[#allocation50_spill] sm:$0xff] }
 0x11c   :  { %v6165_v21 = vmul.f32 -1.442695, %v9515_v46  ;;  %v15255_v46 = vld [vmem:[#allocation46_spill] sm:$0xff] }
 0x11d   :  { %9547 = vpow2.f32 %v6164_v52 }
 0x11e   :  { %9549 = vpow2.f32 %v6165_v21  ;;  %v15263_v21 = vld [vmem:[#allocation54_spill] sm:$0xff] }
 0x127   :  { %v9548_v30 = vpop.eup %9547 }
 0x128   :  { %v605_v3 = vadd.f32 1.0, %v9548_v30  ;;  %v9550_v55 = vpop.eup %9549  ;;  %v15264_v30 = vld [vmem:[#allocation55_spill] sm:$0xff] }
 0x129   :  { %v612_v1 = vadd.f32 1.0, %v9550_v55  ;;  %v15262_v55 = vld [vmem:[#allocation53_spill] sm:$0xff] }
 0x12a   :  { %9551 = vrcp.f32 %v605_v3  ;;  %v15261_v3 = vld [vmem:[#allocation52_spill] sm:$0xff] }
 0x12b   :  { %9553 = vrcp.f32 %v612_v1  ;;  %v15258_v1 = vld [vmem:[#allocation49_spill] sm:$0xff] }
 0x134   :  { %v9552_v17 = vpop.eup %9551 }
 0x135   :  { %v616_v43 = vmul.f32 %v9552_v17, %v615_v42  ;;  %v9554_v38 = vpop.eup %9553  ;;  %v15212_v42 = vmov 0.0   ;;  %v15265_v17 = vld [vmem:[#allocation57_spill] sm:$0xff] }
 0x136   :  { %v619_v8 = vsub.f32 1.0, %v9554_v38  ;;  %v621_v25 = vmul.f32 %v9554_v38, %v10387_v37  ;;  %v15245_v37 = vld [vmem:[#allocation36_spill] sm:$0xff]  ;;  %v1406_v38 = vld [vmem:[%s14884_s2 + $0x218] sm:$0xff] }
 0x137   :  { %v617_v0 = vadd.f32 %v616_v43, %v311_v59  ;;  %v15260_v59 = vld [vmem:[#allocation51_spill] sm:$0xff]  ;;  %v1404_v43 = vld [vmem:[%s14884_s2 + $0x208] sm:$0xff] }
 0x139   :  { %9555 = vtanh.f32 %v617_v0  ;;  %v1408_v0 = vld [vmem:[%s14884_s2 + $0x228] sm:$0xff] }
 0x143   :  { %v9556_v15 = vpop.eup %9555 }
 0x144   :  { %v620_v12 = vmul.f32 %v9556_v15, %v619_v8  ;;  %v11126_v8 = vpack.c.bf16 %v1408_v0, %v1404_v43  ;;  %v1410_v15 = vld [vmem:[%s14884_s2 + $0x238] sm:$0xff]  ;;  %v1407_v43 = vld [vmem:[%s14884_s2 + $0x220] sm:$0xff] }
 0x146   :  { %v11015_v52 = vadd.f32 %v621_v25, %v620_v12  ;;  %v11131_v12 = vpack.c.bf16 %v1410_v15, %v1406_v38  ;;  %v6163_v25 = vld [vmem:[%s14887_s3 + $0x4] sm:$0xf]  ;;  %v1405_v38 = vld [vmem:[%s14884_s2 + $0x210] sm:$0xff] }
 0x147   :  { %v1409_v15 = vld [vmem:[%s14884_s2 + $0x230] sm:$0xff] }
 0x148   :  { %840 = vmatmul.mubr.f32.vlgmr.msra.gmra.mrb[16].mxu0 %v11015_v52  ;;  %911 = vmatmul.mubr.f32.vlgmr.msra.gmra.mrb[18].mxu1 %v11015_v52 }
 0x149   :  { %7981 = vmatpush1.bf16.msra.mxu0 %v10080_v47  ;;  %8013 = vmatpush1.bf16.msra.mxu1 %v10089_v50  ;;  %v15213_v47 = vld [vmem:[#allocation4_spill] sm:$0xff]  ;;  %v15214_v50 = vld [vmem:[#allocation5_spill] sm:$0xff] }
 0x14a   :  { %7983 = vmatprep.subr.bf16.mxu0 %v10098_v53  ;;  %8015 = vmatprep.subr.bf16.mxu1 %v10106_v56  ;;  %v15215_v53 = vld [vmem:[#allocation6_spill] sm:$0xff]  ;;  %v15216_v56 = vld [vmem:[#allocation7_spill] sm:$0xff] }
 0x14b   :  { %1007 = vmatprep.mubr.f32.mxu0 %v15212_v42  ;;  %1078 = vmatprep.mubr.f32.mxu1 %v15212_v42 }
 0x14d   :  { %7985 = vmatpush1.bf16.msra.mxu0 %v10118_v60  ;;  %8017 = vmatpush1.bf16.msra.mxu1 %v10128_v63  ;;  %v15217_v60 = vld [vmem:[#allocation8_spill] sm:$0xff]  ;;  %v15218_v63 = vld [vmem:[#allocation9_spill] sm:$0xff] }
 0x14e   :  { %7987 = vmatprep.subr.bf16.mxu0 %v10138_v2  ;;  %8019 = vmatprep.subr.bf16.mxu1 %v10147_v6  ;;  %v15219_v2 = vld [vmem:[#allocation10_spill] sm:$0xff]  ;;  %v15220_v6 = vld [vmem:[#allocation11_spill] sm:$0xff] }
 0x151   :  { %7989 = vmatpush1.bf16.msra.mxu0 %v10159_v10  ;;  %8021 = vmatpush1.bf16.msra.mxu1 %v10169_v13  ;;  %v15221_v10 = vld [vmem:[#allocation12_spill] sm:$0xff]  ;;  %v15222_v13 = vld [vmem:[#allocation13_spill] sm:$0xff] }
 0x152   :  { %7991 = vmatprep.subr.bf16.mxu0 %v10179_v16  ;;  %8023 = vmatprep.subr.bf16.mxu1 %v10188_v19  ;;  %v15223_v16 = vld [vmem:[#allocation14_spill] sm:$0xff]  ;;  %v15224_v19 = vld [vmem:[#allocation15_spill] sm:$0xff] }
 0x155   :  { %7993 = vmatpush1.bf16.msra.mxu0 %v10200_v23  ;;  %8025 = vmatpush1.bf16.msra.mxu1 %v10210_v26  ;;  %v15225_v23 = vld [vmem:[#allocation16_spill] sm:$0xff]  ;;  %v15226_v26 = vld [vmem:[#allocation17_spill] sm:$0xff] }
 0x156   :  { %7995 = vmatprep.subr.bf16.mxu0 %v10220_v29  ;;  %8027 = vmatprep.subr.bf16.mxu1 %v10229_v32  ;;  %v15227_v29 = vld [vmem:[#allocation18_spill] sm:$0xff]  ;;  %v15228_v32 = vld [vmem:[#allocation19_spill] sm:$0xff] }
 0x159   :  { %7997 = vmatpush1.bf16.msra.mxu0 %v10241_v36  ;;  %8029 = vmatpush1.bf16.msra.mxu1 %v10251_v40  ;;  %v15229_v36 = vld [vmem:[#allocation20_spill] sm:$0xff]  ;;  %v15230_v40 = vld [vmem:[#allocation21_spill] sm:$0xff] }
 0x15a   :  { %7999 = vmatprep.subr.bf16.mxu0 %v10261_v44  ;;  %8031 = vmatprep.subr.bf16.mxu1 %v10270_v48  ;;  %v15231_v44 = vld [vmem:[#allocation22_spill] sm:$0xff]  ;;  %v15232_v48 = vld [vmem:[#allocation23_spill] sm:$0xff] }
 0x15d   :  { %8001 = vmatpush1.bf16.msra.mxu0 %v10282_v54  ;;  %8033 = vmatpush1.bf16.msra.mxu1 %v10292_v58  ;;  %v15233_v54 = vld [vmem:[#allocation24_spill] sm:$0xff]  ;;  %v15234_v58 = vld [vmem:[#allocation25_spill] sm:$0xff] }
 0x15e   :  { %8003 = vmatprep.subr.bf16.mxu0 %v10302_v62  ;;  %8035 = vmatprep.subr.bf16.mxu1 %v10311_v4  ;;  %v15235_v62 = vld [vmem:[#allocation26_spill] sm:$0xff]  ;;  %v15236_v4 = vld [vmem:[#allocation27_spill] sm:$0xff] }
 0x161   :  { %8005 = vmatpush1.bf16.msra.mxu0 %v10323_v9  ;;  %8037 = vmatpush1.bf16.msra.mxu1 %v10333_v14  ;;  %v15237_v9 = vld [vmem:[#allocation28_spill] sm:$0xff]  ;;  %v15238_v14 = vld [vmem:[#allocation29_spill] sm:$0xff] }
 0x162   :  { %8007 = vmatprep.subr.bf16.mxu0 %v10343_v18  ;;  %8039 = vmatprep.subr.bf16.mxu1 %v10352_v22  ;;  %v15239_v18 = vld [vmem:[#allocation30_spill] sm:$0xff]  ;;  %v15240_v22 = vld [vmem:[#allocation31_spill] sm:$0xff] }
 0x165   :  { %8009 = vmatpush1.bf16.msra.mxu0 %v10364_v28  ;;  %8041 = vmatpush1.bf16.msra.mxu1 %v10374_v33  ;;  %v15241_v28 = vld [vmem:[#allocation32_spill] sm:$0xff]  ;;  %v15242_v33 = vld [vmem:[#allocation33_spill] sm:$0xff] }
 0x166   :  { %8043 = vmatprep.subr.bf16.mxu0 %v10378_v34  ;;  %8107 = vmatprep.subr.bf16.mxu1 %v10381_v35  ;;  %v15243_v34 = vld [vmem:[#allocation34_spill] sm:$0xff]  ;;  %v15244_v35 = vld [vmem:[#allocation35_spill] sm:$0xff] }
 0x168   :  { %1008 = vmatmul.mubr.f32.vlgmr.msra.gmra.mrb[2].mxu0 %v11015_v52  ;;  %1079 = vmatmul.mubr.f32.vlgmr.msra.gmra.mrb[20].mxu1 %v11015_v52 }
 0x169   :  { %8045 = vmatpush1.bf16.msra.mxu0 %v10405_v45  ;;  %8109 = vmatpush1.bf16.msra.mxu1 %v10410_v49  ;;  %v15246_v45 = vld [vmem:[#allocation37_spill] sm:$0xff]  ;;  %v15247_v49 = vld [vmem:[#allocation38_spill] sm:$0xff] }
 0x16a   :  { %8047 = vmatprep.subr.bf16.mxu0 %v10423_v57  ;;  %8111 = vmatprep.subr.bf16.mxu1 %v10428_v61  ;;  %v15248_v57 = vld [vmem:[#allocation39_spill] sm:$0xff]  ;;  %v15249_v61 = vld [vmem:[#allocation40_spill] sm:$0xff] }
 0x16d   :  { %8049 = vmatpush1.bf16.msra.mxu0 %v10441_v7  ;;  %8113 = vmatpush1.bf16.msra.mxu1 %v10446_v11  ;;  %v15250_v7 = vld [vmem:[#allocation41_spill] sm:$0xff]  ;;  %v15251_v11 = vld [vmem:[#allocation42_spill] sm:$0xff] }
 0x16e   :  { %8051 = vmatprep.subr.bf16.mxu0 %v10459_v20  ;;  %8115 = vmatprep.subr.bf16.mxu1 %v10464_v24  ;;  %v15252_v20 = vld [vmem:[#allocation43_spill] sm:$0xff]  ;;  %v15253_v24 = vld [vmem:[#allocation44_spill] sm:$0xff] }
 0x171   :  { %8053 = vmatpush1.bf16.msra.mxu0 %v10477_v31  ;;  %8117 = vmatpush1.bf16.msra.mxu1 %v15213_v47  ;;  %v15254_v31 = vld [vmem:[#allocation45_spill] sm:$0xff]  ;;  %v15266_v47 = vld [vmem:[#allocation58_spill] sm:$0xff] }
 0x172   :  { %8055 = vmatprep.subr.bf16.mxu0 %v15214_v50  ;;  %8119 = vmatprep.subr.bf16.mxu1 %v15215_v53  ;;  %v15267_v50 = vsub.s32 0, %v15266_v47 }
 0x174   :  { %v11140_v53 = vrot.slane %v6163_v25, %v15267_v50  ;;  %v1416_v50 = vld [vmem:[%s14884_s2 + $0x268] sm:$0xff] }
 0x175   :  { %8057 = vmatpush1.bf16.msra.mxu0 %v15216_v56  ;;  %8121 = vmatpush1.bf16.msra.mxu1 %v15217_v60 }
 0x176   :  { %8059 = vmatprep.subr.bf16.mxu0 %v15218_v63  ;;  %8123 = vmatprep.subr.bf16.mxu1 %v15219_v2  ;;  %15268 = vst [vmem:[#allocation4_spill] sm:$0xff] %v11140_v53  ;;  %v15269_v63 = vsub.s32 1, %v15266_v47 }
 0x178   :  { %v11144_v2 = vrot.slane %v6163_v25, %v15269_v63 }
 0x179   :  { %8061 = vmatpush1.bf16.msra.mxu0 %v15220_v6  ;;  %8125 = vmatpush1.bf16.msra.mxu1 %v15221_v10 }
 0x17a   :  { %8063 = vmatprep.subr.bf16.mxu0 %v15222_v13  ;;  %8127 = vmatprep.subr.bf16.mxu1 %v15223_v16  ;;  %15270 = vst [vmem:[#allocation5_spill] sm:$0xff] %v11144_v2 }
 0x17d   :  { %8065 = vmatpush1.bf16.msra.mxu0 %v15224_v19  ;;  %8129 = vmatpush1.bf16.msra.mxu1 %v15225_v23 }
 0x17e   :  { %8067 = vmatprep.subr.bf16.mxu0 %v15226_v26  ;;  %8131 = vmatprep.subr.bf16.mxu1 %v15227_v29 }
 0x181   :  { %8069 = vmatpush1.bf16.msra.mxu0 %v15228_v32  ;;  %8133 = vmatpush1.bf16.msra.mxu1 %v15229_v36  ;;  %v15271_v36 = vsub.s32 3, %v15266_v47 }
 0x182   :  { %8071 = vmatprep.subr.bf16.mxu0 %v15230_v40  ;;  %8135 = vmatprep.subr.bf16.mxu1 %v15231_v44  ;;  %v15273_v44 = vsub.s32 2, %v15266_v47 }
 0x183   :  { %v11150_v40 = vrot.slane %v6163_v25, %v15271_v36  ;;  %v1420_v36 = vld [vmem:[%s14884_s2 + $0x288] sm:$0xff] }
 0x185   :  { %8073 = vmatpush1.bf16.msra.mxu0 %v15232_v48  ;;  %8137 = vmatpush1.bf16.msra.mxu1 %v15233_v54  ;;  %15272 = vst [vmem:[#allocation6_spill] sm:$0xff] %v11150_v40  ;;  %v11154_v48 = vrot.slane %v6163_v25, %v15273_v44  ;;  %v1412_v25 = vld [vmem:[%s14884_s2 + $0x248] sm:$0xff] }
 0x186   :  { %8075 = vmatprep.subr.bf16.mxu0 %v15234_v58  ;;  %8139 = vmatprep.subr.bf16.mxu1 %v15235_v62  ;;  %v1424_v44 = vld [vmem:[%s14884_s2 + $0x2a8] sm:$0xff] }
 0x189   :  { %8077 = vmatpush1.bf16.msra.mxu0 %v15236_v4  ;;  %8141 = vmatpush1.bf16.msra.mxu1 %v15237_v9 }
 0x18a   :  { %8079 = vmatprep.subr.bf16.mxu0 %v15238_v14  ;;  %8143 = vmatprep.subr.bf16.mxu1 %v15239_v18 }
 0x18d   :  { %8081 = vmatpush1.bf16.msra.mxu0 %v15240_v22  ;;  %8145 = vmatpush1.bf16.msra.mxu1 %v15241_v28 }
 0x18e   :  { %8083 = vmatprep.subr.bf16.mxu0 %v15242_v33  ;;  %8147 = vmatprep.subr.bf16.mxu1 %v15243_v34 }
 0x191   :  { %8085 = vmatpush1.bf16.msra.mxu0 %v15244_v35  ;;  %8149 = vmatpush1.bf16.msra.mxu1 %v15245_v37  ;;  %v15274_v35 = vld [vmem:[#allocation60_spill] sm:$0xff] }
 0x192   :  { %8087 = vmatprep.subr.bf16.mxu0 %v15246_v45  ;;  %8151 = vmatprep.subr.bf16.mxu1 %v15247_v49 }
 0x195   :  { %8089 = vmatpush1.bf16.msra.mxu0 %v15248_v57  ;;  %8153 = vmatpush1.bf16.msra.mxu1 %v15249_v61 }
 0x196   :  { %8091 = vmatprep.subr.bf16.mxu0 %v15250_v7  ;;  %8155 = vmatprep.subr.bf16.mxu1 %v15251_v11 }
 0x199   :  { %8093 = vmatpush1.bf16.msra.mxu0 %v15252_v20  ;;  %8157 = vmatpush1.bf16.msra.mxu1 %v15253_v24  ;;  %v15275_v24 = vld [vmem:[#allocation56_spill] sm:$0xff] }
 0x19a   :  { %8095 = vmatprep.subr.bf16.mxu0 %v15254_v31  ;;  %8159 = vmatprep.subr.bf16.mxu1 %v15255_v46 }
 0x19d   :  { %8097 = vmatpush1.bf16.msra.mxu0 %v15256_v51  ;;  %8161 = vmatpush1.bf16.msra.mxu1 %v15257_v5 }
 0x19e   :  { %8099 = vmatprep.subr.bf16.mxu0 %v15258_v1  ;;  %8163 = vmatprep.subr.bf16.mxu1 %v15259_v27 }
 0x1a1   :  { %8101 = vmatpush1.bf16.msra.mxu0 %v15260_v59  ;;  %8165 = vmatpush1.bf16.msra.mxu1 %v15261_v3 }
 0x1a2   :  { %8103 = vmatprep.subr.bf16.mxu0 %v15262_v55  ;;  %8167 = vmatprep.subr.bf16.mxu1 %v15263_v21  ;;  %v15277_v55 = vld [vmem:[#allocation59_spill] sm:$0xff] }
 0x1a5   :  { %8105 = vmatpush1.bf16.msra.mxu0 %v15264_v30  ;;  %8169 = vmatpush1.bf16.msra.mxu1 %v15265_v17  ;;  %v1403_v17 = vld [vmem:[%s14884_s2 + $0x200] sm:$0xff] }
 0x1a6   :  { %8171 = vmatprep.subr.bf16.mxu0 %v11126_v8  ;;  %8203 = vmatprep.subr.bf16.mxu1 %v11131_v12 }
 0x21b   :  { %v841_v56 = vpop.f32.mrb[16].mxu0  ;;  %v912_v60 = vpop.f32.mrb[18].mxu1 }
 0x21c   :  { %v842_v6 = vadd.f32 %v841_v56, %v11140_v53  ;;  %v843_v10 = vpop.f32.mrb[17].mxu0  ;;  %v914_v13 = vpop.f32.mrb[19].mxu1  ;;  %v913_v4 = vadd.f32 %v912_v60, %v11154_v48  ;;  %v1414_v56 = vld [vmem:[%s14884_s2 + $0x258] sm:$0xff] }
 0x21d   :  { %v844_v19 = vadd.f32 %v843_v10, %v11144_v2  ;;  %v915_v58 = vadd.f32 %v914_v13, %v11150_v40  ;;  %v1418_v60 = vld [vmem:[%s14884_s2 + $0x278] sm:$0xff]  ;;  %v11192_v10 = vpack.c.bf16 %v1407_v43, %v1403_v17  ;;  %v11194_v13 = vpack.c.bf16 %v1409_v15, %v1405_v38  ;;  %v1437_v43 = vld [vmem:[%s14884_s2 + $0x310] sm:$0xff]  ;;  %v1444_v38 = vld [vmem:[%s14884_s2 + $0x348] sm:$0xff] }
 0x21e   :  { %v6295_v16 = vmul.f32 -1.442695, %v842_v6  ;;  %v1448_v15 = vld [vmem:[%s14884_s2 + $0x368] sm:$0xff] }
 0x21f   :  { %v6296_v23 = vmul.f32 -1.442695, %v844_v19  ;;  %v1415_v19 = vld [vmem:[%s14884_s2 + $0x260] sm:$0xff] }
 0x220   :  { %9557 = vpow2.f32 %v6295_v16  ;;  %v1411_v16 = vld [vmem:[%s14884_s2 + $0x240] sm:$0xff] }
 0x221   :  { %9559 = vpow2.f32 %v6296_v23 }
 0x22a   :  { %v9558_v26 = vpop.eup %9557 }
 0x22b   :  { %v920_v29 = vadd.f32 1.0, %v9558_v26  ;;  %v9560_v32 = vpop.eup %9559  ;;  %v11204_v26 = vpack.c.bf16 %v1416_v50, %v1412_v25  ;;  %v1446_v25 = vld [vmem:[%s14884_s2 + $0x358] sm:$0xff] }
 0x22c   :  { %v926_v54 = vadd.f32 1.0, %v9560_v32  ;;  %v1417_v32 = vld [vmem:[%s14884_s2 + $0x270] sm:$0xff] }
 0x22d   :  { %9561 = vrcp.f32 %v920_v29  ;;  %v11206_v29 = vpack.c.bf16 %v1418_v60, %v1414_v56  ;;  %v1443_v60 = vld [vmem:[%s14884_s2 + $0x340] sm:$0xff] }
 0x22e   :  { %9563 = vrcp.f32 %v926_v54  ;;  %v1422_v54 = vld [vmem:[%s14884_s2 + $0x298] sm:$0xff] }
 0x237   :  { %v9562_v62 = vpop.eup %9561 }
 0x238   :  { %v929_v9 = vmul.f32 %v9562_v62, %v915_v58  ;;  %v9564_v57 = vpop.eup %9563  ;;  %v1426_v58 = vld [vmem:[%s14884_s2 + $0x2b8] sm:$0xff]  ;;  %v11230_v62 = vpack.c.bf16 %v1415_v19, %v1411_v16  ;;  %v1445_v19 = vld [vmem:[%s14884_s2 + $0x350] sm:$0xff] }
 0x239   :  { %v932_v7 = vsub.f32 1.0, %v9564_v57  ;;  %v934_v31 = vmul.f32 %v9564_v57, %v15275_v24  ;;  %v1429_v24 = vld [vmem:[%s14884_s2 + $0x2d0] sm:$0xff] }
 0x23a   :  { %v930_v14 = vadd.f32 %v929_v9, %v913_v4  ;;  %v1419_v9 = vld [vmem:[%s14884_s2 + $0x280] sm:$0xff] }
 0x23b   :  { %v1009_v18 = vpop.f32.mrb[2].mxu0  ;;  %v1080_v22 = vpop.f32.mrb[20].mxu1 }
 0x23c   :  { %9565 = vtanh.f32 %v930_v14  ;;  %v9516_v28 = vadd.f32 %v1009_v18, %v11002_v41  ;;  %v1011_v33 = vpop.f32.mrb[3].mxu0  ;;  %v1081_v34 = vpop.f32.mrb[21].mxu1  ;;  %v1423_v14 = vld [vmem:[%s14884_s2 + $0x2a0] sm:$0xff]  ;;  %v11242_v18 = vpack.c.bf16 %v1424_v44, %v1420_v36  ;;  %v11244_v22 = vpack.c.bf16 %v1426_v58, %v1422_v54  ;;  %v1456_v36 = vld [vmem:[%s14884_s2 + $0x3a8] sm:$0xff]  ;;  %v1454_v44 = vld [vmem:[%s14884_s2 + $0x398] sm:$0xff] }
 0x23d   :  { %v1098_v37 = vadd.f32 %v1081_v34, %v15274_v35  ;;  %v9517_v49 = vadd.f32 %v1011_v33, %v11010_v39  ;;  %v1425_v33 = vld [vmem:[%s14884_s2 + $0x2b0] sm:$0xff]  ;;  %v1428_v34 = vld [vmem:[%s14884_s2 + $0x2c8] sm:$0xff]  ;;  %v1458_v54 = vld [vmem:[%s14884_s2 + $0x3b8] sm:$0xff] }
 0x23e   :  { %v6297_v45 = vmul.f32 -1.442695, %v9516_v28  ;;  %v1421_v28 = vld [vmem:[%s14884_s2 + $0x290] sm:$0xff]  ;;  %v1432_v35 = vld [vmem:[%s14884_s2 + $0x2e8] sm:$0xff] }
 0x23f   :  { %v6298_v61 = vmul.f32 -1.442695, %v9517_v49  ;;  %v11268_v49 = vpack.c.bf16 %v1423_v14, %v1419_v9  ;;  %v11270_v57 = vpack.c.bf16 %v1425_v33, %v1421_v28  ;;  %v1451_v14 = vld [vmem:[%s14884_s2 + $0x380] sm:$0xff] }
 0x240   :  { %9567 = vpow2.f32 %v6297_v45  ;;  %v1434_v45 = vld [vmem:[%s14884_s2 + $0x2f8] sm:$0xff]  ;;  %v1455_v28 = vld [vmem:[%s14884_s2 + $0x3a0] sm:$0xff] }
 0x241   :  { %9569 = vpow2.f32 %v6298_v61  ;;  %v1427_v61 = vld [vmem:[%s14884_s2 + $0x2c0] sm:$0xff] }
 0x246   :  { %v9566_v11 = vpop.eup %9565 }
 0x247   :  { %v933_v20 = vmul.f32 %v9566_v11, %v932_v7  ;;  %v1431_v7 = vld [vmem:[%s14884_s2 + $0x2e0] sm:$0xff]  ;;  %v11280_v11 = vpack.c.bf16 %v1432_v35, %v1428_v34  ;;  %v11390_v34 = vpack.c.bf16 %v1458_v54, %v1454_v44  ;;  %v1453_v35 = vld [vmem:[%s14884_s2 + $0x390] sm:$0xff] }
 0x248   :  { %v6433_v44 = vld [vmem:[%s14884_s2 + $0x410] sm:$0xff] }
 0x249   :  { %v11162_v46 = vadd.f32 %v934_v31, %v933_v20  ;;  %v1433_v31 = vld [vmem:[%s14884_s2 + $0x2f0] sm:$0xff] }
 0x24a   :  { %v9568_v51 = vpop.eup %9567  ;;  %v6437_v54 = vld [vmem:[%s14884_s2 + $0x430] sm:$0xff] }
 0x24b   :  { %15276 = vst [vmem:[#allocation7_spill] sm:$0xff] %v11162_v46  ;;  %v1088_v5 = vadd.f32 1.0, %v9568_v51  ;;  %1299 = vmatprep.mubr.f32.mxu0 %v11162_v46  ;;  %1370 = vmatprep.mubr.f32.mxu1 %v11162_v46  ;;  %v9570_v1 = vpop.eup %9569  ;;  %v1436_v51 = vld [vmem:[%s14884_s2 + $0x308] sm:$0xff] }
 0x24c   :  { %v1095_v27 = vadd.f32 1.0, %v9570_v1  ;;  %v1438_v1 = vld [vmem:[%s14884_s2 + $0x318] sm:$0xff] }
 0x24d   :  { %9571 = vrcp.f32 %v1088_v5  ;;  %v1440_v5 = vld [vmem:[%s14884_s2 + $0x328] sm:$0xff] }
 0x24e   :  { %9573 = vrcp.f32 %v1095_v27  ;;  %v1442_v27 = vld [vmem:[%s14884_s2 + $0x338] sm:$0xff] }
 0x24f   :  { %v11318_v17 = vpack.c.bf16 %v1442_v27, %v1438_v1 }
 0x257   :  { %v9572_v59 = vpop.eup %9571 }
 0x258   :  { %v1099_v3 = vmul.f32 %v9572_v59, %v1098_v37  ;;  %v9574_v30 = vpop.eup %9573  ;;  %v1430_v37 = vld [vmem:[%s14884_s2 + $0x2d8] sm:$0xff]  ;;  %v11304_v59 = vpack.c.bf16 %v1431_v7, %v1427_v61  ;;  %v1464_v61 = vld [vmem:[%s14884_s2 + $0x3e8] sm:$0xff] }
 0x259   :  { %v1102_v0 = vsub.f32 1.0, %v9574_v30  ;;  %v1104_v6 = vmul.f32 %v9574_v30, %v11015_v52  ;;  %v1413_v52 = vld [vmem:[%s14884_s2 + $0x250] sm:$0xff]  ;;  %v11282_v20 = vpack.c.bf16 %v1434_v45, %v1430_v37  ;;  %v11316_v30 = vpack.c.bf16 %v1440_v5, %v1436_v51  ;;  %v1460_v45 = vld [vmem:[%s14884_s2 + $0x3c8] sm:$0xff]  ;;  %v1462_v7 = vld [vmem:[%s14884_s2 + $0x3d8] sm:$0xff] }
 0x25a   :  { %v1100_v21 = vadd.f32 %v1099_v3, %v15277_v55  ;;  %v11232_v4 = vpack.c.bf16 %v1417_v32, %v1413_v52  ;;  %v11306_v3 = vpack.c.bf16 %v1433_v31, %v1429_v24  ;;  %v1435_v55 = vld [vmem:[%s14884_s2 + $0x300] sm:$0xff]  ;;  %v1449_v52 = vld [vmem:[%s14884_s2 + $0x370] sm:$0xff]  ;;  %v1452_v32 = vld [vmem:[%s14884_s2 + $0x388] sm:$0xff]  ;;  %v11412_v31 = vpack.c.bf16 %v1455_v28, %v1451_v14 }
 0x25b   :  { %v11378_v9 = vpack.c.bf16 %v1449_v52, %v1445_v19  ;;  %v11388_v33 = vpack.c.bf16 %v1456_v36, %v1452_v32  ;;  %v1457_v37 = vld [vmem:[%s14884_s2 + $0x3b0] sm:$0xff]  ;;  %v1466_v24 = vld [vmem:[%s14884_s2 + $0x3f8] sm:$0xff]  ;;  %v1459_v5 = vld [vmem:[%s14884_s2 + $0x3c0] sm:$0xff]  ;;  %v11421_v1 = vpack.c.bf16 %v1464_v61, %v1460_v45  ;;  %v11477_v14 = vpack.c.bf16 %v6437_v54, %v6433_v44 }
 0x25c   :  { %9575 = vtanh.f32 %v1100_v21  ;;  %v1439_v21 = vld [vmem:[%s14884_s2 + $0x320] sm:$0xff]  ;;  %v11414_v51 = vpack.c.bf16 %v1457_v37, %v1453_v35  ;;  %v11423_v27 = vpack.c.bf16 %v1466_v24, %v1462_v7  ;;  %v6440_v28 = vld [vmem:[%s14884_s2 + $0x448] sm:$0xff]  ;;  %v6442_v37 = vld [vmem:[%s14884_s2 + $0x458] sm:$0xff] }
 0x25d   :  { %v11340_v50 = vpack.c.bf16 %v1439_v21, %v1435_v55  ;;  %v1463_v55 = vld [vmem:[%s14884_s2 + $0x3e0] sm:$0xff]  ;;  %v1461_v21 = vld [vmem:[%s14884_s2 + $0x3d0] sm:$0xff]  ;;  %v6444_v35 = vld [vmem:[%s14884_s2 + $0x468] sm:$0xff] }
 0x25e   :  { %v6431_v19 = vld [vmem:[%s14884_s2 + $0x400] sm:$0xff]  ;;  %v11491_v45 = vpack.c.bf16 %v6444_v35, %v6440_v28  ;;  %v6446_v61 = vld [vmem:[%s14884_s2 + $0x478] sm:$0xff] }
 0x25f   :  { %v6435_v52 = vld [vmem:[%s14884_s2 + $0x420] sm:$0xff] }
 0x260   :  { %v11468_v36 = vpack.c.bf16 %v6435_v52, %v6431_v19  ;;  %v6439_v7 = vld [vmem:[%s14884_s2 + $0x440] sm:$0xff]  ;;  %v6454_v52 = vld [vmem:[%s14884_s2 + $0x4b8] sm:$0xff] }
 0x261   :  { %v6443_v24 = vld [vmem:[%s14884_s2 + $0x460] sm:$0xff] }
 0x262   :  { %v6447_v44 = vld [vmem:[%s14884_s2 + $0x480] sm:$0xff] }
 0x263   :  { %v6451_v54 = vld [vmem:[%s14884_s2 + $0x4a0] sm:$0xff] }
 0x264   :  { %v11540_v35 = vpack.c.bf16 %v6451_v54, %v6447_v44 }
 0x266   :  { %v9576_v47 = vpop.eup %9575  ;;  %15279 = vst [vmem:[#allocation9_spill] sm:$0xff] %v11540_v35 }
 0x267   :  { %v1103_v63 = vmul.f32 %v9576_v47, %v1102_v0  ;;  %v1441_v0 = vld [vmem:[%s14884_s2 + $0x330] sm:$0xff]  ;;  %v1450_v47 = vld [vmem:[%s14884_s2 + $0x378] sm:$0xff] }
 0x268   :  { %v11342_v56 = vpack.c.bf16 %v1441_v0, %v1437_v43  ;;  %v11354_v16 = vpack.c.bf16 %v1450_v47, %v1446_v25  ;;  %v1465_v43 = vld [vmem:[%s14884_s2 + $0x3f0] sm:$0xff]  ;;  %v11436_v0 = vpack.c.bf16 %v1463_v55, %v1459_v5  ;;  %v6436_v25 = vld [vmem:[%s14884_s2 + $0x428] sm:$0xff]  ;;  %v6434_v47 = vld [vmem:[%s14884_s2 + $0x418] sm:$0xff]  ;;  %v11502_v5 = vpack.c.bf16 %v6446_v61, %v6442_v37 }
 0x269   :  { %v11202_v23 = vadd.f32 %v1104_v6, %v1103_v63  ;;  %v1447_v63 = vld [vmem:[%s14884_s2 + $0x360] sm:$0xff]  ;;  %v11352_v6 = vpack.c.bf16 %v1448_v15, %v1444_v38  ;;  %v11438_v38 = vpack.c.bf16 %v1465_v43, %v1461_v21  ;;  %v6432_v15 = vld [vmem:[%s14884_s2 + $0x408] sm:$0xff]  ;;  %v11504_v55 = vpack.c.bf16 %v6443_v24, %v6439_v7  ;;  %v6441_v21 = vld [vmem:[%s14884_s2 + $0x450] sm:$0xff] }
 0x26a   :  { %v11376_v58 = vpack.c.bf16 %v1447_v63, %v1443_v60  ;;  %v11455_v60 = vpack.c.bf16 %v6436_v25, %v6432_v15  ;;  %v6438_v63 = vld [vmem:[%s14884_s2 + $0x438] sm:$0xff]  ;;  %v6445_v43 = vld [vmem:[%s14884_s2 + $0x470] sm:$0xff]  ;;  %v6448_v25 = vld [vmem:[%s14884_s2 + $0x488] sm:$0xff] }
 0x26b   :  { %1300 = vmatmul.mubr.f32.vlgmr.msra.gmra.mrb[18].mxu0 %v11202_v23  ;;  %1371 = vmatmul.mubr.f32.vlgmr.msra.gmra.mrb[22].mxu1 %v11202_v23  ;;  %v11466_v32 = vpack.c.bf16 %v6438_v63, %v6434_v47  ;;  %v11513_v15 = vpack.c.bf16 %v6445_v43, %v6441_v21  ;;  %v6452_v47 = vld [vmem:[%s14884_s2 + $0x4a8] sm:$0xff]  ;;  %v6450_v63 = vld [vmem:[%s14884_s2 + $0x498] sm:$0xff]  ;;  %v6449_v37 = vld [vmem:[%s14884_s2 + $0x490] sm:$0xff] }
 0x26c   :  { %8173 = vmatpush1.bf16.msra.mxu0 %v11192_v10  ;;  %8205 = vmatpush1.bf16.msra.mxu1 %v11194_v13  ;;  %v11527_v19 = vpack.c.bf16 %v6452_v47, %v6448_v25  ;;  %v11538_v28 = vpack.c.bf16 %v6454_v52, %v6450_v63  ;;  %v6453_v61 = vld [vmem:[%s14884_s2 + $0x4b0] sm:$0xff]  ;;  %v6456_v24 = vld [vmem:[%s14884_s2 + $0x4c8] sm:$0xff]  ;;  %v6458_v43 = vld [vmem:[%s14884_s2 + $0x4d8] sm:$0xff] }
 0x26d   :  { %8175 = vmatprep.subr.bf16.mxu0 %v11204_v26  ;;  %8207 = vmatprep.subr.bf16.mxu1 %v11206_v29  ;;  %v11549_v7 = vpack.c.bf16 %v6453_v61, %v6449_v37  ;;  %v6460_v21 = vld [vmem:[%s14884_s2 + $0x4e8] sm:$0xff]  ;;  %v6462_v47 = vld [vmem:[%s14884_s2 + $0x4f8] sm:$0xff]  ;;  %v6455_v63 = vld [vmem:[%s14884_s2 + $0x4c0] sm:$0xff] }
 0x26e   :  { %1531 = vmatprep.mubr.f32.mxu0 %v15212_v42  ;;  %1602 = vmatprep.mubr.f32.mxu1 %v15212_v42  ;;  %15278 = vst [vmem:[#allocation8_spill] sm:$0xff] %v11538_v28  ;;  %v11563_v25 = vpack.c.bf16 %v6460_v21, %v6456_v24  ;;  %v6459_v52 = vld [vmem:[%s14884_s2 + $0x4e0] sm:$0xff]  ;;  %v11574_v44 = vpack.c.bf16 %v6462_v47, %v6458_v43  ;;  %v6457_v37 = vld [vmem:[%s14884_s2 + $0x4d0] sm:$0xff]  ;;  %v6464_v21 = vld [vmem:[%s14884_s2 + $0x508] sm:$0xff] }
 0x26f   :  { %15280 = vst [vmem:[#allocation10_spill] sm:$0xff] %v11549_v7  ;;  %v11576_v54 = vpack.c.bf16 %v6459_v52, %v6455_v63  ;;  %v6461_v61 = vld [vmem:[%s14884_s2 + $0x4f0] sm:$0xff]  ;;  %v6468_v43 = vld [vmem:[%s14884_s2 + $0x528] sm:$0xff]  ;;  %v6466_v47 = vld [vmem:[%s14884_s2 + $0x518] sm:$0xff] }
 0x270   :  { %8177 = vmatpush1.bf16.msra.mxu0 %v11230_v62  ;;  %8209 = vmatpush1.bf16.msra.mxu1 %v11232_v4  ;;  %15281 = vst [vmem:[#allocation11_spill] sm:$0xff] %v11563_v25  ;;  %15282 = vst [vmem:[#allocation12_spill] sm:$0xff] %v11574_v44  ;;  %v11585_v24 = vpack.c.bf16 %v6461_v61, %v6457_v37  ;;  %v11599_v63 = vpack.c.bf16 %v6468_v43, %v6464_v21  ;;  %v6470_v52 = vld [vmem:[%s14884_s2 + $0x538] sm:$0xff]  ;;  %v6463_v37 = vld [vmem:[%s14884_s2 + $0x500] sm:$0xff] }
 0x271   :  { %8179 = vmatprep.subr.bf16.mxu0 %v11242_v18  ;;  %8211 = vmatprep.subr.bf16.mxu1 %v11244_v22  ;;  %15283 = vst [vmem:[#allocation13_spill] sm:$0xff] %v11576_v54  ;;  %v6467_v61 = vld [vmem:[%s14884_s2 + $0x520] sm:$0xff]  ;;  %v6465_v21 = vld [vmem:[%s14884_s2 + $0x510] sm:$0xff] }
 0x272   :  { %15284 = vst [vmem:[#allocation14_spill] sm:$0xff] %v11585_v24  ;;  %15285 = vst [vmem:[#allocation15_spill] sm:$0xff] %v11599_v63  ;;  %v6469_v43 = vld [vmem:[%s14884_s2 + $0x530] sm:$0xff] }
 0x274   :  { %8181 = vmatpush1.bf16.msra.mxu0 %v11268_v49  ;;  %8213 = vmatpush1.bf16.msra.mxu1 %v11270_v57 }
 0x275   :  { %8183 = vmatprep.subr.bf16.mxu0 %v11280_v11  ;;  %8215 = vmatprep.subr.bf16.mxu1 %v11282_v20 }
 0x278   :  { %8185 = vmatpush1.bf16.msra.mxu0 %v11304_v59  ;;  %8217 = vmatpush1.bf16.msra.mxu1 %v11306_v3 }
 0x279   :  { %8187 = vmatprep.subr.bf16.mxu0 %v11316_v30  ;;  %8219 = vmatprep.subr.bf16.mxu1 %v11318_v17 }
 0x27c   :  { %8189 = vmatpush1.bf16.msra.mxu0 %v11340_v50  ;;  %8221 = vmatpush1.bf16.msra.mxu1 %v11342_v56 }
 0x27d   :  { %8191 = vmatprep.subr.bf16.mxu0 %v11352_v6  ;;  %8223 = vmatprep.subr.bf16.mxu1 %v11354_v16 }
 0x280   :  { %8193 = vmatpush1.bf16.msra.mxu0 %v11376_v58  ;;  %8225 = vmatpush1.bf16.msra.mxu1 %v11378_v9 }
 0x281   :  { %8195 = vmatprep.subr.bf16.mxu0 %v11388_v33  ;;  %8227 = vmatprep.subr.bf16.mxu1 %v11390_v34 }
 0x284   :  { %8197 = vmatpush1.bf16.msra.mxu0 %v11412_v31  ;;  %8229 = vmatpush1.bf16.msra.mxu1 %v11414_v51 }
 0x285   :  { %8199 = vmatprep.subr.bf16.mxu0 %v11421_v1  ;;  %8231 = vmatprep.subr.bf16.mxu1 %v11423_v27 }
 0x288   :  { %8201 = vmatpush1.bf16.msra.mxu0 %v11436_v0  ;;  %8233 = vmatpush1.bf16.msra.mxu1 %v11438_v38 }
 0x289   :  { %8235 = vmatprep.subr.bf16.mxu0 %v11455_v60  ;;  %8299 = vmatprep.subr.bf16.mxu1 %v11466_v32 }
 0x28b   :  { %1532 = vmatmul.mubr.f32.vlgmr.msra.gmra.mrb[4].mxu0 %v11202_v23  ;;  %1603 = vmatmul.mubr.f32.vlgmr.msra.gmra.mrb[24].mxu1 %v11202_v23 }
 0x28c   :  { %8237 = vmatpush1.bf16.msra.mxu0 %v11468_v36  ;;  %8301 = vmatpush1.bf16.msra.mxu1 %v11477_v14 }
 0x28d   :  { %8239 = vmatprep.subr.bf16.mxu0 %v11491_v45  ;;  %8303 = vmatprep.subr.bf16.mxu1 %v11502_v5 }
 0x290   :  { %8241 = vmatpush1.bf16.msra.mxu0 %v11504_v55  ;;  %8305 = vmatpush1.bf16.msra.mxu1 %v11513_v15 }
 0x291   :  { %8243 = vmatprep.subr.bf16.mxu0 %v11527_v19  ;;  %8307 = vmatprep.subr.bf16.mxu1 %v11538_v28 }
 0x294   :  { %8245 = vmatpush1.bf16.msra.mxu0 %v11540_v35  ;;  %8309 = vmatpush1.bf16.msra.mxu1 %v11549_v7  ;;  %v6545_v7 = vld [vmem:[%s14884_s2 + $0x790] sm:$0xff] }
 0x295   :  { %8247 = vmatprep.subr.bf16.mxu0 %v11563_v25  ;;  %8311 = vmatprep.subr.bf16.mxu1 %v11574_v44  ;;  %v11612_v44 = vpack.c.bf16 %v6467_v61, %v6463_v37  ;;  %v6474_v37 = vld [vmem:[%s14884_s2 + $0x558] sm:$0xff] }
 0x297   :  { %15287 = vst [vmem:[#allocation17_spill] sm:$0xff] %v11612_v44 }
 0x298   :  { %8249 = vmatpush1.bf16.msra.mxu0 %v11576_v54  ;;  %8313 = vmatpush1.bf16.msra.mxu1 %v11585_v24  ;;  %v11610_v54 = vpack.c.bf16 %v6470_v52, %v6466_v47  ;;  %v11621_v24 = vpack.c.bf16 %v6469_v43, %v6465_v21  ;;  %v6472_v47 = vld [vmem:[%s14884_s2 + $0x548] sm:$0xff]  ;;  %v6478_v21 = vld [vmem:[%s14884_s2 + $0x578] sm:$0xff]  ;;  %v6471_v43 = vld [vmem:[%s14884_s2 + $0x540] sm:$0xff] }
 0x299   :  { %8251 = vmatprep.subr.bf16.mxu0 %v11599_v63  ;;  %v6476_v52 = vld [vmem:[%s14884_s2 + $0x568] sm:$0xff] }
 0x29a   :  { %15286 = vst [vmem:[#allocation16_spill] sm:$0xff] %v11610_v54  ;;  %15288 = vst [vmem:[#allocation18_spill] sm:$0xff] %v11621_v24  ;;  %8315 = vmatprep.subr.bf16.mxu1 %v11610_v54  ;;  %v11635_v61 = vpack.c.bf16 %v6476_v52, %v6472_v47  ;;  %v11646_v54 = vpack.c.bf16 %v6478_v21, %v6474_v37  ;;  %v6473_v47 = vld [vmem:[%s14884_s2 + $0x550] sm:$0xff]  ;;  %v6484_v37 = vld [vmem:[%s14884_s2 + $0x5a8] sm:$0xff] }
 0x29b   :  { %v6477_v52 = vld [vmem:[%s14884_s2 + $0x570] sm:$0xff]  ;;  %v6482_v21 = vld [vmem:[%s14884_s2 + $0x598] sm:$0xff] }
 0x29c   :  { %8253 = vmatpush1.bf16.msra.mxu0 %v11612_v44  ;;  %8317 = vmatpush1.bf16.msra.mxu1 %v11621_v24  ;;  %15289 = vst [vmem:[#allocation19_spill] sm:$0xff] %v11635_v61  ;;  %v6475_v44 = vld [vmem:[%s14884_s2 + $0x560] sm:$0xff]  ;;  %15290 = vst [vmem:[#allocation20_spill] sm:$0xff] %v11646_v54  ;;  %v11657_v24 = vpack.c.bf16 %v6477_v52, %v6473_v47  ;;  %v6486_v47 = vld [vmem:[%s14884_s2 + $0x5b8] sm:$0xff] }
 0x29d   :  { %v11648_v63 = vpack.c.bf16 %v6475_v44, %v6471_v43  ;;  %8255 = vmatprep.subr.bf16.mxu0 %v11635_v61  ;;  %8319 = vmatprep.subr.bf16.mxu1 %v11646_v54  ;;  %v6480_v44 = vld [vmem:[%s14884_s2 + $0x588] sm:$0xff]  ;;  %v6479_v52 = vld [vmem:[%s14884_s2 + $0x580] sm:$0xff]  ;;  %v11682_v54 = vpack.c.bf16 %v6486_v47, %v6482_v21  ;;  %v6490_v47 = vld [vmem:[%s14884_s2 + $0x5d8] sm:$0xff] }
 0x29e   :  { %15292 = vst [vmem:[#allocation22_spill] sm:$0xff] %v11657_v24  ;;  %v11671_v43 = vpack.c.bf16 %v6484_v37, %v6480_v44  ;;  %v6481_v44 = vld [vmem:[%s14884_s2 + $0x590] sm:$0xff]  ;;  %v6492_v21 = vld [vmem:[%s14884_s2 + $0x5e8] sm:$0xff] }
 0x29f   :  { %15291 = vst [vmem:[#allocation21_spill] sm:$0xff] %v11648_v63  ;;  %15294 = vst [vmem:[#allocation24_spill] sm:$0xff] %v11682_v54  ;;  %v6485_v37 = vld [vmem:[%s14884_s2 + $0x5b0] sm:$0xff] }
 0x2a0   :  { %8257 = vmatpush1.bf16.msra.mxu0 %v11648_v63  ;;  %8321 = vmatpush1.bf16.msra.mxu1 %v11657_v24  ;;  %15293 = vst [vmem:[#allocation23_spill] sm:$0xff] %v11671_v43  ;;  %v6483_v63 = vld [vmem:[%s14884_s2 + $0x5a0] sm:$0xff]  ;;  %v11693_v24 = vpack.c.bf16 %v6485_v37, %v6481_v44  ;;  %v6494_v44 = vld [vmem:[%s14884_s2 + $0x5f8] sm:$0xff] }
 0x2a1   :  { %v11684_v61 = vpack.c.bf16 %v6483_v63, %v6479_v52  ;;  %8259 = vmatprep.subr.bf16.mxu0 %v11671_v43  ;;  %8323 = vmatprep.subr.bf16.mxu1 %v11682_v54  ;;  %v6488_v63 = vld [vmem:[%s14884_s2 + $0x5c8] sm:$0xff]  ;;  %v6487_v37 = vld [vmem:[%s14884_s2 + $0x5c0] sm:$0xff]  ;;  %v11718_v54 = vpack.c.bf16 %v6494_v44, %v6490_v47  ;;  %v6498_v44 = vld [vmem:[%s14884_s2 + $0x618] sm:$0xff] }
 0x2a2   :  { %15296 = vst [vmem:[#allocation26_spill] sm:$0xff] %v11693_v24  ;;  %v11707_v52 = vpack.c.bf16 %v6492_v21, %v6488_v63  ;;  %v6489_v63 = vld [vmem:[%s14884_s2 + $0x5d0] sm:$0xff]  ;;  %v6500_v47 = vld [vmem:[%s14884_s2 + $0x628] sm:$0xff] }
 0x2a3   :  { %15295 = vst [vmem:[#allocation25_spill] sm:$0xff] %v11684_v61  ;;  %15298 = vst [vmem:[#allocation28_spill] sm:$0xff] %v11718_v54  ;;  %v6493_v21 = vld [vmem:[%s14884_s2 + $0x5f0] sm:$0xff] }
 0x2a4   :  { %8261 = vmatpush1.bf16.msra.mxu0 %v11684_v61  ;;  %8325 = vmatpush1.bf16.msra.mxu1 %v11693_v24  ;;  %15297 = vst [vmem:[#allocation27_spill] sm:$0xff] %v11707_v52  ;;  %v6491_v61 = vld [vmem:[%s14884_s2 + $0x5e0] sm:$0xff]  ;;  %v11729_v24 = vpack.c.bf16 %v6493_v21, %v6489_v63  ;;  %v6502_v63 = vld [vmem:[%s14884_s2 + $0x638] sm:$0xff] }
 0x2a5   :  { %v11720_v43 = vpack.c.bf16 %v6491_v61, %v6487_v37  ;;  %8263 = vmatprep.subr.bf16.mxu0 %v11707_v52  ;;  %8327 = vmatprep.subr.bf16.mxu1 %v11718_v54  ;;  %v6496_v61 = vld [vmem:[%s14884_s2 + $0x608] sm:$0xff]  ;;  %v6495_v21 = vld [vmem:[%s14884_s2 + $0x600] sm:$0xff]  ;;  %v11754_v54 = vpack.c.bf16 %v6502_v63, %v6498_v44  ;;  %v6506_v63 = vld [vmem:[%s14884_s2 + $0x658] sm:$0xff] }
 0x2a6   :  { %15300 = vst [vmem:[#allocation30_spill] sm:$0xff] %v11729_v24  ;;  %v11743_v37 = vpack.c.bf16 %v6500_v47, %v6496_v61  ;;  %v6497_v61 = vld [vmem:[%s14884_s2 + $0x610] sm:$0xff]  ;;  %v6508_v44 = vld [vmem:[%s14884_s2 + $0x668] sm:$0xff] }
 0x2a7   :  { %15299 = vst [vmem:[#allocation29_spill] sm:$0xff] %v11720_v43  ;;  %15302 = vst [vmem:[#allocation32_spill] sm:$0xff] %v11754_v54  ;;  %v6501_v47 = vld [vmem:[%s14884_s2 + $0x630] sm:$0xff] }
 0x2a8   :  { %8265 = vmatpush1.bf16.msra.mxu0 %v11720_v43  ;;  %8329 = vmatpush1.bf16.msra.mxu1 %v11729_v24  ;;  %15301 = vst [vmem:[#allocation31_spill] sm:$0xff] %v11743_v37  ;;  %v6499_v43 = vld [vmem:[%s14884_s2 + $0x620] sm:$0xff]  ;;  %v11765_v24 = vpack.c.bf16 %v6501_v47, %v6497_v61  ;;  %v6510_v61 = vld [vmem:[%s14884_s2 + $0x678] sm:$0xff] }
 0x2a9   :  { %v11756_v52 = vpack.c.bf16 %v6499_v43, %v6495_v21  ;;  %8267 = vmatprep.subr.bf16.mxu0 %v11743_v37  ;;  %8331 = vmatprep.subr.bf16.mxu1 %v11754_v54  ;;  %v6504_v43 = vld [vmem:[%s14884_s2 + $0x648] sm:$0xff]  ;;  %v6503_v47 = vld [vmem:[%s14884_s2 + $0x640] sm:$0xff]  ;;  %v11790_v54 = vpack.c.bf16 %v6510_v61, %v6506_v63  ;;  %v6514_v61 = vld [vmem:[%s14884_s2 + $0x698] sm:$0xff] }
 0x2aa   :  { %15304 = vst [vmem:[#allocation34_spill] sm:$0xff] %v11765_v24  ;;  %v11779_v21 = vpack.c.bf16 %v6508_v44, %v6504_v43  ;;  %v6505_v43 = vld [vmem:[%s14884_s2 + $0x650] sm:$0xff]  ;;  %v6516_v63 = vld [vmem:[%s14884_s2 + $0x6a8] sm:$0xff] }
 0x2ab   :  { %15303 = vst [vmem:[#allocation33_spill] sm:$0xff] %v11756_v52  ;;  %15306 = vst [vmem:[#allocation36_spill] sm:$0xff] %v11790_v54  ;;  %v6509_v44 = vld [vmem:[%s14884_s2 + $0x670] sm:$0xff] }
 0x2ac   :  { %8269 = vmatpush1.bf16.msra.mxu0 %v11756_v52  ;;  %8333 = vmatpush1.bf16.msra.mxu1 %v11765_v24  ;;  %15305 = vst [vmem:[#allocation35_spill] sm:$0xff] %v11779_v21  ;;  %v6507_v52 = vld [vmem:[%s14884_s2 + $0x660] sm:$0xff]  ;;  %v11801_v24 = vpack.c.bf16 %v6509_v44, %v6505_v43  ;;  %v6518_v43 = vld [vmem:[%s14884_s2 + $0x6b8] sm:$0xff] }
 0x2ad   :  { %v11792_v37 = vpack.c.bf16 %v6507_v52, %v6503_v47  ;;  %8271 = vmatprep.subr.bf16.mxu0 %v11779_v21  ;;  %8335 = vmatprep.subr.bf16.mxu1 %v11790_v54  ;;  %v6512_v52 = vld [vmem:[%s14884_s2 + $0x688] sm:$0xff]  ;;  %v6511_v44 = vld [vmem:[%s14884_s2 + $0x680] sm:$0xff]  ;;  %v11826_v54 = vpack.c.bf16 %v6518_v43, %v6514_v61  ;;  %v6522_v43 = vld [vmem:[%s14884_s2 + $0x6d8] sm:$0xff] }
 0x2ae   :  { %15308 = vst [vmem:[#allocation38_spill] sm:$0xff] %v11801_v24  ;;  %v11815_v47 = vpack.c.bf16 %v6516_v63, %v6512_v52  ;;  %v6513_v52 = vld [vmem:[%s14884_s2 + $0x690] sm:$0xff]  ;;  %v6524_v61 = vld [vmem:[%s14884_s2 + $0x6e8] sm:$0xff] }
 0x2af   :  { %15307 = vst [vmem:[#allocation37_spill] sm:$0xff] %v11792_v37  ;;  %15310 = vst [vmem:[#allocation40_spill] sm:$0xff] %v11826_v54  ;;  %v6517_v63 = vld [vmem:[%s14884_s2 + $0x6b0] sm:$0xff] }
 0x2b0   :  { %8273 = vmatpush1.bf16.msra.mxu0 %v11792_v37  ;;  %8337 = vmatpush1.bf16.msra.mxu1 %v11801_v24  ;;  %15309 = vst [vmem:[#allocation39_spill] sm:$0xff] %v11815_v47  ;;  %v6515_v37 = vld [vmem:[%s14884_s2 + $0x6a0] sm:$0xff]  ;;  %v11837_v24 = vpack.c.bf16 %v6517_v63, %v6513_v52  ;;  %v6526_v52 = vld [vmem:[%s14884_s2 + $0x6f8] sm:$0xff] }
 0x2b1   :  { %v11828_v21 = vpack.c.bf16 %v6515_v37, %v6511_v44  ;;  %8275 = vmatprep.subr.bf16.mxu0 %v11815_v47  ;;  %8339 = vmatprep.subr.bf16.mxu1 %v11826_v54  ;;  %v6520_v37 = vld [vmem:[%s14884_s2 + $0x6c8] sm:$0xff]  ;;  %v6519_v63 = vld [vmem:[%s14884_s2 + $0x6c0] sm:$0xff]  ;;  %v11862_v54 = vpack.c.bf16 %v6526_v52, %v6522_v43  ;;  %v6530_v52 = vld [vmem:[%s14884_s2 + $0x718] sm:$0xff] }
 0x2b2   :  { %15312 = vst [vmem:[#allocation42_spill] sm:$0xff] %v11837_v24  ;;  %v11851_v44 = vpack.c.bf16 %v6524_v61, %v6520_v37  ;;  %v6521_v37 = vld [vmem:[%s14884_s2 + $0x6d0] sm:$0xff]  ;;  %v6532_v43 = vld [vmem:[%s14884_s2 + $0x728] sm:$0xff] }
 0x2b3   :  { %15311 = vst [vmem:[#allocation41_spill] sm:$0xff] %v11828_v21  ;;  %15314 = vst [vmem:[#allocation44_spill] sm:$0xff] %v11862_v54  ;;  %v6525_v61 = vld [vmem:[%s14884_s2 + $0x6f0] sm:$0xff] }
 0x2b4   :  { %8277 = vmatpush1.bf16.msra.mxu0 %v11828_v21  ;;  %8341 = vmatpush1.bf16.msra.mxu1 %v11837_v24  ;;  %15313 = vst [vmem:[#allocation43_spill] sm:$0xff] %v11851_v44  ;;  %v6523_v21 = vld [vmem:[%s14884_s2 + $0x6e0] sm:$0xff]  ;;  %v11873_v24 = vpack.c.bf16 %v6525_v61, %v6521_v37  ;;  %v6534_v37 = vld [vmem:[%s14884_s2 + $0x738] sm:$0xff] }
 0x2b5   :  { %v11864_v47 = vpack.c.bf16 %v6523_v21, %v6519_v63  ;;  %8279 = vmatprep.subr.bf16.mxu0 %v11851_v44  ;;  %8343 = vmatprep.subr.bf16.mxu1 %v11862_v54  ;;  %v6528_v21 = vld [vmem:[%s14884_s2 + $0x708] sm:$0xff]  ;;  %v6527_v61 = vld [vmem:[%s14884_s2 + $0x700] sm:$0xff]  ;;  %v11898_v54 = vpack.c.bf16 %v6534_v37, %v6530_v52  ;;  %v6538_v37 = vld [vmem:[%s14884_s2 + $0x758] sm:$0xff] }
 0x2b6   :  { %15316 = vst [vmem:[#allocation46_spill] sm:$0xff] %v11873_v24  ;;  %v11887_v63 = vpack.c.bf16 %v6532_v43, %v6528_v21  ;;  %v6529_v21 = vld [vmem:[%s14884_s2 + $0x710] sm:$0xff]  ;;  %v6540_v52 = vld [vmem:[%s14884_s2 + $0x768] sm:$0xff] }
 0x2b7   :  { %15315 = vst [vmem:[#allocation45_spill] sm:$0xff] %v11864_v47  ;;  %15318 = vst [vmem:[#allocation48_spill] sm:$0xff] %v11898_v54  ;;  %v6533_v43 = vld [vmem:[%s14884_s2 + $0x730] sm:$0xff] }
 0x2b8   :  { %8281 = vmatpush1.bf16.msra.mxu0 %v11864_v47  ;;  %8345 = vmatpush1.bf16.msra.mxu1 %v11873_v24  ;;  %15317 = vst [vmem:[#allocation47_spill] sm:$0xff] %v11887_v63  ;;  %v6531_v47 = vld [vmem:[%s14884_s2 + $0x720] sm:$0xff]  ;;  %v11909_v24 = vpack.c.bf16 %v6533_v43, %v6529_v21  ;;  %v6542_v21 = vld [vmem:[%s14884_s2 + $0x778] sm:$0xff] }
 0x2b9   :  { %v11900_v44 = vpack.c.bf16 %v6531_v47, %v6527_v61  ;;  %8283 = vmatprep.subr.bf16.mxu0 %v11887_v63  ;;  %8347 = vmatprep.subr.bf16.mxu1 %v11898_v54  ;;  %v6536_v47 = vld [vmem:[%s14884_s2 + $0x748] sm:$0xff]  ;;  %v6535_v43 = vld [vmem:[%s14884_s2 + $0x740] sm:$0xff]  ;;  %v11934_v54 = vpack.c.bf16 %v6542_v21, %v6538_v37  ;;  %v6546_v37 = vld [vmem:[%s14884_s2 + $0x798] sm:$0xff] }
 0x2ba   :  { %15320 = vst [vmem:[#allocation50_spill] sm:$0xff] %v11909_v24  ;;  %v11923_v61 = vpack.c.bf16 %v6540_v52, %v6536_v47  ;;  %v6537_v47 = vld [vmem:[%s14884_s2 + $0x750] sm:$0xff]  ;;  %v6550_v21 = vld [vmem:[%s14884_s2 + $0x7b8] sm:$0xff] }
 0x2bb   :  { %15319 = vst [vmem:[#allocation49_spill] sm:$0xff] %v11900_v44  ;;  %15322 = vst [vmem:[#allocation52_spill] sm:$0xff] %v11934_v54  ;;  %v6541_v52 = vld [vmem:[%s14884_s2 + $0x770] sm:$0xff] }
 0x2bc   :  { %8285 = vmatpush1.bf16.msra.mxu0 %v11900_v44  ;;  %8349 = vmatpush1.bf16.msra.mxu1 %v11909_v24  ;;  %15321 = vst [vmem:[#allocation51_spill] sm:$0xff] %v11923_v61  ;;  %v6539_v44 = vld [vmem:[%s14884_s2 + $0x760] sm:$0xff]  ;;  %v6544_v24 = vld [vmem:[%s14884_s2 + $0x788] sm:$0xff]  ;;  %v11948_v25 = vpack.c.bf16 %v6541_v52, %v6537_v47  ;;  %v11963_v47 = vpack.c.bf16 %v6550_v21, %v6546_v37 }
 0x2bd   :  { %v11936_v63 = vpack.c.bf16 %v6539_v44, %v6535_v43  ;;  %8287 = vmatprep.subr.bf16.mxu0 %v11923_v61  ;;  %v6548_v44 = vld [vmem:[%s14884_s2 + $0x7a8] sm:$0xff]  ;;  %8351 = vmatprep.subr.bf16.mxu1 %v11934_v54  ;;  %v6543_v52 = vld [vmem:[%s14884_s2 + $0x780] sm:$0xff] }
 0x2be   :  { %15324 = vst [vmem:[#allocation54_spill] sm:$0xff] %v11948_v25  ;;  %v11961_v43 = vpack.c.bf16 %v6548_v44, %v6544_v24  ;;  %15326 = vst [vmem:[#allocation57_spill] sm:$0xff] %v11963_v47  ;;  %v6547_v61 = vld [vmem:[%s14884_s2 + $0x7a0] sm:$0xff]  ;;  %v6549_v24 = vld [vmem:[%s14884_s2 + $0x7b0] sm:$0xff] }
 0x2bf   :  { %15323 = vst [vmem:[#allocation53_spill] sm:$0xff] %v11936_v63  ;;  %v11975_v54 = vpack.c.bf16 %v6547_v61, %v6543_v52  ;;  %v6552_v44 = vld [vmem:[%s14884_s2 + $0x7c8] sm:$0xff]  ;;  %v11988_v21 = vpack.c.bf16 %v6549_v24, %v6545_v7  ;;  %v6554_v52 = vld [vmem:[%s14884_s2 + $0x7d8] sm:$0xff]  ;;  %v6555_v7 = vld [vmem:[%s14884_s2 + $0x7e0] sm:$0xff] }
 0x2c0   :  { %8289 = vmatpush1.bf16.msra.mxu0 %v11936_v63  ;;  %15325 = vst [vmem:[#allocation55_spill] sm:$0xff] %v11961_v43  ;;  %8353 = vmatpush1.bf16.msra.mxu1 %v11948_v25  ;;  %v6556_v37 = vld [vmem:[%s14884_s2 + $0x7e8] sm:$0xff]  ;;  %v6558_v25 = vld [vmem:[%s14884_s2 + $0x7f8] sm:$0xff]  ;;  %v6551_v63 = vld [vmem:[%s14884_s2 + $0x7c0] sm:$0xff] }
 0x2c1   :  { %15327 = vst [vmem:[#allocation58_spill] sm:$0xff] %v11975_v54  ;;  %8291 = vmatprep.subr.bf16.mxu0 %v11961_v43  ;;  %8355 = vmatprep.subr.bf16.mxu1 %v11963_v47  ;;  %15328 = vst [vmem:[#allocation60_spill] sm:$0xff] %v11988_v21  ;;  %v11990_v61 = vpack.c.bf16 %v6556_v37, %v6552_v44  ;;  %v12001_v35 = vpack.c.bf16 %v6558_v25, %v6554_v52  ;;  %v6553_v24 = vld [vmem:[%s14884_s2 + $0x7d0] sm:$0xff] }
 0x2c2   :  { %v6557_v44 = vld [vmem:[%s14884_s2 + $0x7f0] sm:$0xff]  ;;  %v12013_v37 = vpack.c.bf16 %v6555_v7, %v6551_v63 }
 0x2c3   :  { %15329 = vst [vmem:[#allocation56_spill] sm:$0xff] %v11990_v61  ;;  %15330 = vst [vmem:[#allocation59_spill] sm:$0xff] %v12001_v35  ;;  %v12017_v25 = vpack.c.bf16 %v6557_v44, %v6553_v24 }
 0x2c4   :  { %8293 = vmatpush1.bf16.msra.mxu0 %v11975_v54  ;;  %15331 = vst [vmem:[#allocation73_spill] sm:$0xff] %v12013_v37  ;;  %8357 = vmatpush1.bf16.msra.mxu1 %v11988_v21 }
 0x2c5   :  { %8295 = vmatprep.subr.bf16.mxu0 %v11990_v61  ;;  %15332 = vst [vmem:[#allocation74_spill] sm:$0xff] %v12017_v25  ;;  %8359 = vmatprep.subr.bf16.mxu1 %v12001_v35 }
 0x2c8   :  { %8297 = vmatpush1.bf16.msra.mxu0 %v12013_v37  ;;  %8361 = vmatpush1.bf16.msra.mxu1 %v12017_v25 }
 0x2c9   :  { %8363 = vmatprep.subr.bf16.mxu0 %v11126_v8  ;;  %8395 = vmatprep.subr.bf16.mxu1 %v11131_v12 }
 0x33e   :  { %v1301_v52 = vpop.f32.mrb[18].mxu0  ;;  %v1372_v54 = vpop.f32.mrb[22].mxu1 }
 0x33f   :  { %v1302_v63 = vadd.f32 %v1301_v52, %v11140_v53  ;;  %v1303_v7 = vpop.f32.mrb[19].mxu0  ;;  %v1374_v21 = vpop.f32.mrb[23].mxu1  ;;  %v1373_v43 = vadd.f32 %v1372_v54, %v11154_v48 }
 0x340   :  { %v1304_v24 = vadd.f32 %v1303_v7, %v11144_v2  ;;  %v1375_v8 = vadd.f32 %v1374_v21, %v11150_v40 }
 0x341   :  { %v6427_v47 = vmul.f32 -1.442695, %v1302_v63 }
 0x342   :  { %v6428_v44 = vmul.f32 -1.442695, %v1304_v24 }
 0x343   :  { %9577 = vpow2.f32 %v6427_v47 }
 0x344   :  { %9579 = vpow2.f32 %v6428_v44  ;;  %v15333_v44 = vld [vmem:[#allocation62_spill] sm:$0xff] }
 0x34d   :  { %v9578_v35 = vpop.eup %9577 }
 0x34e   :  { %v1380_v37 = vadd.f32 1.0, %v9578_v35  ;;  %v9580_v25 = vpop.eup %9579 }
 0x34f   :  { %v1386_v61 = vadd.f32 1.0, %v9580_v25 }
 0x350   :  { %9581 = vrcp.f32 %v1380_v37 }
 0x351   :  { %9583 = vrcp.f32 %v1386_v61 }
 0x35a   :  { %v9582_v12 = vpop.eup %9581 }
 0x35b   :  { %v1389_v52 = vmul.f32 %v9582_v12, %v1375_v8  ;;  %v9584_v21 = vpop.eup %9583 }
 0x35c   :  { %v1392_v2 = vsub.f32 1.0, %v9584_v21 }
 0x35d   :  { %v1390_v53 = vadd.f32 %v1389_v52, %v1373_v43  ;;  %v1394_v43 = vmul.f32 %v9584_v21, %v11162_v46  ;;  %v6731_v46 = vld [vmem:[%s14884_s2 + $0x520] sm:$0xff] }
 0x35e   :  { %v1533_v28 = vpop.f32.mrb[4].mxu0  ;;  %v1604_v63 = vpop.f32.mrb[24].mxu1 }
 0x35f   :  { %9585 = vtanh.f32 %v1390_v53  ;;  %v9518_v47 = vadd.f32 %v1533_v28, %v11002_v41  ;;  %v1535_v7 = vpop.f32.mrb[5].mxu0  ;;  %v1605_v24 = vpop.f32.mrb[25].mxu1 }
 0x360   :  { %v1622_v35 = vadd.f32 %v1605_v24, %v15333_v44  ;;  %v9519_v25 = vadd.f32 %v1535_v7, %v11010_v39  ;;  %v15335_v7 = vld [vmem:[#allocation61_spill] sm:$0xff] }
 0x361   :  { %v6429_v37 = vmul.f32 -1.442695, %v9518_v47 }
 0x362   :  { %v6430_v40 = vmul.f32 -1.442695, %v9519_v25 }
 0x363   :  { %9587 = vpow2.f32 %v6429_v37 }
 0x364   :  { %9589 = vpow2.f32 %v6430_v40 }
 0x369   :  { %v9586_v54 = vpop.eup %9585 }
 0x36a   :  { %v1393_v61 = vmul.f32 %v9586_v54, %v1392_v2  ;;  %v15377_v54 = vld [vmem:[#allocation49_spill] sm:$0xff] }
 0x36c   :  { %v12032_v8 = vadd.f32 %v1394_v43, %v1393_v61  ;;  %v15378_v61 = vld [vmem:[#allocation50_spill] sm:$0xff]  ;;  %v15379_v43 = vld [vmem:[#allocation51_spill] sm:$0xff] }
 0x36d   :  { %v9588_v53 = vpop.eup %9587 }
 0x36e   :  { %15334 = vst [vmem:[#allocation62_spill] sm:$0xff] %v12032_v8  ;;  %v1612_v28 = vadd.f32 1.0, %v9588_v53  ;;  %1824 = vmatprep.mubr.f32.mxu0 %v12032_v8  ;;  %1895 = vmatprep.mubr.f32.mxu1 %v12032_v8  ;;  %v9590_v12 = vpop.eup %9589  ;;  %v15380_v53 = vld [vmem:[#allocation52_spill] sm:$0xff] }
 0x36f   :  { %v1619_v52 = vadd.f32 1.0, %v9590_v12  ;;  %v15382_v12 = vld [vmem:[#allocation54_spill] sm:$0xff] }
 0x370   :  { %9591 = vrcp.f32 %v1612_v28  ;;  %v15381_v28 = vld [vmem:[#allocation53_spill] sm:$0xff] }
 0x371   :  { %9593 = vrcp.f32 %v1619_v52  ;;  %v15383_v52 = vld [vmem:[#allocation55_spill] sm:$0xff] }
 0x37a   :  { %v9592_v63 = vpop.eup %9591 }
 0x37b   :  { %v1623_v47 = vmul.f32 %v9592_v63, %v1622_v35  ;;  %v9594_v2 = vpop.eup %9593  ;;  %v15376_v35 = vld [vmem:[#allocation48_spill] sm:$0xff]  ;;  %v15384_v63 = vld [vmem:[#allocation57_spill] sm:$0xff] }
 0x37c   :  { %v1626_v40 = vsub.f32 1.0, %v9594_v2  ;;  %v1628_v25 = vmul.f32 %v9594_v2, %v11202_v23  ;;  %v15338_v23 = vld [vmem:[#allocation10_spill] sm:$0xff]  ;;  %v15388_v2 = vld [vmem:[#allocation59_spill] sm:$0xff] }
 0x37d   :  { %v1624_v24 = vadd.f32 %v1623_v47, %v15335_v7  ;;  %v15385_v47 = vld [vmem:[#allocation58_spill] sm:$0xff]  ;;  %v15386_v7 = vld [vmem:[#allocation60_spill] sm:$0xff] }
 0x37f   :  { %9595 = vtanh.f32 %v1624_v24  ;;  %v15387_v24 = vld [vmem:[#allocation56_spill] sm:$0xff] }
 0x389   :  { %v9596_v44 = vpop.eup %9595 }
 0x38a   :  { %v1627_v37 = vmul.f32 %v9596_v44, %v1626_v40  ;;  %v15389_v40 = vld [vmem:[#allocation73_spill] sm:$0xff]  ;;  %v15390_v44 = vld [vmem:[#allocation74_spill] sm:$0xff] }
 0x38c   :  { %v12038_v21 = vadd.f32 %v1628_v25, %v1627_v37  ;;  %v2454_v37 = vld [vmem:[%s14884_s2 + $0x208] sm:$0xff] }
 0x38d   :  { %v2458_v25 = vld [vmem:[%s14884_s2 + $0x228] sm:$0xff] }
 0x38e   :  { %1825 = vmatmul.mubr.f32.vlgmr.msra.gmra.mrb[20].mxu0 %v12038_v21  ;;  %1896 = vmatmul.mubr.f32.vlgmr.msra.gmra.mrb[26].mxu1 %v12038_v21 }
 0x38f   :  { %8365 = vmatpush1.bf16.msra.mxu0 %v11192_v10  ;;  %8397 = vmatpush1.bf16.msra.mxu1 %v11194_v13  ;;  %v15336_v10 = vld [vmem:[#allocation8_spill] sm:$0xff]  ;;  %v15337_v13 = vld [vmem:[#allocation9_spill] sm:$0xff] }
 0x390   :  { %8367 = vmatprep.subr.bf16.mxu0 %v11204_v26  ;;  %8399 = vmatprep.subr.bf16.mxu1 %v11206_v29  ;;  %v15339_v26 = vld [vmem:[#allocation11_spill] sm:$0xff]  ;;  %v15340_v29 = vld [vmem:[#allocation12_spill] sm:$0xff] }
 0x391   :  { %2056 = vmatprep.mubr.f32.mxu0 %v15212_v42  ;;  %2127 = vmatprep.mubr.f32.mxu1 %v15212_v42 }
 0x393   :  { %8369 = vmatpush1.bf16.msra.mxu0 %v11230_v62  ;;  %8401 = vmatpush1.bf16.msra.mxu1 %v11232_v4  ;;  %v15341_v62 = vld [vmem:[#allocation13_spill] sm:$0xff]  ;;  %v15342_v4 = vld [vmem:[#allocation14_spill] sm:$0xff] }
 0x394   :  { %8371 = vmatprep.subr.bf16.mxu0 %v11242_v18  ;;  %8403 = vmatprep.subr.bf16.mxu1 %v11244_v22  ;;  %v15343_v18 = vld [vmem:[#allocation15_spill] sm:$0xff]  ;;  %v15344_v22 = vld [vmem:[#allocation16_spill] sm:$0xff] }
 0x397   :  { %8373 = vmatpush1.bf16.msra.mxu0 %v11268_v49  ;;  %8405 = vmatpush1.bf16.msra.mxu1 %v11270_v57  ;;  %v15345_v49 = vld [vmem:[#allocation17_spill] sm:$0xff]  ;;  %v15346_v57 = vld [vmem:[#allocation18_spill] sm:$0xff] }
 0x398   :  { %8375 = vmatprep.subr.bf16.mxu0 %v11280_v11  ;;  %8407 = vmatprep.subr.bf16.mxu1 %v11282_v20  ;;  %v15347_v11 = vld [vmem:[#allocation19_spill] sm:$0xff]  ;;  %v15348_v20 = vld [vmem:[#allocation20_spill] sm:$0xff] }
 0x39b   :  { %8377 = vmatpush1.bf16.msra.mxu0 %v11304_v59  ;;  %8409 = vmatpush1.bf16.msra.mxu1 %v11306_v3  ;;  %v15349_v59 = vld [vmem:[#allocation21_spill] sm:$0xff]  ;;  %v15350_v3 = vld [vmem:[#allocation22_spill] sm:$0xff] }
 0x39c   :  { %8379 = vmatprep.subr.bf16.mxu0 %v11316_v30  ;;  %8411 = vmatprep.subr.bf16.mxu1 %v11318_v17  ;;  %v15351_v30 = vld [vmem:[#allocation23_spill] sm:$0xff]  ;;  %v15352_v17 = vld [vmem:[#allocation24_spill] sm:$0xff] }
 0x39f   :  { %8381 = vmatpush1.bf16.msra.mxu0 %v11340_v50  ;;  %8413 = vmatpush1.bf16.msra.mxu1 %v11342_v56  ;;  %v15353_v50 = vld [vmem:[#allocation25_spill] sm:$0xff]  ;;  %v15354_v56 = vld [vmem:[#allocation26_spill] sm:$0xff] }
 0x3a0   :  { %8383 = vmatprep.subr.bf16.mxu0 %v11352_v6  ;;  %8415 = vmatprep.subr.bf16.mxu1 %v11354_v16  ;;  %v15355_v6 = vld [vmem:[#allocation27_spill] sm:$0xff]  ;;  %v15356_v16 = vld [vmem:[#allocation28_spill] sm:$0xff] }
 0x3a3   :  { %8385 = vmatpush1.bf16.msra.mxu0 %v11376_v58  ;;  %8417 = vmatpush1.bf16.msra.mxu1 %v11378_v9  ;;  %v15357_v58 = vld [vmem:[#allocation29_spill] sm:$0xff]  ;;  %v15358_v9 = vld [vmem:[#allocation30_spill] sm:$0xff] }
 0x3a4   :  { %8387 = vmatprep.subr.bf16.mxu0 %v11388_v33  ;;  %8419 = vmatprep.subr.bf16.mxu1 %v11390_v34  ;;  %v15359_v33 = vld [vmem:[#allocation31_spill] sm:$0xff]  ;;  %v15360_v34 = vld [vmem:[#allocation32_spill] sm:$0xff] }
 0x3a7   :  { %8389 = vmatpush1.bf16.msra.mxu0 %v11412_v31  ;;  %8421 = vmatpush1.bf16.msra.mxu1 %v11414_v51  ;;  %v15361_v31 = vld [vmem:[#allocation33_spill] sm:$0xff]  ;;  %v15362_v51 = vld [vmem:[#allocation34_spill] sm:$0xff] }
 0x3a8   :  { %8391 = vmatprep.subr.bf16.mxu0 %v11421_v1  ;;  %8423 = vmatprep.subr.bf16.mxu1 %v11423_v27  ;;  %v15363_v1 = vld [vmem:[#allocation35_spill] sm:$0xff]  ;;  %v15364_v27 = vld [vmem:[#allocation36_spill] sm:$0xff] }
 0x3ab   :  { %8393 = vmatpush1.bf16.msra.mxu0 %v11436_v0  ;;  %8425 = vmatpush1.bf16.msra.mxu1 %v11438_v38  ;;  %v15365_v0 = vld [vmem:[#allocation37_spill] sm:$0xff]  ;;  %v15366_v38 = vld [vmem:[#allocation38_spill] sm:$0xff] }
 0x3ac   :  { %8427 = vmatprep.subr.bf16.mxu0 %v11455_v60  ;;  %8491 = vmatprep.subr.bf16.mxu1 %v11466_v32  ;;  %v15367_v60 = vld [vmem:[#allocation39_spill] sm:$0xff]  ;;  %v15368_v32 = vld [vmem:[#allocation40_spill] sm:$0xff] }
 0x3ae   :  { %2057 = vmatmul.mubr.f32.vlgmr.msra.gmra.mrb[6].mxu0 %v12038_v21  ;;  %2128 = vmatmul.mubr.f32.vlgmr.msra.gmra.mrb[28].mxu1 %v12038_v21 }
 0x3af   :  { %8429 = vmatpush1.bf16.msra.mxu0 %v11468_v36  ;;  %8493 = vmatpush1.bf16.msra.mxu1 %v11477_v14  ;;  %v15369_v36 = vld [vmem:[#allocation41_spill] sm:$0xff]  ;;  %v15370_v14 = vld [vmem:[#allocation42_spill] sm:$0xff] }
 0x3b0   :  { %8431 = vmatprep.subr.bf16.mxu0 %v11491_v45  ;;  %8495 = vmatprep.subr.bf16.mxu1 %v11502_v5  ;;  %v15371_v45 = vld [vmem:[#allocation43_spill] sm:$0xff]  ;;  %v15372_v5 = vld [vmem:[#allocation44_spill] sm:$0xff] }
 0x3b3   :  { %8433 = vmatpush1.bf16.msra.mxu0 %v11504_v55  ;;  %8497 = vmatpush1.bf16.msra.mxu1 %v11513_v15  ;;  %v15373_v55 = vld [vmem:[#allocation45_spill] sm:$0xff]  ;;  %v15374_v15 = vld [vmem:[#allocation46_spill] sm:$0xff] }
 0x3b4   :  { %8435 = vmatprep.subr.bf16.mxu0 %v11527_v19  ;;  %8499 = vmatprep.subr.bf16.mxu1 %v15336_v10  ;;  %v15375_v19 = vld [vmem:[#allocation47_spill] sm:$0xff] }
 0x3b5   :  { %v2456_v10 = vld [vmem:[%s14884_s2 + $0x218] sm:$0xff] }
 0x3b7   :  { %8437 = vmatpush1.bf16.msra.mxu0 %v15337_v13  ;;  %8501 = vmatpush1.bf16.msra.mxu1 %v15338_v23  ;;  %v12149_v13 = vpack.c.bf16 %v2458_v25, %v2454_v37  ;;  %v2460_v23 = vld [vmem:[%s14884_s2 + $0x238] sm:$0xff]  ;;  %v2466_v25 = vld [vmem:[%s14884_s2 + $0x268] sm:$0xff] }
 0x3b8   :  { %8439 = vmatprep.subr.bf16.mxu0 %v15339_v26  ;;  %8503 = vmatprep.subr.bf16.mxu1 %v15340_v29  ;;  %v12154_v26 = vpack.c.bf16 %v2460_v23, %v2456_v10  ;;  %v2464_v10 = vld [vmem:[%s14884_s2 + $0x258] sm:$0xff] }
 0x3b9   :  { %v2468_v23 = vld [vmem:[%s14884_s2 + $0x278] sm:$0xff] }
 0x3bb   :  { %8441 = vmatpush1.bf16.msra.mxu0 %v15341_v62  ;;  %8505 = vmatpush1.bf16.msra.mxu1 %v15342_v4  ;;  %v15391_v4 = vld [vmem:[#allocation4_spill] sm:$0xff] }
 0x3bc   :  { %8443 = vmatprep.subr.bf16.mxu0 %v15343_v18  ;;  %8507 = vmatprep.subr.bf16.mxu1 %v15344_v22 }
 0x3bf   :  { %8445 = vmatpush1.bf16.msra.mxu0 %v15345_v49  ;;  %8509 = vmatpush1.bf16.msra.mxu1 %v15346_v57 }
 0x3c0   :  { %8447 = vmatprep.subr.bf16.mxu0 %v15347_v11  ;;  %8511 = vmatprep.subr.bf16.mxu1 %v15348_v20  ;;  %v15392_v11 = vld [vmem:[#allocation5_spill] sm:$0xff] }
 0x3c3   :  { %8449 = vmatpush1.bf16.msra.mxu0 %v15349_v59  ;;  %8513 = vmatpush1.bf16.msra.mxu1 %v15350_v3 }
 0x3c4   :  { %8451 = vmatprep.subr.bf16.mxu0 %v15351_v30  ;;  %8515 = vmatprep.subr.bf16.mxu1 %v15352_v17 }
 0x3c7   :  { %8453 = vmatpush1.bf16.msra.mxu0 %v15353_v50  ;;  %8517 = vmatpush1.bf16.msra.mxu1 %v15354_v56  ;;  %v15393_v56 = vld [vmem:[#allocation6_spill] sm:$0xff] }
 0x3c8   :  { %8455 = vmatprep.subr.bf16.mxu0 %v15355_v6  ;;  %8519 = vmatprep.subr.bf16.mxu1 %v15356_v16 }
 0x3cb   :  { %8457 = vmatpush1.bf16.msra.mxu0 %v15357_v58  ;;  %8521 = vmatpush1.bf16.msra.mxu1 %v15358_v9 }
 0x3cc   :  { %8459 = vmatprep.subr.bf16.mxu0 %v15359_v33  ;;  %8523 = vmatprep.subr.bf16.mxu1 %v15360_v34 }
 0x3cf   :  { %8461 = vmatpush1.bf16.msra.mxu0 %v15361_v31  ;;  %8525 = vmatpush1.bf16.msra.mxu1 %v15362_v51 }
 0x3d0   :  { %8463 = vmatprep.subr.bf16.mxu0 %v15363_v1  ;;  %8527 = vmatprep.subr.bf16.mxu1 %v15364_v27 }
 0x3d3   :  { %8465 = vmatpush1.bf16.msra.mxu0 %v15365_v0  ;;  %8529 = vmatpush1.bf16.msra.mxu1 %v15366_v38  ;;  %v15394_v0 = vld [vmem:[#allocation64_spill] sm:$0xff] }
 0x3d4   :  { %8467 = vmatprep.subr.bf16.mxu0 %v15367_v60  ;;  %8531 = vmatprep.subr.bf16.mxu1 %v15368_v32 }
 0x3d7   :  { %8469 = vmatpush1.bf16.msra.mxu0 %v15369_v36  ;;  %8533 = vmatpush1.bf16.msra.mxu1 %v15370_v14 }
 0x3d8   :  { %8471 = vmatprep.subr.bf16.mxu0 %v15371_v45  ;;  %8535 = vmatprep.subr.bf16.mxu1 %v15372_v5 }
 0x3db   :  { %8473 = vmatpush1.bf16.msra.mxu0 %v15373_v55  ;;  %8537 = vmatpush1.bf16.msra.mxu1 %v15374_v15 }
 0x3dc   :  { %8475 = vmatprep.subr.bf16.mxu0 %v15375_v19  ;;  %8539 = vmatprep.subr.bf16.mxu1 %v15376_v35 }
 0x3df   :  { %8477 = vmatpush1.bf16.msra.mxu0 %v15377_v54  ;;  %8541 = vmatpush1.bf16.msra.mxu1 %v15378_v61 }
 0x3e0   :  { %8479 = vmatprep.subr.bf16.mxu0 %v15379_v43  ;;  %8543 = vmatprep.subr.bf16.mxu1 %v15380_v53 }
 0x3e3   :  { %8481 = vmatpush1.bf16.msra.mxu0 %v15381_v28  ;;  %8545 = vmatpush1.bf16.msra.mxu1 %v15382_v12  ;;  %v15396_v12 = vld [vmem:[#allocation63_spill] sm:$0xff] }
 0x3e4   :  { %8483 = vmatprep.subr.bf16.mxu0 %v15383_v52  ;;  %8547 = vmatprep.subr.bf16.mxu1 %v15384_v63 }
 0x3e7   :  { %8485 = vmatpush1.bf16.msra.mxu0 %v15385_v47  ;;  %8549 = vmatpush1.bf16.msra.mxu1 %v15386_v7  ;;  %v2453_v47 = vld [vmem:[%s14884_s2 + $0x200] sm:$0xff] }
 0x3e8   :  { %8487 = vmatprep.subr.bf16.mxu0 %v15387_v24  ;;  %8551 = vmatprep.subr.bf16.mxu1 %v15388_v2  ;;  %v2457_v7 = vld [vmem:[%s14884_s2 + $0x220] sm:$0xff]  ;;  %v2455_v2 = vld [vmem:[%s14884_s2 + $0x210] sm:$0xff] }
 0x3eb   :  { %8489 = vmatpush1.bf16.msra.mxu0 %v15389_v40  ;;  %8553 = vmatpush1.bf16.msra.mxu1 %v15390_v44  ;;  %v2459_v40 = vld [vmem:[%s14884_s2 + $0x230] sm:$0xff]  ;;  %v2462_v44 = vld [vmem:[%s14884_s2 + $0x248] sm:$0xff] }
 0x3ec   :  { %8555 = vmatprep.subr.bf16.mxu0 %v12149_v13  ;;  %8587 = vmatprep.subr.bf16.mxu1 %v12154_v26 }
 0x461   :  { %v1826_v29 = vpop.f32.mrb[20].mxu0  ;;  %v1897_v62 = vpop.f32.mrb[26].mxu1 }
 0x462   :  { %v1827_v18 = vadd.f32 %v1826_v29, %v15391_v4  ;;  %v1828_v22 = vpop.f32.mrb[21].mxu0  ;;  %v1899_v49 = vpop.f32.mrb[27].mxu1  ;;  %v1898_v58 = vadd.f32 %v1897_v62, %v11154_v48 }
 0x463   :  { %v1829_v20 = vadd.f32 %v1828_v22, %v15392_v11  ;;  %v1900_v6 = vadd.f32 %v1899_v49, %v15393_v56  ;;  %v12198_v22 = vpack.c.bf16 %v2459_v40, %v2455_v2  ;;  %v2461_v49 = vld [vmem:[%s14884_s2 + $0x240] sm:$0xff]  ;;  %v2487_v2 = vld [vmem:[%s14884_s2 + $0x310] sm:$0xff] }
 0x464   :  { %v6559_v57 = vmul.f32 -1.442695, %v1827_v18  ;;  %v12196_v18 = vpack.c.bf16 %v2457_v7, %v2453_v47  ;;  %v2489_v47 = vld [vmem:[%s14884_s2 + $0x320] sm:$0xff]  ;;  %v2491_v40 = vld [vmem:[%s14884_s2 + $0x330] sm:$0xff] }
 0x465   :  { %v6560_v59 = vmul.f32 -1.442695, %v1829_v20 }
 0x466   :  { %9597 = vpow2.f32 %v6559_v57  ;;  %v2465_v57 = vld [vmem:[%s14884_s2 + $0x260] sm:$0xff] }
 0x467   :  { %9599 = vpow2.f32 %v6560_v59  ;;  %v12208_v59 = vpack.c.bf16 %v2466_v25, %v2462_v44  ;;  %v2494_v44 = vld [vmem:[%s14884_s2 + $0x348] sm:$0xff]  ;;  %v2496_v25 = vld [vmem:[%s14884_s2 + $0x358] sm:$0xff] }
 0x470   :  { %v9598_v3 = vpop.eup %9597 }
 0x471   :  { %v1905_v30 = vadd.f32 1.0, %v9598_v3  ;;  %v9600_v17 = vpop.eup %9599  ;;  %v12210_v3 = vpack.c.bf16 %v2468_v23, %v2464_v10  ;;  %v2500_v10 = vld [vmem:[%s14884_s2 + $0x378] sm:$0xff] }
 0x472   :  { %v1911_v50 = vadd.f32 1.0, %v9600_v17  ;;  %v2470_v17 = vld [vmem:[%s14884_s2 + $0x288] sm:$0xff] }
 0x473   :  { %9601 = vrcp.f32 %v1905_v30  ;;  %v2467_v30 = vld [vmem:[%s14884_s2 + $0x270] sm:$0xff] }
 0x474   :  { %9603 = vrcp.f32 %v1911_v50  ;;  %v2474_v50 = vld [vmem:[%s14884_s2 + $0x2a8] sm:$0xff] }
 0x47d   :  { %v9602_v16 = vpop.eup %9601 }
 0x47e   :  { %v1914_v9 = vmul.f32 %v9602_v16, %v1900_v6  ;;  %v9604_v36 = vpop.eup %9603  ;;  %v2472_v6 = vld [vmem:[%s14884_s2 + $0x298] sm:$0xff] }
 0x47f   :  { %v1917_v45 = vsub.f32 1.0, %v9604_v36  ;;  %v1919_v15 = vmul.f32 %v9604_v36, %v12032_v8  ;;  %v2476_v16 = vld [vmem:[%s14884_s2 + $0x2b8] sm:$0xff] }
 0x480   :  { %v1915_v33 = vadd.f32 %v1914_v9, %v1898_v58  ;;  %v12234_v58 = vpack.c.bf16 %v2465_v57, %v2461_v49  ;;  %v2497_v49 = vld [vmem:[%s14884_s2 + $0x360] sm:$0xff] }
 0x481   :  { %v2058_v34 = vpop.f32.mrb[6].mxu0  ;;  %v2129_v31 = vpop.f32.mrb[28].mxu1 }
 0x482   :  { %9605 = vtanh.f32 %v1915_v33  ;;  %v9520_v51 = vadd.f32 %v2058_v34, %v11002_v41  ;;  %v2060_v1 = vpop.f32.mrb[7].mxu0  ;;  %v2130_v27 = vpop.f32.mrb[29].mxu1  ;;  %v2469_v33 = vld [vmem:[%s14884_s2 + $0x280] sm:$0xff]  ;;  %v12246_v31 = vpack.c.bf16 %v2474_v50, %v2470_v17  ;;  %v2499_v17 = vld [vmem:[%s14884_s2 + $0x370] sm:$0xff]  ;;  %v2502_v50 = vld [vmem:[%s14884_s2 + $0x388] sm:$0xff] }
 0x483   :  { %v2147_v38 = vadd.f32 %v2130_v27, %v15394_v0  ;;  %v9521_v32 = vadd.f32 %v2060_v1, %v11010_v39  ;;  %v2473_v34 = vld [vmem:[%s14884_s2 + $0x2a0] sm:$0xff]  ;;  %v2471_v1 = vld [vmem:[%s14884_s2 + $0x290] sm:$0xff]  ;;  %v2478_v0 = vld [vmem:[%s14884_s2 + $0x2c8] sm:$0xff] }
 0x484   :  { %v6561_v60 = vmul.f32 -1.442695, %v9520_v51  ;;  %v12248_v51 = vpack.c.bf16 %v2476_v16, %v2472_v6  ;;  %v2475_v27 = vld [vmem:[%s14884_s2 + $0x2b0] sm:$0xff]  ;;  %v12272_v36 = vpack.c.bf16 %v2473_v34, %v2469_v33  ;;  %v2506_v6 = vld [vmem:[%s14884_s2 + $0x3a8] sm:$0xff]  ;;  %v2504_v16 = vld [vmem:[%s14884_s2 + $0x398] sm:$0xff] }
 0x485   :  { %v6562_v14 = vmul.f32 -1.442695, %v9521_v32  ;;  %v2484_v32 = vld [vmem:[%s14884_s2 + $0x2f8] sm:$0xff] }
 0x486   :  { %9607 = vpow2.f32 %v6561_v60  ;;  %v2480_v60 = vld [vmem:[%s14884_s2 + $0x2d8] sm:$0xff] }
 0x487   :  { %9609 = vpow2.f32 %v6562_v14  ;;  %v12274_v14 = vpack.c.bf16 %v2475_v27, %v2471_v1  ;;  %v2508_v33 = vld [vmem:[%s14884_s2 + $0x3b8] sm:$0xff]  ;;  %v2501_v27 = vld [vmem:[%s14884_s2 + $0x380] sm:$0xff] }
 0x48c   :  { %v9606_v5 = vpop.eup %9605 }
 0x48d   :  { %v1918_v55 = vmul.f32 %v9606_v5, %v1917_v45  ;;  %v2477_v45 = vld [vmem:[%s14884_s2 + $0x2c0] sm:$0xff] }
 0x48e   :  { %v2481_v5 = vld [vmem:[%s14884_s2 + $0x2e0] sm:$0xff] }
 0x48f   :  { %v12166_v19 = vadd.f32 %v1919_v15, %v1918_v55  ;;  %v12286_v15 = vpack.c.bf16 %v2484_v32, %v2480_v60  ;;  %v12394_v60 = vpack.c.bf16 %v2508_v33, %v2504_v16  ;;  %v2503_v32 = vld [vmem:[%s14884_s2 + $0x390] sm:$0xff] }
 0x490   :  { %v9608_v35 = vpop.eup %9607 }
 0x491   :  { %15395 = vst [vmem:[#allocation61_spill] sm:$0xff] %v12166_v19  ;;  %v2137_v54 = vadd.f32 1.0, %v9608_v35  ;;  %2349 = vmatprep.mubr.f32.mxu0 %v12166_v19  ;;  %2420 = vmatprep.mubr.f32.mxu1 %v12166_v19  ;;  %v9610_v61 = vpop.eup %9609  ;;  %v2479_v35 = vld [vmem:[%s14884_s2 + $0x2d0] sm:$0xff] }
 0x492   :  { %v2144_v43 = vadd.f32 1.0, %v9610_v61  ;;  %v2486_v61 = vld [vmem:[%s14884_s2 + $0x308] sm:$0xff] }
 0x493   :  { %9611 = vrcp.f32 %v2137_v54  ;;  %v2483_v54 = vld [vmem:[%s14884_s2 + $0x2f0] sm:$0xff] }
 0x494   :  { %9613 = vrcp.f32 %v2144_v43  ;;  %v2490_v43 = vld [vmem:[%s14884_s2 + $0x328] sm:$0xff] }
 0x495   :  { %v12320_v7 = vpack.c.bf16 %v2490_v43, %v2486_v61  ;;  %v2516_v61 = vld [vmem:[%s14884_s2 + $0x3f8] sm:$0xff] }
 0x49d   :  { %v9612_v53 = vpop.eup %9611 }
 0x49e   :  { %v2148_v28 = vmul.f32 %v9612_v53, %v2147_v38  ;;  %v9614_v63 = vpop.eup %9613  ;;  %v2482_v38 = vld [vmem:[%s14884_s2 + $0x2e8] sm:$0xff]  ;;  %v2488_v53 = vld [vmem:[%s14884_s2 + $0x318] sm:$0xff] }
 0x49f   :  { %v2151_v24 = vsub.f32 1.0, %v9614_v63  ;;  %v2153_v62 = vmul.f32 %v9614_v63, %v12038_v21  ;;  %v2463_v21 = vld [vmem:[%s14884_s2 + $0x250] sm:$0xff]  ;;  %v12284_v55 = vpack.c.bf16 %v2482_v38, %v2478_v0  ;;  %v2485_v63 = vld [vmem:[%s14884_s2 + $0x300] sm:$0xff]  ;;  %v12392_v38 = vpack.c.bf16 %v2506_v6, %v2502_v50 }
 0x4a0   :  { %v2149_v52 = vadd.f32 %v2148_v28, %v15396_v12  ;;  %v12236_v9 = vpack.c.bf16 %v2467_v30, %v2463_v21  ;;  %v2492_v28 = vld [vmem:[%s14884_s2 + $0x338] sm:$0xff]  ;;  %v12308_v12 = vpack.c.bf16 %v2481_v5, %v2477_v45  ;;  %v12344_v23 = vpack.c.bf16 %v2489_v47, %v2485_v63  ;;  %v2495_v30 = vld [vmem:[%s14884_s2 + $0x350] sm:$0xff]  ;;  %v2505_v0 = vld [vmem:[%s14884_s2 + $0x3a0] sm:$0xff] }
 0x4a1   :  { %v12358_v21 = vpack.c.bf16 %v2500_v10, %v2496_v25  ;;  %v12382_v1 = vpack.c.bf16 %v2499_v17, %v2495_v30  ;;  %v2507_v45 = vld [vmem:[%s14884_s2 + $0x3b0] sm:$0xff]  ;;  %v2510_v5 = vld [vmem:[%s14884_s2 + $0x3c8] sm:$0xff]  ;;  %v12416_v43 = vpack.c.bf16 %v2505_v0, %v2501_v27  ;;  %v6702_v17 = vld [vmem:[%s14884_s2 + $0x438] sm:$0xff] }
 0x4a2   :  { %9615 = vtanh.f32 %v2149_v52  ;;  %v12310_v52 = vpack.c.bf16 %v2483_v54, %v2479_v35  ;;  %v2514_v35 = vld [vmem:[%s14884_s2 + $0x3e8] sm:$0xff]  ;;  %v2512_v54 = vld [vmem:[%s14884_s2 + $0x3d8] sm:$0xff]  ;;  %v6695_v50 = vld [vmem:[%s14884_s2 + $0x400] sm:$0xff] }
 0x4a3   :  { %v12425_v63 = vpack.c.bf16 %v2514_v35, %v2510_v5  ;;  %v12427_v47 = vpack.c.bf16 %v2516_v61, %v2512_v54  ;;  %v6696_v10 = vld [vmem:[%s14884_s2 + $0x408] sm:$0xff]  ;;  %v6699_v6 = vld [vmem:[%s14884_s2 + $0x420] sm:$0xff]  ;;  %v6697_v27 = vld [vmem:[%s14884_s2 + $0x410] sm:$0xff] }
 0x4a4   :  { %v12472_v33 = vpack.c.bf16 %v6699_v6, %v6695_v50  ;;  %v6701_v0 = vld [vmem:[%s14884_s2 + $0x430] sm:$0xff]  ;;  %v6708_v5 = vld [vmem:[%s14884_s2 + $0x468] sm:$0xff]  ;;  %v6706_v35 = vld [vmem:[%s14884_s2 + $0x458] sm:$0xff] }
 0x4a5   :  { %v6710_v61 = vld [vmem:[%s14884_s2 + $0x478] sm:$0xff]  ;;  %v6716_v50 = vld [vmem:[%s14884_s2 + $0x4a8] sm:$0xff] }
 0x4a6   :  { %v6714_v6 = vld [vmem:[%s14884_s2 + $0x498] sm:$0xff] }
 0x4ac   :  { %v9616_v37 = vpop.eup %9615 }
 0x4ad   :  { %v2152_v29 = vmul.f32 %v9616_v37, %v2151_v24  ;;  %v12322_v24 = vpack.c.bf16 %v2492_v28, %v2488_v53  ;;  %v2498_v37 = vld [vmem:[%s14884_s2 + $0x368] sm:$0xff]  ;;  %v12418_v53 = vpack.c.bf16 %v2507_v45, %v2503_v32  ;;  %v2509_v28 = vld [vmem:[%s14884_s2 + $0x3c0] sm:$0xff]  ;;  %v12481_v32 = vpack.c.bf16 %v6701_v0, %v6697_v27  ;;  %v6718_v0 = vld [vmem:[%s14884_s2 + $0x4b8] sm:$0xff] }
 0x4ae   :  { %v12356_v57 = vpack.c.bf16 %v2498_v37, %v2494_v44  ;;  %v2515_v44 = vld [vmem:[%s14884_s2 + $0x3f0] sm:$0xff]  ;;  %v6704_v45 = vld [vmem:[%s14884_s2 + $0x448] sm:$0xff] }
 0x4af   :  { %v12206_v20 = vadd.f32 %v2153_v62, %v2152_v29  ;;  %v12346_v29 = vpack.c.bf16 %v2491_v40, %v2487_v2  ;;  %v2493_v62 = vld [vmem:[%s14884_s2 + $0x340] sm:$0xff]  ;;  %v2511_v40 = vld [vmem:[%s14884_s2 + $0x3d0] sm:$0xff]  ;;  %v12495_v54 = vpack.c.bf16 %v6708_v5, %v6704_v45 }
 0x4b0   :  { %v12380_v34 = vpack.c.bf16 %v2497_v49, %v2493_v62  ;;  %v2513_v2 = vld [vmem:[%s14884_s2 + $0x3e0] sm:$0xff]  ;;  %v12442_v25 = vpack.c.bf16 %v2515_v44, %v2511_v40  ;;  %v6700_v62 = vld [vmem:[%s14884_s2 + $0x428] sm:$0xff]  ;;  %v6698_v49 = vld [vmem:[%s14884_s2 + $0x418] sm:$0xff]  ;;  %v12506_v40 = vpack.c.bf16 %v6710_v61, %v6706_v35  ;;  %v12542_v35 = vpack.c.bf16 %v6718_v0, %v6714_v6 }
 0x4b1   :  { %2350 = vmatmul.mubr.f32.vlgmr.msra.gmra.mrb[22].mxu0 %v12206_v20  ;;  %2421 = vmatmul.mubr.f32.vlgmr.msra.gmra.mrb[30].mxu1 %v12206_v20  ;;  %v12440_v37 = vpack.c.bf16 %v2513_v2, %v2509_v28  ;;  %v12459_v30 = vpack.c.bf16 %v6700_v62, %v6696_v10  ;;  %v12470_v16 = vpack.c.bf16 %v6702_v17, %v6698_v49  ;;  %v6703_v28 = vld [vmem:[%s14884_s2 + $0x440] sm:$0xff]  ;;  %v6705_v10 = vld [vmem:[%s14884_s2 + $0x450] sm:$0xff]  ;;  %v6712_v17 = vld [vmem:[%s14884_s2 + $0x488] sm:$0xff] }
 0x4b2   :  { %8557 = vmatpush1.bf16.msra.mxu0 %v12196_v18  ;;  %8589 = vmatpush1.bf16.msra.mxu1 %v12198_v22  ;;  %v6707_v2 = vld [vmem:[%s14884_s2 + $0x460] sm:$0xff]  ;;  %v6709_v62 = vld [vmem:[%s14884_s2 + $0x470] sm:$0xff]  ;;  %v12531_v27 = vpack.c.bf16 %v6716_v50, %v6712_v17  ;;  %15397 = vst [vmem:[#allocation8_spill] sm:$0xff] %v12542_v35  ;;  %v6724_v17 = vld [vmem:[%s14884_s2 + $0x4e8] sm:$0xff] }
 0x4b3   :  { %8559 = vmatprep.subr.bf16.mxu0 %v12208_v59  ;;  %8591 = vmatprep.subr.bf16.mxu1 %v12210_v3  ;;  %v12508_v44 = vpack.c.bf16 %v6707_v2, %v6703_v28  ;;  %v12517_v49 = vpack.c.bf16 %v6709_v62, %v6705_v10  ;;  %v6711_v45 = vld [vmem:[%s14884_s2 + $0x480] sm:$0xff]  ;;  %v6713_v28 = vld [vmem:[%s14884_s2 + $0x490] sm:$0xff]  ;;  %v6720_v62 = vld [vmem:[%s14884_s2 + $0x4c8] sm:$0xff] }
 0x4b4   :  { %2581 = vmatprep.mubr.f32.mxu0 %v15212_v42  ;;  %2652 = vmatprep.mubr.f32.mxu1 %v15212_v42  ;;  %v6715_v5 = vld [vmem:[%s14884_s2 + $0x4a0] sm:$0xff]  ;;  %v6717_v2 = vld [vmem:[%s14884_s2 + $0x4b0] sm:$0xff]  ;;  %v6722_v50 = vld [vmem:[%s14884_s2 + $0x4d8] sm:$0xff]  ;;  %v12567_v6 = vpack.c.bf16 %v6724_v17, %v6720_v62 }
 0x4b5   :  { %v12544_v61 = vpack.c.bf16 %v6715_v5, %v6711_v45  ;;  %v12553_v10 = vpack.c.bf16 %v6717_v2, %v6713_v28  ;;  %v6726_v0 = vld [vmem:[%s14884_s2 + $0x4f8] sm:$0xff]  ;;  %v6719_v45 = vld [vmem:[%s14884_s2 + $0x4c0] sm:$0xff]  ;;  %v6721_v62 = vld [vmem:[%s14884_s2 + $0x4d0] sm:$0xff] }
 0x4b6   :  { %8561 = vmatpush1.bf16.msra.mxu0 %v12234_v58  ;;  %8593 = vmatpush1.bf16.msra.mxu1 %v12236_v9  ;;  %15400 = vst [vmem:[#allocation11_spill] sm:$0xff] %v12567_v6  ;;  %v6723_v5 = vld [vmem:[%s14884_s2 + $0x4e0] sm:$0xff]  ;;  %v12578_v28 = vpack.c.bf16 %v6726_v0, %v6722_v50  ;;  %v6725_v17 = vld [vmem:[%s14884_s2 + $0x4f0] sm:$0xff]  ;;  %v6728_v50 = vld [vmem:[%s14884_s2 + $0x508] sm:$0xff] }
 0x4b7   :  { %8563 = vmatprep.subr.bf16.mxu0 %v12246_v31  ;;  %8595 = vmatprep.subr.bf16.mxu1 %v12248_v51  ;;  %15398 = vst [vmem:[#allocation9_spill] sm:$0xff] %v12544_v61  ;;  %15399 = vst [vmem:[#allocation10_spill] sm:$0xff] %v12553_v10  ;;  %v12580_v2 = vpack.c.bf16 %v6723_v5, %v6719_v45  ;;  %v12589_v8 = vpack.c.bf16 %v6725_v17, %v6721_v62  ;;  %v6732_v0 = vld [vmem:[%s14884_s2 + $0x528] sm:$0xff]  ;;  %v6730_v45 = vld [vmem:[%s14884_s2 + $0x518] sm:$0xff] }
 0x4b8   :  { %15401 = vst [vmem:[#allocation12_spill] sm:$0xff] %v12578_v28  ;;  %v12603_v5 = vpack.c.bf16 %v6732_v0, %v6728_v50  ;;  %v6734_v62 = vld [vmem:[%s14884_s2 + $0x538] sm:$0xff]  ;;  %v6727_v17 = vld [vmem:[%s14884_s2 + $0x500] sm:$0xff]  ;;  %v6729_v50 = vld [vmem:[%s14884_s2 + $0x510] sm:$0xff] }
 0x4b9   :  { %15402 = vst [vmem:[#allocation13_spill] sm:$0xff] %v12580_v2  ;;  %15403 = vst [vmem:[#allocation14_spill] sm:$0xff] %v12589_v8  ;;  %v6733_v0 = vld [vmem:[%s14884_s2 + $0x530] sm:$0xff] }
 0x4ba   :  { %8565 = vmatpush1.bf16.msra.mxu0 %v12272_v36  ;;  %8597 = vmatpush1.bf16.msra.mxu1 %v12274_v14  ;;  %15404 = vst [vmem:[#allocation15_spill] sm:$0xff] %v12603_v5 }
 0x4bb   :  { %8567 = vmatprep.subr.bf16.mxu0 %v12284_v55  ;;  %8599 = vmatprep.subr.bf16.mxu1 %v12286_v15 }
 0x4be   :  { %8569 = vmatpush1.bf16.msra.mxu0 %v12308_v12  ;;  %8601 = vmatpush1.bf16.msra.mxu1 %v12310_v52 }
 0x4bf   :  { %8571 = vmatprep.subr.bf16.mxu0 %v12320_v7  ;;  %8603 = vmatprep.subr.bf16.mxu1 %v12322_v24 }
 0x4c2   :  { %8573 = vmatpush1.bf16.msra.mxu0 %v12344_v23  ;;  %8605 = vmatpush1.bf16.msra.mxu1 %v12346_v29 }
 0x4c3   :  { %8575 = vmatprep.subr.bf16.mxu0 %v12356_v57  ;;  %8607 = vmatprep.subr.bf16.mxu1 %v12358_v21 }
 0x4c6   :  { %8577 = vmatpush1.bf16.msra.mxu0 %v12380_v34  ;;  %8609 = vmatpush1.bf16.msra.mxu1 %v12382_v1 }
 0x4c7   :  { %8579 = vmatprep.subr.bf16.mxu0 %v12392_v38  ;;  %8611 = vmatprep.subr.bf16.mxu1 %v12394_v60 }
 0x4ca   :  { %8581 = vmatpush1.bf16.msra.mxu0 %v12416_v43  ;;  %8613 = vmatpush1.bf16.msra.mxu1 %v12418_v53 }
 0x4cb   :  { %8583 = vmatprep.subr.bf16.mxu0 %v12425_v63  ;;  %8615 = vmatprep.subr.bf16.mxu1 %v12427_v47 }
 0x4ce   :  { %8585 = vmatpush1.bf16.msra.mxu0 %v12440_v37  ;;  %8617 = vmatpush1.bf16.msra.mxu1 %v12442_v25 }
 0x4cf   :  { %8619 = vmatprep.subr.bf16.mxu0 %v12459_v30  ;;  %8683 = vmatprep.subr.bf16.mxu1 %v12470_v16 }
 0x4d1   :  { %2582 = vmatmul.mubr.f32.vlgmr.msra.gmra.mrb[8].mxu0 %v12206_v20  ;;  %2653 = vmatmul.mubr.f32.vlgmr.msra.gmra.mrb[32].mxu1 %v12206_v20 }
 0x4d2   :  { %8621 = vmatpush1.bf16.msra.mxu0 %v12472_v33  ;;  %8685 = vmatpush1.bf16.msra.mxu1 %v12481_v32 }
 0x4d3   :  { %8623 = vmatprep.subr.bf16.mxu0 %v12495_v54  ;;  %8687 = vmatprep.subr.bf16.mxu1 %v12506_v40 }
 0x4d6   :  { %8625 = vmatpush1.bf16.msra.mxu0 %v12508_v44  ;;  %8689 = vmatpush1.bf16.msra.mxu1 %v12517_v49 }
 0x4d7   :  { %8627 = vmatprep.subr.bf16.mxu0 %v12531_v27  ;;  %8691 = vmatprep.subr.bf16.mxu1 %v12542_v35 }
 0x4da   :  { %8629 = vmatpush1.bf16.msra.mxu0 %v12544_v61  ;;  %8693 = vmatpush1.bf16.msra.mxu1 %v12553_v10  ;;  %v6809_v10 = vld [vmem:[%s14884_s2 + $0x790] sm:$0xff] }
 0x4db   :  { %8631 = vmatprep.subr.bf16.mxu0 %v12567_v6  ;;  %8695 = vmatprep.subr.bf16.mxu1 %v12578_v28  ;;  %v12616_v28 = vpack.c.bf16 %v6731_v46, %v6727_v17  ;;  %v6736_v46 = vld [vmem:[%s14884_s2 + $0x548] sm:$0xff] }
 0x4dd   :  { %15406 = vst [vmem:[#allocation17_spill] sm:$0xff] %v12616_v28 }
 0x4de   :  { %8633 = vmatpush1.bf16.msra.mxu0 %v12580_v2  ;;  %8697 = vmatpush1.bf16.msra.mxu1 %v12589_v8  ;;  %v12614_v2 = vpack.c.bf16 %v6734_v62, %v6730_v45  ;;  %v12625_v8 = vpack.c.bf16 %v6733_v0, %v6729_v50  ;;  %v6740_v45 = vld [vmem:[%s14884_s2 + $0x568] sm:$0xff]  ;;  %v6738_v62 = vld [vmem:[%s14884_s2 + $0x558] sm:$0xff]  ;;  %v6735_v0 = vld [vmem:[%s14884_s2 + $0x540] sm:$0xff] }
 0x4df   :  { %8635 = vmatprep.subr.bf16.mxu0 %v12603_v5  ;;  %v12639_v17 = vpack.c.bf16 %v6740_v45, %v6736_v46  ;;  %v6742_v50 = vld [vmem:[%s14884_s2 + $0x578] sm:$0xff]  ;;  %v6737_v46 = vld [vmem:[%s14884_s2 + $0x550] sm:$0xff] }
 0x4e0   :  { %15405 = vst [vmem:[#allocation16_spill] sm:$0xff] %v12614_v2  ;;  %15407 = vst [vmem:[#allocation18_spill] sm:$0xff] %v12625_v8  ;;  %8699 = vmatprep.subr.bf16.mxu1 %v12614_v2  ;;  %v12650_v2 = vpack.c.bf16 %v6742_v50, %v6738_v62  ;;  %v6741_v45 = vld [vmem:[%s14884_s2 + $0x570] sm:$0xff]  ;;  %v6748_v62 = vld [vmem:[%s14884_s2 + $0x5a8] sm:$0xff] }
 0x4e1   :  { %15408 = vst [vmem:[#allocation19_spill] sm:$0xff] %v12639_v17  ;;  %v6746_v50 = vld [vmem:[%s14884_s2 + $0x598] sm:$0xff] }
 0x4e2   :  { %8637 = vmatpush1.bf16.msra.mxu0 %v12616_v28  ;;  %8701 = vmatpush1.bf16.msra.mxu1 %v12625_v8  ;;  %v6739_v28 = vld [vmem:[%s14884_s2 + $0x560] sm:$0xff]  ;;  %15409 = vst [vmem:[#allocation20_spill] sm:$0xff] %v12650_v2  ;;  %v12661_v8 = vpack.c.bf16 %v6741_v45, %v6737_v46  ;;  %v6750_v46 = vld [vmem:[%s14884_s2 + $0x5b8] sm:$0xff] }
 0x4e3   :  { %v12652_v5 = vpack.c.bf16 %v6739_v28, %v6735_v0  ;;  %8639 = vmatprep.subr.bf16.mxu0 %v12639_v17  ;;  %8703 = vmatprep.subr.bf16.mxu1 %v12650_v2  ;;  %v6744_v28 = vld [vmem:[%s14884_s2 + $0x588] sm:$0xff]  ;;  %v6743_v45 = vld [vmem:[%s14884_s2 + $0x580] sm:$0xff]  ;;  %v12686_v2 = vpack.c.bf16 %v6750_v46, %v6746_v50  ;;  %v6754_v46 = vld [vmem:[%s14884_s2 + $0x5d8] sm:$0xff] }
 0x4e4   :  { %15411 = vst [vmem:[#allocation22_spill] sm:$0xff] %v12661_v8  ;;  %v12675_v0 = vpack.c.bf16 %v6748_v62, %v6744_v28  ;;  %v6745_v28 = vld [vmem:[%s14884_s2 + $0x590] sm:$0xff]  ;;  %v6756_v50 = vld [vmem:[%s14884_s2 + $0x5e8] sm:$0xff] }
 0x4e5   :  { %15410 = vst [vmem:[#allocation21_spill] sm:$0xff] %v12652_v5  ;;  %15413 = vst [vmem:[#allocation24_spill] sm:$0xff] %v12686_v2  ;;  %v6749_v62 = vld [vmem:[%s14884_s2 + $0x5b0] sm:$0xff] }
 0x4e6   :  { %8641 = vmatpush1.bf16.msra.mxu0 %v12652_v5  ;;  %8705 = vmatpush1.bf16.msra.mxu1 %v12661_v8  ;;  %15412 = vst [vmem:[#allocation23_spill] sm:$0xff] %v12675_v0  ;;  %v6747_v5 = vld [vmem:[%s14884_s2 + $0x5a0] sm:$0xff]  ;;  %v12697_v8 = vpack.c.bf16 %v6749_v62, %v6745_v28  ;;  %v6758_v28 = vld [vmem:[%s14884_s2 + $0x5f8] sm:$0xff] }
 0x4e7   :  { %v12688_v17 = vpack.c.bf16 %v6747_v5, %v6743_v45  ;;  %8643 = vmatprep.subr.bf16.mxu0 %v12675_v0  ;;  %8707 = vmatprep.subr.bf16.mxu1 %v12686_v2  ;;  %v6752_v5 = vld [vmem:[%s14884_s2 + $0x5c8] sm:$0xff]  ;;  %v6751_v62 = vld [vmem:[%s14884_s2 + $0x5c0] sm:$0xff]  ;;  %v12722_v2 = vpack.c.bf16 %v6758_v28, %v6754_v46  ;;  %v6762_v28 = vld [vmem:[%s14884_s2 + $0x618] sm:$0xff] }
 0x4e8   :  { %15415 = vst [vmem:[#allocation26_spill] sm:$0xff] %v12697_v8  ;;  %v12711_v45 = vpack.c.bf16 %v6756_v50, %v6752_v5  ;;  %v6753_v5 = vld [vmem:[%s14884_s2 + $0x5d0] sm:$0xff]  ;;  %v6764_v46 = vld [vmem:[%s14884_s2 + $0x628] sm:$0xff] }
 0x4e9   :  { %15414 = vst [vmem:[#allocation25_spill] sm:$0xff] %v12688_v17  ;;  %15417 = vst [vmem:[#allocation28_spill] sm:$0xff] %v12722_v2  ;;  %v6757_v50 = vld [vmem:[%s14884_s2 + $0x5f0] sm:$0xff] }
 0x4ea   :  { %8645 = vmatpush1.bf16.msra.mxu0 %v12688_v17  ;;  %8709 = vmatpush1.bf16.msra.mxu1 %v12697_v8  ;;  %15416 = vst [vmem:[#allocation27_spill] sm:$0xff] %v12711_v45  ;;  %v6755_v17 = vld [vmem:[%s14884_s2 + $0x5e0] sm:$0xff]  ;;  %v12733_v8 = vpack.c.bf16 %v6757_v50, %v6753_v5  ;;  %v6766_v5 = vld [vmem:[%s14884_s2 + $0x638] sm:$0xff] }
 0x4eb   :  { %v12724_v0 = vpack.c.bf16 %v6755_v17, %v6751_v62  ;;  %8647 = vmatprep.subr.bf16.mxu0 %v12711_v45  ;;  %8711 = vmatprep.subr.bf16.mxu1 %v12722_v2  ;;  %v6760_v17 = vld [vmem:[%s14884_s2 + $0x608] sm:$0xff]  ;;  %v6759_v50 = vld [vmem:[%s14884_s2 + $0x600] sm:$0xff]  ;;  %v12758_v2 = vpack.c.bf16 %v6766_v5, %v6762_v28  ;;  %v6770_v5 = vld [vmem:[%s14884_s2 + $0x658] sm:$0xff] }
 0x4ec   :  { %15419 = vst [vmem:[#allocation30_spill] sm:$0xff] %v12733_v8  ;;  %v12747_v62 = vpack.c.bf16 %v6764_v46, %v6760_v17  ;;  %v6761_v17 = vld [vmem:[%s14884_s2 + $0x610] sm:$0xff]  ;;  %v6772_v28 = vld [vmem:[%s14884_s2 + $0x668] sm:$0xff] }
 0x4ed   :  { %15418 = vst [vmem:[#allocation29_spill] sm:$0xff] %v12724_v0  ;;  %15421 = vst [vmem:[#allocation32_spill] sm:$0xff] %v12758_v2  ;;  %v6765_v46 = vld [vmem:[%s14884_s2 + $0x630] sm:$0xff] }
 0x4ee   :  { %8649 = vmatpush1.bf16.msra.mxu0 %v12724_v0  ;;  %8713 = vmatpush1.bf16.msra.mxu1 %v12733_v8  ;;  %15420 = vst [vmem:[#allocation31_spill] sm:$0xff] %v12747_v62  ;;  %v6763_v0 = vld [vmem:[%s14884_s2 + $0x620] sm:$0xff]  ;;  %v12769_v8 = vpack.c.bf16 %v6765_v46, %v6761_v17  ;;  %v6774_v17 = vld [vmem:[%s14884_s2 + $0x678] sm:$0xff] }
 0x4ef   :  { %v12760_v45 = vpack.c.bf16 %v6763_v0, %v6759_v50  ;;  %8651 = vmatprep.subr.bf16.mxu0 %v12747_v62  ;;  %8715 = vmatprep.subr.bf16.mxu1 %v12758_v2  ;;  %v6768_v0 = vld [vmem:[%s14884_s2 + $0x648] sm:$0xff]  ;;  %v6767_v46 = vld [vmem:[%s14884_s2 + $0x640] sm:$0xff]  ;;  %v12794_v2 = vpack.c.bf16 %v6774_v17, %v6770_v5  ;;  %v6778_v17 = vld [vmem:[%s14884_s2 + $0x698] sm:$0xff] }
 0x4f0   :  { %15423 = vst [vmem:[#allocation34_spill] sm:$0xff] %v12769_v8  ;;  %v12783_v50 = vpack.c.bf16 %v6772_v28, %v6768_v0  ;;  %v6769_v0 = vld [vmem:[%s14884_s2 + $0x650] sm:$0xff]  ;;  %v6780_v5 = vld [vmem:[%s14884_s2 + $0x6a8] sm:$0xff] }
 0x4f1   :  { %15422 = vst [vmem:[#allocation33_spill] sm:$0xff] %v12760_v45  ;;  %15425 = vst [vmem:[#allocation36_spill] sm:$0xff] %v12794_v2  ;;  %v6773_v28 = vld [vmem:[%s14884_s2 + $0x670] sm:$0xff] }
 0x4f2   :  { %8653 = vmatpush1.bf16.msra.mxu0 %v12760_v45  ;;  %8717 = vmatpush1.bf16.msra.mxu1 %v12769_v8  ;;  %15424 = vst [vmem:[#allocation35_spill] sm:$0xff] %v12783_v50  ;;  %v6771_v45 = vld [vmem:[%s14884_s2 + $0x660] sm:$0xff]  ;;  %v12805_v8 = vpack.c.bf16 %v6773_v28, %v6769_v0  ;;  %v6782_v0 = vld [vmem:[%s14884_s2 + $0x6b8] sm:$0xff] }
 0x4f3   :  { %v12796_v62 = vpack.c.bf16 %v6771_v45, %v6767_v46  ;;  %8655 = vmatprep.subr.bf16.mxu0 %v12783_v50  ;;  %8719 = vmatprep.subr.bf16.mxu1 %v12794_v2  ;;  %v6776_v45 = vld [vmem:[%s14884_s2 + $0x688] sm:$0xff]  ;;  %v6775_v28 = vld [vmem:[%s14884_s2 + $0x680] sm:$0xff]  ;;  %v12830_v2 = vpack.c.bf16 %v6782_v0, %v6778_v17  ;;  %v6786_v0 = vld [vmem:[%s14884_s2 + $0x6d8] sm:$0xff] }
 0x4f4   :  { %15427 = vst [vmem:[#allocation38_spill] sm:$0xff] %v12805_v8  ;;  %v12819_v46 = vpack.c.bf16 %v6780_v5, %v6776_v45  ;;  %v6777_v45 = vld [vmem:[%s14884_s2 + $0x690] sm:$0xff]  ;;  %v6788_v17 = vld [vmem:[%s14884_s2 + $0x6e8] sm:$0xff] }
 0x4f5   :  { %15426 = vst [vmem:[#allocation37_spill] sm:$0xff] %v12796_v62  ;;  %15429 = vst [vmem:[#allocation40_spill] sm:$0xff] %v12830_v2  ;;  %v6781_v5 = vld [vmem:[%s14884_s2 + $0x6b0] sm:$0xff] }
 0x4f6   :  { %8657 = vmatpush1.bf16.msra.mxu0 %v12796_v62  ;;  %8721 = vmatpush1.bf16.msra.mxu1 %v12805_v8  ;;  %15428 = vst [vmem:[#allocation39_spill] sm:$0xff] %v12819_v46  ;;  %v6779_v62 = vld [vmem:[%s14884_s2 + $0x6a0] sm:$0xff]  ;;  %v12841_v8 = vpack.c.bf16 %v6781_v5, %v6777_v45  ;;  %v6790_v45 = vld [vmem:[%s14884_s2 + $0x6f8] sm:$0xff] }
 0x4f7   :  { %v12832_v50 = vpack.c.bf16 %v6779_v62, %v6775_v28  ;;  %8659 = vmatprep.subr.bf16.mxu0 %v12819_v46  ;;  %8723 = vmatprep.subr.bf16.mxu1 %v12830_v2  ;;  %v6784_v62 = vld [vmem:[%s14884_s2 + $0x6c8] sm:$0xff]  ;;  %v6783_v5 = vld [vmem:[%s14884_s2 + $0x6c0] sm:$0xff]  ;;  %v12866_v2 = vpack.c.bf16 %v6790_v45, %v6786_v0  ;;  %v6794_v45 = vld [vmem:[%s14884_s2 + $0x718] sm:$0xff] }
 0x4f8   :  { %15431 = vst [vmem:[#allocation42_spill] sm:$0xff] %v12841_v8  ;;  %v12855_v28 = vpack.c.bf16 %v6788_v17, %v6784_v62  ;;  %v6785_v62 = vld [vmem:[%s14884_s2 + $0x6d0] sm:$0xff]  ;;  %v6796_v0 = vld [vmem:[%s14884_s2 + $0x728] sm:$0xff] }
 0x4f9   :  { %15430 = vst [vmem:[#allocation41_spill] sm:$0xff] %v12832_v50  ;;  %15433 = vst [vmem:[#allocation44_spill] sm:$0xff] %v12866_v2  ;;  %v6789_v17 = vld [vmem:[%s14884_s2 + $0x6f0] sm:$0xff] }
 0x4fa   :  { %8661 = vmatpush1.bf16.msra.mxu0 %v12832_v50  ;;  %8725 = vmatpush1.bf16.msra.mxu1 %v12841_v8  ;;  %15432 = vst [vmem:[#allocation43_spill] sm:$0xff] %v12855_v28  ;;  %v6787_v50 = vld [vmem:[%s14884_s2 + $0x6e0] sm:$0xff]  ;;  %v12877_v8 = vpack.c.bf16 %v6789_v17, %v6785_v62  ;;  %v6798_v62 = vld [vmem:[%s14884_s2 + $0x738] sm:$0xff] }
 0x4fb   :  { %v12868_v46 = vpack.c.bf16 %v6787_v50, %v6783_v5  ;;  %8663 = vmatprep.subr.bf16.mxu0 %v12855_v28  ;;  %8727 = vmatprep.subr.bf16.mxu1 %v12866_v2  ;;  %v6792_v50 = vld [vmem:[%s14884_s2 + $0x708] sm:$0xff]  ;;  %v6791_v17 = vld [vmem:[%s14884_s2 + $0x700] sm:$0xff]  ;;  %v12902_v2 = vpack.c.bf16 %v6798_v62, %v6794_v45  ;;  %v6802_v62 = vld [vmem:[%s14884_s2 + $0x758] sm:$0xff] }
 0x4fc   :  { %15435 = vst [vmem:[#allocation46_spill] sm:$0xff] %v12877_v8  ;;  %v12891_v5 = vpack.c.bf16 %v6796_v0, %v6792_v50  ;;  %v6793_v50 = vld [vmem:[%s14884_s2 + $0x710] sm:$0xff]  ;;  %v6804_v45 = vld [vmem:[%s14884_s2 + $0x768] sm:$0xff] }
 0x4fd   :  { %15434 = vst [vmem:[#allocation45_spill] sm:$0xff] %v12868_v46  ;;  %15437 = vst [vmem:[#allocation48_spill] sm:$0xff] %v12902_v2  ;;  %v6797_v0 = vld [vmem:[%s14884_s2 + $0x730] sm:$0xff] }
 0x4fe   :  { %8665 = vmatpush1.bf16.msra.mxu0 %v12868_v46  ;;  %8729 = vmatpush1.bf16.msra.mxu1 %v12877_v8  ;;  %15436 = vst [vmem:[#allocation47_spill] sm:$0xff] %v12891_v5  ;;  %v6795_v46 = vld [vmem:[%s14884_s2 + $0x720] sm:$0xff]  ;;  %v12913_v8 = vpack.c.bf16 %v6797_v0, %v6793_v50  ;;  %v6806_v50 = vld [vmem:[%s14884_s2 + $0x778] sm:$0xff] }
 0x4ff   :  { %v12904_v28 = vpack.c.bf16 %v6795_v46, %v6791_v17  ;;  %8667 = vmatprep.subr.bf16.mxu0 %v12891_v5  ;;  %8731 = vmatprep.subr.bf16.mxu1 %v12902_v2  ;;  %v6800_v46 = vld [vmem:[%s14884_s2 + $0x748] sm:$0xff]  ;;  %v6799_v0 = vld [vmem:[%s14884_s2 + $0x740] sm:$0xff]  ;;  %v12938_v2 = vpack.c.bf16 %v6806_v50, %v6802_v62  ;;  %v6810_v62 = vld [vmem:[%s14884_s2 + $0x798] sm:$0xff] }
 0x500   :  { %15439 = vst [vmem:[#allocation50_spill] sm:$0xff] %v12913_v8  ;;  %v12927_v17 = vpack.c.bf16 %v6804_v45, %v6800_v46  ;;  %v6801_v46 = vld [vmem:[%s14884_s2 + $0x750] sm:$0xff]  ;;  %v6814_v50 = vld [vmem:[%s14884_s2 + $0x7b8] sm:$0xff] }
 0x501   :  { %15438 = vst [vmem:[#allocation49_spill] sm:$0xff] %v12904_v28  ;;  %15441 = vst [vmem:[#allocation52_spill] sm:$0xff] %v12938_v2  ;;  %v6805_v45 = vld [vmem:[%s14884_s2 + $0x770] sm:$0xff] }
 0x502   :  { %8669 = vmatpush1.bf16.msra.mxu0 %v12904_v28  ;;  %8733 = vmatpush1.bf16.msra.mxu1 %v12913_v8  ;;  %15440 = vst [vmem:[#allocation51_spill] sm:$0xff] %v12927_v17  ;;  %v6803_v28 = vld [vmem:[%s14884_s2 + $0x760] sm:$0xff]  ;;  %v6808_v8 = vld [vmem:[%s14884_s2 + $0x788] sm:$0xff]  ;;  %v12952_v6 = vpack.c.bf16 %v6805_v45, %v6801_v46  ;;  %v12967_v46 = vpack.c.bf16 %v6814_v50, %v6810_v62 }
 0x503   :  { %v12940_v5 = vpack.c.bf16 %v6803_v28, %v6799_v0  ;;  %8671 = vmatprep.subr.bf16.mxu0 %v12927_v17  ;;  %v6812_v28 = vld [vmem:[%s14884_s2 + $0x7a8] sm:$0xff]  ;;  %8735 = vmatprep.subr.bf16.mxu1 %v12938_v2  ;;  %v6807_v45 = vld [vmem:[%s14884_s2 + $0x780] sm:$0xff] }
 0x504   :  { %15443 = vst [vmem:[#allocation54_spill] sm:$0xff] %v12952_v6  ;;  %v12965_v0 = vpack.c.bf16 %v6812_v28, %v6808_v8  ;;  %15445 = vst [vmem:[#allocation57_spill] sm:$0xff] %v12967_v46  ;;  %v6811_v17 = vld [vmem:[%s14884_s2 + $0x7a0] sm:$0xff]  ;;  %v6813_v8 = vld [vmem:[%s14884_s2 + $0x7b0] sm:$0xff] }
 0x505   :  { %15442 = vst [vmem:[#allocation53_spill] sm:$0xff] %v12940_v5  ;;  %v12979_v2 = vpack.c.bf16 %v6811_v17, %v6807_v45  ;;  %v6816_v28 = vld [vmem:[%s14884_s2 + $0x7c8] sm:$0xff]  ;;  %v12992_v50 = vpack.c.bf16 %v6813_v8, %v6809_v10  ;;  %v6818_v45 = vld [vmem:[%s14884_s2 + $0x7d8] sm:$0xff]  ;;  %v6819_v10 = vld [vmem:[%s14884_s2 + $0x7e0] sm:$0xff] }
 0x506   :  { %8673 = vmatpush1.bf16.msra.mxu0 %v12940_v5  ;;  %15444 = vst [vmem:[#allocation55_spill] sm:$0xff] %v12965_v0  ;;  %8737 = vmatpush1.bf16.msra.mxu1 %v12952_v6  ;;  %v6820_v62 = vld [vmem:[%s14884_s2 + $0x7e8] sm:$0xff]  ;;  %v6822_v6 = vld [vmem:[%s14884_s2 + $0x7f8] sm:$0xff]  ;;  %v6815_v5 = vld [vmem:[%s14884_s2 + $0x7c0] sm:$0xff] }
 0x507   :  { %15446 = vst [vmem:[#allocation58_spill] sm:$0xff] %v12979_v2  ;;  %8675 = vmatprep.subr.bf16.mxu0 %v12965_v0  ;;  %8739 = vmatprep.subr.bf16.mxu1 %v12967_v46  ;;  %15447 = vst [vmem:[#allocation60_spill] sm:$0xff] %v12992_v50  ;;  %v12994_v17 = vpack.c.bf16 %v6820_v62, %v6816_v28  ;;  %v13005_v61 = vpack.c.bf16 %v6822_v6, %v6818_v45  ;;  %v6817_v8 = vld [vmem:[%s14884_s2 + $0x7d0] sm:$0xff] }
 0x508   :  { %v6821_v28 = vld [vmem:[%s14884_s2 + $0x7f0] sm:$0xff]  ;;  %v13017_v62 = vpack.c.bf16 %v6819_v10, %v6815_v5 }
 0x509   :  { %15448 = vst [vmem:[#allocation56_spill] sm:$0xff] %v12994_v17  ;;  %15449 = vst [vmem:[#allocation59_spill] sm:$0xff] %v13005_v61  ;;  %v13021_v6 = vpack.c.bf16 %v6821_v28, %v6817_v8 }
 0x50a   :  { %8677 = vmatpush1.bf16.msra.mxu0 %v12979_v2  ;;  %15450 = vst [vmem:[#allocation73_spill] sm:$0xff] %v13017_v62  ;;  %8741 = vmatpush1.bf16.msra.mxu1 %v12992_v50 }
 0x50b   :  { %8679 = vmatprep.subr.bf16.mxu0 %v12994_v17  ;;  %15451 = vst [vmem:[#allocation74_spill] sm:$0xff] %v13021_v6  ;;  %8743 = vmatprep.subr.bf16.mxu1 %v13005_v61 }
 0x50e   :  { %8681 = vmatpush1.bf16.msra.mxu0 %v13017_v62  ;;  %8745 = vmatpush1.bf16.msra.mxu1 %v13021_v6 }
 0x50f   :  { %8747 = vmatprep.subr.bf16.mxu0 %v12149_v13  ;;  %8779 = vmatprep.subr.bf16.mxu1 %v12154_v26 }
 0x584   :  { %v2351_v45 = vpop.f32.mrb[22].mxu0  ;;  %v2422_v2 = vpop.f32.mrb[30].mxu1 }
 0x585   :  { %v2352_v5 = vadd.f32 %v2351_v45, %v15391_v4  ;;  %v2353_v10 = vpop.f32.mrb[23].mxu0  ;;  %v2424_v50 = vpop.f32.mrb[31].mxu1  ;;  %v2423_v0 = vadd.f32 %v2422_v2, %v11154_v48 }
 0x586   :  { %v2354_v8 = vadd.f32 %v2353_v10, %v15392_v11  ;;  %v2425_v13 = vadd.f32 %v2424_v50, %v15393_v56 }
 0x587   :  { %v6691_v46 = vmul.f32 -1.442695, %v2352_v5 }
 0x588   :  { %v6692_v28 = vmul.f32 -1.442695, %v2354_v8 }
 0x589   :  { %9617 = vpow2.f32 %v6691_v46 }
 0x58a   :  { %9619 = vpow2.f32 %v6692_v28  ;;  %v15452_v28 = vld [vmem:[#allocation66_spill] sm:$0xff] }
 0x593   :  { %v9618_v61 = vpop.eup %9617 }
 0x594   :  { %v2430_v62 = vadd.f32 1.0, %v9618_v61  ;;  %v9620_v6 = vpop.eup %9619 }
 0x595   :  { %v2436_v17 = vadd.f32 1.0, %v9620_v6 }
 0x596   :  { %9621 = vrcp.f32 %v2430_v62 }
 0x597   :  { %9623 = vrcp.f32 %v2436_v17 }
 0x5a0   :  { %v9622_v26 = vpop.eup %9621 }
 0x5a1   :  { %v2439_v45 = vmul.f32 %v9622_v26, %v2425_v13  ;;  %v9624_v50 = vpop.eup %9623 }
 0x5a2   :  { %v2442_v11 = vsub.f32 1.0, %v9624_v50 }
 0x5a3   :  { %v2440_v4 = vadd.f32 %v2439_v45, %v2423_v0  ;;  %v2444_v0 = vmul.f32 %v9624_v50, %v12166_v19  ;;  %v6995_v19 = vld [vmem:[%s14884_s2 + $0x520] sm:$0xff] }
 0x5a4   :  { %v2583_v35 = vpop.f32.mrb[8].mxu0  ;;  %v2654_v5 = vpop.f32.mrb[32].mxu1 }
 0x5a5   :  { %9625 = vtanh.f32 %v2440_v4  ;;  %v9522_v46 = vadd.f32 %v2583_v35, %v11002_v41  ;;  %v2585_v10 = vpop.f32.mrb[9].mxu0  ;;  %v2655_v8 = vpop.f32.mrb[33].mxu1 }
 0x5a6   :  { %v2672_v61 = vadd.f32 %v2655_v8, %v15452_v28  ;;  %v9523_v6 = vadd.f32 %v2585_v10, %v11010_v39  ;;  %v15454_v10 = vld [vmem:[#allocation65_spill] sm:$0xff] }
 0x5a7   :  { %v6693_v62 = vmul.f32 -1.442695, %v9522_v46 }
 0x5a8   :  { %v6694_v56 = vmul.f32 -1.442695, %v9523_v6 }
 0x5a9   :  { %9627 = vpow2.f32 %v6693_v62 }
 0x5aa   :  { %9629 = vpow2.f32 %v6694_v56 }
 0x5af   :  { %v9626_v2 = vpop.eup %9625 }
 0x5b0   :  { %v2443_v17 = vmul.f32 %v9626_v2, %v2442_v11  ;;  %v15496_v2 = vld [vmem:[#allocation49_spill] sm:$0xff] }
 0x5b2   :  { %v13036_v13 = vadd.f32 %v2444_v0, %v2443_v17  ;;  %v15497_v17 = vld [vmem:[#allocation50_spill] sm:$0xff]  ;;  %v15498_v0 = vld [vmem:[#allocation51_spill] sm:$0xff] }
 0x5b3   :  { %v9628_v4 = vpop.eup %9627 }
 0x5b4   :  { %15453 = vst [vmem:[#allocation64_spill] sm:$0xff] %v13036_v13  ;;  %v2662_v35 = vadd.f32 1.0, %v9628_v4  ;;  %2874 = vmatprep.mubr.f32.mxu0 %v13036_v13  ;;  %2945 = vmatprep.mubr.f32.mxu1 %v13036_v13  ;;  %v9630_v26 = vpop.eup %9629  ;;  %v15499_v4 = vld [vmem:[#allocation52_spill] sm:$0xff] }
 0x5b5   :  { %v2669_v45 = vadd.f32 1.0, %v9630_v26  ;;  %v15501_v26 = vld [vmem:[#allocation54_spill] sm:$0xff] }
 0x5b6   :  { %9631 = vrcp.f32 %v2662_v35  ;;  %v15500_v35 = vld [vmem:[#allocation53_spill] sm:$0xff] }
 0x5b7   :  { %9633 = vrcp.f32 %v2669_v45  ;;  %v15502_v45 = vld [vmem:[#allocation55_spill] sm:$0xff] }
 0x5c0   :  { %v9632_v5 = vpop.eup %9631 }
 0x5c1   :  { %v2673_v46 = vmul.f32 %v9632_v5, %v2672_v61  ;;  %v9634_v11 = vpop.eup %9633  ;;  %v15495_v61 = vld [vmem:[#allocation48_spill] sm:$0xff]  ;;  %v15503_v5 = vld [vmem:[#allocation57_spill] sm:$0xff] }
 0x5c2   :  { %v2676_v56 = vsub.f32 1.0, %v9634_v11  ;;  %v2678_v6 = vmul.f32 %v9634_v11, %v12206_v20  ;;  %v15457_v20 = vld [vmem:[#allocation10_spill] sm:$0xff]  ;;  %v15507_v11 = vld [vmem:[#allocation59_spill] sm:$0xff] }
 0x5c3   :  { %v2674_v8 = vadd.f32 %v2673_v46, %v15454_v10  ;;  %v15504_v46 = vld [vmem:[#allocation58_spill] sm:$0xff]  ;;  %v15505_v10 = vld [vmem:[#allocation60_spill] sm:$0xff] }
 0x5c5   :  { %9635 = vtanh.f32 %v2674_v8  ;;  %v15506_v8 = vld [vmem:[#allocation56_spill] sm:$0xff] }
 0x5cf   :  { %v9636_v28 = vpop.eup %9635 }
 0x5d0   :  { %v2677_v62 = vmul.f32 %v9636_v28, %v2676_v56  ;;  %v15508_v56 = vld [vmem:[#allocation73_spill] sm:$0xff]  ;;  %v15509_v28 = vld [vmem:[#allocation74_spill] sm:$0xff] }
 0x5d2   :  { %v13042_v50 = vadd.f32 %v2678_v6, %v2677_v62  ;;  %v3504_v62 = vld [vmem:[%s14884_s2 + $0x208] sm:$0xff] }
 0x5d3   :  { %v3508_v6 = vld [vmem:[%s14884_s2 + $0x228] sm:$0xff] }
 0x5d4   :  { %2875 = vmatmul.mubr.f32.vlgmr.msra.gmra.mrb[24].mxu0 %v13042_v50  ;;  %2946 = vmatmul.mubr.f32.vlgmr.msra.gmra.mrb[34].mxu1 %v13042_v50 }
 0x5d5   :  { %8749 = vmatpush1.bf16.msra.mxu0 %v12196_v18  ;;  %8781 = vmatpush1.bf16.msra.mxu1 %v12198_v22  ;;  %v15455_v18 = vld [vmem:[#allocation8_spill] sm:$0xff]  ;;  %v15456_v22 = vld [vmem:[#allocation9_spill] sm:$0xff] }
 0x5d6   :  { %8751 = vmatprep.subr.bf16.mxu0 %v12208_v59  ;;  %8783 = vmatprep.subr.bf16.mxu1 %v12210_v3  ;;  %v15458_v59 = vld [vmem:[#allocation11_spill] sm:$0xff]  ;;  %v15459_v3 = vld [vmem:[#allocation12_spill] sm:$0xff] }
 0x5d7   :  { %3106 = vmatprep.mubr.f32.mxu0 %v15212_v42  ;;  %3177 = vmatprep.mubr.f32.mxu1 %v15212_v42 }
 0x5d9   :  { %8753 = vmatpush1.bf16.msra.mxu0 %v12234_v58  ;;  %8785 = vmatpush1.bf16.msra.mxu1 %v12236_v9  ;;  %v15460_v58 = vld [vmem:[#allocation13_spill] sm:$0xff]  ;;  %v15461_v9 = vld [vmem:[#allocation14_spill] sm:$0xff] }
 0x5da   :  { %8755 = vmatprep.subr.bf16.mxu0 %v12246_v31  ;;  %8787 = vmatprep.subr.bf16.mxu1 %v12248_v51  ;;  %v15462_v31 = vld [vmem:[#allocation15_spill] sm:$0xff]  ;;  %v15463_v51 = vld [vmem:[#allocation16_spill] sm:$0xff] }
 0x5dd   :  { %8757 = vmatpush1.bf16.msra.mxu0 %v12272_v36  ;;  %8789 = vmatpush1.bf16.msra.mxu1 %v12274_v14  ;;  %v15464_v36 = vld [vmem:[#allocation17_spill] sm:$0xff]  ;;  %v15465_v14 = vld [vmem:[#allocation18_spill] sm:$0xff] }
 0x5de   :  { %8759 = vmatprep.subr.bf16.mxu0 %v12284_v55  ;;  %8791 = vmatprep.subr.bf16.mxu1 %v12286_v15  ;;  %v15466_v55 = vld [vmem:[#allocation19_spill] sm:$0xff]  ;;  %v15467_v15 = vld [vmem:[#allocation20_spill] sm:$0xff] }
 0x5e1   :  { %8761 = vmatpush1.bf16.msra.mxu0 %v12308_v12  ;;  %8793 = vmatpush1.bf16.msra.mxu1 %v12310_v52  ;;  %v15468_v12 = vld [vmem:[#allocation21_spill] sm:$0xff]  ;;  %v15469_v52 = vld [vmem:[#allocation22_spill] sm:$0xff] }
 0x5e2   :  { %8763 = vmatprep.subr.bf16.mxu0 %v12320_v7  ;;  %8795 = vmatprep.subr.bf16.mxu1 %v12322_v24  ;;  %v15470_v7 = vld [vmem:[#allocation23_spill] sm:$0xff]  ;;  %v15471_v24 = vld [vmem:[#allocation24_spill] sm:$0xff] }
 0x5e5   :  { %8765 = vmatpush1.bf16.msra.mxu0 %v12344_v23  ;;  %8797 = vmatpush1.bf16.msra.mxu1 %v12346_v29  ;;  %v15472_v23 = vld [vmem:[#allocation25_spill] sm:$0xff]  ;;  %v15473_v29 = vld [vmem:[#allocation26_spill] sm:$0xff] }
 0x5e6   :  { %8767 = vmatprep.subr.bf16.mxu0 %v12356_v57  ;;  %8799 = vmatprep.subr.bf16.mxu1 %v12358_v21  ;;  %v15474_v57 = vld [vmem:[#allocation27_spill] sm:$0xff]  ;;  %v15475_v21 = vld [vmem:[#allocation28_spill] sm:$0xff] }
 0x5e9   :  { %8769 = vmatpush1.bf16.msra.mxu0 %v12380_v34  ;;  %8801 = vmatpush1.bf16.msra.mxu1 %v12382_v1  ;;  %v15476_v34 = vld [vmem:[#allocation29_spill] sm:$0xff]  ;;  %v15477_v1 = vld [vmem:[#allocation30_spill] sm:$0xff] }
 0x5ea   :  { %8771 = vmatprep.subr.bf16.mxu0 %v12392_v38  ;;  %8803 = vmatprep.subr.bf16.mxu1 %v12394_v60  ;;  %v15478_v38 = vld [vmem:[#allocation31_spill] sm:$0xff]  ;;  %v15479_v60 = vld [vmem:[#allocation32_spill] sm:$0xff] }
 0x5ed   :  { %8773 = vmatpush1.bf16.msra.mxu0 %v12416_v43  ;;  %8805 = vmatpush1.bf16.msra.mxu1 %v12418_v53  ;;  %v15480_v43 = vld [vmem:[#allocation33_spill] sm:$0xff]  ;;  %v15481_v53 = vld [vmem:[#allocation34_spill] sm:$0xff] }
 0x5ee   :  { %8775 = vmatprep.subr.bf16.mxu0 %v12425_v63  ;;  %8807 = vmatprep.subr.bf16.mxu1 %v12427_v47  ;;  %v15482_v63 = vld [vmem:[#allocation35_spill] sm:$0xff]  ;;  %v15483_v47 = vld [vmem:[#allocation36_spill] sm:$0xff] }
 0x5f1   :  { %8777 = vmatpush1.bf16.msra.mxu0 %v12440_v37  ;;  %8809 = vmatpush1.bf16.msra.mxu1 %v12442_v25  ;;  %v15484_v37 = vld [vmem:[#allocation37_spill] sm:$0xff]  ;;  %v15485_v25 = vld [vmem:[#allocation38_spill] sm:$0xff] }
 0x5f2   :  { %8811 = vmatprep.subr.bf16.mxu0 %v12459_v30  ;;  %8875 = vmatprep.subr.bf16.mxu1 %v12470_v16  ;;  %v15486_v30 = vld [vmem:[#allocation39_spill] sm:$0xff]  ;;  %v15487_v16 = vld [vmem:[#allocation40_spill] sm:$0xff] }
 0x5f4   :  { %3107 = vmatmul.mubr.f32.vlgmr.msra.gmra.mrb[10].mxu0 %v13042_v50  ;;  %3178 = vmatmul.mubr.f32.vlgmr.msra.gmra.mrb[36].mxu1 %v13042_v50 }
 0x5f5   :  { %8813 = vmatpush1.bf16.msra.mxu0 %v12472_v33  ;;  %8877 = vmatpush1.bf16.msra.mxu1 %v12481_v32  ;;  %v15488_v33 = vld [vmem:[#allocation41_spill] sm:$0xff]  ;;  %v15489_v32 = vld [vmem:[#allocation42_spill] sm:$0xff] }
 0x5f6   :  { %8815 = vmatprep.subr.bf16.mxu0 %v12495_v54  ;;  %8879 = vmatprep.subr.bf16.mxu1 %v12506_v40  ;;  %v15490_v54 = vld [vmem:[#allocation43_spill] sm:$0xff]  ;;  %v15491_v40 = vld [vmem:[#allocation44_spill] sm:$0xff] }
 0x5f9   :  { %8817 = vmatpush1.bf16.msra.mxu0 %v12508_v44  ;;  %8881 = vmatpush1.bf16.msra.mxu1 %v12517_v49  ;;  %v15492_v44 = vld [vmem:[#allocation45_spill] sm:$0xff]  ;;  %v15493_v49 = vld [vmem:[#allocation46_spill] sm:$0xff] }
 0x5fa   :  { %8819 = vmatprep.subr.bf16.mxu0 %v12531_v27  ;;  %8883 = vmatprep.subr.bf16.mxu1 %v15455_v18  ;;  %v15494_v27 = vld [vmem:[#allocation47_spill] sm:$0xff] }
 0x5fb   :  { %v3506_v18 = vld [vmem:[%s14884_s2 + $0x218] sm:$0xff] }
 0x5fd   :  { %8821 = vmatpush1.bf16.msra.mxu0 %v15456_v22  ;;  %8885 = vmatpush1.bf16.msra.mxu1 %v15457_v20  ;;  %v13153_v22 = vpack.c.bf16 %v3508_v6, %v3504_v62  ;;  %v3510_v20 = vld [vmem:[%s14884_s2 + $0x238] sm:$0xff]  ;;  %v3516_v6 = vld [vmem:[%s14884_s2 + $0x268] sm:$0xff] }
 0x5fe   :  { %8823 = vmatprep.subr.bf16.mxu0 %v15458_v59  ;;  %8887 = vmatprep.subr.bf16.mxu1 %v15459_v3  ;;  %v13158_v59 = vpack.c.bf16 %v3510_v20, %v3506_v18  ;;  %v3514_v18 = vld [vmem:[%s14884_s2 + $0x258] sm:$0xff] }
 0x5ff   :  { %v3518_v20 = vld [vmem:[%s14884_s2 + $0x278] sm:$0xff] }
 0x601   :  { %8825 = vmatpush1.bf16.msra.mxu0 %v15460_v58  ;;  %8889 = vmatpush1.bf16.msra.mxu1 %v15461_v9  ;;  %v15510_v9 = vld [vmem:[#allocation4_spill] sm:$0xff] }
 0x602   :  { %8827 = vmatprep.subr.bf16.mxu0 %v15462_v31  ;;  %8891 = vmatprep.subr.bf16.mxu1 %v15463_v51 }
 0x605   :  { %8829 = vmatpush1.bf16.msra.mxu0 %v15464_v36  ;;  %8893 = vmatpush1.bf16.msra.mxu1 %v15465_v14 }
 0x606   :  { %8831 = vmatprep.subr.bf16.mxu0 %v15466_v55  ;;  %8895 = vmatprep.subr.bf16.mxu1 %v15467_v15  ;;  %v15511_v55 = vld [vmem:[#allocation5_spill] sm:$0xff] }
 0x609   :  { %8833 = vmatpush1.bf16.msra.mxu0 %v15468_v12  ;;  %8897 = vmatpush1.bf16.msra.mxu1 %v15469_v52 }
 0x60a   :  { %8835 = vmatprep.subr.bf16.mxu0 %v15470_v7  ;;  %8899 = vmatprep.subr.bf16.mxu1 %v15471_v24 }
 0x60d   :  { %8837 = vmatpush1.bf16.msra.mxu0 %v15472_v23  ;;  %8901 = vmatpush1.bf16.msra.mxu1 %v15473_v29  ;;  %v15512_v29 = vld [vmem:[#allocation6_spill] sm:$0xff] }
 0x60e   :  { %8839 = vmatprep.subr.bf16.mxu0 %v15474_v57  ;;  %8903 = vmatprep.subr.bf16.mxu1 %v15475_v21 }
 0x611   :  { %8841 = vmatpush1.bf16.msra.mxu0 %v15476_v34  ;;  %8905 = vmatpush1.bf16.msra.mxu1 %v15477_v1 }
 0x612   :  { %8843 = vmatprep.subr.bf16.mxu0 %v15478_v38  ;;  %8907 = vmatprep.subr.bf16.mxu1 %v15479_v60 }
 0x615   :  { %8845 = vmatpush1.bf16.msra.mxu0 %v15480_v43  ;;  %8909 = vmatpush1.bf16.msra.mxu1 %v15481_v53 }
 0x616   :  { %8847 = vmatprep.subr.bf16.mxu0 %v15482_v63  ;;  %8911 = vmatprep.subr.bf16.mxu1 %v15483_v47 }
 0x619   :  { %8849 = vmatpush1.bf16.msra.mxu0 %v15484_v37  ;;  %8913 = vmatpush1.bf16.msra.mxu1 %v15485_v25  ;;  %v15513_v37 = vld [vmem:[#allocation68_spill] sm:$0xff] }
 0x61a   :  { %8851 = vmatprep.subr.bf16.mxu0 %v15486_v30  ;;  %8915 = vmatprep.subr.bf16.mxu1 %v15487_v16 }
 0x61d   :  { %8853 = vmatpush1.bf16.msra.mxu0 %v15488_v33  ;;  %8917 = vmatpush1.bf16.msra.mxu1 %v15489_v32 }
 0x61e   :  { %8855 = vmatprep.subr.bf16.mxu0 %v15490_v54  ;;  %8919 = vmatprep.subr.bf16.mxu1 %v15491_v40 }
 0x621   :  { %8857 = vmatpush1.bf16.msra.mxu0 %v15492_v44  ;;  %8921 = vmatpush1.bf16.msra.mxu1 %v15493_v49 }
 0x622   :  { %8859 = vmatprep.subr.bf16.mxu0 %v15494_v27  ;;  %8923 = vmatprep.subr.bf16.mxu1 %v15495_v61 }
 0x625   :  { %8861 = vmatpush1.bf16.msra.mxu0 %v15496_v2  ;;  %8925 = vmatpush1.bf16.msra.mxu1 %v15497_v17 }
 0x626   :  { %8863 = vmatprep.subr.bf16.mxu0 %v15498_v0  ;;  %8927 = vmatprep.subr.bf16.mxu1 %v15499_v4 }
 0x629   :  { %8865 = vmatpush1.bf16.msra.mxu0 %v15500_v35  ;;  %8929 = vmatpush1.bf16.msra.mxu1 %v15501_v26  ;;  %v15514_v26 = vld [vmem:[#allocation67_spill] sm:$0xff] }
 0x62a   :  { %8867 = vmatprep.subr.bf16.mxu0 %v15502_v45  ;;  %8931 = vmatprep.subr.bf16.mxu1 %v15503_v5 }
 0x62d   :  { %8869 = vmatpush1.bf16.msra.mxu0 %v15504_v46  ;;  %8933 = vmatpush1.bf16.msra.mxu1 %v15505_v10  ;;  %v3503_v46 = vld [vmem:[%s14884_s2 + $0x200] sm:$0xff] }
 0x62e   :  { %8871 = vmatprep.subr.bf16.mxu0 %v15506_v8  ;;  %8935 = vmatprep.subr.bf16.mxu1 %v15507_v11  ;;  %v3507_v10 = vld [vmem:[%s14884_s2 + $0x220] sm:$0xff]  ;;  %v3505_v11 = vld [vmem:[%s14884_s2 + $0x210] sm:$0xff] }
 0x631   :  { %8873 = vmatpush1.bf16.msra.mxu0 %v15508_v56  ;;  %8937 = vmatpush1.bf16.msra.mxu1 %v15509_v28  ;;  %v3509_v56 = vld [vmem:[%s14884_s2 + $0x230] sm:$0xff]  ;;  %v3512_v28 = vld [vmem:[%s14884_s2 + $0x248] sm:$0xff] }
 0x632   :  { %8939 = vmatprep.subr.bf16.mxu0 %v13153_v22  ;;  %8971 = vmatprep.subr.bf16.mxu1 %v13158_v59 }
 0x6a7   :  { %v2876_v3 = vpop.f32.mrb[24].mxu0  ;;  %v2947_v58 = vpop.f32.mrb[34].mxu1 }
 0x6a8   :  { %v2877_v31 = vadd.f32 %v2876_v3, %v15510_v9  ;;  %v2878_v51 = vpop.f32.mrb[25].mxu0  ;;  %v2949_v36 = vpop.f32.mrb[35].mxu1  ;;  %v2948_v34 = vadd.f32 %v2947_v58, %v11154_v48 }
 0x6a9   :  { %v2879_v15 = vadd.f32 %v2878_v51, %v15511_v55  ;;  %v2950_v57 = vadd.f32 %v2949_v36, %v15512_v29  ;;  %v13202_v51 = vpack.c.bf16 %v3509_v56, %v3505_v11  ;;  %v3511_v36 = vld [vmem:[%s14884_s2 + $0x240] sm:$0xff]  ;;  %v3537_v11 = vld [vmem:[%s14884_s2 + $0x310] sm:$0xff] }
 0x6aa   :  { %v6823_v14 = vmul.f32 -1.442695, %v2877_v31  ;;  %v13200_v31 = vpack.c.bf16 %v3507_v10, %v3503_v46  ;;  %v3539_v46 = vld [vmem:[%s14884_s2 + $0x320] sm:$0xff]  ;;  %v3541_v56 = vld [vmem:[%s14884_s2 + $0x330] sm:$0xff] }
 0x6ab   :  { %v6824_v12 = vmul.f32 -1.442695, %v2879_v15 }
 0x6ac   :  { %9637 = vpow2.f32 %v6823_v14  ;;  %v3515_v14 = vld [vmem:[%s14884_s2 + $0x260] sm:$0xff] }
 0x6ad   :  { %9639 = vpow2.f32 %v6824_v12  ;;  %v13212_v12 = vpack.c.bf16 %v3516_v6, %v3512_v28  ;;  %v3544_v28 = vld [vmem:[%s14884_s2 + $0x348] sm:$0xff]  ;;  %v3546_v6 = vld [vmem:[%s14884_s2 + $0x358] sm:$0xff] }
 0x6b6   :  { %v9638_v52 = vpop.eup %9637 }
 0x6b7   :  { %v2955_v7 = vadd.f32 1.0, %v9638_v52  ;;  %v9640_v24 = vpop.eup %9639  ;;  %v13214_v52 = vpack.c.bf16 %v3518_v20, %v3514_v18  ;;  %v3550_v18 = vld [vmem:[%s14884_s2 + $0x378] sm:$0xff] }
 0x6b8   :  { %v2961_v23 = vadd.f32 1.0, %v9640_v24  ;;  %v3520_v24 = vld [vmem:[%s14884_s2 + $0x288] sm:$0xff] }
 0x6b9   :  { %9641 = vrcp.f32 %v2955_v7  ;;  %v3517_v7 = vld [vmem:[%s14884_s2 + $0x270] sm:$0xff] }
 0x6ba   :  { %9643 = vrcp.f32 %v2961_v23  ;;  %v3524_v23 = vld [vmem:[%s14884_s2 + $0x2a8] sm:$0xff] }
 0x6c3   :  { %v9642_v21 = vpop.eup %9641 }
 0x6c4   :  { %v2964_v1 = vmul.f32 %v9642_v21, %v2950_v57  ;;  %v9644_v33 = vpop.eup %9643  ;;  %v3522_v57 = vld [vmem:[%s14884_s2 + $0x298] sm:$0xff] }
 0x6c5   :  { %v2967_v54 = vsub.f32 1.0, %v9644_v33  ;;  %v2969_v49 = vmul.f32 %v9644_v33, %v13036_v13  ;;  %v3526_v21 = vld [vmem:[%s14884_s2 + $0x2b8] sm:$0xff] }
 0x6c6   :  { %v2965_v38 = vadd.f32 %v2964_v1, %v2948_v34  ;;  %v13238_v34 = vpack.c.bf16 %v3515_v14, %v3511_v36  ;;  %v3547_v36 = vld [vmem:[%s14884_s2 + $0x360] sm:$0xff] }
 0x6c7   :  { %v3108_v60 = vpop.f32.mrb[10].mxu0  ;;  %v3179_v43 = vpop.f32.mrb[36].mxu1 }
 0x6c8   :  { %9645 = vtanh.f32 %v2965_v38  ;;  %v9524_v53 = vadd.f32 %v3108_v60, %v11002_v41  ;;  %v3110_v63 = vpop.f32.mrb[11].mxu0  ;;  %v3180_v47 = vpop.f32.mrb[37].mxu1  ;;  %v3519_v38 = vld [vmem:[%s14884_s2 + $0x280] sm:$0xff]  ;;  %v13250_v43 = vpack.c.bf16 %v3524_v23, %v3520_v24  ;;  %v3549_v24 = vld [vmem:[%s14884_s2 + $0x370] sm:$0xff]  ;;  %v3552_v23 = vld [vmem:[%s14884_s2 + $0x388] sm:$0xff] }
 0x6c9   :  { %v3197_v25 = vadd.f32 %v3180_v47, %v15513_v37  ;;  %v9525_v16 = vadd.f32 %v3110_v63, %v11010_v39  ;;  %v3523_v60 = vld [vmem:[%s14884_s2 + $0x2a0] sm:$0xff]  ;;  %v3521_v63 = vld [vmem:[%s14884_s2 + $0x290] sm:$0xff]  ;;  %v3528_v37 = vld [vmem:[%s14884_s2 + $0x2c8] sm:$0xff] }
 0x6ca   :  { %v6825_v30 = vmul.f32 -1.442695, %v9524_v53  ;;  %v13252_v53 = vpack.c.bf16 %v3526_v21, %v3522_v57  ;;  %v3525_v47 = vld [vmem:[%s14884_s2 + $0x2b0] sm:$0xff]  ;;  %v13276_v33 = vpack.c.bf16 %v3523_v60, %v3519_v38  ;;  %v3556_v57 = vld [vmem:[%s14884_s2 + $0x3a8] sm:$0xff]  ;;  %v3554_v21 = vld [vmem:[%s14884_s2 + $0x398] sm:$0xff] }
 0x6cb   :  { %v6826_v32 = vmul.f32 -1.442695, %v9525_v16  ;;  %v3534_v16 = vld [vmem:[%s14884_s2 + $0x2f8] sm:$0xff] }
 0x6cc   :  { %9647 = vpow2.f32 %v6825_v30  ;;  %v3530_v30 = vld [vmem:[%s14884_s2 + $0x2d8] sm:$0xff] }
 0x6cd   :  { %9649 = vpow2.f32 %v6826_v32  ;;  %v13278_v32 = vpack.c.bf16 %v3525_v47, %v3521_v63  ;;  %v3558_v38 = vld [vmem:[%s14884_s2 + $0x3b8] sm:$0xff]  ;;  %v3551_v47 = vld [vmem:[%s14884_s2 + $0x380] sm:$0xff] }
 0x6d2   :  { %v9646_v40 = vpop.eup %9645 }
 0x6d3   :  { %v2968_v44 = vmul.f32 %v9646_v40, %v2967_v54  ;;  %v3527_v54 = vld [vmem:[%s14884_s2 + $0x2c0] sm:$0xff] }
 0x6d4   :  { %v3531_v40 = vld [vmem:[%s14884_s2 + $0x2e0] sm:$0xff] }
 0x6d5   :  { %v13170_v27 = vadd.f32 %v2969_v49, %v2968_v44  ;;  %v13290_v49 = vpack.c.bf16 %v3534_v16, %v3530_v30  ;;  %v13398_v30 = vpack.c.bf16 %v3558_v38, %v3554_v21  ;;  %v3553_v16 = vld [vmem:[%s14884_s2 + $0x390] sm:$0xff] }
 0x6d6   :  { %v9648_v61 = vpop.eup %9647 }
 0x6d7   :  { %v3187_v2 = vadd.f32 1.0, %v9648_v61  ;;  %3399 = vmatprep.mubr.f32.mxu0 %v13170_v27  ;;  %3470 = vmatprep.mubr.f32.mxu1 %v13170_v27  ;;  %v9650_v17 = vpop.eup %9649  ;;  %v3529_v61 = vld [vmem:[%s14884_s2 + $0x2d0] sm:$0xff] }
 0x6d8   :  { %v3194_v0 = vadd.f32 1.0, %v9650_v17  ;;  %v3536_v17 = vld [vmem:[%s14884_s2 + $0x308] sm:$0xff] }
 0x6d9   :  { %9651 = vrcp.f32 %v3187_v2  ;;  %v3533_v2 = vld [vmem:[%s14884_s2 + $0x2f0] sm:$0xff] }
 0x6da   :  { %9653 = vrcp.f32 %v3194_v0  ;;  %v3540_v0 = vld [vmem:[%s14884_s2 + $0x328] sm:$0xff] }
 0x6db   :  { %v13324_v10 = vpack.c.bf16 %v3540_v0, %v3536_v17  ;;  %v3566_v17 = vld [vmem:[%s14884_s2 + $0x3f8] sm:$0xff] }
 0x6e3   :  { %v9652_v4 = vpop.eup %9651 }
 0x6e4   :  { %v3198_v35 = vmul.f32 %v9652_v4, %v3197_v25  ;;  %v9654_v5 = vpop.eup %9653  ;;  %v3532_v25 = vld [vmem:[%s14884_s2 + $0x2e8] sm:$0xff]  ;;  %v3538_v4 = vld [vmem:[%s14884_s2 + $0x318] sm:$0xff] }
 0x6e5   :  { %v3201_v8 = vsub.f32 1.0, %v9654_v5  ;;  %v3203_v58 = vmul.f32 %v9654_v5, %v13042_v50  ;;  %v3513_v50 = vld [vmem:[%s14884_s2 + $0x250] sm:$0xff]  ;;  %v13288_v44 = vpack.c.bf16 %v3532_v25, %v3528_v37  ;;  %v3535_v5 = vld [vmem:[%s14884_s2 + $0x300] sm:$0xff]  ;;  %v13396_v25 = vpack.c.bf16 %v3556_v57, %v3552_v23 }
 0x6e6   :  { %v3199_v45 = vadd.f32 %v3198_v35, %v15514_v26  ;;  %v13240_v1 = vpack.c.bf16 %v3517_v7, %v3513_v50  ;;  %v3542_v35 = vld [vmem:[%s14884_s2 + $0x338] sm:$0xff]  ;;  %v13312_v26 = vpack.c.bf16 %v3531_v40, %v3527_v54  ;;  %v13348_v20 = vpack.c.bf16 %v3539_v46, %v3535_v5  ;;  %v3545_v7 = vld [vmem:[%s14884_s2 + $0x350] sm:$0xff]  ;;  %v3555_v37 = vld [vmem:[%s14884_s2 + $0x3a0] sm:$0xff] }
 0x6e7   :  { %v13362_v50 = vpack.c.bf16 %v3550_v18, %v3546_v6  ;;  %v13386_v63 = vpack.c.bf16 %v3549_v24, %v3545_v7  ;;  %v3557_v54 = vld [vmem:[%s14884_s2 + $0x3b0] sm:$0xff]  ;;  %v3560_v40 = vld [vmem:[%s14884_s2 + $0x3c8] sm:$0xff]  ;;  %v13420_v0 = vpack.c.bf16 %v3555_v37, %v3551_v47  ;;  %v6966_v24 = vld [vmem:[%s14884_s2 + $0x438] sm:$0xff] }
 0x6e8   :  { %9655 = vtanh.f32 %v3199_v45  ;;  %v13314_v45 = vpack.c.bf16 %v3533_v2, %v3529_v61  ;;  %v3564_v61 = vld [vmem:[%s14884_s2 + $0x3e8] sm:$0xff]  ;;  %v3562_v2 = vld [vmem:[%s14884_s2 + $0x3d8] sm:$0xff]  ;;  %v6959_v23 = vld [vmem:[%s14884_s2 + $0x400] sm:$0xff] }
 0x6e9   :  { %v13429_v5 = vpack.c.bf16 %v3564_v61, %v3560_v40  ;;  %v13431_v46 = vpack.c.bf16 %v3566_v17, %v3562_v2  ;;  %v6960_v18 = vld [vmem:[%s14884_s2 + $0x408] sm:$0xff]  ;;  %v6963_v57 = vld [vmem:[%s14884_s2 + $0x420] sm:$0xff]  ;;  %v6961_v47 = vld [vmem:[%s14884_s2 + $0x410] sm:$0xff] }
 0x6ea   :  { %v13476_v38 = vpack.c.bf16 %v6963_v57, %v6959_v23  ;;  %v6965_v37 = vld [vmem:[%s14884_s2 + $0x430] sm:$0xff]  ;;  %v6972_v40 = vld [vmem:[%s14884_s2 + $0x468] sm:$0xff]  ;;  %v6970_v61 = vld [vmem:[%s14884_s2 + $0x458] sm:$0xff] }
 0x6eb   :  { %v6974_v17 = vld [vmem:[%s14884_s2 + $0x478] sm:$0xff]  ;;  %v6980_v23 = vld [vmem:[%s14884_s2 + $0x4a8] sm:$0xff] }
 0x6ec   :  { %v6978_v57 = vld [vmem:[%s14884_s2 + $0x498] sm:$0xff] }
 0x6f2   :  { %v9656_v62 = vpop.eup %9655 }
 0x6f3   :  { %v3202_v3 = vmul.f32 %v9656_v62, %v3201_v8  ;;  %v13326_v8 = vpack.c.bf16 %v3542_v35, %v3538_v4  ;;  %v3548_v62 = vld [vmem:[%s14884_s2 + $0x368] sm:$0xff]  ;;  %v13422_v4 = vpack.c.bf16 %v3557_v54, %v3553_v16  ;;  %v3559_v35 = vld [vmem:[%s14884_s2 + $0x3c0] sm:$0xff]  ;;  %v13485_v16 = vpack.c.bf16 %v6965_v37, %v6961_v47  ;;  %v6982_v37 = vld [vmem:[%s14884_s2 + $0x4b8] sm:$0xff] }
 0x6f4   :  { %v13360_v14 = vpack.c.bf16 %v3548_v62, %v3544_v28  ;;  %v3565_v28 = vld [vmem:[%s14884_s2 + $0x3f0] sm:$0xff]  ;;  %v6968_v54 = vld [vmem:[%s14884_s2 + $0x448] sm:$0xff] }
 0x6f5   :  { %v13210_v15 = vadd.f32 %v3203_v58, %v3202_v3  ;;  %v13350_v3 = vpack.c.bf16 %v3541_v56, %v3537_v11  ;;  %v3543_v58 = vld [vmem:[%s14884_s2 + $0x340] sm:$0xff]  ;;  %v3561_v56 = vld [vmem:[%s14884_s2 + $0x3d0] sm:$0xff]  ;;  %v13499_v2 = vpack.c.bf16 %v6972_v40, %v6968_v54 }
 0x6f6   :  { %v13384_v60 = vpack.c.bf16 %v3547_v36, %v3543_v58  ;;  %v3563_v11 = vld [vmem:[%s14884_s2 + $0x3e0] sm:$0xff]  ;;  %v13446_v6 = vpack.c.bf16 %v3565_v28, %v3561_v56  ;;  %v6964_v58 = vld [vmem:[%s14884_s2 + $0x428] sm:$0xff]  ;;  %v6962_v36 = vld [vmem:[%s14884_s2 + $0x418] sm:$0xff]  ;;  %v13510_v56 = vpack.c.bf16 %v6974_v17, %v6970_v61  ;;  %v13546_v61 = vpack.c.bf16 %v6982_v37, %v6978_v57 }
 0x6f7   :  { %3400 = vmatmul.mubr.f32.vlgmr.msra.gmra.mrb[26].mxu0 %v13210_v15  ;;  %3471 = vmatmul.mubr.f32.vlgmr.msra.gmra.mrb[38].mxu1 %v13210_v15  ;;  %v13444_v62 = vpack.c.bf16 %v3563_v11, %v3559_v35  ;;  %v13463_v7 = vpack.c.bf16 %v6964_v58, %v6960_v18  ;;  %v13474_v21 = vpack.c.bf16 %v6966_v24, %v6962_v36  ;;  %v6967_v35 = vld [vmem:[%s14884_s2 + $0x440] sm:$0xff]  ;;  %v6969_v18 = vld [vmem:[%s14884_s2 + $0x450] sm:$0xff]  ;;  %v6976_v24 = vld [vmem:[%s14884_s2 + $0x488] sm:$0xff] }
 0x6f8   :  { %8941 = vmatpush1.bf16.msra.mxu0 %v13200_v31  ;;  %8973 = vmatpush1.bf16.msra.mxu1 %v13202_v51  ;;  %v6971_v11 = vld [vmem:[%s14884_s2 + $0x460] sm:$0xff]  ;;  %v6973_v58 = vld [vmem:[%s14884_s2 + $0x470] sm:$0xff]  ;;  %v13535_v47 = vpack.c.bf16 %v6980_v23, %v6976_v24  ;;  %15515 = vst [vmem:[#allocation63_spill] sm:$0xff] %v13546_v61  ;;  %v6988_v24 = vld [vmem:[%s14884_s2 + $0x4e8] sm:$0xff] }
 0x6f9   :  { %8943 = vmatprep.subr.bf16.mxu0 %v13212_v12  ;;  %8975 = vmatprep.subr.bf16.mxu1 %v13214_v52  ;;  %v13512_v28 = vpack.c.bf16 %v6971_v11, %v6967_v35  ;;  %v13521_v36 = vpack.c.bf16 %v6973_v58, %v6969_v18  ;;  %v6975_v54 = vld [vmem:[%s14884_s2 + $0x480] sm:$0xff]  ;;  %v6977_v35 = vld [vmem:[%s14884_s2 + $0x490] sm:$0xff]  ;;  %v6984_v58 = vld [vmem:[%s14884_s2 + $0x4c8] sm:$0xff] }
 0x6fa   :  { %3631 = vmatprep.mubr.f32.mxu0 %v15212_v42  ;;  %3702 = vmatprep.mubr.f32.mxu1 %v15212_v42  ;;  %v6979_v40 = vld [vmem:[%s14884_s2 + $0x4a0] sm:$0xff]  ;;  %v6981_v11 = vld [vmem:[%s14884_s2 + $0x4b0] sm:$0xff]  ;;  %v6986_v23 = vld [vmem:[%s14884_s2 + $0x4d8] sm:$0xff]  ;;  %v13571_v57 = vpack.c.bf16 %v6988_v24, %v6984_v58 }
 0x6fb   :  { %v13548_v17 = vpack.c.bf16 %v6979_v40, %v6975_v54  ;;  %v13557_v18 = vpack.c.bf16 %v6981_v11, %v6977_v35  ;;  %v6990_v37 = vld [vmem:[%s14884_s2 + $0x4f8] sm:$0xff]  ;;  %v6983_v54 = vld [vmem:[%s14884_s2 + $0x4c0] sm:$0xff]  ;;  %v6985_v58 = vld [vmem:[%s14884_s2 + $0x4d0] sm:$0xff] }
 0x6fc   :  { %8945 = vmatpush1.bf16.msra.mxu0 %v13238_v34  ;;  %8977 = vmatpush1.bf16.msra.mxu1 %v13240_v1  ;;  %15518 = vst [vmem:[#allocation8_spill] sm:$0xff] %v13571_v57  ;;  %v6987_v40 = vld [vmem:[%s14884_s2 + $0x4e0] sm:$0xff]  ;;  %v13582_v35 = vpack.c.bf16 %v6990_v37, %v6986_v23  ;;  %v6989_v24 = vld [vmem:[%s14884_s2 + $0x4f0] sm:$0xff]  ;;  %v6992_v23 = vld [vmem:[%s14884_s2 + $0x508] sm:$0xff] }
 0x6fd   :  { %8947 = vmatprep.subr.bf16.mxu0 %v13250_v43  ;;  %8979 = vmatprep.subr.bf16.mxu1 %v13252_v53  ;;  %15516 = vst [vmem:[#allocation66_spill] sm:$0xff] %v13548_v17  ;;  %15517 = vst [vmem:[#allocation65_spill] sm:$0xff] %v13557_v18  ;;  %v13584_v11 = vpack.c.bf16 %v6987_v40, %v6983_v54  ;;  %v13593_v13 = vpack.c.bf16 %v6989_v24, %v6985_v58  ;;  %v6996_v37 = vld [vmem:[%s14884_s2 + $0x528] sm:$0xff]  ;;  %v6994_v54 = vld [vmem:[%s14884_s2 + $0x518] sm:$0xff] }
 0x6fe   :  { %15519 = vst [vmem:[#allocation9_spill] sm:$0xff] %v13582_v35  ;;  %v13607_v40 = vpack.c.bf16 %v6996_v37, %v6992_v23  ;;  %v6998_v58 = vld [vmem:[%s14884_s2 + $0x538] sm:$0xff]  ;;  %v6991_v24 = vld [vmem:[%s14884_s2 + $0x500] sm:$0xff]  ;;  %v6993_v23 = vld [vmem:[%s14884_s2 + $0x510] sm:$0xff] }
 0x6ff   :  { %15520 = vst [vmem:[#allocation10_spill] sm:$0xff] %v13584_v11  ;;  %15521 = vst [vmem:[#allocation11_spill] sm:$0xff] %v13593_v13  ;;  %v6997_v37 = vld [vmem:[%s14884_s2 + $0x530] sm:$0xff] }
 0x700   :  { %8949 = vmatpush1.bf16.msra.mxu0 %v13276_v33  ;;  %8981 = vmatpush1.bf16.msra.mxu1 %v13278_v32  ;;  %15522 = vst [vmem:[#allocation12_spill] sm:$0xff] %v13607_v40 }
 0x701   :  { %8951 = vmatprep.subr.bf16.mxu0 %v13288_v44  ;;  %8983 = vmatprep.subr.bf16.mxu1 %v13290_v49 }
 0x704   :  { %8953 = vmatpush1.bf16.msra.mxu0 %v13312_v26  ;;  %8985 = vmatpush1.bf16.msra.mxu1 %v13314_v45 }
 0x705   :  { %8955 = vmatprep.subr.bf16.mxu0 %v13324_v10  ;;  %8987 = vmatprep.subr.bf16.mxu1 %v13326_v8 }
 0x708   :  { %8957 = vmatpush1.bf16.msra.mxu0 %v13348_v20  ;;  %8989 = vmatpush1.bf16.msra.mxu1 %v13350_v3 }
 0x709   :  { %8959 = vmatprep.subr.bf16.mxu0 %v13360_v14  ;;  %8991 = vmatprep.subr.bf16.mxu1 %v13362_v50 }
 0x70c   :  { %8961 = vmatpush1.bf16.msra.mxu0 %v13384_v60  ;;  %8993 = vmatpush1.bf16.msra.mxu1 %v13386_v63 }
 0x70d   :  { %8963 = vmatprep.subr.bf16.mxu0 %v13396_v25  ;;  %8995 = vmatprep.subr.bf16.mxu1 %v13398_v30 }
 0x710   :  { %8965 = vmatpush1.bf16.msra.mxu0 %v13420_v0  ;;  %8997 = vmatpush1.bf16.msra.mxu1 %v13422_v4 }
 0x711   :  { %8967 = vmatprep.subr.bf16.mxu0 %v13429_v5  ;;  %8999 = vmatprep.subr.bf16.mxu1 %v13431_v46 }
 0x714   :  { %8969 = vmatpush1.bf16.msra.mxu0 %v13444_v62  ;;  %9001 = vmatpush1.bf16.msra.mxu1 %v13446_v6 }
 0x715   :  { %9003 = vmatprep.subr.bf16.mxu0 %v13463_v7  ;;  %9067 = vmatprep.subr.bf16.mxu1 %v13474_v21 }
 0x717   :  { %3632 = vmatmul.mubr.f32.vlgmr.msra.gmra.mrb[12].mxu0 %v13210_v15  ;;  %3703 = vmatmul.mubr.f32.vlgmr.msra.gmra.mrb[40].mxu1 %v13210_v15 }
 0x718   :  { %9005 = vmatpush1.bf16.msra.mxu0 %v13476_v38  ;;  %9069 = vmatpush1.bf16.msra.mxu1 %v13485_v16 }
 0x719   :  { %9007 = vmatprep.subr.bf16.mxu0 %v13499_v2  ;;  %9071 = vmatprep.subr.bf16.mxu1 %v13510_v56 }
 0x71c   :  { %9009 = vmatpush1.bf16.msra.mxu0 %v13512_v28  ;;  %9073 = vmatpush1.bf16.msra.mxu1 %v13521_v36 }
 0x71d   :  { %9011 = vmatprep.subr.bf16.mxu0 %v13535_v47  ;;  %9075 = vmatprep.subr.bf16.mxu1 %v13546_v61 }
 0x720   :  { %9013 = vmatpush1.bf16.msra.mxu0 %v13548_v17  ;;  %9077 = vmatpush1.bf16.msra.mxu1 %v13557_v18  ;;  %v7073_v18 = vld [vmem:[%s14884_s2 + $0x790] sm:$0xff] }
 0x721   :  { %9015 = vmatprep.subr.bf16.mxu0 %v13571_v57  ;;  %9079 = vmatprep.subr.bf16.mxu1 %v13582_v35  ;;  %v13620_v35 = vpack.c.bf16 %v6995_v19, %v6991_v24  ;;  %v7000_v19 = vld [vmem:[%s14884_s2 + $0x548] sm:$0xff] }
 0x723   :  { %15524 = vst [vmem:[#allocation14_spill] sm:$0xff] %v13620_v35 }
 0x724   :  { %9017 = vmatpush1.bf16.msra.mxu0 %v13584_v11  ;;  %9081 = vmatpush1.bf16.msra.mxu1 %v13593_v13  ;;  %v13618_v11 = vpack.c.bf16 %v6998_v58, %v6994_v54  ;;  %v13629_v13 = vpack.c.bf16 %v6997_v37, %v6993_v23  ;;  %v7004_v54 = vld [vmem:[%s14884_s2 + $0x568] sm:$0xff]  ;;  %v7002_v58 = vld [vmem:[%s14884_s2 + $0x558] sm:$0xff]  ;;  %v6999_v37 = vld [vmem:[%s14884_s2 + $0x540] sm:$0xff] }
 0x725   :  { %9019 = vmatprep.subr.bf16.mxu0 %v13607_v40  ;;  %v13643_v24 = vpack.c.bf16 %v7004_v54, %v7000_v19  ;;  %v7006_v23 = vld [vmem:[%s14884_s2 + $0x578] sm:$0xff]  ;;  %v7001_v19 = vld [vmem:[%s14884_s2 + $0x550] sm:$0xff] }
 0x726   :  { %15523 = vst [vmem:[#allocation13_spill] sm:$0xff] %v13618_v11  ;;  %15525 = vst [vmem:[#allocation15_spill] sm:$0xff] %v13629_v13  ;;  %9083 = vmatprep.subr.bf16.mxu1 %v13618_v11  ;;  %v13654_v11 = vpack.c.bf16 %v7006_v23, %v7002_v58  ;;  %v7005_v54 = vld [vmem:[%s14884_s2 + $0x570] sm:$0xff]  ;;  %v7012_v58 = vld [vmem:[%s14884_s2 + $0x5a8] sm:$0xff] }
 0x727   :  { %15526 = vst [vmem:[#allocation16_spill] sm:$0xff] %v13643_v24  ;;  %v7010_v23 = vld [vmem:[%s14884_s2 + $0x598] sm:$0xff] }
 0x728   :  { %9021 = vmatpush1.bf16.msra.mxu0 %v13620_v35  ;;  %9085 = vmatpush1.bf16.msra.mxu1 %v13629_v13  ;;  %v7003_v35 = vld [vmem:[%s14884_s2 + $0x560] sm:$0xff]  ;;  %15527 = vst [vmem:[#allocation17_spill] sm:$0xff] %v13654_v11  ;;  %v13665_v13 = vpack.c.bf16 %v7005_v54, %v7001_v19  ;;  %v7014_v19 = vld [vmem:[%s14884_s2 + $0x5b8] sm:$0xff] }
 0x729   :  { %v13656_v40 = vpack.c.bf16 %v7003_v35, %v6999_v37  ;;  %9023 = vmatprep.subr.bf16.mxu0 %v13643_v24  ;;  %9087 = vmatprep.subr.bf16.mxu1 %v13654_v11  ;;  %v7008_v35 = vld [vmem:[%s14884_s2 + $0x588] sm:$0xff]  ;;  %v7007_v54 = vld [vmem:[%s14884_s2 + $0x580] sm:$0xff]  ;;  %v13690_v11 = vpack.c.bf16 %v7014_v19, %v7010_v23  ;;  %v7018_v19 = vld [vmem:[%s14884_s2 + $0x5d8] sm:$0xff] }
 0x72a   :  { %15529 = vst [vmem:[#allocation19_spill] sm:$0xff] %v13665_v13  ;;  %v13679_v37 = vpack.c.bf16 %v7012_v58, %v7008_v35  ;;  %v7009_v35 = vld [vmem:[%s14884_s2 + $0x590] sm:$0xff]  ;;  %v7020_v23 = vld [vmem:[%s14884_s2 + $0x5e8] sm:$0xff] }
 0x72b   :  { %15528 = vst [vmem:[#allocation18_spill] sm:$0xff] %v13656_v40  ;;  %15531 = vst [vmem:[#allocation21_spill] sm:$0xff] %v13690_v11  ;;  %v7013_v58 = vld [vmem:[%s14884_s2 + $0x5b0] sm:$0xff] }
 0x72c   :  { %9025 = vmatpush1.bf16.msra.mxu0 %v13656_v40  ;;  %9089 = vmatpush1.bf16.msra.mxu1 %v13665_v13  ;;  %15530 = vst [vmem:[#allocation20_spill] sm:$0xff] %v13679_v37  ;;  %v7011_v40 = vld [vmem:[%s14884_s2 + $0x5a0] sm:$0xff]  ;;  %v13701_v13 = vpack.c.bf16 %v7013_v58, %v7009_v35  ;;  %v7022_v35 = vld [vmem:[%s14884_s2 + $0x5f8] sm:$0xff] }
 0x72d   :  { %v13692_v24 = vpack.c.bf16 %v7011_v40, %v7007_v54  ;;  %9027 = vmatprep.subr.bf16.mxu0 %v13679_v37  ;;  %9091 = vmatprep.subr.bf16.mxu1 %v13690_v11  ;;  %v7016_v40 = vld [vmem:[%s14884_s2 + $0x5c8] sm:$0xff]  ;;  %v7015_v58 = vld [vmem:[%s14884_s2 + $0x5c0] sm:$0xff]  ;;  %v13726_v11 = vpack.c.bf16 %v7022_v35, %v7018_v19  ;;  %v7026_v35 = vld [vmem:[%s14884_s2 + $0x618] sm:$0xff] }
 0x72e   :  { %15533 = vst [vmem:[#allocation23_spill] sm:$0xff] %v13701_v13  ;;  %v13715_v54 = vpack.c.bf16 %v7020_v23, %v7016_v40  ;;  %v7017_v40 = vld [vmem:[%s14884_s2 + $0x5d0] sm:$0xff]  ;;  %v7028_v19 = vld [vmem:[%s14884_s2 + $0x628] sm:$0xff] }
 0x72f   :  { %15532 = vst [vmem:[#allocation22_spill] sm:$0xff] %v13692_v24  ;;  %15535 = vst [vmem:[#allocation25_spill] sm:$0xff] %v13726_v11  ;;  %v7021_v23 = vld [vmem:[%s14884_s2 + $0x5f0] sm:$0xff] }
 0x730   :  { %9029 = vmatpush1.bf16.msra.mxu0 %v13692_v24  ;;  %9093 = vmatpush1.bf16.msra.mxu1 %v13701_v13  ;;  %15534 = vst [vmem:[#allocation24_spill] sm:$0xff] %v13715_v54  ;;  %v7019_v24 = vld [vmem:[%s14884_s2 + $0x5e0] sm:$0xff]  ;;  %v13737_v13 = vpack.c.bf16 %v7021_v23, %v7017_v40  ;;  %v7030_v40 = vld [vmem:[%s14884_s2 + $0x638] sm:$0xff] }
 0x731   :  { %v13728_v37 = vpack.c.bf16 %v7019_v24, %v7015_v58  ;;  %9031 = vmatprep.subr.bf16.mxu0 %v13715_v54  ;;  %9095 = vmatprep.subr.bf16.mxu1 %v13726_v11  ;;  %v7024_v24 = vld [vmem:[%s14884_s2 + $0x608] sm:$0xff]  ;;  %v7023_v23 = vld [vmem:[%s14884_s2 + $0x600] sm:$0xff]  ;;  %v13762_v11 = vpack.c.bf16 %v7030_v40, %v7026_v35  ;;  %v7034_v40 = vld [vmem:[%s14884_s2 + $0x658] sm:$0xff] }
 0x732   :  { %15537 = vst [vmem:[#allocation27_spill] sm:$0xff] %v13737_v13  ;;  %v13751_v58 = vpack.c.bf16 %v7028_v19, %v7024_v24  ;;  %v7025_v24 = vld [vmem:[%s14884_s2 + $0x610] sm:$0xff]  ;;  %v7036_v35 = vld [vmem:[%s14884_s2 + $0x668] sm:$0xff] }
 0x733   :  { %15536 = vst [vmem:[#allocation26_spill] sm:$0xff] %v13728_v37  ;;  %15539 = vst [vmem:[#allocation29_spill] sm:$0xff] %v13762_v11  ;;  %v7029_v19 = vld [vmem:[%s14884_s2 + $0x630] sm:$0xff] }
 0x734   :  { %9033 = vmatpush1.bf16.msra.mxu0 %v13728_v37  ;;  %9097 = vmatpush1.bf16.msra.mxu1 %v13737_v13  ;;  %15538 = vst [vmem:[#allocation28_spill] sm:$0xff] %v13751_v58  ;;  %v7027_v37 = vld [vmem:[%s14884_s2 + $0x620] sm:$0xff]  ;;  %v13773_v13 = vpack.c.bf16 %v7029_v19, %v7025_v24  ;;  %v7038_v24 = vld [vmem:[%s14884_s2 + $0x678] sm:$0xff] }
 0x735   :  { %v13764_v54 = vpack.c.bf16 %v7027_v37, %v7023_v23  ;;  %9035 = vmatprep.subr.bf16.mxu0 %v13751_v58  ;;  %9099 = vmatprep.subr.bf16.mxu1 %v13762_v11  ;;  %v7032_v37 = vld [vmem:[%s14884_s2 + $0x648] sm:$0xff]  ;;  %v7031_v19 = vld [vmem:[%s14884_s2 + $0x640] sm:$0xff]  ;;  %v13798_v11 = vpack.c.bf16 %v7038_v24, %v7034_v40  ;;  %v7042_v24 = vld [vmem:[%s14884_s2 + $0x698] sm:$0xff] }
 0x736   :  { %15541 = vst [vmem:[#allocation31_spill] sm:$0xff] %v13773_v13  ;;  %v13787_v23 = vpack.c.bf16 %v7036_v35, %v7032_v37  ;;  %v7033_v37 = vld [vmem:[%s14884_s2 + $0x650] sm:$0xff]  ;;  %v7044_v40 = vld [vmem:[%s14884_s2 + $0x6a8] sm:$0xff] }
 0x737   :  { %15540 = vst [vmem:[#allocation30_spill] sm:$0xff] %v13764_v54  ;;  %15543 = vst [vmem:[#allocation33_spill] sm:$0xff] %v13798_v11  ;;  %v7037_v35 = vld [vmem:[%s14884_s2 + $0x670] sm:$0xff] }
 0x738   :  { %9037 = vmatpush1.bf16.msra.mxu0 %v13764_v54  ;;  %9101 = vmatpush1.bf16.msra.mxu1 %v13773_v13  ;;  %15542 = vst [vmem:[#allocation32_spill] sm:$0xff] %v13787_v23  ;;  %v7035_v54 = vld [vmem:[%s14884_s2 + $0x660] sm:$0xff]  ;;  %v13809_v13 = vpack.c.bf16 %v7037_v35, %v7033_v37  ;;  %v7046_v37 = vld [vmem:[%s14884_s2 + $0x6b8] sm:$0xff] }
 0x739   :  { %v13800_v58 = vpack.c.bf16 %v7035_v54, %v7031_v19  ;;  %9039 = vmatprep.subr.bf16.mxu0 %v13787_v23  ;;  %9103 = vmatprep.subr.bf16.mxu1 %v13798_v11  ;;  %v7040_v54 = vld [vmem:[%s14884_s2 + $0x688] sm:$0xff]  ;;  %v7039_v35 = vld [vmem:[%s14884_s2 + $0x680] sm:$0xff]  ;;  %v13834_v11 = vpack.c.bf16 %v7046_v37, %v7042_v24  ;;  %v7050_v37 = vld [vmem:[%s14884_s2 + $0x6d8] sm:$0xff] }
 0x73a   :  { %15545 = vst [vmem:[#allocation35_spill] sm:$0xff] %v13809_v13  ;;  %v13823_v19 = vpack.c.bf16 %v7044_v40, %v7040_v54  ;;  %v7041_v54 = vld [vmem:[%s14884_s2 + $0x690] sm:$0xff]  ;;  %v7052_v24 = vld [vmem:[%s14884_s2 + $0x6e8] sm:$0xff] }
 0x73b   :  { %15544 = vst [vmem:[#allocation34_spill] sm:$0xff] %v13800_v58  ;;  %15547 = vst [vmem:[#allocation37_spill] sm:$0xff] %v13834_v11  ;;  %v7045_v40 = vld [vmem:[%s14884_s2 + $0x6b0] sm:$0xff] }
 0x73c   :  { %9041 = vmatpush1.bf16.msra.mxu0 %v13800_v58  ;;  %9105 = vmatpush1.bf16.msra.mxu1 %v13809_v13  ;;  %15546 = vst [vmem:[#allocation36_spill] sm:$0xff] %v13823_v19  ;;  %v7043_v58 = vld [vmem:[%s14884_s2 + $0x6a0] sm:$0xff]  ;;  %v13845_v13 = vpack.c.bf16 %v7045_v40, %v7041_v54  ;;  %v7054_v54 = vld [vmem:[%s14884_s2 + $0x6f8] sm:$0xff] }
 0x73d   :  { %v13836_v23 = vpack.c.bf16 %v7043_v58, %v7039_v35  ;;  %9043 = vmatprep.subr.bf16.mxu0 %v13823_v19  ;;  %9107 = vmatprep.subr.bf16.mxu1 %v13834_v11  ;;  %v7048_v58 = vld [vmem:[%s14884_s2 + $0x6c8] sm:$0xff]  ;;  %v7047_v40 = vld [vmem:[%s14884_s2 + $0x6c0] sm:$0xff]  ;;  %v13870_v11 = vpack.c.bf16 %v7054_v54, %v7050_v37  ;;  %v7058_v54 = vld [vmem:[%s14884_s2 + $0x718] sm:$0xff] }
 0x73e   :  { %15549 = vst [vmem:[#allocation39_spill] sm:$0xff] %v13845_v13  ;;  %v13859_v35 = vpack.c.bf16 %v7052_v24, %v7048_v58  ;;  %v7049_v58 = vld [vmem:[%s14884_s2 + $0x6d0] sm:$0xff]  ;;  %v7060_v37 = vld [vmem:[%s14884_s2 + $0x728] sm:$0xff] }
 0x73f   :  { %15548 = vst [vmem:[#allocation38_spill] sm:$0xff] %v13836_v23  ;;  %15551 = vst [vmem:[#allocation41_spill] sm:$0xff] %v13870_v11  ;;  %v7053_v24 = vld [vmem:[%s14884_s2 + $0x6f0] sm:$0xff] }
 0x740   :  { %9045 = vmatpush1.bf16.msra.mxu0 %v13836_v23  ;;  %9109 = vmatpush1.bf16.msra.mxu1 %v13845_v13  ;;  %15550 = vst [vmem:[#allocation40_spill] sm:$0xff] %v13859_v35  ;;  %v7051_v23 = vld [vmem:[%s14884_s2 + $0x6e0] sm:$0xff]  ;;  %v13881_v13 = vpack.c.bf16 %v7053_v24, %v7049_v58  ;;  %v7062_v58 = vld [vmem:[%s14884_s2 + $0x738] sm:$0xff] }
 0x741   :  { %v13872_v19 = vpack.c.bf16 %v7051_v23, %v7047_v40  ;;  %9047 = vmatprep.subr.bf16.mxu0 %v13859_v35  ;;  %9111 = vmatprep.subr.bf16.mxu1 %v13870_v11  ;;  %v7056_v23 = vld [vmem:[%s14884_s2 + $0x708] sm:$0xff]  ;;  %v7055_v24 = vld [vmem:[%s14884_s2 + $0x700] sm:$0xff]  ;;  %v13906_v11 = vpack.c.bf16 %v7062_v58, %v7058_v54  ;;  %v7066_v58 = vld [vmem:[%s14884_s2 + $0x758] sm:$0xff] }
 0x742   :  { %15553 = vst [vmem:[#allocation43_spill] sm:$0xff] %v13881_v13  ;;  %v13895_v40 = vpack.c.bf16 %v7060_v37, %v7056_v23  ;;  %v7057_v23 = vld [vmem:[%s14884_s2 + $0x710] sm:$0xff]  ;;  %v7068_v54 = vld [vmem:[%s14884_s2 + $0x768] sm:$0xff] }
 0x743   :  { %15552 = vst [vmem:[#allocation42_spill] sm:$0xff] %v13872_v19  ;;  %15555 = vst [vmem:[#allocation45_spill] sm:$0xff] %v13906_v11  ;;  %v7061_v37 = vld [vmem:[%s14884_s2 + $0x730] sm:$0xff] }
 0x744   :  { %9049 = vmatpush1.bf16.msra.mxu0 %v13872_v19  ;;  %9113 = vmatpush1.bf16.msra.mxu1 %v13881_v13  ;;  %15554 = vst [vmem:[#allocation44_spill] sm:$0xff] %v13895_v40  ;;  %v7059_v19 = vld [vmem:[%s14884_s2 + $0x720] sm:$0xff]  ;;  %v13917_v13 = vpack.c.bf16 %v7061_v37, %v7057_v23  ;;  %v7070_v23 = vld [vmem:[%s14884_s2 + $0x778] sm:$0xff] }
 0x745   :  { %v13908_v35 = vpack.c.bf16 %v7059_v19, %v7055_v24  ;;  %9051 = vmatprep.subr.bf16.mxu0 %v13895_v40  ;;  %9115 = vmatprep.subr.bf16.mxu1 %v13906_v11  ;;  %v7064_v19 = vld [vmem:[%s14884_s2 + $0x748] sm:$0xff]  ;;  %v7063_v37 = vld [vmem:[%s14884_s2 + $0x740] sm:$0xff]  ;;  %v13942_v11 = vpack.c.bf16 %v7070_v23, %v7066_v58  ;;  %v7074_v58 = vld [vmem:[%s14884_s2 + $0x798] sm:$0xff] }
 0x746   :  { %15557 = vst [vmem:[#allocation47_spill] sm:$0xff] %v13917_v13  ;;  %v13931_v24 = vpack.c.bf16 %v7068_v54, %v7064_v19  ;;  %v7065_v19 = vld [vmem:[%s14884_s2 + $0x750] sm:$0xff]  ;;  %v7078_v23 = vld [vmem:[%s14884_s2 + $0x7b8] sm:$0xff] }
 0x747   :  { %15556 = vst [vmem:[#allocation46_spill] sm:$0xff] %v13908_v35  ;;  %15559 = vst [vmem:[#allocation49_spill] sm:$0xff] %v13942_v11  ;;  %v7069_v54 = vld [vmem:[%s14884_s2 + $0x770] sm:$0xff] }
 0x748   :  { %9053 = vmatpush1.bf16.msra.mxu0 %v13908_v35  ;;  %9117 = vmatpush1.bf16.msra.mxu1 %v13917_v13  ;;  %15558 = vst [vmem:[#allocation48_spill] sm:$0xff] %v13931_v24  ;;  %v7067_v35 = vld [vmem:[%s14884_s2 + $0x760] sm:$0xff]  ;;  %v7072_v13 = vld [vmem:[%s14884_s2 + $0x788] sm:$0xff]  ;;  %v13956_v57 = vpack.c.bf16 %v7069_v54, %v7065_v19  ;;  %v13971_v19 = vpack.c.bf16 %v7078_v23, %v7074_v58 }
 0x749   :  { %v13944_v40 = vpack.c.bf16 %v7067_v35, %v7063_v37  ;;  %9055 = vmatprep.subr.bf16.mxu0 %v13931_v24  ;;  %v7076_v35 = vld [vmem:[%s14884_s2 + $0x7a8] sm:$0xff]  ;;  %9119 = vmatprep.subr.bf16.mxu1 %v13942_v11  ;;  %v7071_v54 = vld [vmem:[%s14884_s2 + $0x780] sm:$0xff] }
 0x74a   :  { %15561 = vst [vmem:[#allocation51_spill] sm:$0xff] %v13956_v57  ;;  %v13969_v37 = vpack.c.bf16 %v7076_v35, %v7072_v13  ;;  %15563 = vst [vmem:[#allocation53_spill] sm:$0xff] %v13971_v19  ;;  %v7075_v24 = vld [vmem:[%s14884_s2 + $0x7a0] sm:$0xff]  ;;  %v7077_v13 = vld [vmem:[%s14884_s2 + $0x7b0] sm:$0xff] }
 0x74b   :  { %15560 = vst [vmem:[#allocation50_spill] sm:$0xff] %v13944_v40  ;;  %v13983_v11 = vpack.c.bf16 %v7075_v24, %v7071_v54  ;;  %v7080_v35 = vld [vmem:[%s14884_s2 + $0x7c8] sm:$0xff]  ;;  %v13996_v23 = vpack.c.bf16 %v7077_v13, %v7073_v18  ;;  %v7082_v54 = vld [vmem:[%s14884_s2 + $0x7d8] sm:$0xff]  ;;  %v7083_v18 = vld [vmem:[%s14884_s2 + $0x7e0] sm:$0xff] }
 0x74c   :  { %9057 = vmatpush1.bf16.msra.mxu0 %v13944_v40  ;;  %15562 = vst [vmem:[#allocation52_spill] sm:$0xff] %v13969_v37  ;;  %9121 = vmatpush1.bf16.msra.mxu1 %v13956_v57  ;;  %v7084_v58 = vld [vmem:[%s14884_s2 + $0x7e8] sm:$0xff]  ;;  %v7086_v57 = vld [vmem:[%s14884_s2 + $0x7f8] sm:$0xff]  ;;  %v7079_v40 = vld [vmem:[%s14884_s2 + $0x7c0] sm:$0xff] }
 0x74d   :  { %15564 = vst [vmem:[#allocation54_spill] sm:$0xff] %v13983_v11  ;;  %9059 = vmatprep.subr.bf16.mxu0 %v13969_v37  ;;  %9123 = vmatprep.subr.bf16.mxu1 %v13971_v19  ;;  %15565 = vst [vmem:[#allocation55_spill] sm:$0xff] %v13996_v23  ;;  %v13998_v24 = vpack.c.bf16 %v7084_v58, %v7080_v35  ;;  %v14009_v17 = vpack.c.bf16 %v7086_v57, %v7082_v54  ;;  %v7081_v13 = vld [vmem:[%s14884_s2 + $0x7d0] sm:$0xff] }
 0x74e   :  { %v7085_v35 = vld [vmem:[%s14884_s2 + $0x7f0] sm:$0xff]  ;;  %v14021_v58 = vpack.c.bf16 %v7083_v18, %v7079_v40 }
 0x74f   :  { %15566 = vst [vmem:[#allocation57_spill] sm:$0xff] %v13998_v24  ;;  %15567 = vst [vmem:[#allocation58_spill] sm:$0xff] %v14009_v17  ;;  %v14025_v57 = vpack.c.bf16 %v7085_v35, %v7081_v13 }
 0x750   :  { %9061 = vmatpush1.bf16.msra.mxu0 %v13983_v11  ;;  %15568 = vst [vmem:[#allocation60_spill] sm:$0xff] %v14021_v58  ;;  %9125 = vmatpush1.bf16.msra.mxu1 %v13996_v23 }
 0x751   :  { %9063 = vmatprep.subr.bf16.mxu0 %v13998_v24  ;;  %15569 = vst [vmem:[#allocation56_spill] sm:$0xff] %v14025_v57  ;;  %9127 = vmatprep.subr.bf16.mxu1 %v14009_v17 }
 0x754   :  { %9065 = vmatpush1.bf16.msra.mxu0 %v14021_v58  ;;  %9129 = vmatpush1.bf16.msra.mxu1 %v14025_v57 }
 0x755   :  { %9131 = vmatprep.subr.bf16.mxu0 %v13153_v22  ;;  %9163 = vmatprep.subr.bf16.mxu1 %v13158_v59 }
 0x7ca   :  { %v3401_v54 = vpop.f32.mrb[26].mxu0  ;;  %v3472_v11 = vpop.f32.mrb[38].mxu1 }
 0x7cb   :  { %v3402_v40 = vadd.f32 %v3401_v54, %v15510_v9  ;;  %v3403_v18 = vpop.f32.mrb[27].mxu0  ;;  %v3474_v23 = vpop.f32.mrb[39].mxu1  ;;  %v3473_v37 = vadd.f32 %v3472_v11, %v11154_v48 }
 0x7cc   :  { %v3404_v13 = vadd.f32 %v3403_v18, %v15511_v55  ;;  %v3475_v22 = vadd.f32 %v3474_v23, %v15512_v29 }
 0x7cd   :  { %v6955_v19 = vmul.f32 -1.442695, %v3402_v40 }
 0x7ce   :  { %v6956_v35 = vmul.f32 -1.442695, %v3404_v13 }
 0x7cf   :  { %9657 = vpow2.f32 %v6955_v19 }
 0x7d0   :  { %9659 = vpow2.f32 %v6956_v35  ;;  %v15570_v35 = vld [vmem:[#allocation70_spill] sm:$0xff] }
 0x7d9   :  { %v9658_v17 = vpop.eup %9657 }
 0x7da   :  { %v3480_v58 = vadd.f32 1.0, %v9658_v17  ;;  %v9660_v57 = vpop.eup %9659 }
 0x7db   :  { %v3486_v24 = vadd.f32 1.0, %v9660_v57 }
 0x7dc   :  { %9661 = vrcp.f32 %v3480_v58 }
 0x7dd   :  { %9663 = vrcp.f32 %v3486_v24 }
 0x7e6   :  { %v9662_v59 = vpop.eup %9661 }
 0x7e7   :  { %v3489_v54 = vmul.f32 %v9662_v59, %v3475_v22  ;;  %v9664_v23 = vpop.eup %9663 }
 0x7e8   :  { %v3492_v55 = vsub.f32 1.0, %v9664_v23 }
 0x7e9   :  { %v3490_v9 = vadd.f32 %v3489_v54, %v3473_v37  ;;  %v3494_v37 = vmul.f32 %v9664_v23, %v13170_v27 }
 0x7ea   :  { %v3633_v61 = vpop.f32.mrb[12].mxu0  ;;  %v3704_v40 = vpop.f32.mrb[40].mxu1 }
 0x7eb   :  { %9665 = vtanh.f32 %v3490_v9  ;;  %v9526_v19 = vadd.f32 %v3633_v61, %v11002_v41  ;;  %v3635_v18 = vpop.f32.mrb[13].mxu0  ;;  %v3705_v13 = vpop.f32.mrb[41].mxu1 }
 0x7ec   :  { %v3722_v17 = vadd.f32 %v3705_v13, %v15570_v35  ;;  %v9527_v57 = vadd.f32 %v3635_v18, %v11010_v39  ;;  %v15571_v18 = vld [vmem:[#allocation69_spill] sm:$0xff] }
 0x7ed   :  { %v6957_v58 = vmul.f32 -1.442695, %v9526_v19 }
 0x7ee   :  { %v6958_v29 = vmul.f32 -1.442695, %v9527_v57 }
 0x7ef   :  { %9667 = vpow2.f32 %v6957_v58 }
 0x7f0   :  { %9669 = vpow2.f32 %v6958_v29 }
 0x7f5   :  { %v9666_v11 = vpop.eup %9665 }
 0x7f6   :  { %v3493_v24 = vmul.f32 %v9666_v11, %v3492_v55  ;;  %v15614_v11 = vld [vmem:[#allocation47_spill] sm:$0xff] }
 0x7f8   :  { %v14040_v22 = vadd.f32 %v3494_v37, %v3493_v24  ;;  %v15615_v24 = vld [vmem:[#allocation48_spill] sm:$0xff]  ;;  %v15616_v37 = vld [vmem:[#allocation49_spill] sm:$0xff] }
 0x7f9   :  { %v9668_v9 = vpop.eup %9667 }
 0x7fa   :  { %v3712_v61 = vadd.f32 1.0, %v9668_v9  ;;  %3924 = vmatprep.mubr.f32.mxu0 %v14040_v22  ;;  %3995 = vmatprep.mubr.f32.mxu1 %v14040_v22  ;;  %v9670_v59 = vpop.eup %9669  ;;  %v15617_v9 = vld [vmem:[#allocation50_spill] sm:$0xff] }
 0x7fb   :  { %v3719_v54 = vadd.f32 1.0, %v9670_v59  ;;  %v15619_v59 = vld [vmem:[#allocation52_spill] sm:$0xff] }
 0x7fc   :  { %9671 = vrcp.f32 %v3712_v61  ;;  %v15618_v61 = vld [vmem:[#allocation51_spill] sm:$0xff] }
 0x7fd   :  { %9673 = vrcp.f32 %v3719_v54  ;;  %v15620_v54 = vld [vmem:[#allocation53_spill] sm:$0xff] }
 0x806   :  { %v9672_v40 = vpop.eup %9671 }
 0x807   :  { %v3723_v19 = vmul.f32 %v9672_v40, %v3722_v17  ;;  %v9674_v55 = vpop.eup %9673  ;;  %v15613_v17 = vld [vmem:[#allocation46_spill] sm:$0xff] }
 0x808   :  { %v3726_v29 = vsub.f32 1.0, %v9674_v55  ;;  %v3728_v57 = vmul.f32 %v9674_v55, %v13210_v15  ;;  %v15575_v15 = vld [vmem:[#allocation8_spill] sm:$0xff]  ;;  %v15621_v40 = vld [vmem:[#allocation54_spill] sm:$0xff] }
 0x809   :  { %v3724_v13 = vadd.f32 %v3723_v19, %v15571_v18  ;;  %v15622_v19 = vld [vmem:[#allocation55_spill] sm:$0xff]  ;;  %v15623_v18 = vld [vmem:[#allocation57_spill] sm:$0xff]  ;;  %v15625_v55 = vld [vmem:[#allocation60_spill] sm:$0xff] }
 0x80b   :  { %9675 = vtanh.f32 %v3724_v13  ;;  %v15624_v13 = vld [vmem:[#allocation58_spill] sm:$0xff] }
 0x815   :  { %v9676_v35 = vpop.eup %9675 }
 0x816   :  { %v3727_v58 = vmul.f32 %v9676_v35, %v3726_v29  ;;  %v15626_v29 = vld [vmem:[#allocation56_spill] sm:$0xff] }
 0x817   :  { %v4558_v35 = vld [vmem:[%s14888_s4] sm:$0xff] }
 0x818   :  { %v14046_v23 = vadd.f32 %v3728_v57, %v3727_v58  ;;  %v4559_v58 = vld [vmem:[%s14888_s4 + $0x8] sm:$0xff] }
 0x819   :  { %v14154_v57 = vpack.c.bf16 %v4559_v58, %v4558_v35  ;;  %v4565_v35 = vld [vmem:[%s14888_s4 + $0x38] sm:$0xff] }
 0x81a   :  { %3925 = vmatmul.mubr.f32.vlgmr.msra.gmra.mrb[28].mxu0 %v14046_v23  ;;  %3996 = vmatmul.mubr.f32.vlgmr.msra.gmra.mrb[42].mxu1 %v14046_v23 }
 0x81b   :  { %9133 = vmatpush1.bf16.msra.mxu0 %v13200_v31  ;;  %9165 = vmatpush1.bf16.msra.mxu1 %v13202_v51  ;;  %v15573_v31 = vld [vmem:[#allocation66_spill] sm:$0xff]  ;;  %v15574_v51 = vld [vmem:[#allocation65_spill] sm:$0xff] }
 0x81c   :  { %9135 = vmatprep.subr.bf16.mxu0 %v13212_v12  ;;  %9167 = vmatprep.subr.bf16.mxu1 %v13214_v52  ;;  %v15576_v12 = vld [vmem:[#allocation9_spill] sm:$0xff]  ;;  %v15577_v52 = vld [vmem:[#allocation10_spill] sm:$0xff] }
 0x81d   :  { %4156 = vmatprep.mubr.f32.mxu0 %v15212_v42  ;;  %4227 = vmatprep.mubr.f32.mxu1 %v15212_v42  ;;  %v15572_v42 = vld [vmem:[#allocation63_spill] sm:$0xff] }
 0x81f   :  { %9137 = vmatpush1.bf16.msra.mxu0 %v13238_v34  ;;  %9169 = vmatpush1.bf16.msra.mxu1 %v13240_v1  ;;  %v15578_v34 = vld [vmem:[#allocation11_spill] sm:$0xff]  ;;  %v15579_v1 = vld [vmem:[#allocation12_spill] sm:$0xff] }
 0x820   :  { %9139 = vmatprep.subr.bf16.mxu0 %v13250_v43  ;;  %9171 = vmatprep.subr.bf16.mxu1 %v13252_v53  ;;  %v15580_v43 = vld [vmem:[#allocation13_spill] sm:$0xff]  ;;  %v15581_v53 = vld [vmem:[#allocation14_spill] sm:$0xff] }
 0x823   :  { %9141 = vmatpush1.bf16.msra.mxu0 %v13276_v33  ;;  %9173 = vmatpush1.bf16.msra.mxu1 %v13278_v32  ;;  %v15582_v33 = vld [vmem:[#allocation15_spill] sm:$0xff]  ;;  %v15583_v32 = vld [vmem:[#allocation16_spill] sm:$0xff] }
 0x824   :  { %9143 = vmatprep.subr.bf16.mxu0 %v13288_v44  ;;  %9175 = vmatprep.subr.bf16.mxu1 %v13290_v49  ;;  %v15584_v44 = vld [vmem:[#allocation17_spill] sm:$0xff]  ;;  %v15585_v49 = vld [vmem:[#allocation18_spill] sm:$0xff] }
 0x827   :  { %9145 = vmatpush1.bf16.msra.mxu0 %v13312_v26  ;;  %9177 = vmatpush1.bf16.msra.mxu1 %v13314_v45  ;;  %v15586_v26 = vld [vmem:[#allocation19_spill] sm:$0xff]  ;;  %v15587_v45 = vld [vmem:[#allocation20_spill] sm:$0xff] }
 0x828   :  { %9147 = vmatprep.subr.bf16.mxu0 %v13324_v10  ;;  %9179 = vmatprep.subr.bf16.mxu1 %v13326_v8  ;;  %v15588_v10 = vld [vmem:[#allocation21_spill] sm:$0xff]  ;;  %v15589_v8 = vld [vmem:[#allocation22_spill] sm:$0xff] }
 0x82b   :  { %9149 = vmatpush1.bf16.msra.mxu0 %v13348_v20  ;;  %9181 = vmatpush1.bf16.msra.mxu1 %v13350_v3  ;;  %v15590_v20 = vld [vmem:[#allocation23_spill] sm:$0xff]  ;;  %v15591_v3 = vld [vmem:[#allocation24_spill] sm:$0xff] }
 0x82c   :  { %9151 = vmatprep.subr.bf16.mxu0 %v13360_v14  ;;  %9183 = vmatprep.subr.bf16.mxu1 %v13362_v50  ;;  %v15592_v14 = vld [vmem:[#allocation25_spill] sm:$0xff]  ;;  %v15593_v50 = vld [vmem:[#allocation26_spill] sm:$0xff] }
 0x82f   :  { %9153 = vmatpush1.bf16.msra.mxu0 %v13384_v60  ;;  %9185 = vmatpush1.bf16.msra.mxu1 %v13386_v63  ;;  %v15594_v60 = vld [vmem:[#allocation27_spill] sm:$0xff]  ;;  %v15595_v63 = vld [vmem:[#allocation28_spill] sm:$0xff] }
 0x830   :  { %9155 = vmatprep.subr.bf16.mxu0 %v13396_v25  ;;  %9187 = vmatprep.subr.bf16.mxu1 %v13398_v30  ;;  %v15596_v25 = vld [vmem:[#allocation29_spill] sm:$0xff]  ;;  %v15597_v30 = vld [vmem:[#allocation30_spill] sm:$0xff] }
 0x833   :  { %9157 = vmatpush1.bf16.msra.mxu0 %v13420_v0  ;;  %9189 = vmatpush1.bf16.msra.mxu1 %v13422_v4  ;;  %v15598_v0 = vld [vmem:[#allocation31_spill] sm:$0xff]  ;;  %v15599_v4 = vld [vmem:[#allocation32_spill] sm:$0xff] }
 0x834   :  { %9159 = vmatprep.subr.bf16.mxu0 %v13429_v5  ;;  %9191 = vmatprep.subr.bf16.mxu1 %v13431_v46  ;;  %v15600_v5 = vld [vmem:[#allocation33_spill] sm:$0xff]  ;;  %v15601_v46 = vld [vmem:[#allocation34_spill] sm:$0xff] }
 0x837   :  { %9161 = vmatpush1.bf16.msra.mxu0 %v13444_v62  ;;  %9193 = vmatpush1.bf16.msra.mxu1 %v13446_v6  ;;  %v15602_v62 = vld [vmem:[#allocation35_spill] sm:$0xff]  ;;  %v15603_v6 = vld [vmem:[#allocation36_spill] sm:$0xff] }
 0x838   :  { %9195 = vmatprep.subr.bf16.mxu0 %v13463_v7  ;;  %9259 = vmatprep.subr.bf16.mxu1 %v13474_v21  ;;  %v15604_v7 = vld [vmem:[#allocation37_spill] sm:$0xff]  ;;  %v15605_v21 = vld [vmem:[#allocation38_spill] sm:$0xff] }
 0x83a   :  { %4157 = vmatmul.mubr.f32.vlgmr.msra.gmra.mrb[14].mxu0 %v14046_v23  ;;  %4228 = vmatmul.mubr.f32.vlgmr.msra.gmra.mrb[44].mxu1 %v14046_v23 }
 0x83b   :  { %9197 = vmatpush1.bf16.msra.mxu0 %v13476_v38  ;;  %9261 = vmatpush1.bf16.msra.mxu1 %v13485_v16  ;;  %v15606_v38 = vld [vmem:[#allocation39_spill] sm:$0xff]  ;;  %v15607_v16 = vld [vmem:[#allocation40_spill] sm:$0xff] }
 0x83c   :  { %9199 = vmatprep.subr.bf16.mxu0 %v13499_v2  ;;  %9263 = vmatprep.subr.bf16.mxu1 %v13510_v56  ;;  %v15608_v2 = vld [vmem:[#allocation41_spill] sm:$0xff]  ;;  %v15609_v56 = vld [vmem:[#allocation42_spill] sm:$0xff] }
 0x83f   :  { %9201 = vmatpush1.bf16.msra.mxu0 %v13512_v28  ;;  %9265 = vmatpush1.bf16.msra.mxu1 %v13521_v36  ;;  %v15610_v28 = vld [vmem:[#allocation43_spill] sm:$0xff]  ;;  %v15611_v36 = vld [vmem:[#allocation44_spill] sm:$0xff] }
 0x840   :  { %9203 = vmatprep.subr.bf16.mxu0 %v13535_v47  ;;  %9267 = vmatprep.subr.bf16.mxu1 %v15572_v42  ;;  %v15612_v47 = vld [vmem:[#allocation45_spill] sm:$0xff] }
 0x843   :  { %9205 = vmatpush1.bf16.msra.mxu0 %v15573_v31  ;;  %9269 = vmatpush1.bf16.msra.mxu1 %v15574_v51  ;;  %v15627_v51 = vld [vmem:[#allocation4_spill] sm:$0xff] }
 0x844   :  { %9207 = vmatprep.subr.bf16.mxu0 %v15575_v15  ;;  %9271 = vmatprep.subr.bf16.mxu1 %v15576_v12 }
 0x847   :  { %9209 = vmatpush1.bf16.msra.mxu0 %v15577_v52  ;;  %9273 = vmatpush1.bf16.msra.mxu1 %v15578_v34 }
 0x848   :  { %9211 = vmatprep.subr.bf16.mxu0 %v15579_v1  ;;  %9275 = vmatprep.subr.bf16.mxu1 %v15580_v43  ;;  %v15628_v1 = vld [vmem:[#allocation5_spill] sm:$0xff] }
 0x84b   :  { %9213 = vmatpush1.bf16.msra.mxu0 %v15581_v53  ;;  %9277 = vmatpush1.bf16.msra.mxu1 %v15582_v33 }
 0x84c   :  { %9215 = vmatprep.subr.bf16.mxu0 %v15583_v32  ;;  %9279 = vmatprep.subr.bf16.mxu1 %v15584_v44 }
 0x84f   :  { %9217 = vmatpush1.bf16.msra.mxu0 %v15585_v49  ;;  %9281 = vmatpush1.bf16.msra.mxu1 %v15586_v26  ;;  %v15629_v26 = vld [vmem:[#allocation6_spill] sm:$0xff] }
 0x850   :  { %9219 = vmatprep.subr.bf16.mxu0 %v15587_v45  ;;  %9283 = vmatprep.subr.bf16.mxu1 %v15588_v10 }
 0x853   :  { %9221 = vmatpush1.bf16.msra.mxu0 %v15589_v8  ;;  %9285 = vmatpush1.bf16.msra.mxu1 %v15590_v20 }
 0x854   :  { %9223 = vmatprep.subr.bf16.mxu0 %v15591_v3  ;;  %9287 = vmatprep.subr.bf16.mxu1 %v15592_v14 }
 0x857   :  { %9225 = vmatpush1.bf16.msra.mxu0 %v15593_v50  ;;  %9289 = vmatpush1.bf16.msra.mxu1 %v15594_v60 }
 0x858   :  { %9227 = vmatprep.subr.bf16.mxu0 %v15595_v63  ;;  %9291 = vmatprep.subr.bf16.mxu1 %v15596_v25 }
 0x85b   :  { %9229 = vmatpush1.bf16.msra.mxu0 %v15597_v30  ;;  %9293 = vmatpush1.bf16.msra.mxu1 %v15598_v0  ;;  %v15630_v30 = vld [vmem:[#allocation72_spill] sm:$0xff] }
 0x85c   :  { %9231 = vmatprep.subr.bf16.mxu0 %v15599_v4  ;;  %9295 = vmatprep.subr.bf16.mxu1 %v15600_v5 }
 0x85f   :  { %9233 = vmatpush1.bf16.msra.mxu0 %v15601_v46  ;;  %9297 = vmatpush1.bf16.msra.mxu1 %v15602_v62 }
 0x860   :  { %9235 = vmatprep.subr.bf16.mxu0 %v15603_v6  ;;  %9299 = vmatprep.subr.bf16.mxu1 %v15604_v7 }
 0x863   :  { %9237 = vmatpush1.bf16.msra.mxu0 %v15605_v21  ;;  %9301 = vmatpush1.bf16.msra.mxu1 %v15606_v38 }
 0x864   :  { %9239 = vmatprep.subr.bf16.mxu0 %v15607_v16  ;;  %9303 = vmatprep.subr.bf16.mxu1 %v15608_v2 }
 0x867   :  { %9241 = vmatpush1.bf16.msra.mxu0 %v15609_v56  ;;  %9305 = vmatpush1.bf16.msra.mxu1 %v15610_v28 }
 0x868   :  { %9243 = vmatprep.subr.bf16.mxu0 %v15611_v36  ;;  %9307 = vmatprep.subr.bf16.mxu1 %v15612_v47  ;;  %v15631_v47 = vld [vmem:[#allocation71_spill] sm:$0xff] }
 0x86b   :  { %9245 = vmatpush1.bf16.msra.mxu0 %v15613_v17  ;;  %9309 = vmatpush1.bf16.msra.mxu1 %v15614_v11 }
 0x86c   :  { %9247 = vmatprep.subr.bf16.mxu0 %v15615_v24  ;;  %9311 = vmatprep.subr.bf16.mxu1 %v15616_v37 }
 0x86f   :  { %9249 = vmatpush1.bf16.msra.mxu0 %v15617_v9  ;;  %9313 = vmatpush1.bf16.msra.mxu1 %v15618_v61  ;;  %v4560_v9 = vld [vmem:[%s14888_s4 + $0x10] sm:$0xff]  ;;  %v4561_v61 = vld [vmem:[%s14888_s4 + $0x18] sm:$0xff] }
 0x870   :  { %9251 = vmatprep.subr.bf16.mxu0 %v15619_v59  ;;  %9315 = vmatprep.subr.bf16.mxu1 %v15620_v54 }
 0x873   :  { %9253 = vmatpush1.bf16.msra.mxu0 %v15621_v40  ;;  %9317 = vmatpush1.bf16.msra.mxu1 %v15622_v19  ;;  %v9326_v19 = vpack.c.bf16 %v4561_v61, %v4560_v9 }
 0x874   :  { %9255 = vmatprep.subr.bf16.mxu0 %v15623_v18  ;;  %9319 = vmatprep.subr.bf16.mxu1 %v15624_v13  ;;  %v4562_v18 = vld [vmem:[%s14888_s4 + $0x20] sm:$0xff]  ;;  %v4563_v13 = vld [vmem:[%s14888_s4 + $0x28] sm:$0xff] }
 0x877   :  { %9257 = vmatpush1.bf16.msra.mxu0 %v15625_v55  ;;  %9321 = vmatpush1.bf16.msra.mxu1 %v15626_v29  ;;  %v15632_v55 = vld [vmem:[#allocation7_spill] sm:$0xff]  ;;  %v4564_v29 = vld [vmem:[%s14888_s4 + $0x30] sm:$0xff] }
 0x878   :  { %9323 = vmatprep.subr.bf16.mxu0 %v14154_v57  ;;  %v9334_v58 = vpack.c.bf16 %v4565_v35, %v4564_v29 }
 0x8ed   :  { %v3926_v42 = vpop.f32.mrb[28].mxu0  ;;  %v3997_v31 = vpop.f32.mrb[42].mxu1 }
 0x8ee   :  { %v3927_v15 = vadd.f32 %v3926_v42, %v15627_v51  ;;  %v3928_v12 = vpop.f32.mrb[29].mxu0  ;;  %v3999_v52 = vpop.f32.mrb[43].mxu1  ;;  %v3998_v8 = vadd.f32 %v3997_v31, %v11154_v48  ;;  %v4566_v42 = vld [vmem:[%s14888_s4 + $0x40] sm:$0xff] }
 0x8ef   :  { %v3929_v43 = vadd.f32 %v3928_v12, %v15628_v1  ;;  %v4000_v45 = vadd.f32 %v3999_v52, %v15629_v26  ;;  %v4569_v12 = vld [vmem:[%s14888_s4 + $0x58] sm:$0xff] }
 0x8f0   :  { %v7087_v34 = vmul.f32 -1.442695, %v3927_v15  ;;  %v4568_v15 = vld [vmem:[%s14888_s4 + $0x50] sm:$0xff] }
 0x8f1   :  { %v7088_v53 = vmul.f32 -1.442695, %v3929_v43  ;;  %v9342_v52 = vpack.c.bf16 %v4569_v12, %v4568_v15  ;;  %v4571_v43 = vld [vmem:[%s14888_s4 + $0x68] sm:$0xff] }
 0x8f2   :  { %9677 = vpow2.f32 %v7087_v34  ;;  %v4570_v34 = vld [vmem:[%s14888_s4 + $0x60] sm:$0xff] }
 0x8f3   :  { %9679 = vpow2.f32 %v7088_v53  ;;  %v9346_v53 = vpack.c.bf16 %v4571_v43, %v4570_v34 }
 0x8fc   :  { %v9678_v33 = vpop.eup %9677 }
 0x8fd   :  { %v4005_v32 = vadd.f32 1.0, %v9678_v33  ;;  %v9680_v44 = vpop.eup %9679  ;;  %v4572_v33 = vld [vmem:[%s14888_s4 + $0x70] sm:$0xff] }
 0x8fe   :  { %v4011_v49 = vadd.f32 1.0, %v9680_v44 }
 0x8ff   :  { %9681 = vrcp.f32 %v4005_v32  ;;  %v4573_v32 = vld [vmem:[%s14888_s4 + $0x78] sm:$0xff] }
 0x900   :  { %9683 = vrcp.f32 %v4011_v49  ;;  %v9350_v44 = vpack.c.bf16 %v4573_v32, %v4572_v33  ;;  %v15633_v49 = vld [vmem:[#allocation62_spill] sm:$0xff]  ;;  %v7228_v33 = vld [vmem:[%s14888_s4 + $0x98] sm:$0xff] }
 0x909   :  { %v9682_v10 = vpop.eup %9681 }
 0x90a   :  { %v4014_v20 = vmul.f32 %v9682_v10, %v4000_v45  ;;  %v9684_v46 = vpop.eup %9683  ;;  %v15634_v45 = vld [vmem:[#allocation61_spill] sm:$0xff]  ;;  %v15635_v10 = vld [vmem:[#allocation64_spill] sm:$0xff] }
 0x90b   :  { %v4017_v6 = vsub.f32 1.0, %v9684_v46  ;;  %v4019_v38 = vmul.f32 %v9684_v46, %v14040_v22 }
 0x90c   :  { %v4015_v3 = vadd.f32 %v4014_v20, %v3998_v8  ;;  %v7225_v8 = vld [vmem:[%s14888_s4 + $0x80] sm:$0xff]  ;;  %v7226_v20 = vld [vmem:[%s14888_s4 + $0x88] sm:$0xff] }
 0x90d   :  { %v4158_v14 = vpop.f32.mrb[14].mxu0  ;;  %v4229_v50 = vpop.f32.mrb[44].mxu1 }
 0x90e   :  { %9685 = vtanh.f32 %v4015_v3  ;;  %v9528_v60 = vadd.f32 %v4158_v14, %v11002_v41  ;;  %v4160_v63 = vpop.f32.mrb[15].mxu0  ;;  %v4230_v25 = vpop.f32.mrb[45].mxu1  ;;  %v9354_v3 = vpack.c.bf16 %v7226_v20, %v7225_v8  ;;  %v7229_v20 = vld [vmem:[%s14888_s4 + $0xa0] sm:$0xff] }
 0x90f   :  { %v4247_v0 = vadd.f32 %v4230_v25, %v15630_v30  ;;  %v9529_v5 = vadd.f32 %v4160_v63, %v11010_v39 }
 0x910   :  { %v7089_v4 = vmul.f32 -1.442695, %v9528_v60  ;;  %9355 = vmatprep.subr.bf16.mxu1 %v9354_v3 }
 0x911   :  { %v7090_v62 = vmul.f32 -1.442695, %v9529_v5 }
 0x912   :  { %9687 = vpow2.f32 %v7089_v4 }
 0x913   :  { %9689 = vpow2.f32 %v7090_v62 }
 0x918   :  { %v9686_v7 = vpop.eup %9685 }
 0x919   :  { %v4018_v21 = vmul.f32 %v9686_v7, %v4017_v6 }
 0x91b   :  { %v14165_v16 = vadd.f32 %v4019_v38, %v4018_v21 }
 0x91c   :  { %v9688_v2 = vpop.eup %9687 }
 0x91d   :  { %v4237_v41 = vadd.f32 1.0, %v9688_v2  ;;  %4449 = vmatprep.mubr.f32.mxu0 %v14165_v16  ;;  %4520 = vmatprep.mubr.f32.mxu1 %v14165_v16  ;;  %v9690_v56 = vpop.eup %9689  ;;  %v14237_v2 = vld [vmem:[%s14890_s5] ss:$0 sm:$0xff] }
 0x91e   :  { %v4244_v39 = vadd.f32 1.0, %v9690_v56 }
 0x91f   :  { %9691 = vrcp.f32 %v4237_v41 }
 0x920   :  { %9693 = vrcp.f32 %v4244_v39 }
 0x929   :  { %v9692_v28 = vpop.eup %9691 }
 0x92a   :  { %v4248_v36 = vmul.f32 %v9692_v28, %v4247_v0  ;;  %v9694_v11 = vpop.eup %9693 }
 0x92b   :  { %v4251_v24 = vsub.f32 1.0, %v9694_v11  ;;  %v4253_v54 = vmul.f32 %v9694_v11, %v14046_v23  ;;  %v9330_v23 = vpack.c.bf16 %v4563_v13, %v4562_v18 }
 0x92c   :  { %v4249_v17 = vadd.f32 %v4248_v36, %v15631_v47 }
 0x92e   :  { %9695 = vtanh.f32 %v4249_v17 }
 0x938   :  { %v9696_v37 = vpop.eup %9695 }
 0x939   :  { %v4252_v59 = vmul.f32 %v9696_v37, %v4251_v24 }
 0x93b   :  { %v4254_v40 = vadd.f32 %v4253_v54, %v4252_v59 }
 0x93d   :  { %4450 = vmatmul.mubr.f32.vlgmr.msra.gmra.mrb[30].mxu0 %v4254_v40  ;;  %4521 = vmatmul.mubr.f32.vlgmr.msra.gmra.mrb[46].mxu1 %v4254_v40  ;;  %4547 = vst [vmem:[%s14889_s11] sm:$0xff] %v4254_v40 }
 0x93e   :  { %9325 = vmatpush3.bf16.msra.mxu0 %v14154_v57  ;;  %7490 = vmatprep.mubr.f32.mxu0 %v15632_v55  ;;  %v4567_v57 = vld [vmem:[%s14888_s4 + $0x48] sm:$0xff] }
 0x93f   :  { %9327 = vmatprep.subr.bf16.mxu0 %v9326_v19  ;;  %v9338_v31 = vpack.c.bf16 %v4567_v57, %v4566_v42  ;;  %9357 = vmatpush3.bf16.msra.mxu1 %v9354_v3  ;;  %v7230_v3 = vld [vmem:[%s14888_s4 + $0xa8] sm:$0xff] }
 0x942   :  { %9329 = vmatpush3.bf16.msra.mxu0 %v9326_v19 }
 0x943   :  { %9331 = vmatprep.subr.bf16.mxu0 %v9330_v23 }
 0x946   :  { %9333 = vmatpush3.bf16.msra.mxu0 %v9330_v23 }
 0x947   :  { %9335 = vmatprep.subr.bf16.mxu0 %v9334_v58 }
 0x94a   :  { %9337 = vmatpush3.bf16.msra.mxu0 %v9334_v58 }
 0x94b   :  { %9339 = vmatprep.subr.bf16.mxu0 %v9338_v31 }
 0x94e   :  { %9341 = vmatpush3.bf16.msra.mxu0 %v9338_v31 }
 0x94f   :  { %9343 = vmatprep.subr.bf16.mxu0 %v9342_v52 }
 0x952   :  { %9345 = vmatpush3.bf16.msra.mxu0 %v9342_v52 }
 0x953   :  { %9347 = vmatprep.subr.bf16.mxu0 %v9346_v53 }
 0x956   :  { %9349 = vmatpush3.bf16.msra.mxu0 %v9346_v53  ;;  %v7227_v53 = vld [vmem:[%s14888_s4 + $0x90] sm:$0xff] }
 0x957   :  { %9351 = vmatprep.subr.bf16.mxu0 %v9350_v44  ;;  %v9358_v32 = vpack.c.bf16 %v7228_v33, %v7227_v53 }
 0x959   :  { %9359 = vmatprep.subr.bf16.mxu1 %v9358_v32 }
 0x95a   :  { %9353 = vmatpush3.bf16.msra.mxu0 %v9350_v44  ;;  %9361 = vmatpush3.bf16.msra.mxu1 %v9358_v32 }
 0x95d   :  { %7491 = vmatmul.mubr.f32.vlgmr.msra.gmra.mrb[32].mxu0 %v15633_v49 }
 0x95e   :  { %7493 = vmatprep.mubr.f32.mxu0 %v15634_v45 }
 0x961   :  { %7494 = vmatmul.mubr.f32.gmra.mrb[34].mxu0 %v15635_v10 }
 0x962   :  { %7496 = vmatprep.mubr.f32.mxu0 %v13170_v27 }
 0x965   :  { %7497 = vmatmul.mubr.f32.gmra.mrb[36].mxu0 %v14040_v22 }
 0x966   :  { %7499 = vmatprep.mubr.f32.mxu0 %v14165_v16 }
 0xa10   :  { %v4451_v14 = vpop.f32.mrb[30].mxu0  ;;  %v4522_v50 = vpop.f32.mrb[46].mxu1 }
 0xa11   :  { %v4452_v60 = vadd.f32 %v4451_v14, %v15627_v51  ;;  %v4453_v63 = vpop.f32.mrb[31].mxu0  ;;  %v4524_v25 = vpop.f32.mrb[47].mxu1  ;;  %v4523_v38 = vadd.f32 %v4522_v50, %v11154_v48  ;;  %v9362_v50 = vpack.c.bf16 %v7230_v3, %v7229_v20 }
 0xa12   :  { %v4454_v0 = vadd.f32 %v4453_v63, %v15628_v1  ;;  %v4525_v7 = vadd.f32 %v4524_v25, %v15629_v26  ;;  %v7231_v63 = vld [vmem:[%s14888_s4 + $0xb0] sm:$0xff]  ;;  %v7232_v25 = vld [vmem:[%s14888_s4 + $0xb8] sm:$0xff] }
 0xa13   :  { %v7219_v30 = vmul.f32 -1.442695, %v4452_v60  ;;  %9363 = vmatprep.subr.bf16.mxu1 %v9362_v50 }
 0xa14   :  { %v7220_v4 = vmul.f32 -1.442695, %v4454_v0  ;;  %9365 = vmatpush3.bf16.msra.mxu1 %v9362_v50  ;;  %v7233_v0 = vld [vmem:[%s14888_s4 + $0xc0] sm:$0xff] }
 0xa15   :  { %9697 = vpow2.f32 %v7219_v30  ;;  %v9366_v30 = vpack.c.bf16 %v7232_v25, %v7231_v63 }
 0xa16   :  { %9699 = vpow2.f32 %v7220_v4  ;;  %v7234_v4 = vld [vmem:[%s14888_s4 + $0xc8] sm:$0xff] }
 0xa17   :  { %9367 = vmatprep.subr.bf16.mxu1 %v9366_v30 }
 0xa18   :  { %9369 = vmatpush3.bf16.msra.mxu1 %v9366_v30 }
 0xa1f   :  { %v9698_v5 = vpop.eup %9697 }
 0xa20   :  { %v4530_v46 = vadd.f32 1.0, %v9698_v5  ;;  %v9700_v62 = vpop.eup %9699  ;;  %v9370_v5 = vpack.c.bf16 %v7234_v4, %v7233_v0 }
 0xa21   :  { %v4536_v6 = vadd.f32 1.0, %v9700_v62  ;;  %v7236_v62 = vld [vmem:[%s14888_s4 + $0xd8] sm:$0xff] }
 0xa22   :  { %9701 = vrcp.f32 %v4530_v46  ;;  %9371 = vmatprep.subr.bf16.mxu1 %v9370_v5  ;;  %v7235_v46 = vld [vmem:[%s14888_s4 + $0xd0] sm:$0xff] }
 0xa23   :  { %9703 = vrcp.f32 %v4536_v6  ;;  %9373 = vmatpush3.bf16.msra.mxu1 %v9370_v5  ;;  %v9374_v6 = vpack.c.bf16 %v7236_v62, %v7235_v46  ;;  %v14326_v5 = vld [vmem:[%s14891_s6] ss:$0 sm:$0xff] }
 0xa25   :  { %9375 = vmatprep.subr.bf16.mxu1 %v9374_v6 }
 0xa27   :  { %9377 = vmatpush3.bf16.msra.mxu1 %v9374_v6 }
 0xa2c   :  { %v9702_v21 = vpop.eup %9701 }
 0xa2d   :  { %v4539_v51 = vmul.f32 %v9702_v21, %v4525_v7  ;;  %v9704_v37 = vpop.eup %9703  ;;  %v7237_v7 = vld [vmem:[%s14888_s4 + $0xe0] sm:$0xff]  ;;  %v7238_v21 = vld [vmem:[%s14888_s4 + $0xe8] sm:$0xff] }
 0xa2e   :  { %v4542_v18 = vsub.f32 1.0, %v9704_v37  ;;  %v4544_v35 = vmul.f32 %v9704_v37, %v14165_v16 }
 0xa2f   :  { %v4540_v1 = vadd.f32 %v4539_v51, %v4523_v38  ;;  %v9378_v38 = vpack.c.bf16 %v7238_v21, %v7237_v7  ;;  %v7239_v51 = vld [vmem:[%s14888_s4 + $0xf0] sm:$0xff] }
 0xa30   :  { %v7492_v41 = vpop.f32.mrb[32].mxu0 }
 0xa31   :  { %9705 = vtanh.f32 %v4540_v1  ;;  %v4653_v56 = vadd.f32 %v7492_v41, %v14237_v2  ;;  %v4647_v39 = vpop.f32.mrb[33].mxu0  ;;  %9379 = vmatprep.subr.bf16.mxu1 %v9378_v38  ;;  %v7240_v1 = vld [vmem:[%s14888_s4 + $0xf8] sm:$0xff] }
 0xa32   :  { %v4648_v28 = vadd.f32 %v14237_v2, %v4647_v39  ;;  %9381 = vmatpush3.bf16.msra.mxu1 %v9378_v38  ;;  %v9382_v41 = vpack.c.bf16 %v7240_v1, %v7239_v51 }
 0xa33   :  { %v4695_v36 = vmul.f32 0.01, %v4653_v56  ;;  %vm4687_vm0 = vcmp.ge.f32.partialorder %v4653_v56, 0.0 }
 0xa34   :  { %v4694_v26 = vmul.f32 0.01, %v4648_v28  ;;  %v7495_v47 = vpop.f32.mrb[34].mxu0  ;;  %vm4686_vm1 = vcmp.ge.f32.partialorder %v4648_v28, 0.0  ;;  %9383 = vmatprep.subr.bf16.mxu1 %v9382_v41 }
 0xa35   :  { %v4657_v48 = vpop.f32.mrb[35].mxu0  ;;  %v14241_v17 = vsel %vm4687_vm0, %v4653_v56, %v4695_v36  ;;  %v4663_v9 = vadd.f32 %v7495_v47, %v14237_v2 }
 0xa36   :  { %v4658_v11 = vadd.f32 %v14237_v2, %v4657_v48  ;;  %4712 = vadd.xlane.f32.xlu0 %v14241_v17  ;;  %v4735_v24 = vmul.f32 %v14241_v17, %v14241_v17  ;;  %v14248_v61 = vsel %vm4686_vm1, %v4648_v28, %v4694_v26  ;;  %9385 = vmatpush3.bf16.msra.mxu1 %v9382_v41 }
 0xa37   :  { %v4734_v19 = vmul.f32 %v14248_v61, %v14248_v61  ;;  %v4697_v23 = vmul.f32 0.01, %v4663_v9  ;;  %vm4689_vm3 = vcmp.ge.f32.partialorder %v4663_v9, 0.0 }
 0xa38   :  { %4744 = vadd.xlane.f32.xlu1 %v4735_v24  ;;  %v7498_v59 = vpop.f32.mrb[36].mxu0  ;;  %v4696_v54 = vmul.f32 0.01, %v4658_v11  ;;  %vm4688_vm2 = vcmp.ge.f32.partialorder %v4658_v11, 0.0 }
 0xa39   :  { %v4667_v40 = vpop.f32.mrb[37].mxu0  ;;  %v4673_v31 = vadd.f32 %v7498_v59, %v14237_v2  ;;  %v14259_v15 = vsel %vm4689_vm3, %v4663_v9, %v4697_v23 }
 0xa3a   :  { %4710 = vadd.xlane.f32.xlu0 %v14248_v61  ;;  %v4668_v58 = vadd.f32 %v14237_v2, %v4667_v40  ;;  %v14255_v42 = vsel %vm4688_vm2, %v4658_v11, %v4696_v54  ;;  %v4737_v34 = vmul.f32 %v14259_v15, %v14259_v15 }
 0xa3b   :  { %v9706_v13 = vpop.eup %9705  ;;  %v4736_v12 = vmul.f32 %v14255_v42, %v14255_v42  ;;  %v4699_v43 = vmul.f32 0.01, %v4673_v31  ;;  %vm4691_vm5 = vcmp.ge.f32.partialorder %v4673_v31, 0.0 }
 0xa3c   :  { %4742 = vadd.xlane.f32.xlu1 %v4734_v19  ;;  %v4543_v29 = vmul.f32 %v9706_v13, %v4542_v18  ;;  %v4698_v52 = vmul.f32 0.01, %v4668_v58  ;;  %vm4690_vm4 = vcmp.ge.f32.partialorder %v4668_v58, 0.0 }
 0xa3d   :  { %v14278_v8 = vsel %vm4691_vm5, %v4673_v31, %v4699_v43 }
 0xa3e   :  { %4714 = vadd.xlane.f32.xlu0 %v14255_v42  ;;  %v4545_v57 = vadd.f32 %v4544_v35, %v4543_v29  ;;  %v14275_v44 = vsel %vm4690_vm4, %v4668_v58, %v4698_v52  ;;  %v4739_v60 = vmul.f32 %v14278_v8, %v14278_v8 }
 0xa3f   :  { %v4738_v14 = vmul.f32 %v14275_v44, %v14275_v44 }
 0xa40   :  { %4716 = vadd.xlane.f32.xlu1 %v14259_v15  ;;  %7221 = vst [vmem:[%s14889_s11 + $0x8] sm:$0xff] %v4545_v57  ;;  %7500 = vmatmul.mubr.f32.gmra.mrb[38].mxu0 %v4545_v57 }
 0xa42   :  { %4746 = vadd.xlane.f32.xlu0 %v4736_v12 }
 0xa44   :  { %4748 = vadd.xlane.f32.xlu1 %v4737_v34 }
 0xa46   :  { %4718 = vadd.xlane.f32.xlu0 %v14275_v44 }
 0xa48   :  { %4720 = vadd.xlane.f32.xlu1 %v14278_v8 }
 0xa4a   :  { %4750 = vadd.xlane.f32.xlu0 %v4738_v14 }
 0xa4c   :  { %4752 = vadd.xlane.f32.xlu1 %v4739_v60 }
 0xac3   :  { %v4713_v56 = vpop.xlane.xlu0 %4712 }
 0xac4   :  { %v4727_v39 = vmul.f32 0.03125, %v4713_v56 }
 0xac5   :  { %v4745_v28 = vpop.xlane.xlu1 %4744 }
 0xac6   :  { %v4767_v36 = vmul.f32 %v4727_v39, %v4727_v39  ;;  %v4759_v26 = vmul.f32 0.03125, %v4745_v28  ;;  %v4783_v3 = vsub.f32 %v14241_v17, %v4727_v39 }
 0xac7   :  { %v4711_v47 = vpop.xlane.xlu0 %4710 }
 0xac8   :  { %v4775_v48 = vsub.f32 %v4759_v26, %v4767_v36  ;;  %v4726_v11 = vmul.f32 0.03125, %v4711_v47 }
 0xac9   :  { %v4743_v24 = vpop.xlane.xlu1 %4742 }
 0xaca   :  { %v4791_v37 = vadd.f32 1e-05, %v4775_v48  ;;  %v4766_v9 = vmul.f32 %v4726_v11, %v4726_v11  ;;  %v4758_v59 = vmul.f32 0.03125, %v4743_v24  ;;  %v4782_v0 = vsub.f32 %v14248_v61, %v4726_v11  ;;  %v14333_v61 = vld [vmem:[%s14892_s7] ss:$0 sm:$0xff] }
 0xacb   :  { %v4715_v54 = vpop.xlane.xlu0 %4714 }
 0xacc   :  { %9707 = vrsqrt.f32 %v4791_v37  ;;  %v4774_v40 = vsub.f32 %v4758_v59, %v4766_v9  ;;  %v4728_v19 = vmul.f32 0.03125, %v4715_v54 }
 0xacd   :  { %v4717_v18 = vpop.xlane.xlu1 %4716 }
 0xace   :  { %v4790_v13 = vadd.f32 1e-05, %v4774_v40  ;;  %v4729_v23 = vmul.f32 0.03125, %v4717_v18  ;;  %v4768_v35 = vmul.f32 %v4728_v19, %v4728_v19  ;;  %v4784_v56 = vsub.f32 %v14255_v42, %v4728_v19 }
 0xacf   :  { %v4747_v29 = vpop.xlane.xlu0 %4746 }
 0xad0   :  { %9709 = vrsqrt.f32 %v4790_v13  ;;  %v4760_v58 = vmul.f32 0.03125, %v4747_v29  ;;  %v4769_v31 = vmul.f32 %v4729_v23, %v4729_v23  ;;  %v4785_v26 = vsub.f32 %v14259_v15, %v4729_v23 }
 0xad1   :  { %v4749_v57 = vpop.xlane.xlu1 %4748 }
 0xad2   :  { %v4776_v12 = vsub.f32 %v4760_v58, %v4768_v35  ;;  %v4761_v52 = vmul.f32 0.03125, %v4749_v57 }
 0xad3   :  { %v4719_v34 = vpop.xlane.xlu0 %4718 }
 0xad4   :  { %v4792_v43 = vadd.f32 1e-05, %v4776_v12  ;;  %v4777_v53 = vsub.f32 %v4761_v52, %v4769_v31  ;;  %v4730_v33 = vmul.f32 0.03125, %v4719_v34 }
 0xad5   :  { %v4721_v32 = vpop.xlane.xlu1 %4720 }
 0xad6   :  { %v9708_v20 = vpop.eup %9707  ;;  %9711 = vrsqrt.f32 %v4792_v43  ;;  %v4793_v14 = vadd.f32 1e-05, %v4777_v53  ;;  %v4731_v50 = vmul.f32 0.03125, %v4721_v32  ;;  %v4770_v63 = vmul.f32 %v4730_v33, %v4730_v33 }
 0xad7   :  { %v4751_v60 = vpop.xlane.xlu0 %4750  ;;  %v4807_v30 = vmul.f32 %v9708_v20, %v4783_v3  ;;  %v4786_v42 = vsub.f32 %v14275_v44, %v4730_v33  ;;  %v7247_v33 = vld [vmem:[%s14888_s4 + $0x100] sm:$0xff] }
 0xad8   :  { %9713 = vrsqrt.f32 %v4793_v14  ;;  %v4762_v25 = vmul.f32 0.03125, %v4751_v60  ;;  %v4771_v62 = vmul.f32 %v4731_v50, %v4731_v50  ;;  %v4787_v40 = vsub.f32 %v14278_v8, %v4731_v50 }
 0xad9   :  { %v4753_v4 = vpop.xlane.xlu1 %4752  ;;  %v4822_v51 = vmul.f32 %v14326_v5, %v4807_v30 }
 0xada   :  { %v9710_v46 = vpop.eup %9709  ;;  %v4778_v6 = vsub.f32 %v4762_v25, %v4770_v63  ;;  %v4763_v17 = vmul.f32 0.03125, %v4753_v4 }
 0xadb   :  { %v4806_v7 = vmul.f32 %v9710_v46, %v4782_v0  ;;  %v4837_v36 = vadd.f32 %v14333_v61, %v4822_v51 }
 0xadc   :  { %v4794_v21 = vadd.f32 1e-05, %v4778_v6  ;;  %v4779_v38 = vsub.f32 %v4763_v17, %v4771_v62 }
 0xadd   :  { %v4821_v1 = vmul.f32 %v14326_v5, %v4806_v7  ;;  %v14360_v7 = vld [vmem:[%s14890_s5 + $0x1] ss:$0 sm:$0xff] }
 0xade   :  { %9715 = vrsqrt.f32 %v4794_v21  ;;  %v4795_v41 = vadd.f32 1e-05, %v4779_v38 }
 0xadf   :  { %v4836_v39 = vadd.f32 %v14333_v61, %v4821_v1 }
 0xae0   :  { %v9712_v28 = vpop.eup %9711  ;;  %9717 = vrsqrt.f32 %v4795_v41 }
 0xae1   :  { %7534 = vmatprep.mubr.f32.mxu1 %v4836_v39  ;;  %v4808_v47 = vmul.f32 %v9712_v28, %v4784_v56 }
 0xae2   :  { %v9714_v48 = vpop.eup %9713  ;;  %7535 = vmatmul.mubr.f32.vlgmr.msra.gmra.mrb[48].mxu1 %v4837_v36 }
 0xae3   :  { %v4823_v11 = vmul.f32 %v14326_v5, %v4808_v47  ;;  %v4809_v24 = vmul.f32 %v9714_v48, %v4785_v26 }
 0xae5   :  { %v4838_v37 = vadd.f32 %v14333_v61, %v4823_v11  ;;  %v4824_v9 = vmul.f32 %v14326_v5, %v4809_v24 }
 0xae7   :  { %7537 = vmatprep.mubr.f32.mxu1 %v4838_v37  ;;  %v4839_v59 = vadd.f32 %v14333_v61, %v4824_v9 }
 0xae8   :  { %v9716_v54 = vpop.eup %9715 }
 0xae9   :  { %7538 = vmatmul.mubr.f32.gmra.mrb[50].mxu1 %v4839_v59  ;;  %v4810_v15 = vmul.f32 %v9716_v54, %v4786_v42 }
 0xaea   :  { %v9718_v19 = vpop.eup %9717 }
 0xaeb   :  { %v4825_v18 = vmul.f32 %v14326_v5, %v4810_v15  ;;  %v4811_v13 = vmul.f32 %v9718_v19, %v4787_v40 }
 0xaed   :  { %v4840_v23 = vadd.f32 %v14333_v61, %v4825_v18  ;;  %v4826_v29 = vmul.f32 %v14326_v5, %v4811_v13 }
 0xaef   :  { %7540 = vmatprep.mubr.f32.mxu1 %v4840_v23  ;;  %v4841_v35 = vadd.f32 %v14333_v61, %v4826_v29 }
 0xaf1   :  { %7541 = vmatmul.mubr.f32.gmra.mrb[52].mxu1 %v4841_v35 }
 0xb13   :  { %v7501_v44 = vpop.f32.mrb[38].mxu0 }
 0xb14   :  { %v4683_v58 = vadd.f32 %v7501_v44, %v14237_v2  ;;  %v4677_v57 = vpop.f32.mrb[39].mxu0 }
 0xb15   :  { %v4678_v8 = vadd.f32 %v14237_v2, %v4677_v57  ;;  %v7248_v2 = vld [vmem:[%s14888_s4 + $0x108] sm:$0xff] }
 0xb16   :  { %v4701_v31 = vmul.f32 0.01, %v4683_v58  ;;  %vm4693_vm6 = vcmp.ge.f32.partialorder %v4683_v58, 0.0  ;;  %v9386_v32 = vpack.c.bf16 %v7248_v2, %v7247_v33 }
 0xb17   :  { %v4700_v12 = vmul.f32 0.01, %v4678_v8  ;;  %vm4692_vm7 = vcmp.ge.f32.partialorder %v4678_v8, 0.0 }
 0xb18   :  { %v4709_v52 = vsel %vm4693_vm6, %v4683_v58, %v4701_v31  ;;  %9387 = vmatprep.subr.bf16.mxu0 %v9386_v32 }
 0xb19   :  { %4724 = vadd.xlane.f32.xlu1 %v4709_v52  ;;  %v4708_v34 = vsel %vm4692_vm7, %v4678_v8, %v4700_v12  ;;  %v4741_v43 = vmul.f32 %v4709_v52, %v4709_v52  ;;  %9389 = vmatpush3.bf16.msra.mxu0 %v9386_v32  ;;  %v7251_v32 = vld [vmem:[%s14888_s4 + $0x120] sm:$0xff] }
 0xb1a   :  { %4722 = vadd.xlane.f32.xlu0 %v4708_v34  ;;  %v4740_v53 = vmul.f32 %v4708_v34, %v4708_v34 }
 0xb1d   :  { %4756 = vadd.xlane.f32.xlu1 %v4741_v43  ;;  %v7250_v43 = vld [vmem:[%s14888_s4 + $0x118] sm:$0xff] }
 0xb1e   :  { %4754 = vadd.xlane.f32.xlu0 %v4740_v53 }
 0xba6   :  { %v4725_v20 = vpop.xlane.xlu1 %4724 }
 0xba7   :  { %v4733_v3 = vmul.f32 0.03125, %v4725_v20  ;;  %v4723_v14 = vpop.xlane.xlu0 %4722  ;;  %v7252_v20 = vld [vmem:[%s14888_s4 + $0x128] sm:$0xff] }
 0xba8   :  { %v4732_v50 = vmul.f32 0.03125, %v4723_v14  ;;  %v9394_v14 = vpack.c.bf16 %v7252_v20, %v7251_v32 }
 0xba9   :  { %v4773_v63 = vmul.f32 %v4733_v3, %v4733_v3  ;;  %v4789_v39 = vsub.f32 %v4709_v52, %v4733_v3 }
 0xbaa   :  { %v4757_v60 = vpop.xlane.xlu1 %4756  ;;  %v4772_v0 = vmul.f32 %v4732_v50, %v4732_v50  ;;  %v4788_v26 = vsub.f32 %v4708_v34, %v4732_v50  ;;  %v7249_v34 = vld [vmem:[%s14888_s4 + $0x110] sm:$0xff] }
 0xbab   :  { %v4765_v25 = vmul.f32 0.03125, %v4757_v60  ;;  %v4755_v30 = vpop.xlane.xlu0 %4754  ;;  %v9390_v33 = vpack.c.bf16 %v7250_v43, %v7249_v34  ;;  %v7253_v60 = vld [vmem:[%s14888_s4 + $0x130] sm:$0xff] }
 0xbac   :  { %v4764_v4 = vmul.f32 0.03125, %v4755_v30  ;;  %v7255_v30 = vld [vmem:[%s14888_s4 + $0x140] sm:$0xff] }
 0xbad   :  { %v4781_v46 = vsub.f32 %v4765_v25, %v4773_v63  ;;  %9391 = vmatprep.subr.bf16.mxu0 %v9390_v33  ;;  %v7254_v63 = vld [vmem:[%s14888_s4 + $0x138] sm:$0xff] }
 0xbae   :  { %v4780_v62 = vsub.f32 %v4764_v4, %v4772_v0  ;;  %9393 = vmatpush3.bf16.msra.mxu0 %v9390_v33  ;;  %v9398_v25 = vpack.c.bf16 %v7254_v63, %v7253_v60  ;;  %v7256_v0 = vld [vmem:[%s14888_s4 + $0x148] sm:$0xff] }
 0xbaf   :  { %v4797_v6 = vadd.f32 1e-05, %v4781_v46  ;;  %9395 = vmatprep.subr.bf16.mxu0 %v9394_v14  ;;  %v9402_v4 = vpack.c.bf16 %v7256_v0, %v7255_v30  ;;  %v7257_v46 = vld [vmem:[%s14888_s4 + $0x150] sm:$0xff]  ;;  %v14449_v0 = vld [vmem:[%s14891_s6 + $0x1] ss:$0 sm:$0xff] }
 0xbb0   :  { %v4796_v17 = vadd.f32 1e-05, %v4780_v62  ;;  %v7258_v62 = vld [vmem:[%s14888_s4 + $0x158] sm:$0xff] }
 0xbb1   :  { %9719 = vrsqrt.f32 %v4797_v6  ;;  %v9406_v6 = vpack.c.bf16 %v7258_v62, %v7257_v46 }
 0xbb2   :  { %9721 = vrsqrt.f32 %v4796_v17  ;;  %9397 = vmatpush3.bf16.msra.mxu0 %v9394_v14  ;;  %v7259_v17 = vld [vmem:[%s14888_s4 + $0x160] sm:$0xff] }
 0xbb3   :  { %9399 = vmatprep.subr.bf16.mxu0 %v9398_v25 }
 0xbb5   :  { %v7536_v21 = vpop.f32.mrb[48].mxu1 }
 0xbb6   :  { %v4941_v38 = vadd.f32 %v7536_v21, %v14360_v7  ;;  %v4935_v51 = vpop.f32.mrb[49].mxu1  ;;  %9401 = vmatpush3.bf16.msra.mxu0 %v9398_v25  ;;  %v7260_v21 = vld [vmem:[%s14888_s4 + $0x168] sm:$0xff] }
 0xbb7   :  { %v4936_v1 = vadd.f32 %v14360_v7, %v4935_v51  ;;  %9403 = vmatprep.subr.bf16.mxu0 %v9402_v4  ;;  %v7261_v51 = vld [vmem:[%s14888_s4 + $0x170] sm:$0xff] }
 0xbb8   :  { %v4983_v41 = vmul.f32 0.01, %v4941_v38  ;;  %vm4975_vm8 = vcmp.ge.f32.partialorder %v4941_v38, 0.0 }
 0xbb9   :  { %v4982_v56 = vmul.f32 0.01, %v4936_v1  ;;  %vm4974_vm9 = vcmp.ge.f32.partialorder %v4936_v1, 0.0 }
 0xbba   :  { %v14364_v28 = vsel %vm4975_vm8, %v4941_v38, %v4983_v41  ;;  %9405 = vmatpush3.bf16.msra.mxu0 %v9402_v4  ;;  %v9410_v38 = vpack.c.bf16 %v7260_v21, %v7259_v17 }
 0xbbb   :  { %v9720_v36 = vpop.eup %9719  ;;  %5000 = vadd.xlane.f32.xlu1 %v14364_v28  ;;  %v14367_v47 = vsel %vm4974_vm9, %v4936_v1, %v4982_v56  ;;  %v5023_v42 = vmul.f32 %v14364_v28, %v14364_v28  ;;  %9407 = vmatprep.subr.bf16.mxu0 %v9406_v6  ;;  %v7262_v1 = vld [vmem:[%s14888_s4 + $0x178] sm:$0xff] }
 0xbbc   :  { %v9722_v48 = vpop.eup %9721  ;;  %v7539_v11 = vpop.f32.mrb[50].mxu1  ;;  %4998 = vadd.xlane.f32.xlu0 %v14367_v47  ;;  %v4813_v24 = vmul.f32 %v9720_v36, %v4789_v39  ;;  %v5022_v40 = vmul.f32 %v14367_v47, %v14367_v47  ;;  %v9414_v41 = vpack.c.bf16 %v7262_v1, %v7261_v51 }
 0xbbd   :  { %v4951_v37 = vadd.f32 %v7539_v11, %v14360_v7  ;;  %v4945_v9 = vpop.f32.mrb[51].mxu1  ;;  %v4812_v59 = vmul.f32 %v9722_v48, %v4788_v26 }
 0xbbe   :  { %v4946_v54 = vadd.f32 %v14360_v7, %v4945_v9  ;;  %v4828_v15 = vmul.f32 %v14326_v5, %v4813_v24  ;;  %9409 = vmatpush3.bf16.msra.mxu0 %v9406_v6 }
 0xbbf   :  { %v4985_v19 = vmul.f32 0.01, %v4951_v37  ;;  %5032 = vadd.xlane.f32.xlu1 %v5023_v42  ;;  %vm4977_vm10 = vcmp.ge.f32.partialorder %v4951_v37, 0.0  ;;  %v4827_v18 = vmul.f32 %v14326_v5, %v4812_v59  ;;  %9411 = vmatprep.subr.bf16.mxu0 %v9410_v38 }
 0xbc0   :  { %v4984_v13 = vmul.f32 0.01, %v4946_v54  ;;  %5030 = vadd.xlane.f32.xlu0 %v5022_v40  ;;  %vm4976_vm11 = vcmp.ge.f32.partialorder %v4946_v54, 0.0  ;;  %v4843_v44 = vadd.f32 %v14333_v61, %v4828_v15 }
 0xbc1   :  { %v14378_v23 = vsel %vm4977_vm10, %v4951_v37, %v4985_v19  ;;  %v4842_v29 = vadd.f32 %v14333_v61, %v4827_v18 }
 0xbc2   :  { %v14381_v35 = vsel %vm4976_vm11, %v4946_v54, %v4984_v13  ;;  %v5025_v8 = vmul.f32 %v14378_v23, %v14378_v23  ;;  %9413 = vmatpush3.bf16.msra.mxu0 %v9410_v38  ;;  %v14454_v38 = vld [vmem:[%s14892_s7 + $0x1] ss:$0 sm:$0xff] }
 0xbc3   :  { %5004 = vadd.xlane.f32.xlu1 %v14378_v23  ;;  %7543 = vmatprep.mubr.f32.mxu1 %v4842_v29  ;;  %v5024_v12 = vmul.f32 %v14381_v35, %v14381_v35 }
 0xbc4   :  { %v7542_v58 = vpop.f32.mrb[52].mxu1  ;;  %5002 = vadd.xlane.f32.xlu0 %v14381_v35  ;;  %7544 = vmatmul.mubr.f32.gmra.mrb[54].mxu1 %v4843_v44 }
 0xbc5   :  { %v4961_v5 = vadd.f32 %v7542_v58, %v14360_v7  ;;  %v4955_v57 = vpop.f32.mrb[53].mxu1  ;;  %9415 = vmatprep.subr.bf16.mxu0 %v9414_v41 }
 0xbc6   :  { %v4956_v31 = vadd.f32 %v14360_v7, %v4955_v57  ;;  %9417 = vmatpush3.bf16.msra.mxu0 %v9414_v41 }
 0xbc7   :  { %v4987_v52 = vmul.f32 0.01, %v4961_v5  ;;  %5036 = vadd.xlane.f32.xlu1 %v5025_v8  ;;  %vm4979_vm12 = vcmp.ge.f32.partialorder %v4961_v5, 0.0 }
 0xbc8   :  { %v4986_v61 = vmul.f32 0.01, %v4956_v31  ;;  %5034 = vadd.xlane.f32.xlu0 %v5024_v12  ;;  %vm4978_vm13 = vcmp.ge.f32.partialorder %v4956_v31, 0.0 }
 0xbc9   :  { %v14398_v53 = vsel %vm4979_vm12, %v4961_v5, %v4987_v52 }
 0xbca   :  { %v14400_v2 = vsel %vm4978_vm13, %v4956_v31, %v4986_v61  ;;  %v5027_v3 = vmul.f32 %v14398_v53, %v14398_v53 }
 0xbcb   :  { %5008 = vadd.xlane.f32.xlu1 %v14398_v53  ;;  %v5026_v50 = vmul.f32 %v14400_v2, %v14400_v2 }
 0xbcc   :  { %5006 = vadd.xlane.f32.xlu0 %v14400_v2 }
 0xbcf   :  { %5040 = vadd.xlane.f32.xlu1 %v5027_v3 }
 0xbd0   :  { %5038 = vadd.xlane.f32.xlu0 %v5026_v50 }
 0xc48   :  { %v5001_v56 = vpop.xlane.xlu1 %5000 }
 0xc49   :  { %v5015_v39 = vmul.f32 0.03125, %v5001_v56  ;;  %v4999_v36 = vpop.xlane.xlu0 %4998 }
 0xc4a   :  { %v5014_v26 = vmul.f32 0.03125, %v4999_v36 }
 0xc4b   :  { %v5055_v11 = vmul.f32 %v5015_v39, %v5015_v39  ;;  %v5071_v3 = vsub.f32 %v14364_v28, %v5015_v39 }
 0xc4c   :  { %v5033_v48 = vpop.xlane.xlu1 %5032  ;;  %v5054_v9 = vmul.f32 %v5014_v26, %v5014_v26  ;;  %v5070_v60 = vsub.f32 %v14367_v47, %v5014_v26 }
 0xc4d   :  { %v5047_v24 = vmul.f32 0.03125, %v5033_v48  ;;  %v5031_v37 = vpop.xlane.xlu0 %5030 }
 0xc4e   :  { %v5046_v42 = vmul.f32 0.03125, %v5031_v37 }
 0xc4f   :  { %v5063_v59 = vsub.f32 %v5047_v24, %v5055_v11 }
 0xc50   :  { %v5062_v54 = vsub.f32 %v5046_v42, %v5054_v9  ;;  %v5005_v40 = vpop.xlane.xlu1 %5004 }
 0xc51   :  { %v5079_v15 = vadd.f32 1e-05, %v5063_v59  ;;  %v5017_v19 = vmul.f32 0.03125, %v5005_v40  ;;  %v5003_v18 = vpop.xlane.xlu0 %5002 }
 0xc52   :  { %v5078_v13 = vadd.f32 1e-05, %v5062_v54  ;;  %v5016_v29 = vmul.f32 0.03125, %v5003_v18 }
 0xc53   :  { %9723 = vrsqrt.f32 %v5079_v15  ;;  %v5057_v58 = vmul.f32 %v5017_v19, %v5017_v19  ;;  %v5073_v39 = vsub.f32 %v14378_v23, %v5017_v19 }
 0xc54   :  { %9725 = vrsqrt.f32 %v5078_v13  ;;  %v5037_v44 = vpop.xlane.xlu1 %5036  ;;  %v5056_v8 = vmul.f32 %v5016_v29, %v5016_v29  ;;  %v5072_v48 = vsub.f32 %v14381_v35, %v5016_v29 }
 0xc55   :  { %v5049_v5 = vmul.f32 0.03125, %v5037_v44  ;;  %v5035_v57 = vpop.xlane.xlu0 %5034 }
 0xc56   :  { %v5048_v31 = vmul.f32 0.03125, %v5035_v57 }
 0xc57   :  { %v5065_v12 = vsub.f32 %v5049_v5, %v5057_v58 }
 0xc58   :  { %v5064_v52 = vsub.f32 %v5048_v31, %v5056_v8  ;;  %v5009_v61 = vpop.xlane.xlu1 %5008 }
 0xc59   :  { %v5081_v34 = vadd.f32 1e-05, %v5065_v12  ;;  %v5019_v43 = vmul.f32 0.03125, %v5009_v61  ;;  %v5007_v33 = vpop.xlane.xlu0 %5006 }
 0xc5a   :  { %v5080_v32 = vadd.f32 1e-05, %v5064_v52  ;;  %v5018_v20 = vmul.f32 0.03125, %v5007_v33 }
 0xc5b   :  { %9727 = vrsqrt.f32 %v5081_v34  ;;  %v5059_v63 = vmul.f32 %v5019_v43, %v5019_v43  ;;  %v5075_v54 = vsub.f32 %v14398_v53, %v5019_v43  ;;  %v7269_v43 = vld [vmem:[%s14888_s4 + $0x180] sm:$0xff] }
 0xc5c   :  { %9729 = vrsqrt.f32 %v5080_v32  ;;  %v5041_v14 = vpop.xlane.xlu1 %5040  ;;  %v5058_v62 = vmul.f32 %v5018_v20, %v5018_v20  ;;  %v5074_v15 = vsub.f32 %v14400_v2, %v5018_v20 }
 0xc5d   :  { %v9724_v50 = vpop.eup %9723  ;;  %v5051_v25 = vmul.f32 0.03125, %v5041_v14  ;;  %v5039_v30 = vpop.xlane.xlu0 %5038 }
 0xc5e   :  { %v9726_v4 = vpop.eup %9725  ;;  %v5095_v46 = vmul.f32 %v9724_v50, %v5071_v3  ;;  %v5050_v6 = vmul.f32 0.03125, %v5039_v30 }
 0xc5f   :  { %v5067_v17 = vsub.f32 %v5051_v25, %v5059_v63  ;;  %v5094_v21 = vmul.f32 %v9726_v4, %v5070_v60 }
 0xc60   :  { %v5066_v28 = vsub.f32 %v5050_v6, %v5058_v62  ;;  %v5111_v47 = vmul.f32 %v14449_v0, %v5095_v46 }
 0xc61   :  { %v5083_v51 = vadd.f32 1e-05, %v5067_v17  ;;  %v5110_v1 = vmul.f32 %v14449_v0, %v5094_v21  ;;  %v14483_v21 = vld [vmem:[%s14890_s5 + $0x2] ss:$0 sm:$0xff] }
 0xc62   :  { %v5082_v41 = vadd.f32 1e-05, %v5066_v28  ;;  %v5127_v36 = vadd.f32 %v14454_v38, %v5111_v47 }
 0xc63   :  { %9731 = vrsqrt.f32 %v5083_v51  ;;  %v5126_v56 = vadd.f32 %v14454_v38, %v5110_v1 }
 0xc64   :  { %9733 = vrsqrt.f32 %v5082_v41 }
 0xc65   :  { %v9728_v26 = vpop.eup %9727  ;;  %7578 = vmatprep.mubr.f32.mxu0 %v5126_v56 }
 0xc66   :  { %v9730_v11 = vpop.eup %9729  ;;  %7579 = vmatmul.mubr.f32.vlgmr.msra.gmra.mrb[40].mxu0 %v5127_v36  ;;  %v5097_v24 = vmul.f32 %v9728_v26, %v5073_v39 }
 0xc67   :  { %v5096_v37 = vmul.f32 %v9730_v11, %v5072_v48 }
 0xc68   :  { %v5113_v9 = vmul.f32 %v14449_v0, %v5097_v24 }
 0xc69   :  { %v5112_v42 = vmul.f32 %v14449_v0, %v5096_v37 }
 0xc6a   :  { %v5129_v23 = vadd.f32 %v14454_v38, %v5113_v9 }
 0xc6b   :  { %v5128_v59 = vadd.f32 %v14454_v38, %v5112_v42 }
 0xc6d   :  { %v9732_v40 = vpop.eup %9731  ;;  %7581 = vmatprep.mubr.f32.mxu0 %v5128_v59 }
 0xc6e   :  { %v9734_v35 = vpop.eup %9733  ;;  %7582 = vmatmul.mubr.f32.gmra.mrb[42].mxu0 %v5129_v23  ;;  %v5099_v19 = vmul.f32 %v9732_v40, %v5075_v54 }
 0xc6f   :  { %v5098_v18 = vmul.f32 %v9734_v35, %v5074_v15 }
 0xc70   :  { %v5115_v13 = vmul.f32 %v14449_v0, %v5099_v19 }
 0xc71   :  { %v5114_v29 = vmul.f32 %v14449_v0, %v5098_v18 }
 0xc72   :  { %v5131_v58 = vadd.f32 %v14454_v38, %v5115_v13 }
 0xc73   :  { %v5130_v44 = vadd.f32 %v14454_v38, %v5114_v29 }
 0xc75   :  { %7584 = vmatprep.mubr.f32.mxu0 %v5130_v44 }
 0xc76   :  { %7585 = vmatmul.mubr.f32.gmra.mrb[44].mxu0 %v5131_v58 }
 0xc97   :  { %v7545_v53 = vpop.f32.mrb[54].mxu1 }
 0xc98   :  { %v4971_v5 = vadd.f32 %v7545_v53, %v14360_v7  ;;  %v4965_v57 = vpop.f32.mrb[55].mxu1 }
 0xc99   :  { %v4966_v2 = vadd.f32 %v14360_v7, %v4965_v57  ;;  %v7270_v7 = vld [vmem:[%s14888_s4 + $0x188] sm:$0xff] }
 0xc9a   :  { %v4989_v8 = vmul.f32 0.01, %v4971_v5  ;;  %vm4981_vm14 = vcmp.ge.f32.partialorder %v4971_v5, 0.0  ;;  %v9418_v33 = vpack.c.bf16 %v7270_v7, %v7269_v43 }
 0xc9b   :  { %v4988_v31 = vmul.f32 0.01, %v4966_v2  ;;  %vm4980_vm15 = vcmp.ge.f32.partialorder %v4966_v2, 0.0 }
 0xc9c   :  { %v4997_v12 = vsel %vm4981_vm14, %v4971_v5, %v4989_v8  ;;  %9419 = vmatprep.subr.bf16.mxu1 %v9418_v33 }
 0xc9d   :  { %5012 = vadd.xlane.f32.xlu1 %v4997_v12  ;;  %v4996_v52 = vsel %vm4980_vm15, %v4966_v2, %v4988_v31  ;;  %v5029_v61 = vmul.f32 %v4997_v12, %v4997_v12  ;;  %9421 = vmatpush3.bf16.msra.mxu1 %v9418_v33  ;;  %v7273_v33 = vld [vmem:[%s14888_s4 + $0x1a0] sm:$0xff] }
 0xc9e   :  { %5010 = vadd.xlane.f32.xlu0 %v4996_v52  ;;  %v5028_v34 = vmul.f32 %v4996_v52, %v4996_v52 }
 0xca1   :  { %5044 = vadd.xlane.f32.xlu1 %v5029_v61 }
 0xca2   :  { %5042 = vadd.xlane.f32.xlu0 %v5028_v34 }
 0xd2a   :  { %v5013_v32 = vpop.xlane.xlu1 %5012 }
 0xd2b   :  { %v5021_v20 = vmul.f32 0.03125, %v5013_v32  ;;  %v5011_v3 = vpop.xlane.xlu0 %5010  ;;  %v7274_v32 = vld [vmem:[%s14888_s4 + $0x1a8] sm:$0xff] }
 0xd2c   :  { %v5020_v14 = vmul.f32 0.03125, %v5011_v3  ;;  %v9426_v3 = vpack.c.bf16 %v7274_v32, %v7273_v33 }
 0xd2d   :  { %v5061_v60 = vmul.f32 %v5021_v20, %v5021_v20  ;;  %v5077_v39 = vsub.f32 %v4997_v12, %v5021_v20  ;;  %v7271_v12 = vld [vmem:[%s14888_s4 + $0x190] sm:$0xff] }
 0xd2e   :  { %v5045_v50 = vpop.xlane.xlu1 %5044  ;;  %v5060_v30 = vmul.f32 %v5020_v14, %v5020_v14  ;;  %v5076_v48 = vsub.f32 %v4996_v52, %v5020_v14  ;;  %v7272_v52 = vld [vmem:[%s14888_s4 + $0x198] sm:$0xff] }
 0xd2f   :  { %v5053_v63 = vmul.f32 0.03125, %v5045_v50  ;;  %v5043_v25 = vpop.xlane.xlu0 %5042  ;;  %v9422_v34 = vpack.c.bf16 %v7272_v52, %v7271_v12  ;;  %v7275_v50 = vld [vmem:[%s14888_s4 + $0x1b0] sm:$0xff] }
 0xd30   :  { %v5052_v4 = vmul.f32 0.03125, %v5043_v25  ;;  %v7277_v25 = vld [vmem:[%s14888_s4 + $0x1c0] sm:$0xff] }
 0xd31   :  { %v5069_v46 = vsub.f32 %v5053_v63, %v5061_v60  ;;  %9423 = vmatprep.subr.bf16.mxu1 %v9422_v34  ;;  %v7276_v60 = vld [vmem:[%s14888_s4 + $0x1b8] sm:$0xff] }
 0xd32   :  { %v5068_v62 = vsub.f32 %v5052_v4, %v5060_v30  ;;  %9425 = vmatpush3.bf16.msra.mxu1 %v9422_v34  ;;  %v9430_v63 = vpack.c.bf16 %v7276_v60, %v7275_v50  ;;  %v7278_v30 = vld [vmem:[%s14888_s4 + $0x1c8] sm:$0xff] }
 0xd33   :  { %v5085_v6 = vadd.f32 1e-05, %v5069_v46  ;;  %9427 = vmatprep.subr.bf16.mxu1 %v9426_v3  ;;  %v9434_v4 = vpack.c.bf16 %v7278_v30, %v7277_v25  ;;  %v7279_v46 = vld [vmem:[%s14888_s4 + $0x1d0] sm:$0xff]  ;;  %v14572_v30 = vld [vmem:[%s14891_s6 + $0x2] ss:$0 sm:$0xff] }
 0xd34   :  { %v5084_v17 = vadd.f32 1e-05, %v5068_v62  ;;  %v7280_v62 = vld [vmem:[%s14888_s4 + $0x1d8] sm:$0xff] }
 0xd35   :  { %9735 = vrsqrt.f32 %v5085_v6  ;;  %v9438_v6 = vpack.c.bf16 %v7280_v62, %v7279_v46 }
 0xd36   :  { %9737 = vrsqrt.f32 %v5084_v17  ;;  %9429 = vmatpush3.bf16.msra.mxu1 %v9426_v3  ;;  %v7281_v17 = vld [vmem:[%s14888_s4 + $0x1e0] sm:$0xff] }
 0xd37   :  { %9431 = vmatprep.subr.bf16.mxu1 %v9430_v63 }
 0xd39   :  { %v7580_v28 = vpop.f32.mrb[40].mxu0 }
 0xd3a   :  { %v5231_v47 = vadd.f32 %v7580_v28, %v14483_v21  ;;  %v5225_v51 = vpop.f32.mrb[41].mxu0  ;;  %9433 = vmatpush3.bf16.msra.mxu1 %v9430_v63  ;;  %v7282_v28 = vld [vmem:[%s14888_s4 + $0x1e8] sm:$0xff] }
 0xd3b   :  { %v5226_v1 = vadd.f32 %v14483_v21, %v5225_v51  ;;  %9435 = vmatprep.subr.bf16.mxu1 %v9434_v4  ;;  %v7283_v51 = vld [vmem:[%s14888_s4 + $0x1f0] sm:$0xff] }
 0xd3c   :  { %v5273_v41 = vmul.f32 0.01, %v5231_v47  ;;  %vm5265_vm0 = vcmp.ge.f32.partialorder %v5231_v47, 0.0 }
 0xd3d   :  { %v5272_v56 = vmul.f32 0.01, %v5226_v1  ;;  %vm5264_vm1 = vcmp.ge.f32.partialorder %v5226_v1, 0.0 }
 0xd3e   :  { %v14487_v36 = vsel %vm5265_vm0, %v5231_v47, %v5273_v41  ;;  %9437 = vmatpush3.bf16.msra.mxu1 %v9434_v4  ;;  %v9442_v47 = vpack.c.bf16 %v7282_v28, %v7281_v17 }
 0xd3f   :  { %v9736_v26 = vpop.eup %9735  ;;  %5290 = vadd.xlane.f32.xlu1 %v14487_v36  ;;  %v14490_v11 = vsel %vm5264_vm1, %v5226_v1, %v5272_v56  ;;  %v5313_v42 = vmul.f32 %v14487_v36, %v14487_v36  ;;  %9439 = vmatprep.subr.bf16.mxu1 %v9438_v6  ;;  %v7284_v1 = vld [vmem:[%s14888_s4 + $0x1f8] sm:$0xff] }
 0xd40   :  { %v9738_v24 = vpop.eup %9737  ;;  %5288 = vadd.xlane.f32.xlu0 %v14490_v11  ;;  %v5101_v37 = vmul.f32 %v9736_v26, %v5077_v39  ;;  %v5312_v40 = vmul.f32 %v14490_v11, %v14490_v11  ;;  %v9446_v41 = vpack.c.bf16 %v7284_v1, %v7283_v51 }
 0xd41   :  { %v7583_v9 = vpop.f32.mrb[42].mxu0  ;;  %v5100_v59 = vmul.f32 %v9738_v24, %v5076_v48 }
 0xd42   :  { %v5241_v54 = vadd.f32 %v7583_v9, %v14483_v21  ;;  %v5235_v23 = vpop.f32.mrb[43].mxu0  ;;  %v5117_v15 = vmul.f32 %v14449_v0, %v5101_v37  ;;  %9441 = vmatpush3.bf16.msra.mxu1 %v9438_v6 }
 0xd43   :  { %v5236_v35 = vadd.f32 %v14483_v21, %v5235_v23  ;;  %5322 = vadd.xlane.f32.xlu1 %v5313_v42  ;;  %v5116_v19 = vmul.f32 %v14449_v0, %v5100_v59  ;;  %9443 = vmatprep.subr.bf16.mxu1 %v9442_v47 }
 0xd44   :  { %v5275_v18 = vmul.f32 0.01, %v5241_v54  ;;  %5320 = vadd.xlane.f32.xlu0 %v5312_v40  ;;  %vm5267_vm2 = vcmp.ge.f32.partialorder %v5241_v54, 0.0  ;;  %v5133_v58 = vadd.f32 %v14454_v38, %v5117_v15 }
 0xd45   :  { %v5274_v13 = vmul.f32 0.01, %v5236_v35  ;;  %vm5266_vm3 = vcmp.ge.f32.partialorder %v5236_v35, 0.0  ;;  %v5132_v29 = vadd.f32 %v14454_v38, %v5116_v19 }
 0xd46   :  { %v14502_v44 = vsel %vm5267_vm2, %v5241_v54, %v5275_v18  ;;  %9445 = vmatpush3.bf16.msra.mxu1 %v9442_v47  ;;  %v14577_v47 = vld [vmem:[%s14892_s7 + $0x2] ss:$0 sm:$0xff] }
 0xd47   :  { %5294 = vadd.xlane.f32.xlu1 %v14502_v44  ;;  %v14506_v53 = vsel %vm5266_vm3, %v5236_v35, %v5274_v13  ;;  %7587 = vmatprep.mubr.f32.mxu0 %v5132_v29  ;;  %v5315_v5 = vmul.f32 %v14502_v44, %v14502_v44 }
 0xd48   :  { %5292 = vadd.xlane.f32.xlu0 %v14506_v53  ;;  %7588 = vmatmul.mubr.f32.gmra.mrb[46].mxu0 %v5133_v58  ;;  %v5314_v8 = vmul.f32 %v14506_v53, %v14506_v53 }
 0xd49   :  { %v7586_v0 = vpop.f32.mrb[44].mxu0  ;;  %9447 = vmatprep.subr.bf16.mxu1 %v9446_v41 }
 0xd4a   :  { %v5251_v57 = vadd.f32 %v7586_v0, %v14483_v21  ;;  %v5245_v2 = vpop.f32.mrb[45].mxu0  ;;  %9449 = vmatpush3.bf16.msra.mxu1 %v9446_v41 }
 0xd4b   :  { %v5246_v38 = vadd.f32 %v14483_v21, %v5245_v2  ;;  %5326 = vadd.xlane.f32.xlu1 %v5315_v5 }
 0xd4c   :  { %v5277_v31 = vmul.f32 0.01, %v5251_v57  ;;  %5324 = vadd.xlane.f32.xlu0 %v5314_v8  ;;  %vm5269_vm4 = vcmp.ge.f32.partialorder %v5251_v57, 0.0 }
 0xd4d   :  { %v5276_v61 = vmul.f32 0.01, %v5246_v38  ;;  %vm5268_vm5 = vcmp.ge.f32.partialorder %v5246_v38, 0.0 }
 0xd4e   :  { %v14521_v43 = vsel %vm5269_vm4, %v5251_v57, %v5277_v31 }
 0xd4f   :  { %5298 = vadd.xlane.f32.xlu1 %v14521_v43  ;;  %v14524_v7 = vsel %vm5268_vm5, %v5246_v38, %v5276_v61  ;;  %v5317_v20 = vmul.f32 %v14521_v43, %v14521_v43 }
 0xd50   :  { %5296 = vadd.xlane.f32.xlu0 %v14524_v7  ;;  %v5316_v14 = vmul.f32 %v14524_v7, %v14524_v7 }
 0xd53   :  { %5330 = vadd.xlane.f32.xlu1 %v5317_v20 }
 0xd54   :  { %5328 = vadd.xlane.f32.xlu0 %v5316_v14 }
 0xdcc   :  { %v5291_v56 = vpop.xlane.xlu1 %5290 }
 0xdcd   :  { %v5305_v39 = vmul.f32 0.03125, %v5291_v56  ;;  %v5289_v26 = vpop.xlane.xlu0 %5288 }
 0xdce   :  { %v5304_v48 = vmul.f32 0.03125, %v5289_v26 }
 0xdcf   :  { %v5345_v37 = vmul.f32 %v5305_v39, %v5305_v39  ;;  %v5361_v20 = vsub.f32 %v14487_v36, %v5305_v39 }
 0xdd0   :  { %v5323_v24 = vpop.xlane.xlu1 %5322  ;;  %v5344_v59 = vmul.f32 %v5304_v48, %v5304_v48  ;;  %v5360_v50 = vsub.f32 %v14490_v11, %v5304_v48 }
 0xdd1   :  { %v5337_v9 = vmul.f32 0.03125, %v5323_v24  ;;  %v5321_v42 = vpop.xlane.xlu0 %5320 }
 0xdd2   :  { %v5336_v54 = vmul.f32 0.03125, %v5321_v42 }
 0xdd3   :  { %v5353_v23 = vsub.f32 %v5337_v9, %v5345_v37 }
 0xdd4   :  { %v5352_v40 = vsub.f32 %v5336_v54, %v5344_v59  ;;  %v5295_v15 = vpop.xlane.xlu1 %5294 }
 0xdd5   :  { %v5369_v35 = vadd.f32 1e-05, %v5353_v23  ;;  %v5307_v19 = vmul.f32 0.03125, %v5295_v15  ;;  %v5293_v18 = vpop.xlane.xlu0 %5292 }
 0xdd6   :  { %v5368_v13 = vadd.f32 1e-05, %v5352_v40  ;;  %v5306_v29 = vmul.f32 0.03125, %v5293_v18 }
 0xdd7   :  { %9739 = vrsqrt.f32 %v5369_v35  ;;  %v5347_v0 = vmul.f32 %v5307_v19, %v5307_v19  ;;  %v5363_v39 = vsub.f32 %v14502_v44, %v5307_v19 }
 0xdd8   :  { %9741 = vrsqrt.f32 %v5368_v13  ;;  %v5327_v58 = vpop.xlane.xlu1 %5326  ;;  %v5346_v2 = vmul.f32 %v5306_v29, %v5306_v29  ;;  %v5362_v24 = vsub.f32 %v14506_v53, %v5306_v29 }
 0xdd9   :  { %v5339_v5 = vmul.f32 0.03125, %v5327_v58  ;;  %v5325_v57 = vpop.xlane.xlu0 %5324 }
 0xdda   :  { %v5338_v8 = vmul.f32 0.03125, %v5325_v57 }
 0xddb   :  { %v5355_v38 = vsub.f32 %v5339_v5, %v5347_v0 }
 0xddc   :  { %v5354_v31 = vsub.f32 %v5338_v8, %v5346_v2  ;;  %v5299_v12 = vpop.xlane.xlu1 %5298 }
 0xddd   :  { %v5371_v52 = vadd.f32 1e-05, %v5355_v38  ;;  %v5309_v61 = vmul.f32 0.03125, %v5299_v12  ;;  %v5297_v34 = vpop.xlane.xlu0 %5296 }
 0xdde   :  { %v5370_v33 = vadd.f32 1e-05, %v5354_v31  ;;  %v5308_v32 = vmul.f32 0.03125, %v5297_v34 }
 0xddf   :  { %9743 = vrsqrt.f32 %v5371_v52  ;;  %v5349_v60 = vmul.f32 %v5309_v61, %v5309_v61  ;;  %v5365_v40 = vsub.f32 %v14521_v43, %v5309_v61  ;;  %v7291_v61 = vld [vmem:[%s14888_s4 + $0x200] sm:$0xff] }
 0xde0   :  { %9745 = vrsqrt.f32 %v5370_v33  ;;  %v5331_v3 = vpop.xlane.xlu1 %5330  ;;  %v5348_v62 = vmul.f32 %v5308_v32, %v5308_v32  ;;  %v5364_v35 = vsub.f32 %v14524_v7, %v5308_v32 }
 0xde1   :  { %v9740_v14 = vpop.eup %9739  ;;  %v5341_v63 = vmul.f32 0.03125, %v5331_v3  ;;  %v5329_v25 = vpop.xlane.xlu0 %5328 }
 0xde2   :  { %v9742_v4 = vpop.eup %9741  ;;  %v5385_v46 = vmul.f32 %v9740_v14, %v5361_v20  ;;  %v5340_v6 = vmul.f32 0.03125, %v5329_v25 }
 0xde3   :  { %v5357_v17 = vsub.f32 %v5341_v63, %v5349_v60  ;;  %v5384_v28 = vmul.f32 %v9742_v4, %v5360_v50 }
 0xde4   :  { %v5356_v36 = vsub.f32 %v5340_v6, %v5348_v62  ;;  %v5401_v11 = vmul.f32 %v14572_v30, %v5385_v46 }
 0xde5   :  { %v5373_v51 = vadd.f32 1e-05, %v5357_v17  ;;  %v5400_v1 = vmul.f32 %v14572_v30, %v5384_v28  ;;  %v14606_v28 = vld [vmem:[%s14890_s5 + $0x3] ss:$0 sm:$0xff] }
 0xde6   :  { %v5372_v41 = vadd.f32 1e-05, %v5356_v36  ;;  %v5417_v26 = vadd.f32 %v14577_v47, %v5401_v11 }
 0xde7   :  { %9747 = vrsqrt.f32 %v5373_v51  ;;  %v5416_v56 = vadd.f32 %v14577_v47, %v5400_v1 }
 0xde8   :  { %9749 = vrsqrt.f32 %v5372_v41 }
 0xde9   :  { %v9744_v48 = vpop.eup %9743  ;;  %7622 = vmatprep.mubr.f32.mxu1 %v5416_v56 }
 0xdea   :  { %v9746_v37 = vpop.eup %9745  ;;  %7623 = vmatmul.mubr.f32.vlgmr.msra.gmra.mrb[56].mxu1 %v5417_v26  ;;  %v5387_v9 = vmul.f32 %v9744_v48, %v5363_v39 }
 0xdeb   :  { %v5386_v42 = vmul.f32 %v9746_v37, %v5362_v24 }
 0xdec   :  { %v5403_v59 = vmul.f32 %v14572_v30, %v5387_v9 }
 0xded   :  { %v5402_v54 = vmul.f32 %v14572_v30, %v5386_v42 }
 0xdee   :  { %v5419_v44 = vadd.f32 %v14577_v47, %v5403_v59 }
 0xdef   :  { %v5418_v23 = vadd.f32 %v14577_v47, %v5402_v54 }
 0xdf1   :  { %v9748_v15 = vpop.eup %9747  ;;  %7625 = vmatprep.mubr.f32.mxu1 %v5418_v23 }
 0xdf2   :  { %v9750_v53 = vpop.eup %9749  ;;  %7626 = vmatmul.mubr.f32.gmra.mrb[58].mxu1 %v5419_v44  ;;  %v5389_v19 = vmul.f32 %v9748_v15, %v5365_v40 }
 0xdf3   :  { %v5388_v18 = vmul.f32 %v9750_v53, %v5364_v35 }
 0xdf4   :  { %v5405_v13 = vmul.f32 %v14572_v30, %v5389_v19 }
 0xdf5   :  { %v5404_v29 = vmul.f32 %v14572_v30, %v5388_v18 }
 0xdf6   :  { %v5421_v0 = vadd.f32 %v14577_v47, %v5405_v13 }
 0xdf7   :  { %v5420_v58 = vadd.f32 %v14577_v47, %v5404_v29 }
 0xdf9   :  { %7628 = vmatprep.mubr.f32.mxu1 %v5420_v58 }
 0xdfa   :  { %7629 = vmatmul.mubr.f32.gmra.mrb[60].mxu1 %v5421_v0 }
 0xe1b   :  { %v7589_v43 = vpop.f32.mrb[46].mxu0 }
 0xe1c   :  { %v5261_v5 = vadd.f32 %v7589_v43, %v14483_v21  ;;  %v5255_v57 = vpop.f32.mrb[47].mxu0 }
 0xe1d   :  { %v5256_v7 = vadd.f32 %v14483_v21, %v5255_v57  ;;  %v7292_v21 = vld [vmem:[%s14888_s4 + $0x208] sm:$0xff] }
 0xe1e   :  { %v5279_v2 = vmul.f32 0.01, %v5261_v5  ;;  %vm5271_vm6 = vcmp.ge.f32.partialorder %v5261_v5, 0.0  ;;  %v9450_v34 = vpack.c.bf16 %v7292_v21, %v7291_v61 }
 0xe1f   :  { %v5278_v8 = vmul.f32 0.01, %v5256_v7  ;;  %vm5270_vm7 = vcmp.ge.f32.partialorder %v5256_v7, 0.0 }
 0xe20   :  { %v5287_v38 = vsel %vm5271_vm6, %v5261_v5, %v5279_v2  ;;  %9451 = vmatprep.subr.bf16.mxu0 %v9450_v34 }
 0xe21   :  { %5302 = vadd.xlane.f32.xlu1 %v5287_v38  ;;  %v5286_v31 = vsel %vm5270_vm7, %v5256_v7, %v5278_v8  ;;  %v5319_v12 = vmul.f32 %v5287_v38, %v5287_v38  ;;  %9453 = vmatpush3.bf16.msra.mxu0 %v9450_v34  ;;  %v7295_v34 = vld [vmem:[%s14888_s4 + $0x220] sm:$0xff] }
 0xe22   :  { %5300 = vadd.xlane.f32.xlu0 %v5286_v31  ;;  %v5318_v52 = vmul.f32 %v5286_v31, %v5286_v31 }
 0xe25   :  { %5334 = vadd.xlane.f32.xlu1 %v5319_v12 }
 0xe26   :  { %5332 = vadd.xlane.f32.xlu0 %v5318_v52 }
 0xeae   :  { %v5303_v33 = vpop.xlane.xlu1 %5302 }
 0xeaf   :  { %v5311_v32 = vmul.f32 0.03125, %v5303_v33  ;;  %v5301_v20 = vpop.xlane.xlu0 %5300  ;;  %v7296_v33 = vld [vmem:[%s14888_s4 + $0x228] sm:$0xff] }
 0xeb0   :  { %v5310_v3 = vmul.f32 0.03125, %v5301_v20  ;;  %v9458_v20 = vpack.c.bf16 %v7296_v33, %v7295_v34 }
 0xeb1   :  { %v5351_v50 = vmul.f32 %v5311_v32, %v5311_v32  ;;  %v5367_v39 = vsub.f32 %v5287_v38, %v5311_v32  ;;  %v7293_v38 = vld [vmem:[%s14888_s4 + $0x210] sm:$0xff] }
 0xeb2   :  { %v5335_v14 = vpop.xlane.xlu1 %5334  ;;  %v5350_v25 = vmul.f32 %v5310_v3, %v5310_v3  ;;  %v5366_v24 = vsub.f32 %v5286_v31, %v5310_v3  ;;  %v7294_v31 = vld [vmem:[%s14888_s4 + $0x218] sm:$0xff] }
 0xeb3   :  { %v5343_v60 = vmul.f32 0.03125, %v5335_v14  ;;  %v5333_v63 = vpop.xlane.xlu0 %5332  ;;  %v9454_v52 = vpack.c.bf16 %v7294_v31, %v7293_v38  ;;  %v7297_v14 = vld [vmem:[%s14888_s4 + $0x230] sm:$0xff] }
 0xeb4   :  { %v5342_v4 = vmul.f32 0.03125, %v5333_v63  ;;  %v7299_v63 = vld [vmem:[%s14888_s4 + $0x240] sm:$0xff] }
 0xeb5   :  { %v5359_v46 = vsub.f32 %v5343_v60, %v5351_v50  ;;  %9455 = vmatprep.subr.bf16.mxu0 %v9454_v52  ;;  %v7298_v50 = vld [vmem:[%s14888_s4 + $0x238] sm:$0xff] }
 0xeb6   :  { %v5358_v62 = vsub.f32 %v5342_v4, %v5350_v25  ;;  %9457 = vmatpush3.bf16.msra.mxu0 %v9454_v52  ;;  %v9462_v60 = vpack.c.bf16 %v7298_v50, %v7297_v14  ;;  %v7300_v25 = vld [vmem:[%s14888_s4 + $0x248] sm:$0xff] }
 0xeb7   :  { %v5375_v6 = vadd.f32 1e-05, %v5359_v46  ;;  %9459 = vmatprep.subr.bf16.mxu0 %v9458_v20  ;;  %v9466_v4 = vpack.c.bf16 %v7300_v25, %v7299_v63  ;;  %v7301_v46 = vld [vmem:[%s14888_s4 + $0x250] sm:$0xff]  ;;  %v14695_v25 = vld [vmem:[%s14891_s6 + $0x3] ss:$0 sm:$0xff] }
 0xeb8   :  { %v5374_v17 = vadd.f32 1e-05, %v5358_v62  ;;  %v7302_v62 = vld [vmem:[%s14888_s4 + $0x258] sm:$0xff] }
 0xeb9   :  { %9751 = vrsqrt.f32 %v5375_v6  ;;  %v9470_v6 = vpack.c.bf16 %v7302_v62, %v7301_v46 }
 0xeba   :  { %9753 = vrsqrt.f32 %v5374_v17  ;;  %9461 = vmatpush3.bf16.msra.mxu0 %v9458_v20  ;;  %v7303_v17 = vld [vmem:[%s14888_s4 + $0x260] sm:$0xff] }
 0xebb   :  { %9463 = vmatprep.subr.bf16.mxu0 %v9462_v60 }
 0xebd   :  { %v7624_v36 = vpop.f32.mrb[56].mxu1 }
 0xebe   :  { %v5521_v11 = vadd.f32 %v7624_v36, %v14606_v28  ;;  %v5515_v51 = vpop.f32.mrb[57].mxu1  ;;  %9465 = vmatpush3.bf16.msra.mxu0 %v9462_v60  ;;  %v7304_v36 = vld [vmem:[%s14888_s4 + $0x268] sm:$0xff] }
 0xebf   :  { %v5516_v1 = vadd.f32 %v14606_v28, %v5515_v51  ;;  %9467 = vmatprep.subr.bf16.mxu0 %v9466_v4  ;;  %v7305_v51 = vld [vmem:[%s14888_s4 + $0x270] sm:$0xff] }
 0xec0   :  { %v5563_v41 = vmul.f32 0.01, %v5521_v11  ;;  %vm5555_vm8 = vcmp.ge.f32.partialorder %v5521_v11, 0.0 }
 0xec1   :  { %v5562_v56 = vmul.f32 0.01, %v5516_v1  ;;  %vm5554_vm9 = vcmp.ge.f32.partialorder %v5516_v1, 0.0 }
 0xec2   :  { %v14610_v26 = vsel %vm5555_vm8, %v5521_v11, %v5563_v41  ;;  %9469 = vmatpush3.bf16.msra.mxu0 %v9466_v4  ;;  %v9474_v11 = vpack.c.bf16 %v7304_v36, %v7303_v17 }
 0xec3   :  { %v9752_v48 = vpop.eup %9751  ;;  %5580 = vadd.xlane.f32.xlu1 %v14610_v26  ;;  %v14613_v37 = vsel %vm5554_vm9, %v5516_v1, %v5562_v56  ;;  %v5603_v54 = vmul.f32 %v14610_v26, %v14610_v26  ;;  %9471 = vmatprep.subr.bf16.mxu0 %v9470_v6  ;;  %v7306_v1 = vld [vmem:[%s14888_s4 + $0x278] sm:$0xff] }
 0xec4   :  { %v9754_v9 = vpop.eup %9753  ;;  %5578 = vadd.xlane.f32.xlu0 %v14613_v37  ;;  %v5391_v42 = vmul.f32 %v9752_v48, %v5367_v39  ;;  %v5602_v15 = vmul.f32 %v14613_v37, %v14613_v37  ;;  %v9478_v41 = vpack.c.bf16 %v7306_v1, %v7305_v51 }
 0xec5   :  { %v7627_v59 = vpop.f32.mrb[58].mxu1  ;;  %v5390_v23 = vmul.f32 %v9754_v9, %v5366_v24 }
 0xec6   :  { %v5531_v40 = vadd.f32 %v7627_v59, %v14606_v28  ;;  %v5525_v44 = vpop.f32.mrb[59].mxu1  ;;  %v5407_v35 = vmul.f32 %v14572_v30, %v5391_v42  ;;  %9473 = vmatpush3.bf16.msra.mxu0 %v9470_v6 }
 0xec7   :  { %v5526_v53 = vadd.f32 %v14606_v28, %v5525_v44  ;;  %5612 = vadd.xlane.f32.xlu1 %v5603_v54  ;;  %v5406_v19 = vmul.f32 %v14572_v30, %v5390_v23  ;;  %9475 = vmatprep.subr.bf16.mxu0 %v9474_v11 }
 0xec8   :  { %v5565_v18 = vmul.f32 0.01, %v5531_v40  ;;  %5610 = vadd.xlane.f32.xlu0 %v5602_v15  ;;  %vm5557_vm10 = vcmp.ge.f32.partialorder %v5531_v40, 0.0  ;;  %v5423_v0 = vadd.f32 %v14577_v47, %v5407_v35 }
 0xec9   :  { %v5564_v13 = vmul.f32 0.01, %v5526_v53  ;;  %vm5556_vm11 = vcmp.ge.f32.partialorder %v5526_v53, 0.0  ;;  %v5422_v29 = vadd.f32 %v14577_v47, %v5406_v19 }
 0xeca   :  { %v14625_v58 = vsel %vm5557_vm10, %v5531_v40, %v5565_v18  ;;  %9477 = vmatpush3.bf16.msra.mxu0 %v9474_v11  ;;  %v14700_v11 = vld [vmem:[%s14892_s7 + $0x3] ss:$0 sm:$0xff] }
 0xecb   :  { %5584 = vadd.xlane.f32.xlu1 %v14625_v58  ;;  %v14629_v43 = vsel %vm5556_vm11, %v5526_v53, %v5564_v13  ;;  %7631 = vmatprep.mubr.f32.mxu1 %v5422_v29  ;;  %v5605_v5 = vmul.f32 %v14625_v58, %v14625_v58 }
 0xecc   :  { %5582 = vadd.xlane.f32.xlu0 %v14629_v43  ;;  %7632 = vmatmul.mubr.f32.gmra.mrb[62].mxu1 %v5423_v0  ;;  %v5604_v2 = vmul.f32 %v14629_v43, %v14629_v43 }
 0xecd   :  { %v7630_v30 = vpop.f32.mrb[60].mxu1  ;;  %9479 = vmatprep.subr.bf16.mxu0 %v9478_v41 }
 0xece   :  { %v5541_v57 = vadd.f32 %v7630_v30, %v14606_v28  ;;  %v5535_v7 = vpop.f32.mrb[61].mxu1  ;;  %9481 = vmatpush3.bf16.msra.mxu0 %v9478_v41 }
 0xecf   :  { %v5536_v47 = vadd.f32 %v14606_v28, %v5535_v7  ;;  %5616 = vadd.xlane.f32.xlu1 %v5605_v5 }
 0xed0   :  { %v5567_v8 = vmul.f32 0.01, %v5541_v57  ;;  %5614 = vadd.xlane.f32.xlu0 %v5604_v2  ;;  %vm5559_vm12 = vcmp.ge.f32.partialorder %v5541_v57, 0.0 }
 0xed1   :  { %v5566_v12 = vmul.f32 0.01, %v5536_v47  ;;  %vm5558_vm13 = vcmp.ge.f32.partialorder %v5536_v47, 0.0 }
 0xed2   :  { %v14644_v61 = vsel %vm5559_vm12, %v5541_v57, %v5567_v8 }
 0xed3   :  { %5588 = vadd.xlane.f32.xlu1 %v14644_v61  ;;  %v14647_v21 = vsel %vm5558_vm13, %v5536_v47, %v5566_v12  ;;  %v5607_v32 = vmul.f32 %v14644_v61, %v14644_v61 }
 0xed4   :  { %5586 = vadd.xlane.f32.xlu0 %v14647_v21  ;;  %v5606_v3 = vmul.f32 %v14647_v21, %v14647_v21 }
 0xed7   :  { %5620 = vadd.xlane.f32.xlu1 %v5607_v32 }
 0xed8   :  { %5618 = vadd.xlane.f32.xlu0 %v5606_v3 }
 0xf50   :  { %v5581_v56 = vpop.xlane.xlu1 %5580 }
 0xf51   :  { %v5595_v39 = vmul.f32 0.03125, %v5581_v56  ;;  %v5579_v48 = vpop.xlane.xlu0 %5578 }
 0xf52   :  { %v5594_v24 = vmul.f32 0.03125, %v5579_v48 }
 0xf53   :  { %v5635_v42 = vmul.f32 %v5595_v39, %v5595_v39  ;;  %v5651_v32 = vsub.f32 %v14610_v26, %v5595_v39 }
 0xf54   :  { %v5613_v9 = vpop.xlane.xlu1 %5612  ;;  %v5634_v23 = vmul.f32 %v5594_v24, %v5594_v24  ;;  %v5650_v14 = vsub.f32 %v14613_v37, %v5594_v24 }
 0xf55   :  { %v5627_v59 = vmul.f32 0.03125, %v5613_v9  ;;  %v5611_v54 = vpop.xlane.xlu0 %5610 }
 0xf56   :  { %v5626_v40 = vmul.f32 0.03125, %v5611_v54 }
 0xf57   :  { %v5643_v44 = vsub.f32 %v5627_v59, %v5635_v42 }
 0xf58   :  { %v5642_v15 = vsub.f32 %v5626_v40, %v5634_v23  ;;  %v5585_v35 = vpop.xlane.xlu1 %5584 }
 0xf59   :  { %v5659_v53 = vadd.f32 1e-05, %v5643_v44  ;;  %v5597_v19 = vmul.f32 0.03125, %v5585_v35  ;;  %v5583_v18 = vpop.xlane.xlu0 %5582 }
 0xf5a   :  { %v5658_v13 = vadd.f32 1e-05, %v5642_v15  ;;  %v5596_v29 = vmul.f32 0.03125, %v5583_v18 }
 0xf5b   :  { %9755 = vrsqrt.f32 %v5659_v53  ;;  %v5637_v30 = vmul.f32 %v5597_v19, %v5597_v19  ;;  %v5653_v39 = vsub.f32 %v14625_v58, %v5597_v19 }
 0xf5c   :  { %9757 = vrsqrt.f32 %v5658_v13  ;;  %v5617_v0 = vpop.xlane.xlu1 %5616  ;;  %v5636_v7 = vmul.f32 %v5596_v29, %v5596_v29  ;;  %v5652_v9 = vsub.f32 %v14629_v43, %v5596_v29 }
 0xf5d   :  { %v5629_v5 = vmul.f32 0.03125, %v5617_v0  ;;  %v5615_v57 = vpop.xlane.xlu0 %5614 }
 0xf5e   :  { %v5628_v2 = vmul.f32 0.03125, %v5615_v57 }
 0xf5f   :  { %v5645_v47 = vsub.f32 %v5629_v5, %v5637_v30 }
 0xf60   :  { %v5644_v8 = vsub.f32 %v5628_v2, %v5636_v7  ;;  %v5589_v38 = vpop.xlane.xlu1 %5588 }
 0xf61   :  { %v5661_v31 = vadd.f32 1e-05, %v5645_v47  ;;  %v5599_v12 = vmul.f32 0.03125, %v5589_v38  ;;  %v5587_v52 = vpop.xlane.xlu0 %5586 }
 0xf62   :  { %v5660_v34 = vadd.f32 1e-05, %v5644_v8  ;;  %v5598_v33 = vmul.f32 0.03125, %v5587_v52 }
 0xf63   :  { %9759 = vrsqrt.f32 %v5661_v31  ;;  %v5639_v50 = vmul.f32 %v5599_v12, %v5599_v12  ;;  %v5655_v15 = vsub.f32 %v14644_v61, %v5599_v12  ;;  %v6012_v12 = vld [vmem:[%s14893_s8] sm:$0xff] }
 0xf64   :  { %9761 = vrsqrt.f32 %v5660_v34  ;;  %v5621_v20 = vpop.xlane.xlu1 %5620  ;;  %v5638_v62 = vmul.f32 %v5598_v33, %v5598_v33  ;;  %v5654_v53 = vsub.f32 %v14647_v21, %v5598_v33 }
 0xf65   :  { %v9756_v3 = vpop.eup %9755  ;;  %v5631_v60 = vmul.f32 0.03125, %v5621_v20  ;;  %v5619_v63 = vpop.xlane.xlu0 %5618 }
 0xf66   :  { %v9758_v4 = vpop.eup %9757  ;;  %v5675_v46 = vmul.f32 %v9756_v3, %v5651_v32  ;;  %v5630_v6 = vmul.f32 0.03125, %v5619_v63 }
 0xf67   :  { %v5647_v17 = vsub.f32 %v5631_v60, %v5639_v50  ;;  %v5674_v36 = vmul.f32 %v9758_v4, %v5650_v14 }
 0xf68   :  { %v5646_v26 = vsub.f32 %v5630_v6, %v5638_v62  ;;  %v5691_v37 = vmul.f32 %v14695_v25, %v5675_v46 }
 0xf69   :  { %v5663_v51 = vadd.f32 1e-05, %v5647_v17  ;;  %v5690_v1 = vmul.f32 %v14695_v25, %v5674_v36  ;;  %v14729_v36 = vld [vmem:[%s14890_s5 + $0x4] ss:$0 sm:$0xff] }
 0xf6a   :  { %v5662_v41 = vadd.f32 1e-05, %v5646_v26  ;;  %v5707_v48 = vadd.f32 %v14700_v11, %v5691_v37 }
 0xf6b   :  { %9763 = vrsqrt.f32 %v5663_v51  ;;  %v5706_v56 = vadd.f32 %v14700_v11, %v5690_v1 }
 0xf6c   :  { %9765 = vrsqrt.f32 %v5662_v41 }
 0xf6d   :  { %v9760_v24 = vpop.eup %9759  ;;  %7666 = vmatprep.mubr.f32.mxu0 %v5706_v56 }
 0xf6e   :  { %v9762_v42 = vpop.eup %9761  ;;  %7667 = vmatmul.mubr.f32.vlgmr.msra.gmra.mrb[48].mxu0 %v5707_v48  ;;  %v5677_v59 = vmul.f32 %v9760_v24, %v5653_v39 }
 0xf6f   :  { %v5676_v54 = vmul.f32 %v9762_v42, %v5652_v9 }
 0xf70   :  { %v5693_v23 = vmul.f32 %v14695_v25, %v5677_v59 }
 0xf71   :  { %v5692_v40 = vmul.f32 %v14695_v25, %v5676_v54 }
 0xf72   :  { %v5709_v58 = vadd.f32 %v14700_v11, %v5693_v23 }
 0xf73   :  { %v5708_v44 = vadd.f32 %v14700_v11, %v5692_v40 }
 0xf75   :  { %v9764_v35 = vpop.eup %9763  ;;  %7669 = vmatprep.mubr.f32.mxu0 %v5708_v44 }
 0xf76   :  { %v9766_v43 = vpop.eup %9765  ;;  %7670 = vmatmul.mubr.f32.gmra.mrb[50].mxu0 %v5709_v58  ;;  %v5679_v19 = vmul.f32 %v9764_v35, %v5655_v15 }
 0xf77   :  { %v5678_v18 = vmul.f32 %v9766_v43, %v5654_v53 }
 0xf78   :  { %v5695_v13 = vmul.f32 %v14695_v25, %v5679_v19 }
 0xf79   :  { %v5694_v29 = vmul.f32 %v14695_v25, %v5678_v18 }
 0xf7a   :  { %v5711_v30 = vadd.f32 %v14700_v11, %v5695_v13 }
 0xf7b   :  { %v5710_v0 = vadd.f32 %v14700_v11, %v5694_v29 }
 0xf7d   :  { %7672 = vmatprep.mubr.f32.mxu0 %v5710_v0 }
 0xf7e   :  { %7673 = vmatmul.mubr.f32.gmra.mrb[52].mxu0 %v5711_v30 }
 0xf9f   :  { %v7633_v61 = vpop.f32.mrb[62].mxu1 }
 0xfa0   :  { %v5551_v5 = vadd.f32 %v7633_v61, %v14606_v28  ;;  %v5545_v57 = vpop.f32.mrb[63].mxu1 }
 0xfa1   :  { %v5546_v21 = vadd.f32 %v14606_v28, %v5545_v57  ;;  %v6013_v28 = vld [vmem:[%s14893_s8 + $0x8] sm:$0xff] }
 0xfa2   :  { %v5569_v7 = vmul.f32 0.01, %v5551_v5  ;;  %vm5561_vm14 = vcmp.ge.f32.partialorder %v5551_v5, 0.0  ;;  %v9482_v52 = vpack.c.bf16 %v6013_v28, %v6012_v12 }
 0xfa3   :  { %v5568_v2 = vmul.f32 0.01, %v5546_v21  ;;  %vm5560_vm15 = vcmp.ge.f32.partialorder %v5546_v21, 0.0 }
 0xfa4   :  { %v5577_v47 = vsel %vm5561_vm14, %v5551_v5, %v5569_v7  ;;  %9483 = vmatprep.subr.bf16.mxu1 %v9482_v52 }
 0xfa5   :  { %5592 = vadd.xlane.f32.xlu1 %v5577_v47  ;;  %v5576_v8 = vsel %vm5560_vm15, %v5546_v21, %v5568_v2  ;;  %v5609_v38 = vmul.f32 %v5577_v47, %v5577_v47  ;;  %9485 = vmatpush3.bf16.msra.mxu1 %v9482_v52 }
 0xfa6   :  { %5590 = vadd.xlane.f32.xlu0 %v5576_v8  ;;  %v5608_v31 = vmul.f32 %v5576_v8, %v5576_v8 }
 0xfa9   :  { %5624 = vadd.xlane.f32.xlu1 %v5609_v38  ;;  %v6014_v38 = vld [vmem:[%s14893_s8 + $0x10] sm:$0xff] }
 0xfaa   :  { %5622 = vadd.xlane.f32.xlu0 %v5608_v31  ;;  %v6015_v31 = vld [vmem:[%s14893_s8 + $0x18] sm:$0xff] }
 0xfab   :  { %v9486_v28 = vpack.c.bf16 %v6015_v31, %v6014_v38 }
 0xfad   :  { %9487 = vmatprep.subr.bf16.mxu1 %v9486_v28 }
 0xfae   :  { %9489 = vmatpush3.bf16.msra.mxu1 %v9486_v28 }
0x1032   :  { %v5593_v34 = vpop.xlane.xlu1 %5592 }
0x1033   :  { %v5601_v33 = vmul.f32 0.03125, %v5593_v34  ;;  %v5591_v32 = vpop.xlane.xlu0 %5590 }
0x1034   :  { %v5600_v20 = vmul.f32 0.03125, %v5591_v32  ;;  %v6017_v32 = vld [vmem:[%s14893_s8 + $0x28] sm:$0xff] }
0x1035   :  { %v5641_v14 = vmul.f32 %v5601_v33, %v5601_v33  ;;  %v5657_v39 = vsub.f32 %v5577_v47, %v5601_v33  ;;  %v6016_v33 = vld [vmem:[%s14893_s8 + $0x20] sm:$0xff] }
0x1036   :  { %v5625_v3 = vpop.xlane.xlu1 %5624  ;;  %v5640_v63 = vmul.f32 %v5600_v20, %v5600_v20  ;;  %v5656_v9 = vsub.f32 %v5576_v8, %v5600_v20  ;;  %v9490_v20 = vpack.c.bf16 %v6017_v32, %v6016_v33 }
0x1037   :  { %v5633_v50 = vmul.f32 0.03125, %v5625_v3  ;;  %v5623_v60 = vpop.xlane.xlu0 %5622  ;;  %v6018_v3 = vld [vmem:[%s14893_s8 + $0x30] sm:$0xff] }
0x1038   :  { %v5632_v4 = vmul.f32 0.03125, %v5623_v60  ;;  %9491 = vmatprep.subr.bf16.mxu1 %v9490_v20  ;;  %v6020_v60 = vld [vmem:[%s14893_s8 + $0x40] sm:$0xff] }
0x1039   :  { %v5649_v46 = vsub.f32 %v5633_v50, %v5641_v14  ;;  %9493 = vmatpush3.bf16.msra.mxu1 %v9490_v20  ;;  %v6019_v14 = vld [vmem:[%s14893_s8 + $0x38] sm:$0xff] }
0x103a   :  { %v5648_v62 = vsub.f32 %v5632_v4, %v5640_v63  ;;  %v9494_v50 = vpack.c.bf16 %v6019_v14, %v6018_v3  ;;  %v6021_v63 = vld [vmem:[%s14893_s8 + $0x48] sm:$0xff] }
0x103b   :  { %v5665_v6 = vadd.f32 1e-05, %v5649_v46  ;;  %v9498_v4 = vpack.c.bf16 %v6021_v63, %v6020_v60  ;;  %v6022_v46 = vld [vmem:[%s14893_s8 + $0x50] sm:$0xff]  ;;  %v14818_v63 = vld [vmem:[%s14891_s6 + $0x4] ss:$0 sm:$0xff] }
0x103c   :  { %v5664_v17 = vadd.f32 1e-05, %v5648_v62  ;;  %9495 = vmatprep.subr.bf16.mxu1 %v9494_v50  ;;  %v6023_v62 = vld [vmem:[%s14893_s8 + $0x58] sm:$0xff] }
0x103d   :  { %9767 = vrsqrt.f32 %v5665_v6  ;;  %9497 = vmatpush3.bf16.msra.mxu1 %v9494_v50  ;;  %v9502_v6 = vpack.c.bf16 %v6023_v62, %v6022_v46 }
0x103e   :  { %9769 = vrsqrt.f32 %v5664_v17  ;;  %9499 = vmatprep.subr.bf16.mxu1 %v9498_v4  ;;  %v6024_v17 = vld [vmem:[%s14893_s8 + $0x60] sm:$0xff] }
0x1041   :  { %v7668_v26 = vpop.f32.mrb[48].mxu0  ;;  %9501 = vmatpush3.bf16.msra.mxu1 %v9498_v4 }
0x1042   :  { %v5811_v37 = vadd.f32 %v7668_v26, %v14729_v36  ;;  %v5805_v51 = vpop.f32.mrb[49].mxu0  ;;  %9503 = vmatprep.subr.bf16.mxu1 %v9502_v6  ;;  %v6025_v26 = vld [vmem:[%s14893_s8 + $0x68] sm:$0xff] }
0x1043   :  { %v5806_v1 = vadd.f32 %v14729_v36, %v5805_v51  ;;  %v6026_v51 = vld [vmem:[%s14893_s8 + $0x70] sm:$0xff] }
0x1044   :  { %v5853_v41 = vmul.f32 0.01, %v5811_v37  ;;  %vm5845_vm0 = vcmp.ge.f32.partialorder %v5811_v37, 0.0 }
0x1045   :  { %v5852_v56 = vmul.f32 0.01, %v5806_v1  ;;  %vm5844_vm1 = vcmp.ge.f32.partialorder %v5806_v1, 0.0  ;;  %9505 = vmatpush3.bf16.msra.mxu1 %v9502_v6 }
0x1046   :  { %v14733_v48 = vsel %vm5845_vm0, %v5811_v37, %v5853_v41  ;;  %v9506_v37 = vpack.c.bf16 %v6025_v26, %v6024_v17 }
0x1047   :  { %v9768_v24 = vpop.eup %9767  ;;  %5870 = vadd.xlane.f32.xlu1 %v14733_v48  ;;  %v14736_v42 = vsel %vm5844_vm1, %v5806_v1, %v5852_v56  ;;  %v5893_v40 = vmul.f32 %v14733_v48, %v14733_v48  ;;  %v6027_v1 = vld [vmem:[%s14893_s8 + $0x78] sm:$0xff] }
0x1048   :  { %v9770_v59 = vpop.eup %9769  ;;  %5868 = vadd.xlane.f32.xlu0 %v14736_v42  ;;  %v5681_v54 = vmul.f32 %v9768_v24, %v5657_v39  ;;  %v5892_v35 = vmul.f32 %v14736_v42, %v14736_v42  ;;  %9507 = vmatprep.subr.bf16.mxu1 %v9506_v37  ;;  %v9510_v41 = vpack.c.bf16 %v6027_v1, %v6026_v51 }
0x1049   :  { %v7671_v23 = vpop.f32.mrb[50].mxu0  ;;  %v5680_v44 = vmul.f32 %v9770_v59, %v5656_v9  ;;  %9509 = vmatpush3.bf16.msra.mxu1 %v9506_v37 }
0x104a   :  { %v5821_v15 = vadd.f32 %v7671_v23, %v14729_v36  ;;  %v5815_v58 = vpop.f32.mrb[51].mxu0  ;;  %v5697_v53 = vmul.f32 %v14695_v25, %v5681_v54  ;;  %9511 = vmatprep.subr.bf16.mxu1 %v9510_v41 }
0x104b   :  { %v5816_v43 = vadd.f32 %v14729_v36, %v5815_v58  ;;  %5902 = vadd.xlane.f32.xlu1 %v5893_v40  ;;  %v5696_v19 = vmul.f32 %v14695_v25, %v5680_v44 }
0x104c   :  { %v5855_v18 = vmul.f32 0.01, %v5821_v15  ;;  %5900 = vadd.xlane.f32.xlu0 %v5892_v35  ;;  %vm5847_vm2 = vcmp.ge.f32.partialorder %v5821_v15, 0.0  ;;  %v5713_v30 = vadd.f32 %v14700_v11, %v5697_v53 }
0x104d   :  { %v5854_v13 = vmul.f32 0.01, %v5816_v43  ;;  %vm5846_vm3 = vcmp.ge.f32.partialorder %v5816_v43, 0.0  ;;  %v5712_v29 = vadd.f32 %v14700_v11, %v5696_v19  ;;  %9513 = vmatpush3.bf16.msra.mxu1 %v9510_v41 }
0x104e   :  { %v14748_v0 = vsel %vm5847_vm2, %v5821_v15, %v5855_v18 }
0x104f   :  { %5874 = vadd.xlane.f32.xlu1 %v14748_v0  ;;  %v14752_v61 = vsel %vm5846_vm3, %v5816_v43, %v5854_v13  ;;  %7675 = vmatprep.mubr.f32.mxu0 %v5712_v29  ;;  %v5895_v5 = vmul.f32 %v14748_v0, %v14748_v0 }
0x1050   :  { %5872 = vadd.xlane.f32.xlu0 %v14752_v61  ;;  %7676 = vmatmul.mubr.f32.gmra.mrb[54].mxu0 %v5713_v30  ;;  %v5894_v7 = vmul.f32 %v14752_v61, %v14752_v61 }
0x1051   :  { %v7674_v25 = vpop.f32.mrb[52].mxu0 }
0x1052   :  { %v5831_v57 = vadd.f32 %v7674_v25, %v14729_v36  ;;  %v5825_v21 = vpop.f32.mrb[53].mxu0 }
0x1053   :  { %v5826_v11 = vadd.f32 %v14729_v36, %v5825_v21  ;;  %5906 = vadd.xlane.f32.xlu1 %v5895_v5 }
0x1054   :  { %v5857_v2 = vmul.f32 0.01, %v5831_v57  ;;  %5904 = vadd.xlane.f32.xlu0 %v5894_v7  ;;  %vm5849_vm4 = vcmp.ge.f32.partialorder %v5831_v57, 0.0 }
0x1055   :  { %v5856_v47 = vmul.f32 0.01, %v5826_v11  ;;  %vm5848_vm5 = vcmp.ge.f32.partialorder %v5826_v11, 0.0 }
0x1056   :  { %v14761_v8 = vsel %vm5849_vm4, %v5831_v57, %v5857_v2 }
0x1057   :  { %5878 = vadd.xlane.f32.xlu1 %v14761_v8  ;;  %v14770_v12 = vsel %vm5848_vm5, %v5826_v11, %v5856_v47  ;;  %v5897_v52 = vmul.f32 %v14761_v8, %v14761_v8 }
0x1058   :  { %5876 = vadd.xlane.f32.xlu0 %v14770_v12  ;;  %v5896_v34 = vmul.f32 %v14770_v12, %v14770_v12 }
0x105b   :  { %5910 = vadd.xlane.f32.xlu1 %v5897_v52 }
0x105c   :  { %5908 = vadd.xlane.f32.xlu0 %v5896_v34 }
0x10d4   :  { %v5871_v56 = vpop.xlane.xlu1 %5870 }
0x10d5   :  { %v5885_v39 = vmul.f32 0.03125, %v5871_v56  ;;  %v5869_v24 = vpop.xlane.xlu0 %5868 }
0x10d6   :  { %v5884_v9 = vmul.f32 0.03125, %v5869_v24 }
0x10d7   :  { %v5925_v54 = vmul.f32 %v5885_v39, %v5885_v39  ;;  %v5941_v33 = vsub.f32 %v14733_v48, %v5885_v39  ;;  %v14823_v48 = vld [vmem:[%s14892_s7 + $0x4] ss:$0 sm:$0xff] }
0x10d8   :  { %v5903_v59 = vpop.xlane.xlu1 %5902  ;;  %v5924_v44 = vmul.f32 %v5884_v9, %v5884_v9  ;;  %v5940_v3 = vsub.f32 %v14736_v42, %v5884_v9 }
0x10d9   :  { %v5917_v23 = vmul.f32 0.03125, %v5903_v59  ;;  %v5901_v40 = vpop.xlane.xlu0 %5900 }
0x10da   :  { %v5916_v15 = vmul.f32 0.03125, %v5901_v40 }
0x10db   :  { %v5933_v58 = vsub.f32 %v5917_v23, %v5925_v54 }
0x10dc   :  { %v5932_v35 = vsub.f32 %v5916_v15, %v5924_v44  ;;  %v5875_v53 = vpop.xlane.xlu1 %5874 }
0x10dd   :  { %v5949_v43 = vadd.f32 1e-05, %v5933_v58  ;;  %v5887_v19 = vmul.f32 0.03125, %v5875_v53  ;;  %v5873_v18 = vpop.xlane.xlu0 %5872 }
0x10de   :  { %v5948_v13 = vadd.f32 1e-05, %v5932_v35  ;;  %v5886_v29 = vmul.f32 0.03125, %v5873_v18 }
0x10df   :  { %9771 = vrsqrt.f32 %v5949_v43  ;;  %v5927_v25 = vmul.f32 %v5887_v19, %v5887_v19  ;;  %v5943_v24 = vsub.f32 %v14748_v0, %v5887_v19 }
0x10e0   :  { %9773 = vrsqrt.f32 %v5948_v13  ;;  %v5907_v30 = vpop.xlane.xlu1 %5906  ;;  %v5926_v21 = vmul.f32 %v5886_v29, %v5886_v29  ;;  %v5942_v59 = vsub.f32 %v14752_v61, %v5886_v29 }
0x10e1   :  { %v5919_v5 = vmul.f32 0.03125, %v5907_v30  ;;  %v5905_v57 = vpop.xlane.xlu0 %5904 }
0x10e2   :  { %v5918_v7 = vmul.f32 0.03125, %v5905_v57 }
0x10e3   :  { %v5935_v11 = vsub.f32 %v5919_v5, %v5927_v25 }
0x10e4   :  { %v5934_v2 = vsub.f32 %v5918_v7, %v5926_v21  ;;  %v5879_v47 = vpop.xlane.xlu1 %5878 }
0x10e5   :  { %v5951_v38 = vadd.f32 1e-05, %v5935_v11  ;;  %v5889_v31 = vmul.f32 0.03125, %v5879_v47  ;;  %v5877_v28 = vpop.xlane.xlu0 %5876 }
0x10e6   :  { %v5950_v52 = vadd.f32 1e-05, %v5934_v2  ;;  %v5888_v34 = vmul.f32 0.03125, %v5877_v28 }
0x10e7   :  { %9775 = vrsqrt.f32 %v5951_v38  ;;  %v5929_v14 = vmul.f32 %v5889_v31, %v5889_v31  ;;  %v5945_v43 = vsub.f32 %v14761_v8, %v5889_v31 }
0x10e8   :  { %9777 = vrsqrt.f32 %v5950_v52  ;;  %v5911_v32 = vpop.xlane.xlu1 %5910  ;;  %v5928_v62 = vmul.f32 %v5888_v34, %v5888_v34 }
0x10e9   :  { %v9772_v20 = vpop.eup %9771  ;;  %v5921_v50 = vmul.f32 0.03125, %v5911_v32  ;;  %v5909_v60 = vpop.xlane.xlu0 %5908 }
0x10ea   :  { %v9774_v4 = vpop.eup %9773  ;;  %v5965_v46 = vmul.f32 %v9772_v20, %v5941_v33  ;;  %v5920_v6 = vmul.f32 0.03125, %v5909_v60 }
0x10eb   :  { %v5937_v17 = vsub.f32 %v5921_v50, %v5929_v14  ;;  %v5964_v26 = vmul.f32 %v9774_v4, %v5940_v3 }
0x10ec   :  { %v5936_v42 = vsub.f32 %v5920_v6, %v5928_v62  ;;  %v5981_v37 = vmul.f32 %v14818_v63, %v5965_v46  ;;  %v7313_v62 = vld [vmem:[%s14894_s9] ss:$0 sm:$0xff] }
0x10ed   :  { %v5953_v51 = vadd.f32 1e-05, %v5937_v17  ;;  %v5980_v1 = vmul.f32 %v14818_v63, %v5964_v26 }
0x10ee   :  { %v5952_v41 = vadd.f32 1e-05, %v5936_v42  ;;  %v5997_v56 = vadd.f32 %v14823_v48, %v5981_v37 }
0x10ef   :  { %9779 = vrsqrt.f32 %v5953_v51  ;;  %v5996_v39 = vadd.f32 %v14823_v48, %v5980_v1 }
0x10f0   :  { %9781 = vrsqrt.f32 %v5952_v41  ;;  %v6005_v40 = vadd.f32 %v5997_v56, %v15633_v49 }
0x10f1   :  { %v9776_v9 = vpop.eup %9775  ;;  %v6004_v54 = vadd.f32 %v5996_v39, %v15632_v55  ;;  %v5944_v55 = vsub.f32 %v14770_v12, %v5888_v34 }
0x10f2   :  { %v9778_v23 = vpop.eup %9777  ;;  %v5967_v44 = vmul.f32 %v9776_v9, %v5943_v24 }
0x10f3   :  { %7710 = vmatprep.mubr.f32.mxu1 %v6004_v54  ;;  %v5966_v15 = vmul.f32 %v9778_v23, %v5942_v59 }
0x10f4   :  { %7711 = vmatmul.mubr.f32.vlgmr.msra.gmra.mrb[64].mxu1 %v6005_v40  ;;  %v5983_v58 = vmul.f32 %v14818_v63, %v5967_v44 }
0x10f5   :  { %v5982_v35 = vmul.f32 %v14818_v63, %v5966_v15 }
0x10f6   :  { %v5999_v53 = vadd.f32 %v14823_v48, %v5983_v58 }
0x10f7   :  { %v5998_v0 = vadd.f32 %v14823_v48, %v5982_v35 }
0x10f8   :  { %v6007_v18 = vadd.f32 %v5999_v53, %v15635_v10 }
0x10f9   :  { %v9780_v61 = vpop.eup %9779  ;;  %v6006_v19 = vadd.f32 %v5998_v0, %v15634_v45 }
0x10fa   :  { %v9782_v49 = vpop.eup %9781  ;;  %v5969_v13 = vmul.f32 %v9780_v61, %v5945_v43 }
0x10fb   :  { %7713 = vmatprep.mubr.f32.mxu1 %v6006_v19  ;;  %v5968_v29 = vmul.f32 %v9782_v49, %v5944_v55 }
0x10fc   :  { %7714 = vmatmul.mubr.f32.gmra.mrb[66].mxu1 %v6007_v18  ;;  %v5985_v30 = vmul.f32 %v14818_v63, %v5969_v13 }
0x10fd   :  { %v5984_v25 = vmul.f32 %v14818_v63, %v5968_v29 }
0x10fe   :  { %v6001_v5 = vadd.f32 %v14823_v48, %v5985_v30 }
0x10ff   :  { %v6000_v8 = vadd.f32 %v14823_v48, %v5984_v25 }
0x1100   :  { %v6009_v12 = vadd.f32 %v6001_v5, %v14040_v22 }
0x1101   :  { %v6008_v57 = vadd.f32 %v6000_v8, %v13170_v27 }
0x1103   :  { %7716 = vmatprep.mubr.f32.mxu1 %v6008_v57 }
0x1104   :  { %7717 = vmatmul.mubr.f32.gmra.mrb[68].mxu1 %v6009_v12 }
0x1123   :  { %v7677_v45 = vpop.f32.mrb[54].mxu0 }
0x1124   :  { %v5841_v10 = vadd.f32 %v7677_v45, %v14729_v36  ;;  %v5835_v21 = vpop.f32.mrb[55].mxu0 }
0x1125   :  { %v5836_v7 = vadd.f32 %v14729_v36, %v5835_v21 }
0x1126   :  { %v5859_v11 = vmul.f32 0.01, %v5841_v10  ;;  %vm5851_vm6 = vcmp.ge.f32.partialorder %v5841_v10, 0.0 }
0x1127   :  { %v5858_v2 = vmul.f32 0.01, %v5836_v7  ;;  %vm5850_vm7 = vcmp.ge.f32.partialorder %v5836_v7, 0.0 }
0x1128   :  { %v5867_v47 = vsel %vm5851_vm6, %v5841_v10, %v5859_v11 }
0x1129   :  { %5882 = vadd.xlane.f32.xlu1 %v5867_v47  ;;  %v5866_v38 = vsel %vm5850_vm7, %v5836_v7, %v5858_v2  ;;  %v5899_v31 = vmul.f32 %v5867_v47, %v5867_v47 }
0x112a   :  { %5880 = vadd.xlane.f32.xlu0 %v5866_v38  ;;  %v5898_v27 = vmul.f32 %v5866_v38, %v5866_v38 }
0x112d   :  { %5914 = vadd.xlane.f32.xlu1 %v5899_v31 }
0x112e   :  { %5912 = vadd.xlane.f32.xlu0 %v5898_v27 }
0x11b6   :  { %v5883_v22 = vpop.xlane.xlu1 %5882 }
0x11b7   :  { %v5891_v28 = vmul.f32 0.03125, %v5883_v22  ;;  %v5881_v52 = vpop.xlane.xlu0 %5880 }
0x11b8   :  { %v5890_v34 = vmul.f32 0.03125, %v5881_v52 }
0x11b9   :  { %v5931_v32 = vmul.f32 %v5891_v28, %v5891_v28  ;;  %v5947_v37 = vsub.f32 %v5867_v47, %v5891_v28 }
0x11ba   :  { %v5915_v33 = vpop.xlane.xlu1 %5914  ;;  %v5930_v3 = vmul.f32 %v5890_v34, %v5890_v34  ;;  %v5946_v1 = vsub.f32 %v5866_v38, %v5890_v34 }
0x11bb   :  { %v5923_v20 = vmul.f32 0.03125, %v5915_v33  ;;  %v5913_v36 = vpop.xlane.xlu0 %5912 }
0x11bc   :  { %v5922_v14 = vmul.f32 0.03125, %v5913_v36 }
0x11bd   :  { %v5939_v50 = vsub.f32 %v5923_v20, %v5931_v32 }
0x11be   :  { %v5938_v60 = vsub.f32 %v5922_v14, %v5930_v3 }
0x11bf   :  { %v5955_v4 = vadd.f32 1e-05, %v5939_v50 }
0x11c0   :  { %v5954_v46 = vadd.f32 1e-05, %v5938_v60 }
0x11c1   :  { %9783 = vrsqrt.f32 %v5955_v4 }
0x11c2   :  { %9785 = vrsqrt.f32 %v5954_v46 }
0x11c7   :  { %v7712_v6 = vpop.f32.mrb[64].mxu1 }
0x11c8   :  { %v6107_v17 = vadd.f32 %v7712_v6, %v7313_v62  ;;  %v6101_v26 = vpop.f32.mrb[65].mxu1 }
0x11c9   :  { %v6102_v42 = vadd.f32 %v7313_v62, %v6101_v26 }
0x11ca   :  { %6141 = vst [vmem:[%s14895_s10 + $0x8] sm:$0xff] %v6107_v17 }
0x11cb   :  { %v9784_v51 = vpop.eup %9783  ;;  %6140 = vst [vmem:[%s14895_s10] sm:$0xff] %v6102_v42 }
0x11cc   :  { %v9786_v41 = vpop.eup %9785  ;;  %v5971_v56 = vmul.f32 %v9784_v51, %v5947_v37 }
0x11cd   :  { %v5970_v39 = vmul.f32 %v9786_v41, %v5946_v1 }
0x11ce   :  { %v5987_v24 = vmul.f32 %v14818_v63, %v5971_v56 }
0x11cf   :  { %v7715_v9 = vpop.f32.mrb[66].mxu1  ;;  %v5986_v59 = vmul.f32 %v14818_v63, %v5970_v39  ;;  %v9787_v63 = vld [vmem:[%s14889_s11 + $0x8] sm:$0xff] }
0x11d0   :  { %v6117_v54 = vadd.f32 %v7715_v9, %v7313_v62  ;;  %v6111_v23 = vpop.f32.mrb[67].mxu1  ;;  %v6003_v40 = vadd.f32 %v14823_v48, %v5987_v24 }
0x11d1   :  { %v6112_v44 = vadd.f32 %v7313_v62, %v6111_v23  ;;  %v6002_v15 = vadd.f32 %v14823_v48, %v5986_v59 }
0x11d2   :  { %6143 = vst [vmem:[%s14895_s10 + $0x18] sm:$0xff] %v6117_v54  ;;  %v6011_v35 = vadd.f32 %v9787_v63, %v6003_v40 }
0x11d3   :  { %6142 = vst [vmem:[%s14895_s10 + $0x10] sm:$0xff] %v6112_v44  ;;  %v6010_v58 = vadd.f32 %v6002_v15, %v14165_v16 }
0x11d5   :  { %7719 = vmatprep.mubr.f32.mxu1 %v6010_v58 }
0x11d6   :  { %7720 = vmatmul.mubr.f32.gmra.mrb[70].mxu1 %v6011_v35 }
0x11d7   :  { %v7718_v53 = vpop.f32.mrb[68].mxu1 }
0x11d8   :  { %v6127_v0 = vadd.f32 %v7718_v53, %v7313_v62  ;;  %v6121_v48 = vpop.f32.mrb[69].mxu1 }
0x11d9   :  { %v6122_v43 = vadd.f32 %v7313_v62, %v6121_v48 }
0x11da   :  { %6145 = vst [vmem:[%s14895_s10 + $0x28] sm:$0xff] %v6127_v0 }
0x11db   :  { %6144 = vst [vmem:[%s14895_s10 + $0x20] sm:$0xff] %v6122_v43 }
0x12a9   :  { %v7721_v16 = vpop.f32.mrb[70].mxu1 }
0x12aa   :  { %v6137_v61 = vadd.f32 %v7721_v16, %v7313_v62  ;;  %v6131_v55 = vpop.f32.mrb[71].mxu1 }
0x12ab   :  { %v6132_v19 = vadd.f32 %v7313_v62, %v6131_v55 }
0x12ac   :  { %6147 = vst [vmem:[%s14895_s10 + $0x38] sm:$0xff] %v6137_v61 }
0x12ad   :  { %6146 = vst [vmem:[%s14895_s10 + $0x30] sm:$0xff] %v6132_v19 }

</bundles_post_ra>
